<compile_context>
chip_gen: v5e
topology: v5e:2x2
jax: 0.10.0
libtpu: 0.0.40
codegen_flags: <defaults>
</compile_context>

<pallas_src>
import jax
import jax.numpy as jnp
from jax import lax
from jax.experimental import pallas as pl
from jax.experimental.pallas import tpu as pltpu

# Synthetic small config (mirrors v2.py hyperparameters, scaled down for the test)
VOCAB_SIZE = 65          # len(sorted(set(text))) for tiny-shakespeare
V_PAD = 128              # vocab padded to a lane-dense multiple of 128
N_EMBED = 64             # v2.py uses 384
N_HEADS = 4              # v2.py uses 6
HEAD_SIZE = N_EMBED // N_HEADS
N_LAYER = 2              # v2.py uses 6
BLOCK_SIZE = 32          # max context; v2.py uses 256
EPS = 1e-5               # nn.LayerNorm default

MXU_DTYPE = jnp.bfloat16   # bf16 MXU operands on all generations (v5e MXU is bf16-native)


def _layer_norm(x, g, b):
    # Centered two-pass variance (robust against cancellation for deeper configs).
    mu = jnp.mean(x, axis=-1, keepdims=True)
    xc = x - mu
    var = jnp.mean(xc * xc, axis=-1, keepdims=True)
    return xc * lax.rsqrt(var + EPS) * g + b


def fused_forward_kernel(x_ref,
                         ln1g_ref, ln1b_ref, wqkv_ref, wproj_ref, bproj_ref,
                         ln2g_ref, ln2b_ref, w1_ref, b1_ref, w2_ref, b2_ref,
                         lnfg_ref, lnfb_ref, wlm_ref, blm_ref,
                         o_ref):
    Bb, T, C = x_ref.shape
    M = Bb * T
    x = x_ref[...].reshape(M, C)                    # fold batch rows into matmul M dim

    # Causal bias built ONCE per grid step (hoisted out of the layer loop).
    row = lax.broadcasted_iota(jnp.int32, (T, T), 0)
    col = lax.broadcasted_iota(jnp.int32, (T, T), 1)
    causal_bias = jnp.where(row >= col, 0.0, -1e30).astype(jnp.float32)     # (T, T)

    scale = N_EMBED ** (-0.5)   # v2.py scales by C**-0.5 with C = n_embed (not head_size)

    # TODO(synk): at 6 layers switch this static unroll to a layer grid axis (or
    # lax.fori_loop with dynamic first-axis weight indexing) to bound vreg live ranges.
    for li in range(N_LAYER):
        # ---- multi-head causal self-attention on ln1(x) ----
        h = _layer_norm(x, ln1g_ref[li], ln1b_ref[li]).astype(MXU_DTYPE)
        # Fused QKV: one N=3C matmul instead of three N=C matmuls.
        qkv = jnp.dot(h, wqkv_ref[li], preferred_element_type=jnp.float32)   # (M, 3C)

        heads = []
        # TODO(synk): per-head 16-lane slices of the fused qkv result remain; a
        # head-major (b,h,t,d) transpose / two-batch-dim contraction does not lower
        # cleanly, so heads stay a short static loop with batch-row-batched einsums.
        for hd in range(N_HEADS):
            q_h = qkv[:, hd * HEAD_SIZE:(hd + 1) * HEAD_SIZE]
            k_h = qkv[:, C + hd * HEAD_SIZE:C + (hd + 1) * HEAD_SIZE]
            v_h = qkv[:, 2 * C + hd * HEAD_SIZE:2 * C + (hd + 1) * HEAD_SIZE]
            q_h = q_h.reshape(Bb, T, HEAD_SIZE).astype(MXU_DTYPE)
            k_h = k_h.reshape(Bb, T, HEAD_SIZE).astype(MXU_DTYPE)
            v_h = v_h.reshape(Bb, T, HEAD_SIZE).astype(MXU_DTYPE)
            s = jnp.einsum('btd,bsd->bts', q_h, k_h,
                           preferred_element_type=jnp.float32) * scale
            s = s + causal_bias                                        # (Bb, T, T)
            m = jnp.max(s, axis=-1, keepdims=True)
            p = jnp.exp(s - m)
            p = p * pl.reciprocal(jnp.sum(p, axis=-1, keepdims=True), approx=True)
            # TODO(synk): attention-weight dropout omitted (identity in eval mode)
            o_h = jnp.einsum('bts,bsd->btd', p.astype(MXU_DTYPE), v_h,
                             preferred_element_type=jnp.float32)       # (Bb, T, Hd)
            heads.append(o_h.reshape(M, HEAD_SIZE))

        # Head concat (torch.cat) + ONE full-width K=C output projection.
        att_cat = jnp.concatenate(heads, axis=-1).astype(MXU_DTYPE)    # (M, C)
        att = jnp.dot(att_cat, wproj_ref[li], preferred_element_type=jnp.float32)
        x = x + att + bproj_ref[li]                                    # residual 1

        # ---- feed-forward on ln2(x) ----
        h2 = _layer_norm(x, ln2g_ref[li], ln2b_ref[li]).astype(MXU_DTYPE)
        f = jnp.dot(h2, w1_ref[li], preferred_element_type=jnp.float32) + b1_ref[li]
        f = jnp.maximum(f, 0.0)                                        # ReLU
        f = jnp.dot(f.astype(MXU_DTYPE), w2_ref[li],
                    preferred_element_type=jnp.float32) + b2_ref[li]
        x = x + f                                                      # residual 2

    # ---- ln_f + lm_head (vocab padded to lane-dense 128) ----
    hf = _layer_norm(x, lnfg_ref[...], lnfb_ref[...]).astype(MXU_DTYPE)
    logits = jnp.dot(hf, wlm_ref[...], preferred_element_type=jnp.float32) + blm_ref[...]
    o_ref[...] = logits.reshape(o_ref.shape)


def _full_spec(shape):
    # TODO(synk): at the full v2.py config mark these invariant weight specs with
    # pipeline_mode=pl.Buffered(1) (no double-buffering) and stream layers through a
    # grid axis instead of keeping the whole stack resident (v7x has 64 MiB VMEM).
    return pl.BlockSpec(shape, lambda b: (0,) * len(shape))


def _tensorcores_per_chip():
    """Best-effort TensorCore count per chip (v7x and v4/v5p megacore -> 2)."""
    try:
        kind = jax.devices()[0].device_kind.lower()
    except Exception:
        return 1
    if "v7" in kind or "v4" in kind or "v5p" in kind:
        return 2
    return 1


def _pick_b_blk(B):
    """Generation-aware batch blocking: one grid step per TensorCore.

    Single-TC chips (v5e/v6e): Bb = B (grid of 1) -> max matmul M, zero extra
    per-step overhead.  2-TC chips (v7x): Bb = B/2 -> exactly two 'parallel' steps.
    """
    cores = _tensorcores_per_chip()
    if cores >= 2 and B >= 2 and B % 2 == 0:
        return B // 2
    return B


def _vmem_limit_bytes(weights, Bb, T):
    tile_in = Bb * T * N_EMBED * 4
    tile_out = Bb * T * V_PAD * 4
    w_bytes = sum(int(w.size) * w.dtype.itemsize for w in weights)
    # double-buffered activation/output tiles + (conservatively 2x) weights + headroom
    need = 2 * (tile_in + tile_out) + 2 * w_bytes + (8 << 20)
    return int(min(max(need, 16 << 20), 64 << 20))


def fused_forward(x, params):
    B, T, C = x.shape
    Bb = _pick_b_blk(B)
    weights = [params["ln1_g"], params["ln1_b"], params["wqkv"], params["wproj"],
               params["bproj"], params["ln2_g"], params["ln2_b"],
               params["w1"], params["b1"], params["w2"], params["b2"],
               params["lnf_g"], params["lnf_b"], params["w_lm"], params["b_lm"]]
    in_specs = [pl.BlockSpec((Bb, T, C), lambda b: (b, 0, 0))]
    in_specs += [_full_spec(w.shape) for w in weights]
    return pl.pallas_call(
        fused_forward_kernel,
        out_shape=jax.ShapeDtypeStruct((B, T, V_PAD), jnp.float32),
        grid_spec=pltpu.PrefetchScalarGridSpec(
            num_scalar_prefetch=0, grid=(B // Bb,),
            in_specs=in_specs,
            out_specs=pl.BlockSpec((Bb, T, V_PAD), lambda b: (b, 0, 0))),
        compiler_params=pltpu.CompilerParams(
            dimension_semantics=("parallel",),
            vmem_limit_bytes=_vmem_limit_bytes(weights, Bb, T)),
    )(x, *weights)


def init_params(key):
    def nrm(k, shape, scale=0.02):
        return scale * jax.random.normal(k, shape, dtype=jnp.float32)

    keys = jax.random.split(key, 9)
    L, C, F4 = N_LAYER, N_EMBED, 4 * N_EMBED
    w_lm = jnp.zeros((C, V_PAD), jnp.float32)
    w_lm = w_lm.at[:, :VOCAB_SIZE].set(nrm(keys[2], (C, VOCAB_SIZE)))
    # Fused QKV weight: columns ordered [Q | K | V], each a head-concat of HEAD_SIZE.
    wqkv = jnp.concatenate([nrm(keys[3], (L, C, C)),
                            nrm(keys[4], (L, C, C)),
                            nrm(keys[5], (L, C, C))], axis=-1)
    params = {
        # embedding tables are consumed by the XLA gather outside the kernel -> f32
        "tok_table": nrm(keys[0], (VOCAB_SIZE, C)),
        "pos_table": nrm(keys[1], (BLOCK_SIZE, C)),
        # final LayerNorm + lm_head (vocab padded 65 -> 128 for lane-dense stores)
        "lnf_g": jnp.ones((1, C), jnp.float32),
        "lnf_b": jnp.zeros((1, C), jnp.float32),
        "w_lm": w_lm.astype(MXU_DTYPE),
        "b_lm": jnp.zeros((1, V_PAD), jnp.float32),
        # per-layer weights stacked along a leading (N_LAYER,) axis
        "ln1_g": jnp.ones((L, 1, C), jnp.float32),
        "ln1_b": jnp.zeros((L, 1, C), jnp.float32),
        "wqkv": wqkv.astype(MXU_DTYPE),
        "wproj": nrm(keys[6], (L, C, C)).astype(MXU_DTYPE),
        "bproj": jnp.zeros((L, 1, C), jnp.float32),
        "ln2_g": jnp.ones((L, 1, C), jnp.float32),
        "ln2_b": jnp.zeros((L, 1, C), jnp.float32),
        "w1": nrm(keys[7], (L, C, F4)).astype(MXU_DTYPE),
        "b1": jnp.zeros((L, 1, F4), jnp.float32),
        "w2": nrm(keys[8], (L, F4, C)).astype(MXU_DTYPE),
        "b2": jnp.zeros((L, 1, C), jnp.float32),
    }
    return params


def bigram_lm_forward(params, idx, targets=None):
    """Mirrors BigramLanguageModel.forward. Returns (logits, loss)."""
    B, T = idx.shape
    tok_emb = jnp.take(params["tok_table"], idx, axis=0)      # (B,T,C) embedding gather (XLA glue)
    pos_emb = params["pos_table"][:T]                         # (T,C)
    x = (tok_emb + pos_emb).astype(jnp.float32)
    logits = fused_forward(x, params)[..., :VOCAB_SIZE]       # fused Pallas forward; drop pad lanes
    if targets is None:
        return logits, None
    # cross-entropy (plain JAX glue, matches F.cross_entropy over (B*T, V))
    logp = jax.nn.log_softmax(logits.reshape(B * T, VOCAB_SIZE), axis=-1)
    loss = -jnp.mean(jnp.take_along_axis(logp, targets.reshape(B * T, 1), axis=1))
    return logits, loss


if __name__ == "__main__":
    key = jax.random.PRNGKey(0)
    pkey, ikey = jax.random.split(key)
    params = init_params(pkey)

    B, T = 4, 16
    idx = jax.random.randint(ikey, (B, T), 0, VOCAB_SIZE, dtype=jnp.int32)

    logits, loss = bigram_lm_forward(params, idx, targets=None)
    jax.block_until_ready(logits)
    assert logits.shape == (B, T, VOCAB_SIZE)
    assert loss is None
    print("KERNEL_OK")
</pallas_src>

<mosaic_0001>
module attributes {stable_mosaic.version = 11 : i64} {
  func.func @fused_forward_kernel(%arg0: i32, %arg1: memref<4x16x64xf32, #tpu.memory_space<vmem>>, %arg2: memref<2x1x64xf32, #tpu.memory_space<vmem>>, %arg3: memref<2x1x64xf32, #tpu.memory_space<vmem>>, %arg4: memref<2x64x192xbf16, #tpu.memory_space<vmem>>, %arg5: memref<2x64x64xbf16, #tpu.memory_space<vmem>>, %arg6: memref<2x1x64xf32, #tpu.memory_space<vmem>>, %arg7: memref<2x1x64xf32, #tpu.memory_space<vmem>>, %arg8: memref<2x1x64xf32, #tpu.memory_space<vmem>>, %arg9: memref<2x64x256xbf16, #tpu.memory_space<vmem>>, %arg10: memref<2x1x256xf32, #tpu.memory_space<vmem>>, %arg11: memref<2x256x64xbf16, #tpu.memory_space<vmem>>, %arg12: memref<2x1x64xf32, #tpu.memory_space<vmem>>, %arg13: memref<1x64xf32, #tpu.memory_space<vmem>>, %arg14: memref<1x64xf32, #tpu.memory_space<vmem>>, %arg15: memref<64x128xbf16, #tpu.memory_space<vmem>>, %arg16: memref<1x128xf32, #tpu.memory_space<vmem>>, %arg17: memref<4x16x128xf32, #tpu.memory_space<vmem>>) attributes {dimension_semantics = [#tpu.dimension_semantics<parallel>], iteration_bounds = array<i64: 1>, scalar_prefetch = 0 : i64, scratch_operands = 0 : i64, tpu.core_type = #tpu.core_type<tc>, window_params = [{transform_indices = @transform_0, window_bounds = array<i64: 4, 16, 64>}, {pipeline_mode = #tpu.pipeline_mode<synchronous>, transform_indices = @transform_1, window_bounds = array<i64: 2, 1, 64>}, {pipeline_mode = #tpu.pipeline_mode<synchronous>, transform_indices = @transform_2, window_bounds = array<i64: 2, 1, 64>}, {pipeline_mode = #tpu.pipeline_mode<synchronous>, transform_indices = @transform_3, window_bounds = array<i64: 2, 64, 192>}, {pipeline_mode = #tpu.pipeline_mode<synchronous>, transform_indices = @transform_4, window_bounds = array<i64: 2, 64, 64>}, {pipeline_mode = #tpu.pipeline_mode<synchronous>, transform_indices = @transform_5, window_bounds = array<i64: 2, 1, 64>}, {pipeline_mode = #tpu.pipeline_mode<synchronous>, transform_indices = @transform_6, window_bounds = array<i64: 2, 1, 64>}, {pipeline_mode = #tpu.pipeline_mode<synchronous>, transform_indices = @transform_7, window_bounds = array<i64: 2, 1, 64>}, {pipeline_mode = #tpu.pipeline_mode<synchronous>, transform_indices = @transform_8, window_bounds = array<i64: 2, 64, 256>}, {pipeline_mode = #tpu.pipeline_mode<synchronous>, transform_indices = @transform_9, window_bounds = array<i64: 2, 1, 256>}, {pipeline_mode = #tpu.pipeline_mode<synchronous>, transform_indices = @transform_10, window_bounds = array<i64: 2, 256, 64>}, {pipeline_mode = #tpu.pipeline_mode<synchronous>, transform_indices = @transform_11, window_bounds = array<i64: 2, 1, 64>}, {pipeline_mode = #tpu.pipeline_mode<synchronous>, transform_indices = @transform_12, window_bounds = array<i64: 1, 64>}, {pipeline_mode = #tpu.pipeline_mode<synchronous>, transform_indices = @transform_13, window_bounds = array<i64: 1, 64>}, {pipeline_mode = #tpu.pipeline_mode<synchronous>, transform_indices = @transform_14, window_bounds = array<i64: 64, 128>}, {pipeline_mode = #tpu.pipeline_mode<synchronous>, transform_indices = @transform_15, window_bounds = array<i64: 1, 128>}, {transform_indices = @transform_16, window_bounds = array<i64: 4, 16, 128>}]} {
    %c0 = arith.constant 0 : index
    %c0_0 = arith.constant 0 : index
    %c0_1 = arith.constant 0 : index
    %0 = vector.load %arg1[%c0, %c0_0, %c0_1] : memref<4x16x64xf32, #tpu.memory_space<vmem>>, vector<4x16x64xf32>
    %1 = vector.shape_cast %0 : vector<4x16x64xf32> to vector<64x64xf32>
    %2 = tpu.iota {dimensions = array<i32: 0>} : vector<16x16xi32>
    %3 = tpu.iota {dimensions = array<i32: 1>} : vector<16x16xi32>
    %4 = arith.cmpi sge, %2, %3 : vector<16x16xi32>
    %cst = arith.constant 0.000000e+00 : f32
    %cst_2 = arith.constant -1.000000e+30 : f32
    %5 = vector.broadcast %cst : f32 to vector<16x16xf32>
    %6 = vector.broadcast %cst_2 : f32 to vector<16x16xf32>
    %7 = arith.select %4, %5, %6 : vector<16x16xi1>, vector<16x16xf32>
    %c0_3 = arith.constant 0 : index
    %c0_4 = arith.constant 0 : index
    %c0_5 = arith.constant 0 : index
    %8 = vector.load %arg2[%c0_3, %c0_4, %c0_5] : memref<2x1x64xf32, #tpu.memory_space<vmem>>, vector<1x1x64xf32>
    %9 = vector.shape_cast %8 : vector<1x1x64xf32> to vector<1x64xf32>
    %c0_6 = arith.constant 0 : index
    %c0_7 = arith.constant 0 : index
    %c0_8 = arith.constant 0 : index
    %10 = vector.load %arg3[%c0_6, %c0_7, %c0_8] : memref<2x1x64xf32, #tpu.memory_space<vmem>>, vector<1x1x64xf32>
    %11 = vector.shape_cast %10 : vector<1x1x64xf32> to vector<1x64xf32>
    %cst_9 = arith.constant dense<0.000000e+00> : vector<64xf32>
    %12 = vector.multi_reduction <add>, %1, %cst_9 [1] : vector<64x64xf32> to vector<64xf32>
    %13 = vector.shape_cast %12 : vector<64xf32> to vector<64x1xf32>
    %cst_10 = arith.constant 6.400000e+01 : f32
    %14 = vector.broadcast %cst_10 : f32 to vector<64x1xf32>
    %15 = arith.divf %13, %14 : vector<64x1xf32>
    %16 = vector.broadcast %15 : vector<64x1xf32> to vector<64x64xf32>
    %17 = arith.subf %1, %16 : vector<64x64xf32>
    %18 = arith.mulf %17, %17 : vector<64x64xf32>
    %cst_11 = arith.constant dense<0.000000e+00> : vector<64xf32>
    %19 = vector.multi_reduction <add>, %18, %cst_11 [1] : vector<64x64xf32> to vector<64xf32>
    %20 = vector.shape_cast %19 : vector<64xf32> to vector<64x1xf32>
    %cst_12 = arith.constant 6.400000e+01 : f32
    %21 = vector.broadcast %cst_12 : f32 to vector<64x1xf32>
    %22 = arith.divf %20, %21 : vector<64x1xf32>
    %cst_13 = arith.constant 9.99999974E-6 : f32
    %23 = vector.broadcast %cst_13 : f32 to vector<64x1xf32>
    %24 = arith.addf %22, %23 : vector<64x1xf32>
    %25 = math.rsqrt %24 : vector<64x1xf32>
    %26 = vector.broadcast %25 : vector<64x1xf32> to vector<64x64xf32>
    %27 = arith.mulf %17, %26 : vector<64x64xf32>
    %28 = vector.broadcast %9 : vector<1x64xf32> to vector<64x64xf32>
    %29 = arith.mulf %27, %28 : vector<64x64xf32>
    %30 = vector.broadcast %11 : vector<1x64xf32> to vector<64x64xf32>
    %31 = arith.addf %29, %30 : vector<64x64xf32>
    %32 = arith.truncf %31 : vector<64x64xf32> to vector<64x64xbf16>
    %c0_14 = arith.constant 0 : index
    %c0_15 = arith.constant 0 : index
    %c0_16 = arith.constant 0 : index
    %33 = vector.load %arg4[%c0_14, %c0_15, %c0_16] : memref<2x64x192xbf16, #tpu.memory_space<vmem>>, vector<1x64x192xbf16>
    %34 = vector.shape_cast %33 : vector<1x64x192xbf16> to vector<64x192xbf16>
    %cst_17 = arith.constant dense<0.000000e+00> : vector<64x192xf32>
    %35 = tpu.matmul %32, %34, %cst_17 {dimension_numbers = #tpu.dot_dimension_numbers<[1], [0], [0], [1], [0, 0, 1, 1], [], []>} : vector<64x64xbf16>, vector<64x192xbf16>, vector<64x192xf32> -> vector<64x192xf32>
    %36 = vector.extract_strided_slice %35 {offsets = [0, 0], sizes = [64, 16], strides = [1, 1]} : vector<64x192xf32> to vector<64x16xf32>
    %37 = vector.extract_strided_slice %35 {offsets = [0, 64], sizes = [64, 16], strides = [1, 1]} : vector<64x192xf32> to vector<64x16xf32>
    %38 = vector.extract_strided_slice %35 {offsets = [0, 128], sizes = [64, 16], strides = [1, 1]} : vector<64x192xf32> to vector<64x16xf32>
    %39 = vector.shape_cast %36 : vector<64x16xf32> to vector<4x16x16xf32>
    %40 = arith.truncf %39 : vector<4x16x16xf32> to vector<4x16x16xbf16>
    %41 = vector.shape_cast %37 : vector<64x16xf32> to vector<4x16x16xf32>
    %42 = arith.truncf %41 : vector<4x16x16xf32> to vector<4x16x16xbf16>
    %43 = vector.shape_cast %38 : vector<64x16xf32> to vector<4x16x16xf32>
    %44 = arith.truncf %43 : vector<4x16x16xf32> to vector<4x16x16xbf16>
    "tpu.trace_start"() <{level = 10 : i32, message = "btd,bsd->bts"}> : () -> ()
    %cst_18 = arith.constant dense<0.000000e+00> : vector<4x16x16xf32>
    %45 = tpu.matmul %40, %42, %cst_18 {dimension_numbers = #tpu.dot_dimension_numbers<[2], [2], [1], [1], [0, 0, 0, 1, 1, 1], [0], [0]>} : vector<4x16x16xbf16>, vector<4x16x16xbf16>, vector<4x16x16xf32> -> vector<4x16x16xf32>
    "tpu.trace_stop"() : () -> ()
    %cst_19 = arith.constant 1.250000e-01 : f32
    %46 = vector.broadcast %cst_19 : f32 to vector<4x16x16xf32>
    %47 = arith.mulf %45, %46 : vector<4x16x16xf32>
    %48 = vector.shape_cast %7 : vector<16x16xf32> to vector<1x16x16xf32>
    %49 = vector.broadcast %48 : vector<1x16x16xf32> to vector<4x16x16xf32>
    %50 = arith.addf %47, %49 : vector<4x16x16xf32>
    %cst_20 = arith.constant dense<0xFF800000> : vector<4x16xf32>
    %51 = vector.multi_reduction <maximumf>, %50, %cst_20 [2] : vector<4x16x16xf32> to vector<4x16xf32>
    %52 = vector.shape_cast %51 : vector<4x16xf32> to vector<4x16x1xf32>
    %53 = vector.broadcast %52 : vector<4x16x1xf32> to vector<4x16x16xf32>
    %54 = arith.subf %50, %53 : vector<4x16x16xf32>
    %55 = math.exp %54 : vector<4x16x16xf32>
    %cst_21 = arith.constant dense<0.000000e+00> : vector<4x16xf32>
    %56 = vector.multi_reduction <add>, %55, %cst_21 [2] : vector<4x16x16xf32> to vector<4x16xf32>
    %57 = vector.shape_cast %56 : vector<4x16xf32> to vector<4x16x1xf32>
    %58 = tpu.reciprocal %57 {approx = true} : vector<4x16x1xf32> -> vector<4x16x1xf32>
    %59 = vector.broadcast %58 : vector<4x16x1xf32> to vector<4x16x16xf32>
    %60 = arith.mulf %55, %59 : vector<4x16x16xf32>
    %61 = arith.truncf %60 : vector<4x16x16xf32> to vector<4x16x16xbf16>
    "tpu.trace_start"() <{level = 10 : i32, message = "bts,bsd->btd"}> : () -> ()
    %cst_22 = arith.constant dense<0.000000e+00> : vector<4x16x16xf32>
    %62 = tpu.matmul %61, %44, %cst_22 {dimension_numbers = #tpu.dot_dimension_numbers<[2], [1], [1], [2], [0, 0, 0, 1, 1, 2], [0], [0]>} : vector<4x16x16xbf16>, vector<4x16x16xbf16>, vector<4x16x16xf32> -> vector<4x16x16xf32>
    "tpu.trace_stop"() : () -> ()
    %63 = vector.shape_cast %62 : vector<4x16x16xf32> to vector<64x16xf32>
    %64 = vector.extract_strided_slice %35 {offsets = [0, 16], sizes = [64, 16], strides = [1, 1]} : vector<64x192xf32> to vector<64x16xf32>
    %65 = vector.extract_strided_slice %35 {offsets = [0, 80], sizes = [64, 16], strides = [1, 1]} : vector<64x192xf32> to vector<64x16xf32>
    %66 = vector.extract_strided_slice %35 {offsets = [0, 144], sizes = [64, 16], strides = [1, 1]} : vector<64x192xf32> to vector<64x16xf32>
    %67 = vector.shape_cast %64 : vector<64x16xf32> to vector<4x16x16xf32>
    %68 = arith.truncf %67 : vector<4x16x16xf32> to vector<4x16x16xbf16>
    %69 = vector.shape_cast %65 : vector<64x16xf32> to vector<4x16x16xf32>
    %70 = arith.truncf %69 : vector<4x16x16xf32> to vector<4x16x16xbf16>
    %71 = vector.shape_cast %66 : vector<64x16xf32> to vector<4x16x16xf32>
    %72 = arith.truncf %71 : vector<4x16x16xf32> to vector<4x16x16xbf16>
    "tpu.trace_start"() <{level = 10 : i32, message = "btd,bsd->bts"}> : () -> ()
    %cst_23 = arith.constant dense<0.000000e+00> : vector<4x16x16xf32>
    %73 = tpu.matmul %68, %70, %cst_23 {dimension_numbers = #tpu.dot_dimension_numbers<[2], [2], [1], [1], [0, 0, 0, 1, 1, 1], [0], [0]>} : vector<4x16x16xbf16>, vector<4x16x16xbf16>, vector<4x16x16xf32> -> vector<4x16x16xf32>
    "tpu.trace_stop"() : () -> ()
    %cst_24 = arith.constant 1.250000e-01 : f32
    %74 = vector.broadcast %cst_24 : f32 to vector<4x16x16xf32>
    %75 = arith.mulf %73, %74 : vector<4x16x16xf32>
    %76 = vector.shape_cast %7 : vector<16x16xf32> to vector<1x16x16xf32>
    %77 = vector.broadcast %76 : vector<1x16x16xf32> to vector<4x16x16xf32>
    %78 = arith.addf %75, %77 : vector<4x16x16xf32>
    %cst_25 = arith.constant dense<0xFF800000> : vector<4x16xf32>
    %79 = vector.multi_reduction <maximumf>, %78, %cst_25 [2] : vector<4x16x16xf32> to vector<4x16xf32>
    %80 = vector.shape_cast %79 : vector<4x16xf32> to vector<4x16x1xf32>
    %81 = vector.broadcast %80 : vector<4x16x1xf32> to vector<4x16x16xf32>
    %82 = arith.subf %78, %81 : vector<4x16x16xf32>
    %83 = math.exp %82 : vector<4x16x16xf32>
    %cst_26 = arith.constant dense<0.000000e+00> : vector<4x16xf32>
    %84 = vector.multi_reduction <add>, %83, %cst_26 [2] : vector<4x16x16xf32> to vector<4x16xf32>
    %85 = vector.shape_cast %84 : vector<4x16xf32> to vector<4x16x1xf32>
    %86 = tpu.reciprocal %85 {approx = true} : vector<4x16x1xf32> -> vector<4x16x1xf32>
    %87 = vector.broadcast %86 : vector<4x16x1xf32> to vector<4x16x16xf32>
    %88 = arith.mulf %83, %87 : vector<4x16x16xf32>
    %89 = arith.truncf %88 : vector<4x16x16xf32> to vector<4x16x16xbf16>
    "tpu.trace_start"() <{level = 10 : i32, message = "bts,bsd->btd"}> : () -> ()
    %cst_27 = arith.constant dense<0.000000e+00> : vector<4x16x16xf32>
    %90 = tpu.matmul %89, %72, %cst_27 {dimension_numbers = #tpu.dot_dimension_numbers<[2], [1], [1], [2], [0, 0, 0, 1, 1, 2], [0], [0]>} : vector<4x16x16xbf16>, vector<4x16x16xbf16>, vector<4x16x16xf32> -> vector<4x16x16xf32>
    "tpu.trace_stop"() : () -> ()
    %91 = vector.shape_cast %90 : vector<4x16x16xf32> to vector<64x16xf32>
    %92 = vector.extract_strided_slice %35 {offsets = [0, 32], sizes = [64, 16], strides = [1, 1]} : vector<64x192xf32> to vector<64x16xf32>
    %93 = vector.extract_strided_slice %35 {offsets = [0, 96], sizes = [64, 16], strides = [1, 1]} : vector<64x192xf32> to vector<64x16xf32>
    %94 = vector.extract_strided_slice %35 {offsets = [0, 160], sizes = [64, 16], strides = [1, 1]} : vector<64x192xf32> to vector<64x16xf32>
    %95 = vector.shape_cast %92 : vector<64x16xf32> to vector<4x16x16xf32>
    %96 = arith.truncf %95 : vector<4x16x16xf32> to vector<4x16x16xbf16>
    %97 = vector.shape_cast %93 : vector<64x16xf32> to vector<4x16x16xf32>
    %98 = arith.truncf %97 : vector<4x16x16xf32> to vector<4x16x16xbf16>
    %99 = vector.shape_cast %94 : vector<64x16xf32> to vector<4x16x16xf32>
    %100 = arith.truncf %99 : vector<4x16x16xf32> to vector<4x16x16xbf16>
    "tpu.trace_start"() <{level = 10 : i32, message = "btd,bsd->bts"}> : () -> ()
    %cst_28 = arith.constant dense<0.000000e+00> : vector<4x16x16xf32>
    %101 = tpu.matmul %96, %98, %cst_28 {dimension_numbers = #tpu.dot_dimension_numbers<[2], [2], [1], [1], [0, 0, 0, 1, 1, 1], [0], [0]>} : vector<4x16x16xbf16>, vector<4x16x16xbf16>, vector<4x16x16xf32> -> vector<4x16x16xf32>
    "tpu.trace_stop"() : () -> ()
    %cst_29 = arith.constant 1.250000e-01 : f32
    %102 = vector.broadcast %cst_29 : f32 to vector<4x16x16xf32>
    %103 = arith.mulf %101, %102 : vector<4x16x16xf32>
    %104 = vector.shape_cast %7 : vector<16x16xf32> to vector<1x16x16xf32>
    %105 = vector.broadcast %104 : vector<1x16x16xf32> to vector<4x16x16xf32>
    %106 = arith.addf %103, %105 : vector<4x16x16xf32>
    %cst_30 = arith.constant dense<0xFF800000> : vector<4x16xf32>
    %107 = vector.multi_reduction <maximumf>, %106, %cst_30 [2] : vector<4x16x16xf32> to vector<4x16xf32>
    %108 = vector.shape_cast %107 : vector<4x16xf32> to vector<4x16x1xf32>
    %109 = vector.broadcast %108 : vector<4x16x1xf32> to vector<4x16x16xf32>
    %110 = arith.subf %106, %109 : vector<4x16x16xf32>
    %111 = math.exp %110 : vector<4x16x16xf32>
    %cst_31 = arith.constant dense<0.000000e+00> : vector<4x16xf32>
    %112 = vector.multi_reduction <add>, %111, %cst_31 [2] : vector<4x16x16xf32> to vector<4x16xf32>
    %113 = vector.shape_cast %112 : vector<4x16xf32> to vector<4x16x1xf32>
    %114 = tpu.reciprocal %113 {approx = true} : vector<4x16x1xf32> -> vector<4x16x1xf32>
    %115 = vector.broadcast %114 : vector<4x16x1xf32> to vector<4x16x16xf32>
    %116 = arith.mulf %111, %115 : vector<4x16x16xf32>
    %117 = arith.truncf %116 : vector<4x16x16xf32> to vector<4x16x16xbf16>
    "tpu.trace_start"() <{level = 10 : i32, message = "bts,bsd->btd"}> : () -> ()
    %cst_32 = arith.constant dense<0.000000e+00> : vector<4x16x16xf32>
    %118 = tpu.matmul %117, %100, %cst_32 {dimension_numbers = #tpu.dot_dimension_numbers<[2], [1], [1], [2], [0, 0, 0, 1, 1, 2], [0], [0]>} : vector<4x16x16xbf16>, vector<4x16x16xbf16>, vector<4x16x16xf32> -> vector<4x16x16xf32>
    "tpu.trace_stop"() : () -> ()
    %119 = vector.shape_cast %118 : vector<4x16x16xf32> to vector<64x16xf32>
    %120 = vector.extract_strided_slice %35 {offsets = [0, 48], sizes = [64, 16], strides = [1, 1]} : vector<64x192xf32> to vector<64x16xf32>
    %121 = vector.extract_strided_slice %35 {offsets = [0, 112], sizes = [64, 16], strides = [1, 1]} : vector<64x192xf32> to vector<64x16xf32>
    %122 = vector.extract_strided_slice %35 {offsets = [0, 176], sizes = [64, 16], strides = [1, 1]} : vector<64x192xf32> to vector<64x16xf32>
    %123 = vector.shape_cast %120 : vector<64x16xf32> to vector<4x16x16xf32>
    %124 = arith.truncf %123 : vector<4x16x16xf32> to vector<4x16x16xbf16>
    %125 = vector.shape_cast %121 : vector<64x16xf32> to vector<4x16x16xf32>
    %126 = arith.truncf %125 : vector<4x16x16xf32> to vector<4x16x16xbf16>
    %127 = vector.shape_cast %122 : vector<64x16xf32> to vector<4x16x16xf32>
    %128 = arith.truncf %127 : vector<4x16x16xf32> to vector<4x16x16xbf16>
    "tpu.trace_start"() <{level = 10 : i32, message = "btd,bsd->bts"}> : () -> ()
    %cst_33 = arith.constant dense<0.000000e+00> : vector<4x16x16xf32>
    %129 = tpu.matmul %124, %126, %cst_33 {dimension_numbers = #tpu.dot_dimension_numbers<[2], [2], [1], [1], [0, 0, 0, 1, 1, 1], [0], [0]>} : vector<4x16x16xbf16>, vector<4x16x16xbf16>, vector<4x16x16xf32> -> vector<4x16x16xf32>
    "tpu.trace_stop"() : () -> ()
    %cst_34 = arith.constant 1.250000e-01 : f32
    %130 = vector.broadcast %cst_34 : f32 to vector<4x16x16xf32>
    %131 = arith.mulf %129, %130 : vector<4x16x16xf32>
    %132 = vector.shape_cast %7 : vector<16x16xf32> to vector<1x16x16xf32>
    %133 = vector.broadcast %132 : vector<1x16x16xf32> to vector<4x16x16xf32>
    %134 = arith.addf %131, %133 : vector<4x16x16xf32>
    %cst_35 = arith.constant dense<0xFF800000> : vector<4x16xf32>
    %135 = vector.multi_reduction <maximumf>, %134, %cst_35 [2] : vector<4x16x16xf32> to vector<4x16xf32>
    %136 = vector.shape_cast %135 : vector<4x16xf32> to vector<4x16x1xf32>
    %137 = vector.broadcast %136 : vector<4x16x1xf32> to vector<4x16x16xf32>
    %138 = arith.subf %134, %137 : vector<4x16x16xf32>
    %139 = math.exp %138 : vector<4x16x16xf32>
    %cst_36 = arith.constant dense<0.000000e+00> : vector<4x16xf32>
    %140 = vector.multi_reduction <add>, %139, %cst_36 [2] : vector<4x16x16xf32> to vector<4x16xf32>
    %141 = vector.shape_cast %140 : vector<4x16xf32> to vector<4x16x1xf32>
    %142 = tpu.reciprocal %141 {approx = true} : vector<4x16x1xf32> -> vector<4x16x1xf32>
    %143 = vector.broadcast %142 : vector<4x16x1xf32> to vector<4x16x16xf32>
    %144 = arith.mulf %139, %143 : vector<4x16x16xf32>
    %145 = arith.truncf %144 : vector<4x16x16xf32> to vector<4x16x16xbf16>
    "tpu.trace_start"() <{level = 10 : i32, message = "bts,bsd->btd"}> : () -> ()
    %cst_37 = arith.constant dense<0.000000e+00> : vector<4x16x16xf32>
    %146 = tpu.matmul %145, %128, %cst_37 {dimension_numbers = #tpu.dot_dimension_numbers<[2], [1], [1], [2], [0, 0, 0, 1, 1, 2], [0], [0]>} : vector<4x16x16xbf16>, vector<4x16x16xbf16>, vector<4x16x16xf32> -> vector<4x16x16xf32>
    "tpu.trace_stop"() : () -> ()
    %147 = vector.shape_cast %146 : vector<4x16x16xf32> to vector<64x16xf32>
    %148 = tpu.concatenate %63, %91, %119, %147 in 1 : vector<64x16xf32>, vector<64x16xf32>, vector<64x16xf32>, vector<64x16xf32> -> vector<64x64xf32>
    %149 = arith.truncf %148 : vector<64x64xf32> to vector<64x64xbf16>
    %c0_38 = arith.constant 0 : index
    %c0_39 = arith.constant 0 : index
    %c0_40 = arith.constant 0 : index
    %150 = vector.load %arg5[%c0_38, %c0_39, %c0_40] : memref<2x64x64xbf16, #tpu.memory_space<vmem>>, vector<1x64x64xbf16>
    %151 = vector.shape_cast %150 : vector<1x64x64xbf16> to vector<64x64xbf16>
    %cst_41 = arith.constant dense<0.000000e+00> : vector<64x64xf32>
    %152 = tpu.matmul %149, %151, %cst_41 {dimension_numbers = #tpu.dot_dimension_numbers<[1], [0], [0], [1], [0, 0, 1, 1], [], []>} : vector<64x64xbf16>, vector<64x64xbf16>, vector<64x64xf32> -> vector<64x64xf32>
    %153 = arith.addf %1, %152 : vector<64x64xf32>
    %c0_42 = arith.constant 0 : index
    %c0_43 = arith.constant 0 : index
    %c0_44 = arith.constant 0 : index
    %154 = vector.load %arg6[%c0_42, %c0_43, %c0_44] : memref<2x1x64xf32, #tpu.memory_space<vmem>>, vector<1x1x64xf32>
    %155 = vector.shape_cast %154 : vector<1x1x64xf32> to vector<1x64xf32>
    %156 = vector.broadcast %155 : vector<1x64xf32> to vector<64x64xf32>
    %157 = arith.addf %153, %156 : vector<64x64xf32>
    %c0_45 = arith.constant 0 : index
    %c0_46 = arith.constant 0 : index
    %c0_47 = arith.constant 0 : index
    %158 = vector.load %arg7[%c0_45, %c0_46, %c0_47] : memref<2x1x64xf32, #tpu.memory_space<vmem>>, vector<1x1x64xf32>
    %159 = vector.shape_cast %158 : vector<1x1x64xf32> to vector<1x64xf32>
    %c0_48 = arith.constant 0 : index
    %c0_49 = arith.constant 0 : index
    %c0_50 = arith.constant 0 : index
    %160 = vector.load %arg8[%c0_48, %c0_49, %c0_50] : memref<2x1x64xf32, #tpu.memory_space<vmem>>, vector<1x1x64xf32>
    %161 = vector.shape_cast %160 : vector<1x1x64xf32> to vector<1x64xf32>
    %cst_51 = arith.constant dense<0.000000e+00> : vector<64xf32>
    %162 = vector.multi_reduction <add>, %157, %cst_51 [1] : vector<64x64xf32> to vector<64xf32>
    %163 = vector.shape_cast %162 : vector<64xf32> to vector<64x1xf32>
    %cst_52 = arith.constant 6.400000e+01 : f32
    %164 = vector.broadcast %cst_52 : f32 to vector<64x1xf32>
    %165 = arith.divf %163, %164 : vector<64x1xf32>
    %166 = vector.broadcast %165 : vector<64x1xf32> to vector<64x64xf32>
    %167 = arith.subf %157, %166 : vector<64x64xf32>
    %168 = arith.mulf %167, %167 : vector<64x64xf32>
    %cst_53 = arith.constant dense<0.000000e+00> : vector<64xf32>
    %169 = vector.multi_reduction <add>, %168, %cst_53 [1] : vector<64x64xf32> to vector<64xf32>
    %170 = vector.shape_cast %169 : vector<64xf32> to vector<64x1xf32>
    %cst_54 = arith.constant 6.400000e+01 : f32
    %171 = vector.broadcast %cst_54 : f32 to vector<64x1xf32>
    %172 = arith.divf %170, %171 : vector<64x1xf32>
    %cst_55 = arith.constant 9.99999974E-6 : f32
    %173 = vector.broadcast %cst_55 : f32 to vector<64x1xf32>
    %174 = arith.addf %172, %173 : vector<64x1xf32>
    %175 = math.rsqrt %174 : vector<64x1xf32>
    %176 = vector.broadcast %175 : vector<64x1xf32> to vector<64x64xf32>
    %177 = arith.mulf %167, %176 : vector<64x64xf32>
    %178 = vector.broadcast %159 : vector<1x64xf32> to vector<64x64xf32>
    %179 = arith.mulf %177, %178 : vector<64x64xf32>
    %180 = vector.broadcast %161 : vector<1x64xf32> to vector<64x64xf32>
    %181 = arith.addf %179, %180 : vector<64x64xf32>
    %182 = arith.truncf %181 : vector<64x64xf32> to vector<64x64xbf16>
    %c0_56 = arith.constant 0 : index
    %c0_57 = arith.constant 0 : index
    %c0_58 = arith.constant 0 : index
    %183 = vector.load %arg9[%c0_56, %c0_57, %c0_58] : memref<2x64x256xbf16, #tpu.memory_space<vmem>>, vector<1x64x256xbf16>
    %184 = vector.shape_cast %183 : vector<1x64x256xbf16> to vector<64x256xbf16>
    %cst_59 = arith.constant dense<0.000000e+00> : vector<64x256xf32>
    %185 = tpu.matmul %182, %184, %cst_59 {dimension_numbers = #tpu.dot_dimension_numbers<[1], [0], [0], [1], [0, 0, 1, 1], [], []>} : vector<64x64xbf16>, vector<64x256xbf16>, vector<64x256xf32> -> vector<64x256xf32>
    %c0_60 = arith.constant 0 : index
    %c0_61 = arith.constant 0 : index
    %c0_62 = arith.constant 0 : index
    %186 = vector.load %arg10[%c0_60, %c0_61, %c0_62] : memref<2x1x256xf32, #tpu.memory_space<vmem>>, vector<1x1x256xf32>
    %187 = vector.shape_cast %186 : vector<1x1x256xf32> to vector<1x256xf32>
    %188 = vector.broadcast %187 : vector<1x256xf32> to vector<64x256xf32>
    %189 = arith.addf %185, %188 : vector<64x256xf32>
    %cst_63 = arith.constant 0.000000e+00 : f32
    %190 = vector.broadcast %cst_63 : f32 to vector<64x256xf32>
    %191 = arith.maximumf %189, %190 : vector<64x256xf32>
    %192 = arith.truncf %191 : vector<64x256xf32> to vector<64x256xbf16>
    %c0_64 = arith.constant 0 : index
    %c0_65 = arith.constant 0 : index
    %c0_66 = arith.constant 0 : index
    %193 = vector.load %arg11[%c0_64, %c0_65, %c0_66] : memref<2x256x64xbf16, #tpu.memory_space<vmem>>, vector<1x256x64xbf16>
    %194 = vector.shape_cast %193 : vector<1x256x64xbf16> to vector<256x64xbf16>
    %cst_67 = arith.constant dense<0.000000e+00> : vector<64x64xf32>
    %195 = tpu.matmul %192, %194, %cst_67 {dimension_numbers = #tpu.dot_dimension_numbers<[1], [0], [0], [1], [0, 0, 1, 1], [], []>} : vector<64x256xbf16>, vector<256x64xbf16>, vector<64x64xf32> -> vector<64x64xf32>
    %c0_68 = arith.constant 0 : index
    %c0_69 = arith.constant 0 : index
    %c0_70 = arith.constant 0 : index
    %196 = vector.load %arg12[%c0_68, %c0_69, %c0_70] : memref<2x1x64xf32, #tpu.memory_space<vmem>>, vector<1x1x64xf32>
    %197 = vector.shape_cast %196 : vector<1x1x64xf32> to vector<1x64xf32>
    %198 = vector.broadcast %197 : vector<1x64xf32> to vector<64x64xf32>
    %199 = arith.addf %195, %198 : vector<64x64xf32>
    %200 = arith.addf %157, %199 : vector<64x64xf32>
    %c1 = arith.constant 1 : index
    %c0_71 = arith.constant 0 : index
    %c0_72 = arith.constant 0 : index
    %201 = vector.load %arg2[%c1, %c0_71, %c0_72] : memref<2x1x64xf32, #tpu.memory_space<vmem>>, vector<1x1x64xf32>
    %202 = vector.shape_cast %201 : vector<1x1x64xf32> to vector<1x64xf32>
    %c1_73 = arith.constant 1 : index
    %c0_74 = arith.constant 0 : index
    %c0_75 = arith.constant 0 : index
    %203 = vector.load %arg3[%c1_73, %c0_74, %c0_75] : memref<2x1x64xf32, #tpu.memory_space<vmem>>, vector<1x1x64xf32>
    %204 = vector.shape_cast %203 : vector<1x1x64xf32> to vector<1x64xf32>
    %cst_76 = arith.constant dense<0.000000e+00> : vector<64xf32>
    %205 = vector.multi_reduction <add>, %200, %cst_76 [1] : vector<64x64xf32> to vector<64xf32>
    %206 = vector.shape_cast %205 : vector<64xf32> to vector<64x1xf32>
    %cst_77 = arith.constant 6.400000e+01 : f32
    %207 = vector.broadcast %cst_77 : f32 to vector<64x1xf32>
    %208 = arith.divf %206, %207 : vector<64x1xf32>
    %209 = vector.broadcast %208 : vector<64x1xf32> to vector<64x64xf32>
    %210 = arith.subf %200, %209 : vector<64x64xf32>
    %211 = arith.mulf %210, %210 : vector<64x64xf32>
    %cst_78 = arith.constant dense<0.000000e+00> : vector<64xf32>
    %212 = vector.multi_reduction <add>, %211, %cst_78 [1] : vector<64x64xf32> to vector<64xf32>
    %213 = vector.shape_cast %212 : vector<64xf32> to vector<64x1xf32>
    %cst_79 = arith.constant 6.400000e+01 : f32
    %214 = vector.broadcast %cst_79 : f32 to vector<64x1xf32>
    %215 = arith.divf %213, %214 : vector<64x1xf32>
    %cst_80 = arith.constant 9.99999974E-6 : f32
    %216 = vector.broadcast %cst_80 : f32 to vector<64x1xf32>
    %217 = arith.addf %215, %216 : vector<64x1xf32>
    %218 = math.rsqrt %217 : vector<64x1xf32>
    %219 = vector.broadcast %218 : vector<64x1xf32> to vector<64x64xf32>
    %220 = arith.mulf %210, %219 : vector<64x64xf32>
    %221 = vector.broadcast %202 : vector<1x64xf32> to vector<64x64xf32>
    %222 = arith.mulf %220, %221 : vector<64x64xf32>
    %223 = vector.broadcast %204 : vector<1x64xf32> to vector<64x64xf32>
    %224 = arith.addf %222, %223 : vector<64x64xf32>
    %225 = arith.truncf %224 : vector<64x64xf32> to vector<64x64xbf16>
    %c1_81 = arith.constant 1 : index
    %c0_82 = arith.constant 0 : index
    %c0_83 = arith.constant 0 : index
    %226 = vector.load %arg4[%c1_81, %c0_82, %c0_83] : memref<2x64x192xbf16, #tpu.memory_space<vmem>>, vector<1x64x192xbf16>
    %227 = vector.shape_cast %226 : vector<1x64x192xbf16> to vector<64x192xbf16>
    %cst_84 = arith.constant dense<0.000000e+00> : vector<64x192xf32>
    %228 = tpu.matmul %225, %227, %cst_84 {dimension_numbers = #tpu.dot_dimension_numbers<[1], [0], [0], [1], [0, 0, 1, 1], [], []>} : vector<64x64xbf16>, vector<64x192xbf16>, vector<64x192xf32> -> vector<64x192xf32>
    %229 = vector.extract_strided_slice %228 {offsets = [0, 0], sizes = [64, 16], strides = [1, 1]} : vector<64x192xf32> to vector<64x16xf32>
    %230 = vector.extract_strided_slice %228 {offsets = [0, 64], sizes = [64, 16], strides = [1, 1]} : vector<64x192xf32> to vector<64x16xf32>
    %231 = vector.extract_strided_slice %228 {offsets = [0, 128], sizes = [64, 16], strides = [1, 1]} : vector<64x192xf32> to vector<64x16xf32>
    %232 = vector.shape_cast %229 : vector<64x16xf32> to vector<4x16x16xf32>
    %233 = arith.truncf %232 : vector<4x16x16xf32> to vector<4x16x16xbf16>
    %234 = vector.shape_cast %230 : vector<64x16xf32> to vector<4x16x16xf32>
    %235 = arith.truncf %234 : vector<4x16x16xf32> to vector<4x16x16xbf16>
    %236 = vector.shape_cast %231 : vector<64x16xf32> to vector<4x16x16xf32>
    %237 = arith.truncf %236 : vector<4x16x16xf32> to vector<4x16x16xbf16>
    "tpu.trace_start"() <{level = 10 : i32, message = "btd,bsd->bts"}> : () -> ()
    %cst_85 = arith.constant dense<0.000000e+00> : vector<4x16x16xf32>
    %238 = tpu.matmul %233, %235, %cst_85 {dimension_numbers = #tpu.dot_dimension_numbers<[2], [2], [1], [1], [0, 0, 0, 1, 1, 1], [0], [0]>} : vector<4x16x16xbf16>, vector<4x16x16xbf16>, vector<4x16x16xf32> -> vector<4x16x16xf32>
    "tpu.trace_stop"() : () -> ()
    %cst_86 = arith.constant 1.250000e-01 : f32
    %239 = vector.broadcast %cst_86 : f32 to vector<4x16x16xf32>
    %240 = arith.mulf %238, %239 : vector<4x16x16xf32>
    %241 = vector.shape_cast %7 : vector<16x16xf32> to vector<1x16x16xf32>
    %242 = vector.broadcast %241 : vector<1x16x16xf32> to vector<4x16x16xf32>
    %243 = arith.addf %240, %242 : vector<4x16x16xf32>
    %cst_87 = arith.constant dense<0xFF800000> : vector<4x16xf32>
    %244 = vector.multi_reduction <maximumf>, %243, %cst_87 [2] : vector<4x16x16xf32> to vector<4x16xf32>
    %245 = vector.shape_cast %244 : vector<4x16xf32> to vector<4x16x1xf32>
    %246 = vector.broadcast %245 : vector<4x16x1xf32> to vector<4x16x16xf32>
    %247 = arith.subf %243, %246 : vector<4x16x16xf32>
    %248 = math.exp %247 : vector<4x16x16xf32>
    %cst_88 = arith.constant dense<0.000000e+00> : vector<4x16xf32>
    %249 = vector.multi_reduction <add>, %248, %cst_88 [2] : vector<4x16x16xf32> to vector<4x16xf32>
    %250 = vector.shape_cast %249 : vector<4x16xf32> to vector<4x16x1xf32>
    %251 = tpu.reciprocal %250 {approx = true} : vector<4x16x1xf32> -> vector<4x16x1xf32>
    %252 = vector.broadcast %251 : vector<4x16x1xf32> to vector<4x16x16xf32>
    %253 = arith.mulf %248, %252 : vector<4x16x16xf32>
    %254 = arith.truncf %253 : vector<4x16x16xf32> to vector<4x16x16xbf16>
    "tpu.trace_start"() <{level = 10 : i32, message = "bts,bsd->btd"}> : () -> ()
    %cst_89 = arith.constant dense<0.000000e+00> : vector<4x16x16xf32>
    %255 = tpu.matmul %254, %237, %cst_89 {dimension_numbers = #tpu.dot_dimension_numbers<[2], [1], [1], [2], [0, 0, 0, 1, 1, 2], [0], [0]>} : vector<4x16x16xbf16>, vector<4x16x16xbf16>, vector<4x16x16xf32> -> vector<4x16x16xf32>
    "tpu.trace_stop"() : () -> ()
    %256 = vector.shape_cast %255 : vector<4x16x16xf32> to vector<64x16xf32>
    %257 = vector.extract_strided_slice %228 {offsets = [0, 16], sizes = [64, 16], strides = [1, 1]} : vector<64x192xf32> to vector<64x16xf32>
    %258 = vector.extract_strided_slice %228 {offsets = [0, 80], sizes = [64, 16], strides = [1, 1]} : vector<64x192xf32> to vector<64x16xf32>
    %259 = vector.extract_strided_slice %228 {offsets = [0, 144], sizes = [64, 16], strides = [1, 1]} : vector<64x192xf32> to vector<64x16xf32>
    %260 = vector.shape_cast %257 : vector<64x16xf32> to vector<4x16x16xf32>
    %261 = arith.truncf %260 : vector<4x16x16xf32> to vector<4x16x16xbf16>
    %262 = vector.shape_cast %258 : vector<64x16xf32> to vector<4x16x16xf32>
    %263 = arith.truncf %262 : vector<4x16x16xf32> to vector<4x16x16xbf16>
    %264 = vector.shape_cast %259 : vector<64x16xf32> to vector<4x16x16xf32>
    %265 = arith.truncf %264 : vector<4x16x16xf32> to vector<4x16x16xbf16>
    "tpu.trace_start"() <{level = 10 : i32, message = "btd,bsd->bts"}> : () -> ()
    %cst_90 = arith.constant dense<0.000000e+00> : vector<4x16x16xf32>
    %266 = tpu.matmul %261, %263, %cst_90 {dimension_numbers = #tpu.dot_dimension_numbers<[2], [2], [1], [1], [0, 0, 0, 1, 1, 1], [0], [0]>} : vector<4x16x16xbf16>, vector<4x16x16xbf16>, vector<4x16x16xf32> -> vector<4x16x16xf32>
    "tpu.trace_stop"() : () -> ()
    %cst_91 = arith.constant 1.250000e-01 : f32
    %267 = vector.broadcast %cst_91 : f32 to vector<4x16x16xf32>
    %268 = arith.mulf %266, %267 : vector<4x16x16xf32>
    %269 = vector.shape_cast %7 : vector<16x16xf32> to vector<1x16x16xf32>
    %270 = vector.broadcast %269 : vector<1x16x16xf32> to vector<4x16x16xf32>
    %271 = arith.addf %268, %270 : vector<4x16x16xf32>
    %cst_92 = arith.constant dense<0xFF800000> : vector<4x16xf32>
    %272 = vector.multi_reduction <maximumf>, %271, %cst_92 [2] : vector<4x16x16xf32> to vector<4x16xf32>
    %273 = vector.shape_cast %272 : vector<4x16xf32> to vector<4x16x1xf32>
    %274 = vector.broadcast %273 : vector<4x16x1xf32> to vector<4x16x16xf32>
    %275 = arith.subf %271, %274 : vector<4x16x16xf32>
    %276 = math.exp %275 : vector<4x16x16xf32>
    %cst_93 = arith.constant dense<0.000000e+00> : vector<4x16xf32>
    %277 = vector.multi_reduction <add>, %276, %cst_93 [2] : vector<4x16x16xf32> to vector<4x16xf32>
    %278 = vector.shape_cast %277 : vector<4x16xf32> to vector<4x16x1xf32>
    %279 = tpu.reciprocal %278 {approx = true} : vector<4x16x1xf32> -> vector<4x16x1xf32>
    %280 = vector.broadcast %279 : vector<4x16x1xf32> to vector<4x16x16xf32>
    %281 = arith.mulf %276, %280 : vector<4x16x16xf32>
    %282 = arith.truncf %281 : vector<4x16x16xf32> to vector<4x16x16xbf16>
    "tpu.trace_start"() <{level = 10 : i32, message = "bts,bsd->btd"}> : () -> ()
    %cst_94 = arith.constant dense<0.000000e+00> : vector<4x16x16xf32>
    %283 = tpu.matmul %282, %265, %cst_94 {dimension_numbers = #tpu.dot_dimension_numbers<[2], [1], [1], [2], [0, 0, 0, 1, 1, 2], [0], [0]>} : vector<4x16x16xbf16>, vector<4x16x16xbf16>, vector<4x16x16xf32> -> vector<4x16x16xf32>
    "tpu.trace_stop"() : () -> ()
    %284 = vector.shape_cast %283 : vector<4x16x16xf32> to vector<64x16xf32>
    %285 = vector.extract_strided_slice %228 {offsets = [0, 32], sizes = [64, 16], strides = [1, 1]} : vector<64x192xf32> to vector<64x16xf32>
    %286 = vector.extract_strided_slice %228 {offsets = [0, 96], sizes = [64, 16], strides = [1, 1]} : vector<64x192xf32> to vector<64x16xf32>
    %287 = vector.extract_strided_slice %228 {offsets = [0, 160], sizes = [64, 16], strides = [1, 1]} : vector<64x192xf32> to vector<64x16xf32>
    %288 = vector.shape_cast %285 : vector<64x16xf32> to vector<4x16x16xf32>
    %289 = arith.truncf %288 : vector<4x16x16xf32> to vector<4x16x16xbf16>
    %290 = vector.shape_cast %286 : vector<64x16xf32> to vector<4x16x16xf32>
    %291 = arith.truncf %290 : vector<4x16x16xf32> to vector<4x16x16xbf16>
    %292 = vector.shape_cast %287 : vector<64x16xf32> to vector<4x16x16xf32>
    %293 = arith.truncf %292 : vector<4x16x16xf32> to vector<4x16x16xbf16>
    "tpu.trace_start"() <{level = 10 : i32, message = "btd,bsd->bts"}> : () -> ()
    %cst_95 = arith.constant dense<0.000000e+00> : vector<4x16x16xf32>
    %294 = tpu.matmul %289, %291, %cst_95 {dimension_numbers = #tpu.dot_dimension_numbers<[2], [2], [1], [1], [0, 0, 0, 1, 1, 1], [0], [0]>} : vector<4x16x16xbf16>, vector<4x16x16xbf16>, vector<4x16x16xf32> -> vector<4x16x16xf32>
    "tpu.trace_stop"() : () -> ()
    %cst_96 = arith.constant 1.250000e-01 : f32
    %295 = vector.broadcast %cst_96 : f32 to vector<4x16x16xf32>
    %296 = arith.mulf %294, %295 : vector<4x16x16xf32>
    %297 = vector.shape_cast %7 : vector<16x16xf32> to vector<1x16x16xf32>
    %298 = vector.broadcast %297 : vector<1x16x16xf32> to vector<4x16x16xf32>
    %299 = arith.addf %296, %298 : vector<4x16x16xf32>
    %cst_97 = arith.constant dense<0xFF800000> : vector<4x16xf32>
    %300 = vector.multi_reduction <maximumf>, %299, %cst_97 [2] : vector<4x16x16xf32> to vector<4x16xf32>
    %301 = vector.shape_cast %300 : vector<4x16xf32> to vector<4x16x1xf32>
    %302 = vector.broadcast %301 : vector<4x16x1xf32> to vector<4x16x16xf32>
    %303 = arith.subf %299, %302 : vector<4x16x16xf32>
    %304 = math.exp %303 : vector<4x16x16xf32>
    %cst_98 = arith.constant dense<0.000000e+00> : vector<4x16xf32>
    %305 = vector.multi_reduction <add>, %304, %cst_98 [2] : vector<4x16x16xf32> to vector<4x16xf32>
    %306 = vector.shape_cast %305 : vector<4x16xf32> to vector<4x16x1xf32>
    %307 = tpu.reciprocal %306 {approx = true} : vector<4x16x1xf32> -> vector<4x16x1xf32>
    %308 = vector.broadcast %307 : vector<4x16x1xf32> to vector<4x16x16xf32>
    %309 = arith.mulf %304, %308 : vector<4x16x16xf32>
    %310 = arith.truncf %309 : vector<4x16x16xf32> to vector<4x16x16xbf16>
    "tpu.trace_start"() <{level = 10 : i32, message = "bts,bsd->btd"}> : () -> ()
    %cst_99 = arith.constant dense<0.000000e+00> : vector<4x16x16xf32>
    %311 = tpu.matmul %310, %293, %cst_99 {dimension_numbers = #tpu.dot_dimension_numbers<[2], [1], [1], [2], [0, 0, 0, 1, 1, 2], [0], [0]>} : vector<4x16x16xbf16>, vector<4x16x16xbf16>, vector<4x16x16xf32> -> vector<4x16x16xf32>
    "tpu.trace_stop"() : () -> ()
    %312 = vector.shape_cast %311 : vector<4x16x16xf32> to vector<64x16xf32>
    %313 = vector.extract_strided_slice %228 {offsets = [0, 48], sizes = [64, 16], strides = [1, 1]} : vector<64x192xf32> to vector<64x16xf32>
    %314 = vector.extract_strided_slice %228 {offsets = [0, 112], sizes = [64, 16], strides = [1, 1]} : vector<64x192xf32> to vector<64x16xf32>
    %315 = vector.extract_strided_slice %228 {offsets = [0, 176], sizes = [64, 16], strides = [1, 1]} : vector<64x192xf32> to vector<64x16xf32>
    %316 = vector.shape_cast %313 : vector<64x16xf32> to vector<4x16x16xf32>
    %317 = arith.truncf %316 : vector<4x16x16xf32> to vector<4x16x16xbf16>
    %318 = vector.shape_cast %314 : vector<64x16xf32> to vector<4x16x16xf32>
    %319 = arith.truncf %318 : vector<4x16x16xf32> to vector<4x16x16xbf16>
    %320 = vector.shape_cast %315 : vector<64x16xf32> to vector<4x16x16xf32>
    %321 = arith.truncf %320 : vector<4x16x16xf32> to vector<4x16x16xbf16>
    "tpu.trace_start"() <{level = 10 : i32, message = "btd,bsd->bts"}> : () -> ()
    %cst_100 = arith.constant dense<0.000000e+00> : vector<4x16x16xf32>
    %322 = tpu.matmul %317, %319, %cst_100 {dimension_numbers = #tpu.dot_dimension_numbers<[2], [2], [1], [1], [0, 0, 0, 1, 1, 1], [0], [0]>} : vector<4x16x16xbf16>, vector<4x16x16xbf16>, vector<4x16x16xf32> -> vector<4x16x16xf32>
    "tpu.trace_stop"() : () -> ()
    %cst_101 = arith.constant 1.250000e-01 : f32
    %323 = vector.broadcast %cst_101 : f32 to vector<4x16x16xf32>
    %324 = arith.mulf %322, %323 : vector<4x16x16xf32>
    %325 = vector.shape_cast %7 : vector<16x16xf32> to vector<1x16x16xf32>
    %326 = vector.broadcast %325 : vector<1x16x16xf32> to vector<4x16x16xf32>
    %327 = arith.addf %324, %326 : vector<4x16x16xf32>
    %cst_102 = arith.constant dense<0xFF800000> : vector<4x16xf32>
    %328 = vector.multi_reduction <maximumf>, %327, %cst_102 [2] : vector<4x16x16xf32> to vector<4x16xf32>
    %329 = vector.shape_cast %328 : vector<4x16xf32> to vector<4x16x1xf32>
    %330 = vector.broadcast %329 : vector<4x16x1xf32> to vector<4x16x16xf32>
    %331 = arith.subf %327, %330 : vector<4x16x16xf32>
    %332 = math.exp %331 : vector<4x16x16xf32>
    %cst_103 = arith.constant dense<0.000000e+00> : vector<4x16xf32>
    %333 = vector.multi_reduction <add>, %332, %cst_103 [2] : vector<4x16x16xf32> to vector<4x16xf32>
    %334 = vector.shape_cast %333 : vector<4x16xf32> to vector<4x16x1xf32>
    %335 = tpu.reciprocal %334 {approx = true} : vector<4x16x1xf32> -> vector<4x16x1xf32>
    %336 = vector.broadcast %335 : vector<4x16x1xf32> to vector<4x16x16xf32>
    %337 = arith.mulf %332, %336 : vector<4x16x16xf32>
    %338 = arith.truncf %337 : vector<4x16x16xf32> to vector<4x16x16xbf16>
    "tpu.trace_start"() <{level = 10 : i32, message = "bts,bsd->btd"}> : () -> ()
    %cst_104 = arith.constant dense<0.000000e+00> : vector<4x16x16xf32>
    %339 = tpu.matmul %338, %321, %cst_104 {dimension_numbers = #tpu.dot_dimension_numbers<[2], [1], [1], [2], [0, 0, 0, 1, 1, 2], [0], [0]>} : vector<4x16x16xbf16>, vector<4x16x16xbf16>, vector<4x16x16xf32> -> vector<4x16x16xf32>
    "tpu.trace_stop"() : () -> ()
    %340 = vector.shape_cast %339 : vector<4x16x16xf32> to vector<64x16xf32>
    %341 = tpu.concatenate %256, %284, %312, %340 in 1 : vector<64x16xf32>, vector<64x16xf32>, vector<64x16xf32>, vector<64x16xf32> -> vector<64x64xf32>
    %342 = arith.truncf %341 : vector<64x64xf32> to vector<64x64xbf16>
    %c1_105 = arith.constant 1 : index
    %c0_106 = arith.constant 0 : index
    %c0_107 = arith.constant 0 : index
    %343 = vector.load %arg5[%c1_105, %c0_106, %c0_107] : memref<2x64x64xbf16, #tpu.memory_space<vmem>>, vector<1x64x64xbf16>
    %344 = vector.shape_cast %343 : vector<1x64x64xbf16> to vector<64x64xbf16>
    %cst_108 = arith.constant dense<0.000000e+00> : vector<64x64xf32>
    %345 = tpu.matmul %342, %344, %cst_108 {dimension_numbers = #tpu.dot_dimension_numbers<[1], [0], [0], [1], [0, 0, 1, 1], [], []>} : vector<64x64xbf16>, vector<64x64xbf16>, vector<64x64xf32> -> vector<64x64xf32>
    %346 = arith.addf %200, %345 : vector<64x64xf32>
    %c1_109 = arith.constant 1 : index
    %c0_110 = arith.constant 0 : index
    %c0_111 = arith.constant 0 : index
    %347 = vector.load %arg6[%c1_109, %c0_110, %c0_111] : memref<2x1x64xf32, #tpu.memory_space<vmem>>, vector<1x1x64xf32>
    %348 = vector.shape_cast %347 : vector<1x1x64xf32> to vector<1x64xf32>
    %349 = vector.broadcast %348 : vector<1x64xf32> to vector<64x64xf32>
    %350 = arith.addf %346, %349 : vector<64x64xf32>
    %c1_112 = arith.constant 1 : index
    %c0_113 = arith.constant 0 : index
    %c0_114 = arith.constant 0 : index
    %351 = vector.load %arg7[%c1_112, %c0_113, %c0_114] : memref<2x1x64xf32, #tpu.memory_space<vmem>>, vector<1x1x64xf32>
    %352 = vector.shape_cast %351 : vector<1x1x64xf32> to vector<1x64xf32>
    %c1_115 = arith.constant 1 : index
    %c0_116 = arith.constant 0 : index
    %c0_117 = arith.constant 0 : index
    %353 = vector.load %arg8[%c1_115, %c0_116, %c0_117] : memref<2x1x64xf32, #tpu.memory_space<vmem>>, vector<1x1x64xf32>
    %354 = vector.shape_cast %353 : vector<1x1x64xf32> to vector<1x64xf32>
    %cst_118 = arith.constant dense<0.000000e+00> : vector<64xf32>
    %355 = vector.multi_reduction <add>, %350, %cst_118 [1] : vector<64x64xf32> to vector<64xf32>
    %356 = vector.shape_cast %355 : vector<64xf32> to vector<64x1xf32>
    %cst_119 = arith.constant 6.400000e+01 : f32
    %357 = vector.broadcast %cst_119 : f32 to vector<64x1xf32>
    %358 = arith.divf %356, %357 : vector<64x1xf32>
    %359 = vector.broadcast %358 : vector<64x1xf32> to vector<64x64xf32>
    %360 = arith.subf %350, %359 : vector<64x64xf32>
    %361 = arith.mulf %360, %360 : vector<64x64xf32>
    %cst_120 = arith.constant dense<0.000000e+00> : vector<64xf32>
    %362 = vector.multi_reduction <add>, %361, %cst_120 [1] : vector<64x64xf32> to vector<64xf32>
    %363 = vector.shape_cast %362 : vector<64xf32> to vector<64x1xf32>
    %cst_121 = arith.constant 6.400000e+01 : f32
    %364 = vector.broadcast %cst_121 : f32 to vector<64x1xf32>
    %365 = arith.divf %363, %364 : vector<64x1xf32>
    %cst_122 = arith.constant 9.99999974E-6 : f32
    %366 = vector.broadcast %cst_122 : f32 to vector<64x1xf32>
    %367 = arith.addf %365, %366 : vector<64x1xf32>
    %368 = math.rsqrt %367 : vector<64x1xf32>
    %369 = vector.broadcast %368 : vector<64x1xf32> to vector<64x64xf32>
    %370 = arith.mulf %360, %369 : vector<64x64xf32>
    %371 = vector.broadcast %352 : vector<1x64xf32> to vector<64x64xf32>
    %372 = arith.mulf %370, %371 : vector<64x64xf32>
    %373 = vector.broadcast %354 : vector<1x64xf32> to vector<64x64xf32>
    %374 = arith.addf %372, %373 : vector<64x64xf32>
    %375 = arith.truncf %374 : vector<64x64xf32> to vector<64x64xbf16>
    %c1_123 = arith.constant 1 : index
    %c0_124 = arith.constant 0 : index
    %c0_125 = arith.constant 0 : index
    %376 = vector.load %arg9[%c1_123, %c0_124, %c0_125] : memref<2x64x256xbf16, #tpu.memory_space<vmem>>, vector<1x64x256xbf16>
    %377 = vector.shape_cast %376 : vector<1x64x256xbf16> to vector<64x256xbf16>
    %cst_126 = arith.constant dense<0.000000e+00> : vector<64x256xf32>
    %378 = tpu.matmul %375, %377, %cst_126 {dimension_numbers = #tpu.dot_dimension_numbers<[1], [0], [0], [1], [0, 0, 1, 1], [], []>} : vector<64x64xbf16>, vector<64x256xbf16>, vector<64x256xf32> -> vector<64x256xf32>
    %c1_127 = arith.constant 1 : index
    %c0_128 = arith.constant 0 : index
    %c0_129 = arith.constant 0 : index
    %379 = vector.load %arg10[%c1_127, %c0_128, %c0_129] : memref<2x1x256xf32, #tpu.memory_space<vmem>>, vector<1x1x256xf32>
    %380 = vector.shape_cast %379 : vector<1x1x256xf32> to vector<1x256xf32>
    %381 = vector.broadcast %380 : vector<1x256xf32> to vector<64x256xf32>
    %382 = arith.addf %378, %381 : vector<64x256xf32>
    %cst_130 = arith.constant 0.000000e+00 : f32
    %383 = vector.broadcast %cst_130 : f32 to vector<64x256xf32>
    %384 = arith.maximumf %382, %383 : vector<64x256xf32>
    %385 = arith.truncf %384 : vector<64x256xf32> to vector<64x256xbf16>
    %c1_131 = arith.constant 1 : index
    %c0_132 = arith.constant 0 : index
    %c0_133 = arith.constant 0 : index
    %386 = vector.load %arg11[%c1_131, %c0_132, %c0_133] : memref<2x256x64xbf16, #tpu.memory_space<vmem>>, vector<1x256x64xbf16>
    %387 = vector.shape_cast %386 : vector<1x256x64xbf16> to vector<256x64xbf16>
    %cst_134 = arith.constant dense<0.000000e+00> : vector<64x64xf32>
    %388 = tpu.matmul %385, %387, %cst_134 {dimension_numbers = #tpu.dot_dimension_numbers<[1], [0], [0], [1], [0, 0, 1, 1], [], []>} : vector<64x256xbf16>, vector<256x64xbf16>, vector<64x64xf32> -> vector<64x64xf32>
    %c1_135 = arith.constant 1 : index
    %c0_136 = arith.constant 0 : index
    %c0_137 = arith.constant 0 : index
    %389 = vector.load %arg12[%c1_135, %c0_136, %c0_137] : memref<2x1x64xf32, #tpu.memory_space<vmem>>, vector<1x1x64xf32>
    %390 = vector.shape_cast %389 : vector<1x1x64xf32> to vector<1x64xf32>
    %391 = vector.broadcast %390 : vector<1x64xf32> to vector<64x64xf32>
    %392 = arith.addf %388, %391 : vector<64x64xf32>
    %393 = arith.addf %350, %392 : vector<64x64xf32>
    %c0_138 = arith.constant 0 : index
    %c0_139 = arith.constant 0 : index
    %394 = vector.load %arg13[%c0_138, %c0_139] : memref<1x64xf32, #tpu.memory_space<vmem>>, vector<1x64xf32>
    %c0_140 = arith.constant 0 : index
    %c0_141 = arith.constant 0 : index
    %395 = vector.load %arg14[%c0_140, %c0_141] : memref<1x64xf32, #tpu.memory_space<vmem>>, vector<1x64xf32>
    %cst_142 = arith.constant dense<0.000000e+00> : vector<64xf32>
    %396 = vector.multi_reduction <add>, %393, %cst_142 [1] : vector<64x64xf32> to vector<64xf32>
    %397 = vector.shape_cast %396 : vector<64xf32> to vector<64x1xf32>
    %cst_143 = arith.constant 6.400000e+01 : f32
    %398 = vector.broadcast %cst_143 : f32 to vector<64x1xf32>
    %399 = arith.divf %397, %398 : vector<64x1xf32>
    %400 = vector.broadcast %399 : vector<64x1xf32> to vector<64x64xf32>
    %401 = arith.subf %393, %400 : vector<64x64xf32>
    %402 = arith.mulf %401, %401 : vector<64x64xf32>
    %cst_144 = arith.constant dense<0.000000e+00> : vector<64xf32>
    %403 = vector.multi_reduction <add>, %402, %cst_144 [1] : vector<64x64xf32> to vector<64xf32>
    %404 = vector.shape_cast %403 : vector<64xf32> to vector<64x1xf32>
    %cst_145 = arith.constant 6.400000e+01 : f32
    %405 = vector.broadcast %cst_145 : f32 to vector<64x1xf32>
    %406 = arith.divf %404, %405 : vector<64x1xf32>
    %cst_146 = arith.constant 9.99999974E-6 : f32
    %407 = vector.broadcast %cst_146 : f32 to vector<64x1xf32>
    %408 = arith.addf %406, %407 : vector<64x1xf32>
    %409 = math.rsqrt %408 : vector<64x1xf32>
    %410 = vector.broadcast %409 : vector<64x1xf32> to vector<64x64xf32>
    %411 = arith.mulf %401, %410 : vector<64x64xf32>
    %412 = vector.broadcast %394 : vector<1x64xf32> to vector<64x64xf32>
    %413 = arith.mulf %411, %412 : vector<64x64xf32>
    %414 = vector.broadcast %395 : vector<1x64xf32> to vector<64x64xf32>
    %415 = arith.addf %413, %414 : vector<64x64xf32>
    %416 = arith.truncf %415 : vector<64x64xf32> to vector<64x64xbf16>
    %c0_147 = arith.constant 0 : index
    %c0_148 = arith.constant 0 : index
    %417 = vector.load %arg15[%c0_147, %c0_148] : memref<64x128xbf16, #tpu.memory_space<vmem>>, vector<64x128xbf16>
    %cst_149 = arith.constant dense<0.000000e+00> : vector<64x128xf32>
    %418 = tpu.matmul %416, %417, %cst_149 {dimension_numbers = #tpu.dot_dimension_numbers<[1], [0], [0], [1], [0, 0, 1, 1], [], []>} : vector<64x64xbf16>, vector<64x128xbf16>, vector<64x128xf32> -> vector<64x128xf32>
    %c0_150 = arith.constant 0 : index
    %c0_151 = arith.constant 0 : index
    %419 = vector.load %arg16[%c0_150, %c0_151] : memref<1x128xf32, #tpu.memory_space<vmem>>, vector<1x128xf32>
    %420 = vector.broadcast %419 : vector<1x128xf32> to vector<64x128xf32>
    %421 = arith.addf %418, %420 : vector<64x128xf32>
    %422 = vector.shape_cast %421 : vector<64x128xf32> to vector<4x16x128xf32>
    %c0_152 = arith.constant 0 : index
    %c0_153 = arith.constant 0 : index
    %c0_154 = arith.constant 0 : index
    %423 = vector.load %arg17[%c0_152, %c0_153, %c0_154] : memref<4x16x128xf32, #tpu.memory_space<vmem>>, vector<4x16x128xf32>
    tpu.vector_store %arg17[%c0_152, %c0_153, %c0_154], %422 {strides = array<i32>} : memref<4x16x128xf32, #tpu.memory_space<vmem>>, vector<4x16x128xf32>,
    return
  }
  func.func @transform_0(%arg0: i32) -> (i32, i32, i32) {
    %c0_i32 = arith.constant 0 : i32
    %c0_i32_0 = arith.constant 0 : i32
    %c0_i32_1 = arith.constant 0 : i32
    return %arg0, %c0_i32, %c0_i32_0 : i32, i32, i32
  }
  func.func @transform_1(%arg0: i32) -> (i32, i32, i32) {
    %c0_i32 = arith.constant 0 : i32
    %c0_i32_0 = arith.constant 0 : i32
    %c0_i32_1 = arith.constant 0 : i32
    %c0_i32_2 = arith.constant 0 : i32
    return %c0_i32, %c0_i32_0, %c0_i32_1 : i32, i32, i32
  }
  func.func @transform_2(%arg0: i32) -> (i32, i32, i32) {
    %c0_i32 = arith.constant 0 : i32
    %c0_i32_0 = arith.constant 0 : i32
    %c0_i32_1 = arith.constant 0 : i32
    %c0_i32_2 = arith.constant 0 : i32
    return %c0_i32, %c0_i32_0, %c0_i32_1 : i32, i32, i32
  }
  func.func @transform_3(%arg0: i32) -> (i32, i32, i32) {
    %c0_i32 = arith.constant 0 : i32
    %c0_i32_0 = arith.constant 0 : i32
    %c0_i32_1 = arith.constant 0 : i32
    %c0_i32_2 = arith.constant 0 : i32
    return %c0_i32, %c0_i32_0, %c0_i32_1 : i32, i32, i32
  }
  func.func @transform_4(%arg0: i32) -> (i32, i32, i32) {
    %c0_i32 = arith.constant 0 : i32
    %c0_i32_0 = arith.constant 0 : i32
    %c0_i32_1 = arith.constant 0 : i32
    %c0_i32_2 = arith.constant 0 : i32
    return %c0_i32, %c0_i32_0, %c0_i32_1 : i32, i32, i32
  }
  func.func @transform_5(%arg0: i32) -> (i32, i32, i32) {
    %c0_i32 = arith.constant 0 : i32
    %c0_i32_0 = arith.constant 0 : i32
    %c0_i32_1 = arith.constant 0 : i32
    %c0_i32_2 = arith.constant 0 : i32
    return %c0_i32, %c0_i32_0, %c0_i32_1 : i32, i32, i32
  }
  func.func @transform_6(%arg0: i32) -> (i32, i32, i32) {
    %c0_i32 = arith.constant 0 : i32
    %c0_i32_0 = arith.constant 0 : i32
    %c0_i32_1 = arith.constant 0 : i32
    %c0_i32_2 = arith.constant 0 : i32
    return %c0_i32, %c0_i32_0, %c0_i32_1 : i32, i32, i32
  }
  func.func @transform_7(%arg0: i32) -> (i32, i32, i32) {
    %c0_i32 = arith.constant 0 : i32
    %c0_i32_0 = arith.constant 0 : i32
    %c0_i32_1 = arith.constant 0 : i32
    %c0_i32_2 = arith.constant 0 : i32
    return %c0_i32, %c0_i32_0, %c0_i32_1 : i32, i32, i32
  }
  func.func @transform_8(%arg0: i32) -> (i32, i32, i32) {
    %c0_i32 = arith.constant 0 : i32
    %c0_i32_0 = arith.constant 0 : i32
    %c0_i32_1 = arith.constant 0 : i32
    %c0_i32_2 = arith.constant 0 : i32
    return %c0_i32, %c0_i32_0, %c0_i32_1 : i32, i32, i32
  }
  func.func @transform_9(%arg0: i32) -> (i32, i32, i32) {
    %c0_i32 = arith.constant 0 : i32
    %c0_i32_0 = arith.constant 0 : i32
    %c0_i32_1 = arith.constant 0 : i32
    %c0_i32_2 = arith.constant 0 : i32
    return %c0_i32, %c0_i32_0, %c0_i32_1 : i32, i32, i32
  }
  func.func @transform_10(%arg0: i32) -> (i32, i32, i32) {
    %c0_i32 = arith.constant 0 : i32
    %c0_i32_0 = arith.constant 0 : i32
    %c0_i32_1 = arith.constant 0 : i32
    %c0_i32_2 = arith.constant 0 : i32
    return %c0_i32, %c0_i32_0, %c0_i32_1 : i32, i32, i32
  }
  func.func @transform_11(%arg0: i32) -> (i32, i32, i32) {
    %c0_i32 = arith.constant 0 : i32
    %c0_i32_0 = arith.constant 0 : i32
    %c0_i32_1 = arith.constant 0 : i32
    %c0_i32_2 = arith.constant 0 : i32
    return %c0_i32, %c0_i32_0, %c0_i32_1 : i32, i32, i32
  }
  func.func @transform_12(%arg0: i32) -> (i32, i32) {
    %c0_i32 = arith.constant 0 : i32
    %c0_i32_0 = arith.constant 0 : i32
    %c0_i32_1 = arith.constant 0 : i32
    return %c0_i32, %c0_i32_0 : i32, i32
  }
  func.func @transform_13(%arg0: i32) -> (i32, i32) {
    %c0_i32 = arith.constant 0 : i32
    %c0_i32_0 = arith.constant 0 : i32
    %c0_i32_1 = arith.constant 0 : i32
    return %c0_i32, %c0_i32_0 : i32, i32
  }
  func.func @transform_14(%arg0: i32) -> (i32, i32) {
    %c0_i32 = arith.constant 0 : i32
    %c0_i32_0 = arith.constant 0 : i32
    %c0_i32_1 = arith.constant 0 : i32
    return %c0_i32, %c0_i32_0 : i32, i32
  }
  func.func @transform_15(%arg0: i32) -> (i32, i32) {
    %c0_i32 = arith.constant 0 : i32
    %c0_i32_0 = arith.constant 0 : i32
    %c0_i32_1 = arith.constant 0 : i32
    return %c0_i32, %c0_i32_0 : i32, i32
  }
  func.func @transform_16(%arg0: i32) -> (i32, i32, i32) {
    %c0_i32 = arith.constant 0 : i32
    %c0_i32_0 = arith.constant 0 : i32
    %c0_i32_1 = arith.constant 0 : i32
    return %arg0, %c0_i32, %c0_i32_0 : i32, i32, i32
  }
}

</mosaic_0001>

<bundles_post_ra>
// kernel: tpu_custom_call.1
= control target key start
LH: loop header
LB: loop body
LE: loop exit
PB: predicated region body
PF: predicated region fallthrough
CT: control target
= control target key end

     0   :  { %s8533_s0 = inlined_call_operand.vmem [shape: f32[4,16,64], index: 0, kind: input, shape index: {}]   ;;  %s8534_s1 = inlined_call_operand.hbm [shape: f32[2,1,64], index: 1, kind: input, shape index: {}]   ;;  %s8535_s2 = inlined_call_operand.hbm [shape: f32[2,1,64], index: 2, kind: input, shape index: {}]   ;;  %s8536_s3 = inlined_call_operand.vmem [shape: bf16[2,64,192], index: 3, kind: input, shape index: {}]   ;;  %s8537_s4 = inlined_call_operand.vmem [shape: bf16[2,64,64], index: 4, kind: input, shape index: {}]   ;;  %s8538_s5 = inlined_call_operand.hbm [shape: f32[2,1,64], index: 5, kind: input, shape index: {}]   ;;  %s8539_s6 = inlined_call_operand.hbm [shape: f32[2,1,64], index: 6, kind: input, shape index: {}]   ;;  %s8540_s7 = inlined_call_operand.hbm [shape: f32[2,1,64], index: 7, kind: input, shape index: {}]   ;;  %s8541_s8 = inlined_call_operand.vmem [shape: bf16[2,64,256], index: 8, kind: input, shape index: {}]   ;;  %s8542_s9 = inlined_call_operand.vmem [shape: f32[2,1,256], index: 9, kind: input, shape index: {}]   ;;  %s8543_s10 = inlined_call_operand.vmem [shape: bf16[2,256,64], index: 10, kind: input, shape index: {}]   ;;  %s8544_s11 = inlined_call_operand.vmem [shape: f32[2,1,64], index: 11, kind: input, shape index: {}]   ;;  %s8545_s12 = inlined_call_operand.vmem [shape: f32[1,64], index: 12, kind: input, shape index: {}]   ;;  %s8546_s13 = inlined_call_operand.vmem [shape: f32[1,64], index: 13, kind: input, shape index: {}]   ;;  %s8547_s14 = inlined_call_operand.hbm [shape: bf16[64,128], index: 14, kind: input, shape index: {}]   ;;  %s8548_s15 = inlined_call_operand.vmem [shape: f32[1,128], index: 15, kind: input, shape index: {}]   ;;  %s8549_s16 = inlined_call_operand.hbm [shape: f32[4,16,128], index: 16, kind: output, shape index: {}]  }
   0x1   :  { %8551 = sst [smem:[#allocation19_spill]] %s8533_s0 }
   0x2   :  { %21 = vsyncpa [#allocation3], 0 }
   0x3   :  { %22 = vsyncpa [#allocation6], 0 }
   0x4   :  { %23 = vsyncpa [#allocation9], 0 }
   0x5   :  { %24 = vsyncpa [#allocation12], 0 }
   0x6   :  { %25 = vsyncpa [#allocation4], 0  ;;  %s45_s23 = sshll.u32 %s8535_s2, 4  ;;  %s6450_s24 = smov [#allocation5]   ;;  %s46_s23 = int_to_ptr.hbm [resolvable:$true] %s45_s23 }
   0x7   :  { %s47_s25 = sshll.u32 %s6450_s24, 4  ;;  %s75_s28 = sshll.u32 %s8539_s6, 4  ;;  %s48_s25 = int_to_ptr.vmem [resolvable:$true] %s47_s25  ;;  %s76_s28 = int_to_ptr.hbm [resolvable:$true] %s75_s28 }
   0x8   :  { %s6451_s29 = smov 16   ;;  %s6452_s30 = smov 1  }
   0x9   :  { %53 = dma.hbm_to_vmem [thread:$0]  %s46_s23, 32, %s48_s25, [#allocation6], %s6451_s29, %s6451_s29, %s6452_s30  }
   0xa   :  { %s6453_s0 = smov [#allocation8]   ;;  %s32_s2 = sshll.u32 %s8534_s1, 4  ;;  %s33_s2 = int_to_ptr.hbm [resolvable:$true] %s32_s2 }
   0xb   :  { %s77_s17 = sshll.u32 %s6453_s0, 4  ;;  %s62_s21 = sshll.u32 %s8538_s5, 4  ;;  %s78_s17 = int_to_ptr.vmem [resolvable:$true] %s77_s17  ;;  %s63_s21 = int_to_ptr.hbm [resolvable:$true] %s62_s21 }
   0xc   :  { %83 = dma.hbm_to_vmem [thread:$0]  %s76_s28, 32, %s78_s17, [#allocation9], %s6451_s29, %s6451_s29, %s6452_s30  }
   0xd   :  { %s6454_s22 = smov [#allocation2]   ;;  %s6455_s23 = smov [#allocation7]  }
   0xe   :  { %s34_s24 = sshll.u32 %s6454_s22, 4  ;;  %s64_s1 = sshll.u32 %s6455_s23, 4  ;;  %s35_s24 = int_to_ptr.vmem [resolvable:$true] %s34_s24  ;;  %s65_s1 = int_to_ptr.vmem [resolvable:$true] %s64_s1 }
   0xf   :  { %40 = dma.hbm_to_vmem [thread:$0]  %s33_s2, 32, %s35_s24, [#allocation3], %s6451_s29, %s6451_s29, %s6452_s30  }
  0x10   :  { %s88_s27 = sshll.u32 %s8540_s7, 4  ;;  %s113_s0 = sshll.u32 %s8547_s14, 4  ;;  %s89_s27 = int_to_ptr.hbm [resolvable:$true] %s88_s27  ;;  %s114_s0 = int_to_ptr.hbm [resolvable:$true] %s113_s0 }
  0x11   :  { %70 = dma.hbm_to_vmem [thread:$0]  %s63_s21, 32, %s65_s1, [#allocation6], %s6451_s29, %s6451_s29, %s6452_s30  }
  0x12   :  { %s6456_s17 = smov [#allocation10]   ;;  %s6457_s19 = smov [#allocation11]  }
  0x13   :  { %s90_s18 = sshll.u32 %s6456_s17, 4  ;;  %s115_s7 = sshll.u32 %s6457_s19, 4  ;;  %s91_s18 = int_to_ptr.vmem [resolvable:$true] %s90_s18  ;;  %s116_s7 = int_to_ptr.vmem [resolvable:$true] %s115_s7 }
  0x14   :  { %96 = dma.hbm_to_vmem [thread:$0]  %s89_s27, 32, %s91_s18, [#allocation9], %s6451_s29, %s6451_s29, %s6452_s30  }
  0x15   :  { %s6458_s2 = smov 64   ;;  %s6459_s6 = smov 4  }
  0x16   :  { %121 = dma.hbm_to_vmem [thread:$0]  %s114_s0, 512, %s116_s7, [#allocation12], %s6458_s2, %s6458_s2, %s6459_s6  }
  0x17   :  { %6440 = dma.done.wait [#allocation3], 32  }
  0x18   :  { %6441 = vsyncadd [#allocation3], 4294967264 }
  0x19   :  { %6442 = dma.done.wait [#allocation6], 64  }
  0x1a   :  { %6443 = vsyncadd [#allocation6], 4294967232 }
  0x1b   :  { %6444 = dma.done.wait [#allocation9], 64  }
  0x1c   :  { %6445 = vsyncadd [#allocation9], 4294967232 }
  0x1d   :  { %6446 = dma.done.wait [#allocation12], 512  }
  0x1e   :  { %6447 = vsyncadd [#allocation12], 4294966784  ;;  %vm168_vm0 = vcmask 523264   ;;  %s8552_s30 = sld [smem:[#allocation19_spill]]  ;;  %v6460_v14 = vmov 64.0   ;;  %s6462_s0 = smov 48  }
  0x1f   :  { %5926 = vrcp.f32 %v6460_v14  ;;  %v5247_v58 = vld [vmem:[%s8536_s3 + $0x30] sm:$0xf]  ;;  %v5698_v59 = vld [vmem:[%s8536_s3 + $0x34] sm:$0xf0]  ;;  %v5697_v60 = vld [vmem:[%s8536_s3 + $0x34] sm:$0xf] }
  0x20   :  { %v5248_v61 = vor.u32 %v5698_v59, %v5247_v58  ;;  %v5249_v62 = vld [vmem:[%s8536_s3 + $0x38] sm:$0xf0]  ;;  %v5223_v14 = vld [vmem:[%s8536_s3] sm:$0xf]  ;;  %s6463_s17 = smov 112   ;;  %s6464_s18 = smov 32  }
  0x21   :  { %v5252_v63 = vor.u32 %v5697_v60, %v5249_v62  ;;  %s6465_s19 = smov 96   ;;  %s6466_s7 = smov 80  }
  0x22   :  { %442 = vmatpush.bf16.msra.mxu0 %v5248_v61 }
  0x23   :  { %471 = vmatpush.bf16.msra.mxu1 %v5252_v63 }
  0x24   :  { %v153_v0 = vld [vmem:[%s8552_s30 + $0x20] sm:$0xff]  ;;  %v151_v1 = vld [vmem:[%s8552_s30 + $0x10] sm:$0xff]  ;;  %v154_v6 = vld [vmem:[%s8552_s30 + $0x28] sm:$0xff] }
  0x25   :  { %v149_v2 = vld [vmem:[%s8552_s30] sm:$0xff]  ;;  %v181_v3 = vsel %vm168_vm0, %v153_v0, 0.0  ;;  %v175_v4 = vsel %vm168_vm0, %v151_v1, 0.0  ;;  %v152_v7 = vld [vmem:[%s8552_s30 + $0x18] sm:$0xff]  ;;  %v150_v8 = vld [vmem:[%s8552_s30 + $0x8] sm:$0xff]  ;;  %v184_v9 = vsel %vm168_vm0, %v154_v6, 0.0  ;;  %v5927_v15 = vpop.eup %5926 }
  0x26   :  { %v169_v5 = vsel %vm168_vm0, %v149_v2, 0.0  ;;  %182 = vadd.xlane.f32.xlu2 %v181_v3  ;;  %176 = vadd.xlane.f32.xlu1 %v175_v4  ;;  %v178_v10 = vsel %vm168_vm0, %v152_v7, 0.0  ;;  %v172_v11 = vsel %vm168_vm0, %v150_v8, 0.0  ;;  %v155_v12 = vld [vmem:[%s8552_s30 + $0x30] sm:$0xff]  ;;  %v194_v16 = vmul.f32 64.0, %v5927_v15  ;;  %v6635_v36 = vld [vmem:[%s8552_s30 + $0x38] sm:$0xff] }
  0x27   :  { %170 = vadd.xlane.f32.xlu0 %v169_v5  ;;  %v187_v13 = vsel %vm168_vm0, %v155_v12, 0.0  ;;  %vm198_vm1 = vweird.f32 %v5927_v15  ;;  %v190_v41 = vsel %vm168_vm0, %v6635_v36, 0.0  ;;  %v5241_v4 = vld [vmem:[%s8536_s3 + $0x28] sm:$0xf0] }
  0x28   :  { %v195_v17 = vsub.f32 1.0, %v194_v16  ;;  %v5691_v16 = vld [vmem:[%s8536_s3 + $0x4] sm:$0xf] }
  0x2a   :  { %v196_v18 = vmul.f32 %v5927_v15, %v195_v17 }
  0x2c   :  { %v197_v19 = vadd.f32 %v5927_v15, %v196_v18 }
  0x2e   :  { %185 = vadd.xlane.f32.xlu2 %v184_v9  ;;  %179 = vadd.xlane.f32.xlu1 %v178_v10  ;;  %v6618_v20 = vsel %vm198_vm1, %v5927_v15, %v197_v19  ;;  %v5233_v10 = vld [vmem:[%s8536_s3 + $0x18] sm:$0xf0]  ;;  %v5692_v15 = vld [vmem:[%s8536_s3 + $0x4] sm:$0xf0]  ;;  %v5225_v19 = vld [vmem:[%s8536_s3 + $0x8] sm:$0xf0] }
  0x2f   :  { %173 = vadd.xlane.f32.xlu0 %v172_v11  ;;  %v5224_v18 = vor.u32 %v5692_v15, %v5223_v14 }
  0x36   :  { %188 = vadd.xlane.f32.xlu2 %v187_v13 }
  0x99   :  { %v183_v21 = vpop.xlane.xlu2 %182  ;;  %v177_v22 = vpop.xlane.xlu1 %176 }
  0x9a   :  { %v171_v23 = vpop.xlane.xlu0 %170  ;;  %v204_v32 = vmul.f32 %v6618_v20, %v183_v21  ;;  %v202_v33 = vmul.f32 %v6618_v20, %v177_v22  ;;  %v5228_v21 = vor.u32 %v5691_v16, %v5225_v19 }
  0x9b   :  { %v200_v24 = vmul.f32 %v6618_v20, %v171_v23 }
  0x9c   :  { %v6641_v39 = vsub.f32 %v153_v0, %v204_v32  ;;  %v6643_v40 = vsub.f32 %v151_v1, %v202_v33  ;;  %v5239_v0 = vld [vmem:[%s8536_s3 + $0x20] sm:$0xf]  ;;  %v5696_v1 = vld [vmem:[%s8536_s3 + $0x24] sm:$0xf0] }
  0x9d   :  { %v6621_v25 = vsub.f32 %v149_v2, %v200_v24  ;;  %v5695_v2 = vld [vmem:[%s8536_s3 + $0x24] sm:$0xf]  ;;  %v5240_v3 = vor.u32 %v5696_v1, %v5239_v0 }
  0x9e   :  { %v220_v48 = vmul.f32 %v6641_v39, %v6641_v39  ;;  %v218_v49 = vmul.f32 %v6643_v40, %v6643_v40  ;;  %v5244_v5 = vor.u32 %v5695_v2, %v5241_v4 }
  0x9f   :  { %v216_v26 = vmul.f32 %v6621_v25, %v6621_v25  ;;  %443 = vmatpush.bf16.msra.mxu0 %v5240_v3 }
  0xa0   :  { %v236_v53 = vsel %vm168_vm0, %v220_v48, 0.0  ;;  %v230_v54 = vsel %vm168_vm0, %v218_v49, 0.0  ;;  %472 = vmatpush.bf16.msra.mxu1 %v5244_v5  ;;  %v6748_v5 = vld [vmem:[#allocation2] ss:$0 sm:$0xff] }
  0xa1   :  { %v186_v27 = vpop.xlane.xlu2 %185  ;;  %v180_v28 = vpop.xlane.xlu1 %179  ;;  %v224_v29 = vsel %vm168_vm0, %v216_v26, 0.0 }
  0xa2   :  { %v203_v30 = vmul.f32 %v6618_v20, %v180_v28  ;;  %225 = vadd.xlane.f32.xlu0 %v224_v29  ;;  %v174_v31 = vpop.xlane.xlu0 %173  ;;  %v205_v47 = vmul.f32 %v6618_v20, %v186_v27 }
  0xa3   :  { %v201_v34 = vmul.f32 %v6618_v20, %v174_v31 }
  0xa4   :  { %v6630_v35 = vsub.f32 %v152_v7, %v203_v30  ;;  %v6661_v52 = vsub.f32 %v154_v6, %v205_v47  ;;  %v5231_v6 = vld [vmem:[%s8536_s3 + $0x10] sm:$0xf]  ;;  %v5694_v7 = vld [vmem:[%s8536_s3 + $0x14] sm:$0xf0] }
  0xa5   :  { %v6637_v37 = vsub.f32 %v150_v8, %v201_v34  ;;  %v5693_v8 = vld [vmem:[%s8536_s3 + $0x14] sm:$0xf]  ;;  %v5232_v9 = vor.u32 %v5694_v7, %v5231_v6 }
  0xa6   :  { %v219_v38 = vmul.f32 %v6630_v35, %v6630_v35  ;;  %v221_v56 = vmul.f32 %v6661_v52, %v6661_v52 }
  0xa7   :  { %v217_v42 = vmul.f32 %v6637_v37, %v6637_v37  ;;  %444 = vmatpush.bf16.msra.mxu0 %v5232_v9 }
  0xa8   :  { %v233_v43 = vsel %vm168_vm0, %v219_v38, 0.0  ;;  %v239_v57 = vsel %vm168_vm0, %v221_v56, 0.0 }
  0xa9   :  { %v189_v44 = vpop.xlane.xlu2 %188  ;;  %234 = vadd.xlane.f32.xlu2 %v233_v43  ;;  %v227_v45 = vsel %vm168_vm0, %v217_v42, 0.0 }
  0xaa   :  { %v206_v46 = vmul.f32 %v6618_v20, %v189_v44  ;;  %191 = vadd.xlane.f32.xlu0 %v190_v41  ;;  %228 = vadd.xlane.f32.xlu1 %v227_v45 }
  0xab   :  { %445 = vmatpush.bf16.msra.mxu0 %v5224_v18 }
  0xac   :  { %v6657_v50 = vsub.f32 %v155_v12, %v206_v46  ;;  %v5236_v12 = vor.u32 %v5693_v8, %v5233_v10 }
  0xae   :  { %v222_v51 = vmul.f32 %v6657_v50, %v6657_v50  ;;  %473 = vmatpush.bf16.msra.mxu1 %v5236_v12  ;;  %v6752_v12 = vld [vmem:[#allocation5] ss:$0 sm:$0xff] }
  0xb0   :  { %v242_v55 = vsel %vm168_vm0, %v222_v51, 0.0 }
  0xb1   :  { %243 = vadd.xlane.f32.xlu2 %v242_v55 }
  0xb2   :  { %237 = vadd.xlane.f32.xlu0 %v236_v53  ;;  %231 = vadd.xlane.f32.xlu1 %v230_v54 }
  0xb3   :  { %474 = vmatpush.bf16.msra.mxu1 %v5228_v21 }
  0xba   :  { %240 = vadd.xlane.f32.xlu1 %v239_v57 }
 0x115   :  { %v226_v11 = vpop.xlane.xlu0 %225 }
 0x116   :  { %v248_v13 = vmul.f32 %v226_v11, %v6618_v20 }
 0x118   :  { %v256_v17 = vadd.f32 1e-05, %v248_v13 }
 0x11a   :  { %5928 = vrsqrt.f32 %v256_v17  ;;  %vm270_vm3 = vweird.f32 %v256_v17 }
 0x11c   :  { %v235_v22 = vpop.xlane.xlu2 %234 }
 0x11d   :  { %v251_v23 = vmul.f32 %v235_v22, %v6618_v20  ;;  %v229_v24 = vpop.xlane.xlu1 %228  ;;  %v192_v26 = vpop.xlane.xlu0 %191 }
 0x11e   :  { %v249_v27 = vmul.f32 %v229_v24, %v6618_v20  ;;  %v207_v28 = vmul.f32 %v6618_v20, %v192_v26 }
 0x11f   :  { %v6721_v29 = vadd.f32 1e-05, %v251_v23 }
 0x120   :  { %v5929_v30 = vpop.eup %5928  ;;  %v257_v31 = vadd.f32 1e-05, %v249_v27  ;;  %v6724_v32 = vsub.f32 %v6635_v36, %v207_v28 }
 0x121   :  { %v265_v33 = vmul.f32 %v5929_v30, %v256_v17  ;;  %5930 = vrsqrt.f32 %v6721_v29  ;;  %vm271_vm2 = vweird.f32 %v5929_v30  ;;  %vm300_vm10 = vweird.f32 %v6721_v29 }
 0x122   :  { %5932 = vrsqrt.f32 %v257_v31  ;;  %v223_v34 = vmul.f32 %v6724_v32, %v6724_v32  ;;  %vm6736_vm4 = vmor %vm270_vm3, %vm271_vm2  ;;  %vm280_vm5 = vweird.f32 %v257_v31 }
 0x123   :  { %v266_v38 = vmul.f32 %v5929_v30, %v265_v33 }
 0x124   :  { %v245_v41 = vsel %vm168_vm0, %v223_v34, 0.0  ;;  %v244_v56 = vpop.xlane.xlu2 %243 }
 0x125   :  { %v267_v42 = vmul.f32 0.5, %v266_v38  ;;  %v232_v43 = vpop.xlane.xlu1 %231  ;;  %246 = vadd.xlane.f32.xlu0 %v245_v41  ;;  %v238_v45 = vpop.xlane.xlu0 %237 }
 0x126   :  { %v250_v44 = vmul.f32 %v232_v43, %v6618_v20  ;;  %v252_v51 = vmul.f32 %v238_v45, %v6618_v20 }
 0x127   :  { %v6731_v46 = vpop.eup %5930  ;;  %v268_v36 = vsub.f32 1.5, %v267_v42 }
 0x128   :  { %v5933_v47 = vpop.eup %5932  ;;  %v258_v48 = vadd.f32 1e-05, %v250_v44  ;;  %v295_v54 = vmul.f32 %v6731_v46, %v6721_v29  ;;  %v6740_v58 = vadd.f32 1e-05, %v252_v51  ;;  %vm301_vm11 = vweird.f32 %v6731_v46 }
 0x129   :  { %v275_v49 = vmul.f32 %v5933_v47, %v257_v31  ;;  %v269_v53 = vmul.f32 %v5929_v30, %v268_v36  ;;  %vm281_vm6 = vweird.f32 %v5933_v47  ;;  %vm302_vm13 = vmor %vm300_vm10, %vm301_vm11  ;;  %vm519_vm11 = vcmask 130048  }
 0x12a   :  { %5934 = vrsqrt.f32 %v258_v48  ;;  %v296_v61 = vmul.f32 %v6731_v46, %v295_v54  ;;  %vm282_vm7 = vmor %vm280_vm5, %vm281_vm6  ;;  %vm290_vm8 = vweird.f32 %v258_v48  ;;  %vm310_vm1 = vweird.f32 %v6740_v58 }
 0x12b   :  { %v276_v55 = vmul.f32 %v5933_v47, %v275_v49  ;;  %v273_v60 = vsel %vm6736_vm4, %v5929_v30, %v269_v53  ;;  %5936 = vrsqrt.f32 %v6740_v58 }
 0x12c   :  { %v344_v4 = vmul.f32 %v273_v60, %v6621_v25  ;;  %v297_v6 = vmul.f32 0.5, %v296_v61 }
 0x12d   :  { %v277_v57 = vmul.f32 0.5, %v276_v55  ;;  %v241_v59 = vpop.xlane.xlu1 %240 }
 0x12e   :  { %v253_v62 = vmul.f32 %v241_v59, %v6618_v20  ;;  %v355_v11 = vmul.f32 %v6748_v5, %v344_v4  ;;  %v298_v13 = vsub.f32 1.5, %v297_v6 }
 0x12f   :  { %v278_v63 = vsub.f32 1.5, %v277_v57  ;;  %v254_v57 = vmul.f32 %v244_v56, %v6618_v20 }
 0x130   :  { %v5935_v0 = vpop.eup %5934  ;;  %v261_v1 = vadd.f32 1e-05, %v253_v62  ;;  %v366_v18 = vadd.f32 %v6752_v12, %v355_v11  ;;  %v299_v19 = vmul.f32 %v6731_v46, %v298_v13 }
 0x131   :  { %v279_v2 = vmul.f32 %v5933_v47, %v278_v63  ;;  %v285_v3 = vmul.f32 %v5935_v0, %v258_v48  ;;  %vm291_vm9 = vweird.f32 %v5935_v0  ;;  %v5937_v15 = vpop.eup %5936 }
 0x132   :  { %5938 = vrsqrt.f32 %v261_v1  ;;  %vm292_vm12 = vmor %vm290_vm8, %vm291_vm9  ;;  %v305_v21 = vmul.f32 %v5937_v15, %v6740_v58  ;;  %v303_v27 = vsel %vm302_vm13, %v6731_v46, %v299_v19  ;;  %vm320_vm14 = vweird.f32 %v261_v1 }
 0x133   :  { %v283_v7 = vsel %vm282_vm7, %v5933_v47, %v279_v2  ;;  %v286_v8 = vmul.f32 %v5935_v0, %v285_v3  ;;  %v347_v31 = vmul.f32 %v303_v27, %v6630_v35  ;;  %vm311_vm2 = vweird.f32 %v5937_v15 }
 0x134   :  { %v345_v9 = vmul.f32 %v283_v7, %v6637_v37  ;;  %v306_v28 = vmul.f32 %v5937_v15, %v305_v21  ;;  %vm312_vm4 = vmor %vm310_vm1, %vm311_vm2  ;;  %v262_v58 = vadd.f32 1e-05, %v254_v57 }
 0x135   :  { %v287_v10 = vmul.f32 0.5, %v286_v8  ;;  %v358_v41 = vmul.f32 %v6748_v5, %v347_v31 }
 0x136   :  { %v356_v14 = vmul.f32 %v6748_v5, %v345_v9  ;;  %v307_v33 = vmul.f32 0.5, %v306_v28  ;;  %5940 = vrsqrt.f32 %v262_v58  ;;  %vm330_vm5 = vweird.f32 %v262_v58 }
 0x137   :  { %v288_v25 = vsub.f32 1.5, %v287_v10 }
 0x138   :  { %v367_v16 = vadd.f32 %v6752_v12, %v356_v14  ;;  %v5939_v17 = vpop.eup %5938  ;;  %v308_v42 = vsub.f32 1.5, %v307_v33 }
 0x139   :  { %v289_v37 = vmul.f32 %v5935_v0, %v288_v25  ;;  %v315_v22 = vmul.f32 %v5939_v17, %v261_v1  ;;  %vm321_vm15 = vweird.f32 %v5939_v17 }
 0x13a   :  { %v374_v23 = vpack.c.bf16 %v367_v16, %v366_v18  ;;  %vm322_vm3 = vmor %vm320_vm14, %vm321_vm15  ;;  %v309_v45 = vmul.f32 %v5937_v15, %v308_v42  ;;  %vm1873_vm14 = vcmask 261120   ;;  %vm1882_vm15 = vcmask 392192  }
 0x13b   :  { %v293_v24 = vsel %vm292_vm12, %v5935_v0, %v289_v37  ;;  %v316_v26 = vmul.f32 %v5939_v17, %v315_v22 }
 0x13c   :  { %5253 = vmatmul.msk.bf16.vlgmr.msra.gmra.mxu0 %vm168_vm0, %v374_v23  ;;  %5257 = vmatmul.msk.bf16.vlgmr.msra.gmra.mxu1 %vm168_vm0, %v374_v23  ;;  %v346_v29 = vmul.f32 %v293_v24, %v6643_v40  ;;  %v369_v40 = vadd.f32 %v6752_v12, %v358_v41  ;;  %v313_v36 = vsel %vm312_vm4, %v5937_v15, %v309_v45 }
 0x13d   :  { %v317_v30 = vmul.f32 0.5, %v316_v26  ;;  %v348_v48 = vmul.f32 %v313_v36, %v6641_v39 }
 0x13e   :  { %v357_v34 = vmul.f32 %v6748_v5, %v346_v29 }
 0x13f   :  { %v318_v38 = vsub.f32 1.5, %v317_v30  ;;  %v359_v51 = vmul.f32 %v6748_v5, %v348_v48 }
 0x140   :  { %v368_v43 = vadd.f32 %v6752_v12, %v357_v34 }
 0x141   :  { %v319_v44 = vmul.f32 %v5939_v17, %v318_v38  ;;  %v370_v54 = vadd.f32 %v6752_v12, %v359_v51 }
 0x142   :  { %v375_v35 = vpack.c.bf16 %v369_v40, %v368_v43 }
 0x143   :  { %v323_v46 = vsel %vm322_vm3, %v5939_v17, %v319_v44 }
 0x144   :  { %v349_v47 = vmul.f32 %v323_v46, %v6661_v52  ;;  %v5941_v52 = vpop.eup %5940 }
 0x145   :  { %v325_v39 = vmul.f32 %v5941_v52, %v262_v58  ;;  %vm331_vm6 = vweird.f32 %v5941_v52 }
 0x146   :  { %v360_v49 = vmul.f32 %v6748_v5, %v349_v47  ;;  %vm332_vm7 = vmor %vm330_vm5, %vm331_vm6 }
 0x147   :  { %v326_v59 = vmul.f32 %v5941_v52, %v325_v39 }
 0x148   :  { %v371_v53 = vadd.f32 %v6752_v12, %v360_v49 }
 0x149   :  { %v327_v63 = vmul.f32 0.5, %v326_v59 }
 0x14a   :  { %v376_v55 = vpack.c.bf16 %v371_v53, %v370_v54 }
 0x14b   :  { %v328_v0 = vsub.f32 1.5, %v327_v63 }
 0x14c   :  { %5254 = vmatmul.msk.bf16.gmra.mxu0 %vm168_vm0, %v375_v35  ;;  %5258 = vmatmul.msk.bf16.gmra.mxu1 %vm168_vm0, %v375_v35 }
 0x14d   :  { %v329_v2 = vmul.f32 %v5941_v52, %v328_v0 }
 0x14f   :  { %v333_v6 = vsel %vm332_vm7, %v5941_v52, %v329_v2 }
 0x150   :  { %v350_v9 = vmul.f32 %v333_v6, %v6657_v50 }
 0x152   :  { %v361_v14 = vmul.f32 %v6748_v5, %v350_v9 }
 0x154   :  { %v372_v25 = vadd.f32 %v6752_v12, %v361_v14 }
 0x15c   :  { %5255 = vmatmul.msk.bf16.gmra.mxu0 %vm168_vm0, %v376_v55  ;;  %5259 = vmatmul.msk.bf16.gmra.mxu1 %vm168_vm0, %v376_v55 }
 0x198   :  { %v247_v60 = vpop.xlane.xlu0 %246 }
 0x199   :  { %v255_v61 = vmul.f32 %v247_v60, %v6618_v20 }
 0x19b   :  { %v263_v62 = vadd.f32 1e-05, %v255_v61 }
 0x19d   :  { %5942 = vrsqrt.f32 %v263_v62  ;;  %vm340_vm9 = vweird.f32 %v263_v62 }
 0x1a3   :  { %v5943_v1 = vpop.eup %5942 }
 0x1a4   :  { %v335_v3 = vmul.f32 %v5943_v1, %v263_v62  ;;  %vm341_vm8 = vweird.f32 %v5943_v1 }
 0x1a5   :  { %vm342_vm10 = vmor %vm340_vm9, %vm341_vm8 }
 0x1a6   :  { %v336_v4 = vmul.f32 %v5943_v1, %v335_v3 }
 0x1a8   :  { %v337_v7 = vmul.f32 0.5, %v336_v4 }
 0x1aa   :  { %v338_v8 = vsub.f32 1.5, %v337_v7 }
 0x1ac   :  { %v339_v10 = vmul.f32 %v5943_v1, %v338_v8 }
 0x1ae   :  { %v343_v11 = vsel %vm342_vm10, %v5943_v1, %v339_v10 }
 0x1af   :  { %v351_v13 = vmul.f32 %v343_v11, %v6724_v32 }
 0x1b1   :  { %v362_v15 = vmul.f32 %v6748_v5, %v351_v13 }
 0x1b3   :  { %v373_v16 = vadd.f32 %v6752_v12, %v362_v15 }
 0x1b5   :  { %v377_v17 = vpack.c.bf16 %v373_v16, %v372_v25 }
 0x1b7   :  { %5256 = vmatmul.msk.bf16.gmra.mxu0 %vm168_vm0, %v377_v17  ;;  %5260 = vmatmul.msk.bf16.gmra.mxu1 %vm168_vm0, %v377_v17 }
 0x1b9   :  { %v447_v50 = vpop.f32.mrf.mxu0  ;;  %v476_v42 = vpop.f32.mrf.mxu1 }
 0x1ba   :  { %v496_v37 = vpack.c.bf16 %v447_v50, %v447_v50  ;;  %v504_v51 = vpack.c.bf16 %v476_v42, %v476_v42 }
 0x1bc   :  { %v514_v21 = vunpack.c.l.b16 %v496_v37  ;;  %v740_v58 = vunpack.c.l.b16 %v504_v51  ;;  %v157_v37 = vlaneseq }
 0x1c1   :  { %v449_v18 = vpop.f32.mrf.mxu0  ;;  %v478_v43 = vpop.f32.mrf.mxu1 }
 0x1c2   :  { %v497_v19 = vpack.c.bf16 %v449_v18, %v449_v18  ;;  %v505_v36 = vpack.c.bf16 %v478_v43, %v478_v43  ;;  %v158_v18 = vshrl.u32 %v157_v37, 7 }
 0x1c4   :  { %v515_v22 = vunpack.c.l.b16 %v497_v19  ;;  %v741_v56 = vunpack.c.l.b16 %v505_v36  ;;  %v161_v19 = vand.u32 127, %v157_v37 }
 0x1c6   :  { %v6791_v32 = vpack.c.b16 %v515_v22, %v514_v21  ;;  %v6808_v39 = vpack.c.b16 %v741_v56, %v740_v58  ;;  %vm162_vm12 = vcmp.ge.s32.totalorder %v158_v18, %v161_v19  ;;  %v6461_v22 = vmov -1e+30  }
 0x1c8   :  { %517 = vrot.lane.b32.xlu1 %v6791_v32, %s6458_s2 }
 0x1c9   :  { %v452_v5 = vpop.f32.mrf.mxu0  ;;  %v481_v44 = vpop.f32.mrf.mxu1 }
 0x1ca   :  { %v498_v23 = vpack.c.bf16 %v452_v5, %v452_v5  ;;  %v506_v7 = vpack.c.bf16 %v481_v44, %v481_v44  ;;  %v6831_v5 = vsel %vm162_vm12, 0.0, %v6461_v22 }
 0x1cc   :  { %v542_v26 = vunpack.c.l.b16 %v498_v23  ;;  %v768_v10 = vunpack.c.l.b16 %v506_v7 }
 0x1d1   :  { %v454_v24 = vpop.f32.mrf.mxu0  ;;  %v483_v40 = vpop.f32.mrf.mxu1 }
 0x1d2   :  { %v499_v12 = vpack.c.bf16 %v454_v24, %v454_v24  ;;  %v507_v6 = vpack.c.bf16 %v483_v40, %v483_v40  ;;  %v159_v24 = vadd.s32 8, %v158_v18 }
 0x1d4   :  { %v543_v27 = vunpack.c.l.b16 %v499_v12  ;;  %v769_v8 = vunpack.c.l.b16 %v507_v6  ;;  %vm163_vm13 = vcmp.ge.s32.totalorder %v159_v24, %v161_v19 }
 0x1d6   :  { %v6795_v28 = vpack.c.b16 %v543_v27, %v542_v26  ;;  %v6822_v14 = vpack.c.b16 %v769_v8, %v768_v10 }
 0x1d8   :  { %545 = vrot.lane.b32.xlu0 %v6795_v28, %s6458_s2 }
 0x1d9   :  { %v457_v29 = vpop.f32.mrf.mxu0  ;;  %v486_v53 = vpop.f32.mrf.mxu1 }
 0x1da   :  { %v500_v30 = vpack.c.bf16 %v457_v29, %v457_v29  ;;  %v508_v0 = vpack.c.bf16 %v486_v53, %v486_v53  ;;  %v6835_v29 = vsel %vm163_vm13, 0.0, %v6461_v22 }
 0x1dc   :  { %v569_v34 = vunpack.c.l.b16 %v500_v30  ;;  %v796_v2 = vunpack.c.l.b16 %v508_v0 }
 0x1e1   :  { %v459_v31 = vpop.f32.mrf.mxu0  ;;  %v488_v60 = vpop.f32.mrf.mxu1 }
 0x1e2   :  { %v501_v33 = vpack.c.bf16 %v459_v31, %v459_v31  ;;  %v509_v61 = vpack.c.bf16 %v488_v60, %v488_v60 }
 0x1e4   :  { %v570_v38 = vunpack.c.l.b16 %v501_v33  ;;  %v797_v1 = vunpack.c.l.b16 %v509_v61 }
 0x1e6   :  { %v6799_v41 = vpack.c.b16 %v570_v38, %v569_v34  ;;  %v6815_v3 = vpack.c.b16 %v797_v1, %v796_v2 }
 0x1e8   :  { %572 = vrot.lane.b32.xlu2 %v6799_v41, %s6458_s2 }
 0x234   :  { %v462_v45 = vpop.f32.mrf.mxu0  ;;  %v491_v4 = vpop.f32.mrf.mxu1 }
 0x235   :  { %v502_v35 = vpack.c.bf16 %v462_v45, %v462_v45  ;;  %v510_v25 = vpack.c.bf16 %v491_v4, %v491_v4 }
 0x237   :  { %v596_v54 = vunpack.c.l.b16 %v502_v35  ;;  %v824_v17 = vunpack.c.l.b16 %v510_v25 }
 0x23a   :  { %v518_v46 = vpop.permute.xlu1 %517 }
 0x23b   :  { %v524_v48 = vsel %vm519_vm11, %v518_v46, 0 }
 0x23c   :  { %v464_v47 = vpop.f32.mrf.mxu0  ;;  %533 = vmatpush.bf16.xpose.msra.mxu2 %v524_v48  ;;  %v493_v9 = vpop.f32.mrf.mxu1 }
 0x23d   :  { %v503_v49 = vpack.c.bf16 %v464_v47, %v464_v47  ;;  %v511_v11 = vpack.c.bf16 %v493_v9, %v493_v9 }
 0x23f   :  { %v597_v55 = vunpack.c.l.b16 %v503_v49  ;;  %v825_v16 = vunpack.c.l.b16 %v511_v11 }
 0x241   :  { %v6804_v57 = vpack.c.b16 %v597_v55, %v596_v54  ;;  %v6826_v50 = vpack.c.b16 %v825_v16, %v824_v17 }
 0x242   :  { %v573_v52 = vpop.permute.xlu2 %572 }
 0x243   :  { %599 = vrot.lane.b32.xlu2 %v6804_v57, %s6458_s2  ;;  %5261 = vmatmul.msk.bf16.vlgmr.msra.gmra.mxu2 %vm519_vm11, %v6791_v32  ;;  %v578_v59 = vsel %vm519_vm11, %v573_v52, 0 }
 0x244   :  { %587 = vmatpush.bf16.xpose.msrb.mxu2 %v578_v59 }
 0x24a   :  { %v546_v62 = vpop.permute.xlu0 %545 }
 0x24b   :  { %v551_v63 = vsel %vm519_vm11, %v546_v62, 0 }
 0x24c   :  { %754 = vmatpush.bf16.msra.mxu2 %v6808_v39  ;;  %560 = vmatpush.bf16.xpose.msrb.mxu0 %v551_v63 }
 0x253   :  { %5262 = vmatmul.msk.bf16.vlgmr.msrb.gmra.mxu0 %vm519_vm11, %v6795_v28  ;;  %5263 = vmatmul.msk.bf16.vlgmr.msrb.gmra.mxu2 %vm519_vm11, %v6799_v41 }
 0x254   :  { %810 = vmatpush.bf16.msrb.mxu2 %v6815_v3 }
 0x29d   :  { %v600_v13 = vpop.permute.xlu2 %599 }
 0x29e   :  { %v605_v15 = vsel %vm519_vm11, %v600_v13, 0 }
 0x29f   :  { %614 = vmatpush.bf16.xpose.msra.mxu3 %v605_v15 }
 0x2a6   :  { %5264 = vmatmul.msk.bf16.vlgmr.msra.gmra.mxu3 %vm519_vm11, %v6804_v57 }
 0x2a7   :  { %782 = vmatpush.bf16.msrb.mxu3 %v6822_v14 }
 0x2ab   :  { %838 = vmatpush.bf16.msra.mxu3 %v6826_v50 }
 0x2c6   :  { %v535_v21 = vpop.f32.mrf.mxu2 }
 0x2c7   :  { %v621_v23 = vmul.f32 0.125, %v535_v21 }
 0x2c9   :  { %v629_v12 = vadd.f32 %v621_v23, %v6831_v5 }
 0x2cb   :  { %v637_v26 = vsel %vm519_vm11, %v629_v12, -inf }
 0x2cc   :  { %638 = vmax.xlane.f32.xlu1 %v637_v26 }
 0x2ce   :  { %v537_v27 = vpop.f32.mrf.mxu2 }
 0x2cf   :  { %v622_v30 = vmul.f32 0.125, %v537_v27 }
 0x2d0   :  { %v562_v31 = vpop.f32.mrf.mxu0 }
 0x2d1   :  { %v623_v33 = vmul.f32 0.125, %v562_v31  ;;  %v630_v34 = vadd.f32 %v622_v30, %v6835_v29 }
 0x2d3   :  { %v640_v38 = vsel %vm519_vm11, %v630_v34, -inf  ;;  %v631_v42 = vadd.f32 %v623_v33, %v6831_v5 }
 0x2d4   :  { %641 = vmax.xlane.f32.xlu0 %v640_v38 }
 0x2d5   :  { %v643_v43 = vsel %vm519_vm11, %v631_v42, -inf }
 0x2d6   :  { %v589_v44 = vpop.f32.mrf.mxu2  ;;  %644 = vmax.xlane.f32.xlu2 %v643_v43 }
 0x2d7   :  { %v625_v40 = vmul.f32 0.125, %v589_v44 }
 0x2d8   :  { %v564_v45 = vpop.f32.mrf.mxu0 }
 0x2d9   :  { %v624_v35 = vmul.f32 0.125, %v564_v45  ;;  %v633_v46 = vadd.f32 %v625_v40, %v6831_v5 }
 0x2db   :  { %v649_v36 = vsel %vm519_vm11, %v633_v46, -inf  ;;  %v632_v47 = vadd.f32 %v624_v35, %v6835_v29 }
 0x2dc   :  { %650 = vmax.xlane.f32.xlu0 %v649_v36 }
 0x2dd   :  { %v646_v48 = vsel %vm519_vm11, %v632_v47, -inf }
 0x2de   :  { %v591_v49 = vpop.f32.mrf.mxu2  ;;  %647 = vmax.xlane.f32.xlu1 %v646_v48 }
 0x2df   :  { %v626_v51 = vmul.f32 0.125, %v591_v49 }
 0x2e1   :  { %v634_v53 = vadd.f32 %v626_v51, %v6835_v29 }
 0x2e3   :  { %v652_v54 = vsel %vm519_vm11, %v634_v53, -inf }
 0x2e4   :  { %653 = vmax.xlane.f32.xlu2 %v652_v54 }
 0x329   :  { %v616_v55 = vpop.f32.mrf.mxu3 }
 0x32a   :  { %v627_v56 = vmul.f32 0.125, %v616_v55 }
 0x32c   :  { %v635_v58 = vadd.f32 %v627_v56, %v6831_v5 }
 0x32e   :  { %v655_v52 = vsel %vm519_vm11, %v635_v58, -inf }
 0x32f   :  { %656 = vmax.xlane.f32.xlu1 %v655_v52 }
 0x331   :  { %v618_v59 = vpop.f32.mrf.mxu3 }
 0x332   :  { %v628_v60 = vmul.f32 0.125, %v618_v59 }
 0x334   :  { %v636_v61 = vadd.f32 %v628_v60, %v6835_v29 }
 0x336   :  { %v658_v62 = vsel %vm519_vm11, %v636_v61, -inf }
 0x337   :  { %659 = vmax.xlane.f32.xlu0 %v658_v62 }
 0x33f   :  { %v639_v63 = vpop.xlane.xlu1 %638 }
 0x340   :  { %v661_v0 = vsub.f32 %v629_v12, %v639_v63 }
 0x342   :  { %v669_v1 = vmul.f32 1.442695, %v661_v0 }
 0x344   :  { %5944 = vpow2.f32 %v669_v1 }
 0x347   :  { %v642_v2 = vpop.xlane.xlu0 %641 }
 0x348   :  { %v662_v4 = vsub.f32 %v630_v34, %v642_v2 }
 0x349   :  { %v645_v6 = vpop.xlane.xlu2 %644 }
 0x34a   :  { %v5945_v7 = vpop.eup %5944  ;;  %v671_v8 = vmul.f32 1.442695, %v662_v4  ;;  %v663_v9 = vsub.f32 %v631_v42, %v645_v6 }
 0x34b   :  { %v685_v10 = vsel %vm519_vm11, %v5945_v7, 0.0 }
 0x34c   :  { %5946 = vpow2.f32 %v671_v8  ;;  %v673_v11 = vmul.f32 1.442695, %v663_v9  ;;  %686 = vadd.xlane.f32.xlu2 %v685_v10 }
 0x34e   :  { %5948 = vpow2.f32 %v673_v11 }
 0x34f   :  { %v651_v13 = vpop.xlane.xlu0 %650 }
 0x350   :  { %v665_v15 = vsub.f32 %v633_v46, %v651_v13 }
 0x351   :  { %v648_v25 = vpop.xlane.xlu1 %647 }
 0x352   :  { %v5947_v16 = vpop.eup %5946  ;;  %v677_v17 = vmul.f32 1.442695, %v665_v15  ;;  %v664_v37 = vsub.f32 %v632_v47, %v648_v25 }
 0x353   :  { %v688_v18 = vsel %vm519_vm11, %v5947_v16, 0.0 }
 0x354   :  { %v5949_v19 = vpop.eup %5948  ;;  %5950 = vpow2.f32 %v677_v17  ;;  %v675_v21 = vmul.f32 1.442695, %v664_v37  ;;  %689 = vadd.xlane.f32.xlu1 %v688_v18 }
 0x355   :  { %v691_v22 = vsel %vm519_vm11, %v5949_v19, 0.0 }
 0x356   :  { %5952 = vpow2.f32 %v675_v21  ;;  %692 = vadd.xlane.f32.xlu0 %v691_v22 }
 0x357   :  { %v654_v23 = vpop.xlane.xlu2 %653 }
 0x358   :  { %v666_v24 = vsub.f32 %v634_v53, %v654_v23 }
 0x35a   :  { %v6854_v12 = vpop.eup %5950  ;;  %v679_v26 = vmul.f32 1.442695, %v666_v24 }
 0x35b   :  { %v697_v27 = vsel %vm519_vm11, %v6854_v12, 0.0 }
 0x35c   :  { %v5953_v30 = vpop.eup %5952  ;;  %5954 = vpow2.f32 %v679_v26  ;;  %698 = vadd.xlane.f32.xlu1 %v697_v27 }
 0x35d   :  { %v694_v31 = vsel %vm519_vm11, %v5953_v30, 0.0 }
 0x35e   :  { %695 = vadd.xlane.f32.xlu2 %v694_v31 }
 0x362   :  { %v5955_v33 = vpop.eup %5954 }
 0x363   :  { %v700_v34 = vsel %vm519_vm11, %v5955_v33, 0.0 }
 0x364   :  { %701 = vadd.xlane.f32.xlu0 %v700_v34 }
 0x378   :  { %847 = vrot.lane.b32.xlu0 %v6791_v32, %s6462_s0 }
 0x380   :  { %869 = vrot.lane.b32.xlu0 %v6795_v28, %s6463_s17 }
 0x388   :  { %893 = vrot.lane.b32.xlu0 %v6799_v41, %s6463_s17 }
 0x3a2   :  { %v657_v38 = vpop.xlane.xlu1 %656 }
 0x3a3   :  { %v667_v42 = vsub.f32 %v635_v58, %v657_v38 }
 0x3a5   :  { %v681_v43 = vmul.f32 1.442695, %v667_v42 }
 0x3a7   :  { %5956 = vpow2.f32 %v681_v43 }
 0x3aa   :  { %v660_v44 = vpop.xlane.xlu0 %659 }
 0x3ab   :  { %v668_v40 = vsub.f32 %v636_v61, %v660_v44 }
 0x3ad   :  { %v6866_v45 = vpop.eup %5956  ;;  %v683_v35 = vmul.f32 1.442695, %v668_v40 }
 0x3ae   :  { %v703_v46 = vsel %vm519_vm11, %v6866_v45, 0.0 }
 0x3af   :  { %5958 = vpow2.f32 %v683_v35  ;;  %704 = vadd.xlane.f32.xlu2 %v703_v46 }
 0x3b5   :  { %v6870_v36 = vpop.eup %5958 }
 0x3b6   :  { %v706_v47 = vsel %vm519_vm11, %v6870_v36, 0.0 }
 0x3b7   :  { %707 = vadd.xlane.f32.xlu1 %v706_v47 }
 0x3bf   :  { %v687_v48 = vpop.xlane.xlu2 %686 }
 0x3c0   :  { %5960 = vrcp.f32 %v687_v48 }
 0x3c6   :  { %v5961_v51 = vpop.eup %5960 }
 0x3c7   :  { %845 = vrot.lane.b32.xlu2 %v6791_v32, %s6463_s17  ;;  %v690_v49 = vpop.xlane.xlu1 %689  ;;  %v717_v54 = vmul.f32 %v5961_v51, %v5945_v7 }
 0x3c8   :  { %5962 = vrcp.f32 %v690_v49 }
 0x3c9   :  { %v693_v53 = vpop.xlane.xlu0 %692  ;;  %v725_v56 = vpack.c.bf16 %v717_v54, %v717_v54 }
 0x3ca   :  { %5964 = vrcp.f32 %v693_v53 }
 0x3cb   :  { %v735_v62 = vunpack.c.l.b16 %v725_v56 }
 0x3ce   :  { %v5963_v55 = vpop.eup %5962 }
 0x3cf   :  { %895 = vrot.lane.b32.xlu2 %v6799_v41, %s6462_s0  ;;  %v718_v58 = vmul.f32 %v5963_v55, %v5947_v16  ;;  %v699_v52 = vpop.xlane.xlu1 %698 }
 0x3d0   :  { %871 = vrot.lane.b32.xlu1 %v6795_v28, %s6462_s0  ;;  %5966 = vrcp.f32 %v699_v52  ;;  %v5965_v61 = vpop.eup %5964 }
 0x3d1   :  { %v726_v59 = vpack.c.bf16 %v718_v58, %v718_v58  ;;  %v696_v60 = vpop.xlane.xlu2 %695  ;;  %v719_v1 = vmul.f32 %v5965_v61, %v5949_v19 }
 0x3d2   :  { %5968 = vrcp.f32 %v696_v60 }
 0x3d3   :  { %v736_v63 = vunpack.c.l.b16 %v726_v59  ;;  %v727_v7 = vpack.c.bf16 %v719_v1, %v719_v1 }
 0x3d5   :  { %v737_v0 = vpack.c.b16 %v736_v63, %v735_v62  ;;  %v763_v11 = vunpack.c.l.b16 %v727_v7 }
 0x3d6   :  { %v5967_v2 = vpop.eup %5966 }
 0x3d7   :  { %917 = vrot.lane.b32.xlu2 %v6804_v57, %s6463_s17  ;;  %5265 = vmatmul.msk.bf16.vlgmr.msra.gmra.mxu2 %vm519_vm11, %v737_v0  ;;  %v702_v4 = vpop.xlane.xlu0 %701  ;;  %v721_v9 = vmul.f32 %v5967_v2, %v6854_v12 }
 0x3d8   :  { %919 = vrot.lane.b32.xlu1 %v6804_v57, %s6462_s0  ;;  %v5969_v6 = vpop.eup %5968  ;;  %5970 = vrcp.f32 %v702_v4 }
 0x3d9   :  { %v720_v8 = vmul.f32 %v5969_v6, %v5953_v30  ;;  %v729_v25 = vpack.c.bf16 %v721_v9, %v721_v9 }
 0x3db   :  { %v728_v10 = vpack.c.bf16 %v720_v8, %v720_v8  ;;  %v791_v18 = vunpack.c.l.b16 %v729_v25 }
 0x3dd   :  { %v764_v13 = vunpack.c.l.b16 %v728_v10 }
 0x3de   :  { %v5971_v15 = vpop.eup %5970 }
 0x3df   :  { %v722_v16 = vmul.f32 %v5971_v15, %v5955_v33  ;;  %v765_v17 = vpack.c.b16 %v764_v13, %v763_v11 }
 0x3e1   :  { %v730_v37 = vpack.c.bf16 %v722_v16, %v722_v16  ;;  %5266 = vmatmul.msk.bf16.vlgmr.msrb.gmra.mxu3 %vm519_vm11, %v765_v17 }
 0x3e3   :  { %v792_v19 = vunpack.c.l.b16 %v730_v37 }
 0x3e5   :  { %v793_v21 = vpack.c.b16 %v792_v19, %v791_v18 }
 0x3e7   :  { %5267 = vmatmul.msk.bf16.vlgmr.msrb.gmra.mxu2 %vm519_vm11, %v793_v21 }
 0x3ea   :  { %v848_v22 = vpop.permute.xlu0 %847 }
 0x3eb   :  { %v853_v23 = vsel %vm519_vm11, %v848_v22, 0 }
 0x3ec   :  { %862 = vmatpush.bf16.xpose.msra.mxu2 %v853_v23 }
 0x3f2   :  { %v870_v31 = vpop.permute.xlu0 %869 }
 0x3fa   :  { %v894_v47 = vpop.permute.xlu0 %893 }
 0x422   :  { %v705_v24 = vpop.xlane.xlu2 %704 }
 0x423   :  { %5972 = vrcp.f32 %v705_v24 }
 0x429   :  { %v5973_v27 = vpop.eup %5972 }
 0x42a   :  { %v846_v12 = vpop.permute.xlu2 %845  ;;  %v708_v26 = vpop.xlane.xlu1 %707  ;;  %v723_v30 = vmul.f32 %v5973_v27, %v6866_v45 }
 0x42b   :  { %5974 = vrcp.f32 %v708_v26  ;;  %5269 = vmatmul.msk.bf16.vlgmr.msra.gmra.mxu2 %vm519_vm11, %v846_v12 }
 0x42c   :  { %v731_v34 = vpack.c.bf16 %v723_v30, %v723_v30 }
 0x42e   :  { %v819_v40 = vunpack.c.l.b16 %v731_v34 }
 0x431   :  { %v5975_v33 = vpop.eup %5974 }
 0x432   :  { %v724_v38 = vmul.f32 %v5975_v33, %v6870_v36  ;;  %v896_v42 = vpop.permute.xlu2 %895 }
 0x433   :  { %v901_v43 = vsel %vm519_vm11, %v896_v42, 0 }
 0x434   :  { %v732_v44 = vpack.c.bf16 %v724_v38, %v724_v38  ;;  %910 = vmatpush.bf16.xpose.msra.mxu0 %v901_v43 }
 0x436   :  { %v820_v35 = vunpack.c.l.b16 %v732_v44 }
 0x438   :  { %v821_v46 = vpack.c.b16 %v820_v35, %v819_v40 }
 0x43a   :  { %5268 = vmatmul.msk.bf16.vlgmr.msra.gmra.mxu3 %vm519_vm11, %v821_v46  ;;  %v918_v51 = vpop.permute.xlu2 %917 }
 0x43b   :  { %5271 = vmatmul.msk.bf16.vlgmr.msra.gmra.mxu0 %vm519_vm11, %v894_v47 }
 0x442   :  { %v872_v48 = vpop.permute.xlu1 %871 }
 0x443   :  { %v877_v45 = vsel %vm519_vm11, %v872_v48, 0 }
 0x444   :  { %886 = vmatpush.bf16.xpose.msrb.mxu3 %v877_v45 }
 0x44a   :  { %v920_v49 = vpop.permute.xlu1 %919 }
 0x44b   :  { %5270 = vmatmul.msk.bf16.vlgmr.msrb.gmra.mxu3 %vm519_vm11, %v870_v31  ;;  %v925_v36 = vsel %vm519_vm11, %v920_v49, 0 }
 0x44c   :  { %934 = vmatpush.bf16.xpose.msrb.mxu1 %v925_v36 }
 0x453   :  { %5272 = vmatmul.msk.bf16.vlgmr.msrb.gmra.mxu1 %vm519_vm11, %v918_v51 }
 0x45a   :  { %v6899_v53 = vpop.f32.mrf.mxu2 }
 0x462   :  { %v6901_v54 = vpop.f32.mrf.mxu2 }
 0x464   :  { %v6921_v15 = vpop.f32.mrf.mxu3 }
 0x46a   :  { %v6903_v55 = vpop.f32.mrf.mxu2 }
 0x46c   :  { %v6929_v21 = vpop.f32.mrf.mxu3 }
 0x472   :  { %v6905_v56 = vpop.f32.mrf.mxu2 }
 0x4ae   :  { %v864_v58 = vpop.f32.mrf.mxu2 }
 0x4af   :  { %v941_v11 = vmul.f32 0.125, %v864_v58 }
 0x4b1   :  { %v949_v17 = vadd.f32 %v941_v11, %v6831_v5 }
 0x4b3   :  { %v957_v18 = vsel %vm519_vm11, %v949_v17, -inf }
 0x4b6   :  { %v866_v60 = vpop.f32.mrf.mxu2 }
 0x4b7   :  { %v942_v62 = vmul.f32 0.125, %v866_v60 }
 0x4b8   :  { %v912_v52 = vpop.f32.mrf.mxu0 }
 0x4b9   :  { %v945_v59 = vmul.f32 0.125, %v912_v52  ;;  %v950_v2 = vadd.f32 %v942_v62, %v6835_v29 }
 0x4bb   :  { %v953_v61 = vadd.f32 %v945_v59, %v6831_v5  ;;  %v960_v6 = vsel %vm519_vm11, %v950_v2, -inf }
 0x4bd   :  { %v969_v63 = vsel %vm519_vm11, %v953_v61, -inf  ;;  %v6931_v22 = vpop.f32.mrf.mxu3 }
 0x4be   :  { %970 = vmax.xlane.f32.xlu1 %v969_v63 }
 0x4c0   :  { %v914_v0 = vpop.f32.mrf.mxu0 }
 0x4c1   :  { %v946_v1 = vmul.f32 0.125, %v914_v0 }
 0x4c3   :  { %v6911_v4 = vadd.f32 %v946_v1, %v6835_v29 }
 0x4c5   :  { %v972_v7 = vsel %vm519_vm11, %v6911_v4, -inf  ;;  %v6933_v23 = vpop.f32.mrf.mxu3 }
 0x4c6   :  { %961 = vmax.xlane.f32.xlu1 %v960_v6  ;;  %973 = vmax.xlane.f32.xlu2 %v972_v7 }
 0x4ce   :  { %v888_v24 = vpop.f32.mrf.mxu3 }
 0x4cf   :  { %v943_v12 = vmul.f32 0.125, %v888_v24 }
 0x4d0   :  { %v936_v8 = vpop.f32.mrf.mxu1 }
 0x4d1   :  { %v947_v9 = vmul.f32 0.125, %v936_v8  ;;  %v951_v26 = vadd.f32 %v943_v12, %v6831_v5 }
 0x4d3   :  { %v6917_v10 = vadd.f32 %v947_v9, %v6831_v5  ;;  %v963_v27 = vsel %vm519_vm11, %v951_v26, -inf }
 0x4d5   :  { %v975_v13 = vsel %vm519_vm11, %v6917_v10, -inf }
 0x4d6   :  { %976 = vmax.xlane.f32.xlu0 %v975_v13  ;;  %v890_v30 = vpop.f32.mrf.mxu3 }
 0x4d7   :  { %v944_v31 = vmul.f32 0.125, %v890_v30 }
 0x4d8   :  { %v938_v25 = vpop.f32.mrf.mxu1 }
 0x4d9   :  { %v948_v16 = vmul.f32 0.125, %v938_v25  ;;  %v952_v33 = vadd.f32 %v944_v31, %v6835_v29 }
 0x4db   :  { %v956_v37 = vadd.f32 %v948_v16, %v6835_v29  ;;  %v966_v34 = vsel %vm519_vm11, %v952_v33, -inf }
 0x4dd   :  { %v978_v19 = vsel %vm519_vm11, %v956_v37, -inf }
 0x4de   :  { %958 = vmax.xlane.f32.xlu0 %v957_v18  ;;  %979 = vmax.xlane.f32.xlu1 %v978_v19 }
 0x4df   :  { %1058 = vrot.lane.b32.xlu2 %v6808_v39, %s6463_s17 }
 0x4f2   :  { %1155 = vrot.lane.b32.xlu0 %v6791_v32, %s6464_s18 }
 0x508   :  { %964 = vmax.xlane.f32.xlu2 %v963_v27 }
 0x51c   :  { %967 = vmax.xlane.f32.xlu0 %v966_v34 }
 0x520   :  { %1153 = vrot.lane.b32.xlu2 %v6791_v32, %s6465_s19 }
 0x528   :  { %1179 = vrot.lane.b32.xlu2 %v6795_v28, %s6464_s18 }
 0x531   :  { %v971_v38 = vpop.xlane.xlu1 %970 }
 0x532   :  { %v985_v35 = vsub.f32 %v953_v61, %v971_v38 }
 0x534   :  { %v997_v47 = vmul.f32 1.442695, %v985_v35 }
 0x539   :  { %v962_v42 = vpop.xlane.xlu1 %961  ;;  %v6945_v43 = vpop.xlane.xlu2 %973 }
 0x53a   :  { %v982_v44 = vsub.f32 %v950_v2, %v962_v42  ;;  %v986_v34 = vsub.f32 %v6911_v4, %v6945_v43 }
 0x53c   :  { %v991_v40 = vmul.f32 1.442695, %v982_v44  ;;  %v999_v42 = vmul.f32 1.442695, %v986_v34 }
 0x53e   :  { %5976 = vpow2.f32 %v991_v40 }
 0x53f   :  { %5978 = vpow2.f32 %v997_v47 }
 0x541   :  { %v1059_v46 = vpop.permute.xlu2 %1058 }
 0x542   :  { %1071 = vmatpush.bf16.msrb.mxu2 %v1059_v46 }
 0x544   :  { %v5977_v48 = vpop.eup %5976 }
 0x545   :  { %v1008_v45 = vsel %vm519_vm11, %v5977_v48, 0.0  ;;  %v6948_v36 = vpop.eup %5978 }
 0x546   :  { %1009 = vadd.xlane.f32.xlu1 %v1008_v45  ;;  %v1017_v51 = vsel %vm519_vm11, %v6948_v36, 0.0 }
 0x549   :  { %v977_v49 = vpop.xlane.xlu0 %976 }
 0x54a   :  { %v987_v12 = vsub.f32 %v6917_v10, %v977_v49 }
 0x551   :  { %1018 = vadd.xlane.f32.xlu2 %v1017_v51  ;;  %v980_v58 = vpop.xlane.xlu1 %979  ;;  %v959_v52 = vpop.xlane.xlu0 %958 }
 0x552   :  { %v988_v59 = vsub.f32 %v956_v37, %v980_v58  ;;  %v981_v60 = vsub.f32 %v949_v17, %v959_v52 }
 0x554   :  { %v1003_v61 = vmul.f32 1.442695, %v988_v59  ;;  %v989_v62 = vmul.f32 1.442695, %v981_v60 }
 0x556   :  { %5980 = vpow2.f32 %v1003_v61 }
 0x557   :  { %5982 = vpow2.f32 %v989_v62 }
 0x55c   :  { %v6952_v63 = vpop.eup %5980 }
 0x55d   :  { %v5983_v0 = vpop.eup %5982  ;;  %v1026_v1 = vsel %vm519_vm11, %v6952_v63, 0.0 }
 0x55e   :  { %1027 = vadd.xlane.f32.xlu2 %v1026_v1  ;;  %v1005_v2 = vsel %vm519_vm11, %v5983_v0, 0.0 }
 0x55f   :  { %1006 = vadd.xlane.f32.xlu0 %v1005_v2 }
 0x564   :  { %v1156_v6 = vpop.permute.xlu0 %1155 }
 0x565   :  { %v1161_v7 = vsel %vm519_vm11, %v1156_v6, 0 }
 0x566   :  { %1170 = vmatpush.bf16.xpose.msra.mxu2 %v1161_v7 }
 0x576   :  { %1133 = vrot.lane.b32.xlu2 %v6826_v50, %s6463_s17 }
 0x57b   :  { %v965_v8 = vpop.xlane.xlu2 %964 }
 0x57c   :  { %v983_v9 = vsub.f32 %v951_v26, %v965_v8  ;;  %v1001_v26 = vmul.f32 1.442695, %v987_v12 }
 0x57e   :  { %v993_v11 = vmul.f32 1.442695, %v983_v9  ;;  %1225 = vrot.lane.b32.xlu2 %v6804_v57, %s6465_s19 }
 0x580   :  { %5984 = vpow2.f32 %v993_v11 }
 0x583   :  { %v1154_v24 = vpop.permute.xlu2 %1153 }
 0x586   :  { %v5985_v13 = vpop.eup %5984 }
 0x587   :  { %v1011_v25 = vsel %vm519_vm11, %v5985_v13, 0.0 }
 0x588   :  { %1012 = vadd.xlane.f32.xlu0 %v1011_v25 }
 0x58b   :  { %v1180_v27 = vpop.permute.xlu2 %1179 }
 0x58f   :  { %v968_v16 = vpop.xlane.xlu0 %967 }
 0x590   :  { %v984_v17 = vsub.f32 %v952_v33, %v968_v16  ;;  %v1185_v16 = vsel %vm519_vm11, %v1180_v27, 0 }
 0x592   :  { %v995_v37 = vmul.f32 1.442695, %v984_v17 }
 0x594   :  { %5986 = vpow2.f32 %v995_v37 }
 0x595   :  { %5988 = vpow2.f32 %v1001_v26 }
 0x59a   :  { %v5987_v18 = vpop.eup %5986 }
 0x59b   :  { %v1014_v19 = vsel %vm519_vm11, %v5987_v18, 0.0  ;;  %v5989_v31 = vpop.eup %5988 }
 0x59c   :  { %1177 = vrot.lane.b32.xlu0 %v6795_v28, %s6465_s19  ;;  %1015 = vadd.xlane.f32.xlu1 %v1014_v19  ;;  %v1023_v38 = vsel %vm519_vm11, %v5989_v31, 0.0 }
 0x5a4   :  { %1108 = vrot.lane.b32.xlu0 %v6815_v3, %s6463_s17 }
 0x5b5   :  { %1083 = vrot.lane.b32.xlu1 %v6822_v14, %s6463_s17 }
 0x5b9   :  { %v1010_v33 = vpop.xlane.xlu1 %1009 }
 0x5ba   :  { %5990 = vrcp.f32 %v1010_v33 }
 0x5c0   :  { %v5991_v35 = vpop.eup %5990 }
 0x5c1   :  { %v1038_v10 = vmul.f32 %v5991_v35, %v5977_v48 }
 0x5c3   :  { %v1046_v45 = vpack.c.bf16 %v1038_v10, %v1038_v10 }
 0x5c4   :  { %v1019_v30 = vpop.xlane.xlu2 %1018 }
 0x5c5   :  { %v1056_v52 = vunpack.c.l.b16 %v1046_v45 }
 0x5ce   :  { %1024 = vadd.xlane.f32.xlu0 %v1023_v38 }
 0x5d1   :  { %v1028_v44 = vpop.xlane.xlu2 %1027 }
 0x5d2   :  { %v1007_v40 = vpop.xlane.xlu0 %1006 }
 0x5d3   :  { %5992 = vrcp.f32 %v1007_v40 }
 0x5d4   :  { %5994 = vpow2.f32 %v999_v42 }
 0x5d9   :  { %v5993_v46 = vpop.eup %5992  ;;  %v1134_v47 = vpop.permute.xlu2 %1133 }
 0x5da   :  { %v1037_v49 = vmul.f32 %v5993_v46, %v5983_v0  ;;  %1146 = vmatpush.bf16.msra.mxu1 %v1134_v47  ;;  %v5995_v51 = vpop.eup %5994 }
 0x5db   :  { %v1020_v43 = vsel %vm519_vm11, %v5995_v51, 0.0 }
 0x5dc   :  { %v1045_v58 = vpack.c.bf16 %v1037_v49, %v1037_v49 }
 0x5de   :  { %v1055_v4 = vunpack.c.l.b16 %v1045_v58 }
 0x5df   :  { %1021 = vadd.xlane.f32.xlu1 %v1020_v43 }
 0x5e0   :  { %v1057_v59 = vpack.c.b16 %v1056_v52, %v1055_v4 }
 0x5e2   :  { %1201 = vrot.lane.b32.xlu0 %v6799_v41, %s6465_s19  ;;  %5273 = vmatmul.msk.bf16.vlgmr.msrb.gmra.mxu2 %vm519_vm11, %v1057_v59 }
 0x5f2   :  { %5277 = vmatmul.msk.bf16.vlgmr.msra.gmra.mxu2 %vm519_vm11, %v1154_v24 }
 0x5f8   :  { %1203 = vrot.lane.b32.xlu1 %v6799_v41, %s6464_s18 }
 0x5fb   :  { %v1013_v48 = vpop.xlane.xlu0 %1012 }
 0x600   :  { %1227 = vrot.lane.b32.xlu1 %v6804_v57, %s6464_s18 }
 0x60e   :  { %v1178_v60 = vpop.permute.xlu0 %1177 }
 0x60f   :  { %v1016_v61 = vpop.xlane.xlu1 %1015 }
 0x610   :  { %5996 = vrcp.f32 %v1016_v61 }
 0x611   :  { %5998 = vrcp.f32 %v1013_v48 }
 0x612   :  { %6000 = vrcp.f32 %v1028_v44 }
 0x616   :  { %v1109_v62 = vpop.permute.xlu0 %1108  ;;  %v5997_v0 = vpop.eup %5996 }
 0x617   :  { %1121 = vmatpush.bf16.msrb.mxu0 %v1109_v62  ;;  %v5999_v1 = vpop.eup %5998  ;;  %v1040_v2 = vmul.f32 %v5997_v0, %v5987_v18 }
 0x618   :  { %v1039_v6 = vmul.f32 %v5999_v1, %v5985_v13  ;;  %v6001_v19 = vpop.eup %6000 }
 0x619   :  { %v1048_v7 = vpack.c.bf16 %v1040_v2, %v1040_v2  ;;  %v1044_v13 = vmul.f32 %v6001_v19, %v6952_v63 }
 0x61a   :  { %v1047_v8 = vpack.c.bf16 %v1039_v6, %v1039_v6 }
 0x61b   :  { %v1081_v9 = vunpack.c.l.b16 %v1048_v7  ;;  %v1052_v24 = vpack.c.bf16 %v1044_v13, %v1044_v13 }
 0x61c   :  { %v1080_v11 = vunpack.c.l.b16 %v1047_v8 }
 0x61d   :  { %v1131_v33 = vunpack.c.l.b16 %v1052_v24 }
 0x61e   :  { %v1082_v17 = vpack.c.b16 %v1081_v9, %v1080_v11 }
 0x627   :  { %v1084_v25 = vpop.permute.xlu1 %1083 }
 0x628   :  { %1096 = vmatpush.bf16.msra.mxu3 %v1084_v25 }
 0x62b   :  { %5274 = vmatmul.msk.bf16.vlgmr.msra.gmra.mxu3 %vm519_vm11, %v1082_v17 }
 0x62c   :  { %1194 = vmatpush.bf16.xpose.msrb.mxu3 %v1185_v16 }
 0x63b   :  { %5278 = vmatmul.msk.bf16.vlgmr.msrb.gmra.mxu3 %vm519_vm11, %v1178_v60 }
 0x641   :  { %v1025_v37 = vpop.xlane.xlu0 %1024 }
 0x642   :  { %6002 = vrcp.f32 %v1025_v37 }
 0x643   :  { %6004 = vrcp.f32 %v1019_v30 }
 0x648   :  { %v6003_v18 = vpop.eup %6002 }
 0x649   :  { %v1043_v12 = vmul.f32 %v6003_v18, %v5989_v31  ;;  %v6005_v42 = vpop.eup %6004 }
 0x64a   :  { %v1041_v44 = vmul.f32 %v6005_v42, %v6948_v36  ;;  %v1226_v36 = vpop.permute.xlu2 %1225 }
 0x64b   :  { %v1051_v26 = vpack.c.bf16 %v1043_v12, %v1043_v12 }
 0x64c   :  { %v1049_v35 = vpack.c.bf16 %v1041_v44, %v1041_v44 }
 0x64d   :  { %v1130_v27 = vunpack.c.l.b16 %v1051_v26 }
 0x64e   :  { %v1105_v63 = vunpack.c.l.b16 %v1049_v35 }
 0x64f   :  { %v1132_v34 = vpack.c.b16 %v1131_v33, %v1130_v27 }
 0x651   :  { %5276 = vmatmul.msk.bf16.vlgmr.msra.gmra.mxu1 %vm519_vm11, %v1132_v34 }
 0x652   :  { %v1022_v38 = vpop.xlane.xlu1 %1021 }
 0x653   :  { %6006 = vrcp.f32 %v1022_v38 }
 0x654   :  { %v1202_v49 = vpop.permute.xlu0 %1201 }
 0x659   :  { %v6007_v40 = vpop.eup %6006 }
 0x65a   :  { %v1042_v10 = vmul.f32 %v6007_v40, %v5995_v51 }
 0x65c   :  { %v1050_v46 = vpack.c.bf16 %v1042_v10, %v1042_v10 }
 0x65e   :  { %v1106_v47 = vunpack.c.l.b16 %v1050_v46 }
 0x660   :  { %v1107_v45 = vpack.c.b16 %v1106_v47, %v1105_v63 }
 0x662   :  { %5275 = vmatmul.msk.bf16.vlgmr.msrb.gmra.mxu0 %vm519_vm11, %v1107_v45 }
 0x665   :  { %v6994_v51 = vpop.f32.mrf.mxu2 }
 0x66a   :  { %v1204_v30 = vpop.permute.xlu1 %1203 }
 0x66b   :  { %v1209_v31 = vsel %vm519_vm11, %v1204_v30, 0 }
 0x66c   :  { %1218 = vmatpush.bf16.xpose.msra.mxu0 %v1209_v31 }
 0x66d   :  { %v6996_v4 = vpop.f32.mrf.mxu2 }
 0x672   :  { %v1228_v58 = vpop.permute.xlu1 %1227 }
 0x673   :  { %v1233_v52 = vsel %vm519_vm11, %v1228_v58, 0  ;;  %5279 = vmatmul.msk.bf16.vlgmr.msra.gmra.mxu0 %vm519_vm11, %v1202_v49 }
 0x674   :  { %1242 = vmatpush.bf16.xpose.msrb.mxu1 %v1233_v52 }
 0x675   :  { %v1172_v60 = vpop.f32.mrf.mxu2 }
 0x676   :  { %v1249_v34 = vmul.f32 0.125, %v1172_v60 }
 0x678   :  { %v1257_v40 = vadd.f32 %v1249_v34, %v6831_v5 }
 0x67a   :  { %v1265_v10 = vsel %vm519_vm11, %v1257_v40, -inf }
 0x67b   :  { %5280 = vmatmul.msk.bf16.vlgmr.msrb.gmra.mxu1 %vm519_vm11, %v1226_v36 }
 0x67d   :  { %v1174_v2 = vpop.f32.mrf.mxu2 }
 0x67e   :  { %v1250_v7 = vmul.f32 0.125, %v1174_v2 }
 0x680   :  { %v1258_v17 = vadd.f32 %v1250_v7, %v6835_v29 }
 0x682   :  { %v1268_v13 = vsel %vm519_vm11, %v1258_v17, -inf }
 0x6ae   :  { %v7004_v61 = vpop.f32.mrf.mxu3 }
 0x6b6   :  { %v7010_v9 = vpop.f32.mrf.mxu3 }
 0x6be   :  { %v1196_v33 = vpop.f32.mrf.mxu3 }
 0x6bf   :  { %v1251_v38 = vmul.f32 0.125, %v1196_v33 }
 0x6c1   :  { %v1259_v35 = vadd.f32 %v1251_v38, %v6831_v5 }
 0x6c3   :  { %v1271_v46 = vsel %vm519_vm11, %v1259_v35, -inf }
 0x6c6   :  { %v1198_v63 = vpop.f32.mrf.mxu3 }
 0x6c7   :  { %v1252_v47 = vmul.f32 0.125, %v1198_v63 }
 0x6c9   :  { %v1260_v45 = vadd.f32 %v1252_v47, %v6835_v29 }
 0x6cb   :  { %v1274_v30 = vsel %vm519_vm11, %v1260_v45, -inf }
 0x6ce   :  { %v7000_v59 = vpop.f32.mrf.mxu1 }
 0x6d6   :  { %v7006_v62 = vpop.f32.mrf.mxu1 }
 0x6df   :  { %v6998_v43 = vpop.f32.mrf.mxu0 }
 0x6e7   :  { %v7002_v48 = vpop.f32.mrf.mxu0 }
 0x6f0   :  { %v1220_v0 = vpop.f32.mrf.mxu0 }
 0x6f1   :  { %v1253_v1 = vmul.f32 0.125, %v1220_v0 }
 0x6f3   :  { %v1261_v6 = vadd.f32 %v1253_v1, %v6831_v5 }
 0x6f5   :  { %v1277_v8 = vsel %vm519_vm11, %v1261_v6, -inf }
 0x6f6   :  { %1278 = vmax.xlane.f32.xlu1 %v1277_v8 }
 0x6f8   :  { %v1222_v11 = vpop.f32.mrf.mxu0  ;;  %v1244_v25 = vpop.f32.mrf.mxu1 }
 0x6f9   :  { %v1254_v16 = vmul.f32 0.125, %v1222_v11  ;;  %v1255_v19 = vmul.f32 0.125, %v1244_v25 }
 0x6fb   :  { %v7014_v37 = vadd.f32 %v1254_v16, %v6835_v29  ;;  %v7020_v26 = vadd.f32 %v1255_v19, %v6831_v5 }
 0x6fd   :  { %v1280_v18 = vsel %vm519_vm11, %v7014_v37, -inf  ;;  %v1283_v44 = vsel %vm519_vm11, %v7020_v26, -inf }
 0x6fe   :  { %1269 = vmax.xlane.f32.xlu1 %v1268_v13  ;;  %1281 = vmax.xlane.f32.xlu2 %v1280_v18 }
 0x700   :  { %v1246_v24 = vpop.f32.mrf.mxu1 }
 0x701   :  { %v1256_v12 = vmul.f32 0.125, %v1246_v24 }
 0x703   :  { %v1264_v27 = vadd.f32 %v1256_v12, %v6835_v29 }
 0x705   :  { %v1286_v42 = vsel %vm519_vm11, %v1264_v27, -inf }
 0x706   :  { %1287 = vmax.xlane.f32.xlu0 %v1286_v42  ;;  %1284 = vmax.xlane.f32.xlu2 %v1283_v44 }
 0x70e   :  { %1266 = vmax.xlane.f32.xlu0 %v1265_v10  ;;  %1272 = vmax.xlane.f32.xlu2 %v1271_v46 }
 0x717   :  { %1366 = vrot.lane.b32.xlu1 %v6808_v39, %s6465_s19 }
 0x722   :  { %1391 = vrot.lane.b32.xlu0 %v6822_v14, %s6465_s19 }
 0x726   :  { %1463 = vrot.lane.b32.xlu2 %v6791_v32, %s6451_s29 }
 0x74c   :  { %1275 = vmax.xlane.f32.xlu0 %v1274_v30 }
 0x769   :  { %v1279_v31 = vpop.xlane.xlu1 %1278 }
 0x76a   :  { %v1293_v16 = vsub.f32 %v1261_v6, %v1279_v31 }
 0x771   :  { %v1270_v49 = vpop.xlane.xlu1 %1269  ;;  %v1282_v58 = vpop.xlane.xlu2 %1281 }
 0x772   :  { %v1290_v52 = vsub.f32 %v1258_v17, %v1270_v49  ;;  %v1305_v17 = vmul.f32 1.442695, %v1293_v16  ;;  %v1294_v63 = vsub.f32 %v7014_v37, %v1282_v58 }
 0x774   :  { %v1299_v36 = vmul.f32 1.442695, %v1290_v52  ;;  %v1307_v47 = vmul.f32 1.442695, %v1294_v63 }
 0x776   :  { %6008 = vpow2.f32 %v1299_v36 }
 0x779   :  { %v7038_v60 = vpop.xlane.xlu2 %1284  ;;  %v1288_v0 = vpop.xlane.xlu0 %1287 }
 0x77a   :  { %v1296_v34 = vsub.f32 %v1264_v27, %v1288_v0 }
 0x77c   :  { %v7040_v1 = vpop.eup %6008  ;;  %v1311_v44 = vmul.f32 1.442695, %v1296_v34 }
 0x77d   :  { %v1316_v2 = vsel %vm519_vm11, %v7040_v1, 0.0 }
 0x77e   :  { %1317 = vadd.xlane.f32.xlu1 %v1316_v2 }
 0x781   :  { %v1273_v7 = vpop.xlane.xlu2 %1272  ;;  %v1267_v8 = vpop.xlane.xlu0 %1266 }
 0x782   :  { %v1291_v11 = vsub.f32 %v1259_v35, %v1273_v7  ;;  %v1289_v25 = vsub.f32 %v1257_v40, %v1267_v8 }
 0x784   :  { %v1301_v19 = vmul.f32 1.442695, %v1291_v11  ;;  %v1297_v13 = vmul.f32 1.442695, %v1289_v25 }
 0x786   :  { %6010 = vpow2.f32 %v1301_v19 }
 0x787   :  { %6012 = vpow2.f32 %v1297_v13 }
 0x788   :  { %6014 = vpow2.f32 %v1305_v17 }
 0x789   :  { %v1367_v18 = vpop.permute.xlu1 %1366  ;;  %v1464_v24 = vpop.permute.xlu2 %1463  ;;  %6016 = vpow2.f32 %v1311_v44 }
 0x78a   :  { %v1469_v12 = vsel %vm519_vm11, %v1464_v24, 0  ;;  %1379 = vmatpush.bf16.msrb.mxu2 %v1367_v18  ;;  %6018 = vpow2.f32 %v1307_v47 }
 0x78c   :  { %v7045_v33 = vpop.eup %6010 }
 0x78d   :  { %v6013_v38 = vpop.eup %6012  ;;  %v1319_v42 = vsel %vm519_vm11, %v7045_v33, 0.0 }
 0x78e   :  { %1478 = vmatpush.bf16.xpose.msra.mxu2 %v1469_v12  ;;  %1320 = vadd.xlane.f32.xlu2 %v1319_v42  ;;  %v1313_v6 = vsel %vm519_vm11, %v6013_v38, 0.0  ;;  %v7050_v40 = vpop.eup %6014 }
 0x78f   :  { %1314 = vadd.xlane.f32.xlu0 %v1313_v6  ;;  %v1325_v10 = vsel %vm519_vm11, %v7050_v40, 0.0  ;;  %v7056_v27 = vpop.eup %6016 }
 0x790   :  { %v1334_v46 = vsel %vm519_vm11, %v7056_v27, 0.0 }
 0x794   :  { %v1392_v35 = vpop.permute.xlu0 %1391 }
 0x795   :  { %1404 = vmatpush.bf16.msra.mxu3 %v1392_v35 }
 0x796   :  { %1326 = vadd.xlane.f32.xlu2 %v1325_v10 }
 0x797   :  { %1461 = vrot.lane.b32.xlu1 %v6791_v32, %s6466_s7  ;;  %v6019_v32 = vpop.eup %6018 }
 0x798   :  { %v1328_v31 = vsel %vm519_vm11, %v6019_v32, 0.0 }
 0x79e   :  { %1335 = vadd.xlane.f32.xlu2 %v1334_v46 }
 0x7a3   :  { %1487 = vrot.lane.b32.xlu0 %v6795_v28, %s6451_s29 }
 0x7ab   :  { %1485 = vrot.lane.b32.xlu0 %v6795_v28, %s6466_s7 }
 0x7b6   :  { %1441 = vrot.lane.b32.xlu2 %v6826_v50, %s6465_s19 }
 0x7be   :  { %1533 = vrot.lane.b32.xlu2 %v6804_v57, %s6466_s7 }
 0x7bf   :  { %v1276_v30 = vpop.xlane.xlu0 %1275 }
 0x7c0   :  { %v1292_v49 = vsub.f32 %v1260_v45, %v1276_v30  ;;  %v1295_v45 = vsub.f32 %v7020_v26, %v7038_v60 }
 0x7c1   :  { %1329 = vadd.xlane.f32.xlu1 %v1328_v31 }
 0x7c2   :  { %v1303_v52 = vmul.f32 1.442695, %v1292_v49  ;;  %v1309_v7 = vmul.f32 1.442695, %v1295_v45 }
 0x7c4   :  { %6020 = vpow2.f32 %v1303_v52 }
 0x7ca   :  { %v6021_v36 = vpop.eup %6020 }
 0x7cb   :  { %v1322_v28 = vsel %vm519_vm11, %v6021_v36, 0.0 }
 0x7d5   :  { %1323 = vadd.xlane.f32.xlu0 %v1322_v28 }
 0x7da   :  { %1511 = vrot.lane.b32.xlu1 %v6799_v41, %s6451_s29 }
 0x7e2   :  { %1535 = vrot.lane.b32.xlu1 %v6804_v57, %s6451_s29 }
 0x7e9   :  { %1416 = vrot.lane.b32.xlu0 %v6815_v3, %s6465_s19 }
 0x7f1   :  { %v1318_v37 = vpop.xlane.xlu1 %1317 }
 0x7f2   :  { %6022 = vrcp.f32 %v1318_v37 }
 0x7f8   :  { %v6023_v2 = vpop.eup %6022 }
 0x7f9   :  { %v1346_v8 = vmul.f32 %v6023_v2, %v7040_v1 }
 0x7fb   :  { %v1354_v16 = vpack.c.bf16 %v1346_v8, %v1346_v8 }
 0x7fd   :  { %v1364_v13 = vunpack.c.l.b16 %v1354_v16 }
 0x801   :  { %v1321_v58 = vpop.xlane.xlu2 %1320 }
 0x802   :  { %v1315_v0 = vpop.xlane.xlu0 %1314 }
 0x803   :  { %6024 = vrcp.f32 %v1315_v0 }
 0x804   :  { %6026 = vpow2.f32 %v1309_v7 }
 0x805   :  { %6028 = vrcp.f32 %v1321_v58 }
 0x809   :  { %v6025_v11 = vpop.eup %6024  ;;  %v1327_v25 = vpop.xlane.xlu2 %1326 }
 0x80a   :  { %v1345_v57 = vmul.f32 %v6025_v11, %v6013_v38  ;;  %v6027_v18 = vpop.eup %6026  ;;  %v1462_v42 = vpop.permute.xlu1 %1461 }
 0x80b   :  { %v1331_v26 = vsel %vm519_vm11, %v6027_v18, 0.0  ;;  %v6029_v35 = vpop.eup %6028 }
 0x80c   :  { %v1353_v19 = vpack.c.bf16 %v1345_v57, %v1345_v57  ;;  %v1347_v10 = vmul.f32 %v6029_v35, %v7045_v33 }
 0x80e   :  { %v1363_v17 = vunpack.c.l.b16 %v1353_v19  ;;  %v1355_v31 = vpack.c.bf16 %v1347_v10, %v1347_v10 }
 0x810   :  { %v1365_v24 = vpack.c.b16 %v1364_v13, %v1363_v17  ;;  %v1388_v37 = vunpack.c.l.b16 %v1355_v31 }
 0x811   :  { %v1336_v12 = vpop.xlane.xlu2 %1335 }
 0x812   :  { %5281 = vmatmul.msk.bf16.vlgmr.msrb.gmra.mxu2 %vm519_vm11, %v1365_v24 }
 0x813   :  { %1332 = vadd.xlane.f32.xlu0 %v1331_v26 }
 0x815   :  { %v1488_v60 = vpop.permute.xlu0 %1487 }
 0x816   :  { %v1493_v34 = vsel %vm519_vm11, %v1488_v60, 0 }
 0x817   :  { %1502 = vmatpush.bf16.xpose.msrb.mxu3 %v1493_v34 }
 0x819   :  { %v1442_v1 = vpop.permute.xlu2 %1441 }
 0x81a   :  { %1454 = vmatpush.bf16.msra.mxu1 %v1442_v1 }
 0x81d   :  { %v1486_v38 = vpop.permute.xlu0 %1485 }
 0x822   :  { %5285 = vmatmul.msk.bf16.vlgmr.msra.gmra.mxu2 %vm519_vm11, %v1462_v42 }
 0x827   :  { %1509 = vrot.lane.b32.xlu0 %v6799_v41, %s6466_s7 }
 0x834   :  { %v1330_v6 = vpop.xlane.xlu1 %1329 }
 0x835   :  { %6030 = vrcp.f32 %v1330_v6 }
 0x83b   :  { %v6031_v63 = vpop.eup %6030 }
 0x83c   :  { %v1350_v52 = vmul.f32 %v6031_v63, %v6019_v32 }
 0x83e   :  { %v1358_v0 = vpack.c.bf16 %v1350_v52, %v1350_v52 }
 0x840   :  { %v1414_v33 = vunpack.c.l.b16 %v1358_v0 }
 0x848   :  { %v1324_v44 = vpop.xlane.xlu0 %1323 }
 0x849   :  { %6032 = vrcp.f32 %v1324_v44 }
 0x84a   :  { %6034 = vrcp.f32 %v1327_v25 }
 0x84b   :  { %6036 = vrcp.f32 %v1336_v12 }
 0x84c   :  { %v1512_v46 = vpop.permute.xlu1 %1511 }
 0x84f   :  { %v6033_v47 = vpop.eup %6032 }
 0x850   :  { %v6035_v30 = vpop.eup %6034  ;;  %v1348_v49 = vmul.f32 %v6033_v47, %v6021_v36  ;;  %v1517_v36 = vsel %vm519_vm11, %v1512_v46, 0 }
 0x851   :  { %v1349_v41 = vmul.f32 %v6035_v30, %v7050_v40  ;;  %v6037_v16 = vpop.eup %6036 }
 0x852   :  { %v1356_v28 = vpack.c.bf16 %v1348_v49, %v1348_v49  ;;  %v1352_v57 = vmul.f32 %v6037_v16, %v7056_v27 }
 0x853   :  { %v1357_v8 = vpack.c.bf16 %v1349_v41, %v1349_v41 }
 0x854   :  { %v1389_v45 = vunpack.c.l.b16 %v1356_v28  ;;  %v1536_v58 = vpop.permute.xlu1 %1535  ;;  %v1360_v13 = vpack.c.bf16 %v1352_v57, %v1352_v57 }
 0x855   :  { %v1541_v2 = vsel %vm519_vm11, %v1536_v58, 0  ;;  %v1413_v11 = vunpack.c.l.b16 %v1357_v8 }
 0x856   :  { %v1390_v7 = vpack.c.b16 %v1389_v45, %v1388_v37  ;;  %1550 = vmatpush.bf16.xpose.msrb.mxu1 %v1541_v2  ;;  %v1439_v26 = vunpack.c.l.b16 %v1360_v13 }
 0x857   :  { %v1415_v32 = vpack.c.b16 %v1414_v33, %v1413_v11 }
 0x858   :  { %5282 = vmatmul.msk.bf16.vlgmr.msra.gmra.mxu3 %vm519_vm11, %v1390_v7 }
 0x85b   :  { %v1417_v25 = vpop.permute.xlu0 %1416 }
 0x85c   :  { %1429 = vmatpush.bf16.msrb.mxu0 %v1417_v25 }
 0x85f   :  { %5283 = vmatmul.msk.bf16.vlgmr.msrb.gmra.mxu0 %vm519_vm11, %v1415_v32 }
 0x860   :  { %1526 = vmatpush.bf16.xpose.msra.mxu0 %v1517_v36 }
 0x868   :  { %5286 = vmatmul.msk.bf16.vlgmr.msrb.gmra.mxu3 %vm519_vm11, %v1486_v38  ;;  %v1534_v38 = vpop.permute.xlu2 %1533 }
 0x886   :  { %v1333_v40 = vpop.xlane.xlu0 %1332 }
 0x887   :  { %6038 = vrcp.f32 %v1333_v40 }
 0x88d   :  { %v6039_v19 = vpop.eup %6038 }
 0x88e   :  { %v1351_v17 = vmul.f32 %v6039_v19, %v6027_v18 }
 0x890   :  { %v1359_v24 = vpack.c.bf16 %v1351_v17, %v1351_v17 }
 0x892   :  { %v1438_v60 = vunpack.c.l.b16 %v1359_v24 }
 0x894   :  { %v1440_v34 = vpack.c.b16 %v1439_v26, %v1438_v60 }
 0x895   :  { %v7094_v1 = vpop.f32.mrf.mxu2 }
 0x896   :  { %5284 = vmatmul.msk.bf16.vlgmr.msra.gmra.mxu1 %vm519_vm11, %v1440_v34 }
 0x899   :  { %v1510_v42 = vpop.permute.xlu0 %1509 }
 0x89a   :  { %5287 = vmatmul.msk.bf16.vlgmr.msra.gmra.mxu0 %vm519_vm11, %v1510_v42 }
 0x89d   :  { %v7098_v12 = vpop.f32.mrf.mxu2 }
 0x8a5   :  { %v1480_v6 = vpop.f32.mrf.mxu2 }
 0x8a6   :  { %v1557_v44 = vmul.f32 0.125, %v1480_v6  ;;  %5288 = vmatmul.msk.bf16.vlgmr.msrb.gmra.mxu1 %vm519_vm11, %v1534_v38 }
 0x8a8   :  { %v1565_v27 = vadd.f32 %v1557_v44, %v6831_v5 }
 0x8aa   :  { %v1573_v18 = vsel %vm519_vm11, %v1565_v27, -inf }
 0x8ab   :  { %1574 = vmax.xlane.f32.xlu1 %v1573_v18 }
 0x8ad   :  { %v1482_v35 = vpop.f32.mrf.mxu2 }
 0x8ae   :  { %v1558_v10 = vmul.f32 0.125, %v1482_v35 }
 0x8b0   :  { %v1566_v46 = vadd.f32 %v1558_v10, %v6835_v29 }
 0x8b2   :  { %v1576_v63 = vsel %vm519_vm11, %v1566_v46, -inf }
 0x8b3   :  { %1577 = vmax.xlane.f32.xlu2 %v1576_v63 }
 0x8db   :  { %v7105_v47 = vpop.f32.mrf.mxu3 }
 0x8dc   :  { %v7113_v0 = vpop.f32.mrf.mxu0 }
 0x8e3   :  { %v7107_v30 = vpop.f32.mrf.mxu3 }
 0x8e4   :  { %v7115_v2 = vpop.f32.mrf.mxu0 }
 0x8eb   :  { %v1504_v31 = vpop.f32.mrf.mxu3 }
 0x8ec   :  { %v1559_v49 = vmul.f32 0.125, %v1504_v31 }
 0x8ee   :  { %v1567_v52 = vadd.f32 %v1559_v49, %v6831_v5 }
 0x8f0   :  { %v1579_v28 = vsel %vm519_vm11, %v1567_v52, -inf }
 0x8f1   :  { %1580 = vmax.xlane.f32.xlu0 %v1579_v28 }
 0x8f3   :  { %v1506_v41 = vpop.f32.mrf.mxu3 }
 0x8f4   :  { %v1560_v37 = vmul.f32 0.125, %v1506_v41 }
 0x8f6   :  { %v1568_v45 = vadd.f32 %v1560_v37, %v6835_v29 }
 0x8f8   :  { %v1582_v58 = vsel %vm519_vm11, %v1568_v45, -inf }
 0x8f9   :  { %1583 = vmax.xlane.f32.xlu1 %v1582_v58 }
 0x913   :  { %v7117_v7 = vpop.f32.mrf.mxu1 }
 0x917   :  { %v1528_v8 = vpop.f32.mrf.mxu0 }
 0x918   :  { %v1561_v33 = vmul.f32 0.125, %v1528_v8 }
 0x91a   :  { %v1569_v11 = vadd.f32 %v1561_v33, %v6831_v5 }
 0x91b   :  { %v7120_v25 = vpop.f32.mrf.mxu1 }
 0x91c   :  { %v1585_v36 = vsel %vm519_vm11, %v1569_v11, -inf }
 0x91d   :  { %1586 = vmax.xlane.f32.xlu2 %v1585_v36 }
 0x91e   :  { %v1575_v32 = vpop.xlane.xlu1 %1574 }
 0x91f   :  { %v1597_v40 = vsub.f32 %v1565_v27, %v1575_v32  ;;  %v1530_v16 = vpop.f32.mrf.mxu0 }
 0x920   :  { %v1562_v57 = vmul.f32 0.125, %v1530_v16  ;;  %v5796_v16 = vpack.i.bf16 %v7098_v12, %v7094_v1 }
 0x921   :  { %v1605_v19 = vmul.f32 1.442695, %v1597_v40 }
 0x922   :  { %v1570_v13 = vadd.f32 %v1562_v57, %v6835_v29 }
 0x923   :  { %6040 = vpow2.f32 %v1605_v19  ;;  %v1552_v17 = vpop.f32.mrf.mxu1 }
 0x924   :  { %v1563_v24 = vmul.f32 0.125, %v1552_v17  ;;  %v1588_v26 = vsel %vm519_vm11, %v1570_v13, -inf }
 0x925   :  { %1589 = vmax.xlane.f32.xlu1 %v1588_v26 }
 0x926   :  { %v1571_v60 = vadd.f32 %v1563_v24, %v6831_v5  ;;  %v1578_v35 = vpop.xlane.xlu2 %1577 }
 0x927   :  { %v1598_v10 = vsub.f32 %v1566_v46, %v1578_v35 }
 0x928   :  { %v1591_v44 = vsel %vm519_vm11, %v1571_v60, -inf }
 0x929   :  { %v7126_v34 = vpop.eup %6040  ;;  %v1607_v63 = vmul.f32 1.442695, %v1598_v10  ;;  %v5791_v10 = vpack.i.bf16 %v6996_v4, %v6994_v51 }
 0x92a   :  { %v1621_v42 = vsel %vm519_vm11, %v7126_v34, 0.0 }
 0x92b   :  { %1622 = vadd.xlane.f32.xlu0 %v1621_v42  ;;  %v1554_v38 = vpop.f32.mrf.mxu1  ;;  %6042 = vpow2.f32 %v1607_v63  ;;  %v5826_v63 = vpack.i.bf16 %v7115_v2, %v7113_v0 }
 0x92c   :  { %v1564_v6 = vmul.f32 0.125, %v1554_v38 }
 0x92d   :  { %1592 = vmax.xlane.f32.xlu1 %v1591_v44 }
 0x92e   :  { %v1572_v27 = vadd.f32 %v1564_v6, %v6835_v29 }
 0x930   :  { %v1594_v18 = vsel %vm519_vm11, %v1572_v27, -inf }
 0x931   :  { %v7135_v31 = vpop.eup %6042 }
 0x932   :  { %v1624_v49 = vsel %vm519_vm11, %v7135_v31, 0.0 }
 0x933   :  { %1595 = vmax.xlane.f32.xlu0 %v1594_v18 }
 0x935   :  { %1674 = vrot.lane.b32.xlu2 %v6808_v39, %s6466_s7 }
 0x95e   :  { %1625 = vadd.xlane.f32.xlu2 %v1624_v49 }
 0x964   :  { %v1581_v28 = vpop.xlane.xlu0 %1580 }
 0x965   :  { %v1599_v41 = vsub.f32 %v1567_v52, %v1581_v28 }
 0x967   :  { %v1609_v37 = vmul.f32 1.442695, %v1599_v41 }
 0x969   :  { %6044 = vpow2.f32 %v1609_v37 }
 0x96c   :  { %v1584_v58 = vpop.xlane.xlu1 %1583 }
 0x96d   :  { %v1600_v8 = vsub.f32 %v1568_v45, %v1584_v58 }
 0x96f   :  { %v7139_v33 = vpop.eup %6044  ;;  %v1611_v36 = vmul.f32 1.442695, %v1600_v8 }
 0x970   :  { %v1627_v39 = vsel %vm519_vm11, %v7139_v33, 0.0 }
 0x971   :  { %6046 = vpow2.f32 %v1611_v36  ;;  %1628 = vadd.xlane.f32.xlu1 %v1627_v39 }
 0x976   :  { %1724 = vrot.lane.b32.xlu2 %v6815_v3, %s6466_s7 }
 0x977   :  { %v7145_v46 = vpop.eup %6046 }
 0x978   :  { %v1630_v52 = vsel %vm519_vm11, %v7145_v46, 0.0 }
 0x979   :  { %1631 = vadd.xlane.f32.xlu0 %v1630_v52 }
 0x98a   :  { %1699 = vrot.lane.b32.xlu1 %v6822_v14, %s6466_s7 }
 0x990   :  { %v1587_v45 = vpop.xlane.xlu2 %1586 }
 0x991   :  { %v1601_v32 = vsub.f32 %v1569_v11, %v1587_v45 }
 0x992   :  { %1749 = vrot.lane.b32.xlu1 %v6826_v50, %s6466_s7 }
 0x993   :  { %v1613_v40 = vmul.f32 1.442695, %v1601_v32 }
 0x995   :  { %6048 = vpow2.f32 %v1613_v40 }
 0x998   :  { %v1675_v3 = vpop.permute.xlu2 %1674  ;;  %v1590_v57 = vpop.xlane.xlu1 %1589 }
 0x999   :  { %v1602_v19 = vsub.f32 %v1570_v13, %v1590_v57  ;;  %1687 = vmatpush.bf16.msrb.mxu2 %v1675_v3 }
 0x99a   :  { %5797 = vrot.lane.b32.xlu1 %v5796_v16, %s6464_s18 }
 0x99b   :  { %v7156_v17 = vpop.eup %6048  ;;  %v1615_v24 = vmul.f32 1.442695, %v1602_v19 }
 0x99c   :  { %v1633_v14 = vsel %vm519_vm11, %v7156_v17, 0.0 }
 0x99d   :  { %6050 = vpow2.f32 %v1615_v24  ;;  %1634 = vadd.xlane.f32.xlu0 %v1633_v14 }
 0x99e   :  { %v1623_v50 = vpop.xlane.xlu0 %1622 }
 0x9a0   :  { %v1593_v11 = vpop.xlane.xlu1 %1592 }
 0x9a1   :  { %v1603_v26 = vsub.f32 %v1571_v60, %v1593_v11 }
 0x9a3   :  { %v6051_v42 = vpop.eup %6050  ;;  %v1617_v38 = vmul.f32 1.442695, %v1603_v26 }
 0x9a4   :  { %v1636_v1 = vsel %vm519_vm11, %v6051_v42, 0.0 }
 0x9a5   :  { %6052 = vpow2.f32 %v1617_v38  ;;  %1637 = vadd.xlane.f32.xlu0 %v1636_v1 }
 0x9a6   :  { %v1596_v12 = vpop.xlane.xlu0 %1595 }
 0x9a7   :  { %v1604_v13 = vsub.f32 %v1572_v27, %v1596_v12  ;;  %v5806_v27 = vpack.i.bf16 %v7010_v9, %v7004_v61 }
 0x9a9   :  { %v1619_v6 = vmul.f32 1.442695, %v1604_v13 }
 0x9ab   :  { %v7161_v44 = vpop.eup %6052  ;;  %6054 = vpow2.f32 %v1619_v6 }
 0x9ac   :  { %v1639_v18 = vsel %vm519_vm11, %v7161_v44, 0.0  ;;  %6056 = vrcp.f32 %v1623_v50 }
 0x9ad   :  { %1640 = vadd.xlane.f32.xlu0 %v1639_v18 }
 0x9b1   :  { %v7165_v35 = vpop.eup %6054 }
 0x9b2   :  { %v1642_v60 = vsel %vm519_vm11, %v7165_v35, 0.0  ;;  %v6057_v28 = vpop.eup %6056 }
 0x9b3   :  { %1643 = vadd.xlane.f32.xlu2 %v1642_v60  ;;  %v1653_v41 = vmul.f32 %v6057_v28, %v7126_v34 }
 0x9b5   :  { %v1661_v51 = vpack.c.bf16 %v1653_v41, %v1653_v41 }
 0x9b7   :  { %v1671_v9 = vunpack.c.l.b16 %v1661_v51 }
 0x9c1   :  { %5792 = vrot.lane.b32.xlu0 %v5791_v10, %s6451_s29 }
 0x9c9   :  { %5807 = vrot.lane.b32.xlu0 %v5806_v27, %s6451_s29 }
 0x9cb   :  { %5827 = vrot.lane.b32.xlu2 %v5826_v63, %s6464_s18 }
 0x9d1   :  { %v1626_v49 = vpop.xlane.xlu2 %1625 }
 0x9d2   :  { %6058 = vrcp.f32 %v1626_v49 }
 0x9d8   :  { %v6059_v37 = vpop.eup %6058 }
 0x9d9   :  { %v1654_v4 = vmul.f32 %v6059_v37, %v7135_v31  ;;  %v1725_v58 = vpop.permute.xlu2 %1724 }
 0x9da   :  { %1737 = vmatpush.bf16.msrb.mxu0 %v1725_v58  ;;  %v5811_v58 = vpack.i.bf16 %v7107_v30, %v7105_v47  ;;  %v5702_v47 = vld [vmem:[%s8537_s4 + $0x18] sm:$0xff] }
 0x9db   :  { %v1662_v61 = vpack.c.bf16 %v1654_v4, %v1654_v4  ;;  %1943 = vmatpush.bf16.msra.mxu2 %v5702_v47 }
 0x9dd   :  { %v1672_v8 = vunpack.c.l.b16 %v1662_v61  ;;  %v5836_v61 = vpack.i.bf16 %v7006_v62, %v7000_v59  ;;  %v5700_v59 = vld [vmem:[%s8537_s4 + $0x8] sm:$0xff] }
 0x9df   :  { %v1673_v0 = vpack.c.b16 %v1672_v8, %v1671_v9 }
 0x9e1   :  { %5289 = vmatmul.msk.bf16.vlgmr.msrb.gmra.mxu2 %vm519_vm11, %v1673_v0 }
 0x9e4   :  { %v1629_v2 = vpop.xlane.xlu1 %1628 }
 0x9e5   :  { %6060 = vrcp.f32 %v1629_v2  ;;  %v5841_v2 = vpack.i.bf16 %v7120_v25, %v7117_v7 }
 0x9eb   :  { %v6061_v39 = vpop.eup %6060 }
 0x9ec   :  { %v1632_v36 = vpop.xlane.xlu0 %1631  ;;  %v1655_v34 = vmul.f32 %v6061_v39, %v7139_v33 }
 0x9ed   :  { %6062 = vrcp.f32 %v1632_v36 }
 0x9ee   :  { %v1663_v31 = vpack.c.bf16 %v1655_v34, %v1655_v34 }
 0x9f0   :  { %v1696_v16 = vunpack.c.l.b16 %v1663_v31 }
 0x9f3   :  { %v6063_v52 = vpop.eup %6062 }
 0x9f4   :  { %v1656_v45 = vmul.f32 %v6063_v52, %v7145_v46  ;;  %v5699_v52 = vld [vmem:[%s8537_s4] sm:$0xff] }
 0x9f6   :  { %v1664_v32 = vpack.c.bf16 %v1656_v45, %v1656_v45 }
 0x9f8   :  { %v1697_v40 = vunpack.c.l.b16 %v1664_v32 }
 0x9fa   :  { %v1698_v57 = vpack.c.b16 %v1697_v40, %v1696_v16 }
 0x9fc   :  { %v1700_v3 = vpop.permute.xlu1 %1699 }
 0x9fd   :  { %1712 = vmatpush.bf16.msra.mxu3 %v1700_v3 }
 0xa00   :  { %5290 = vmatmul.msk.bf16.vlgmr.msra.gmra.mxu3 %vm519_vm11, %v1698_v57 }
 0xa04   :  { %v1750_v19 = vpop.permute.xlu1 %1749 }
 0xa05   :  { %1762 = vmatpush.bf16.msra.mxu1 %v1750_v19 }
 0xa0c   :  { %v5798_v34 = vpop.permute.xlu1 %5797 }
 0xa0d   :  { %v5800_v25 = vunpack.i.h.bf16 %v5798_v34  ;;  %v5799_v16 = vunpack.i.l.bf16 %v5798_v34 }
 0xa10   :  { %v1635_v24 = vpop.xlane.xlu0 %1634 }
 0xa11   :  { %6064 = vrcp.f32 %v1635_v24 }
 0xa17   :  { %v6065_v50 = vpop.eup %6064 }
 0xa18   :  { %v1638_v14 = vpop.xlane.xlu0 %1637  ;;  %v1657_v33 = vmul.f32 %v6065_v50, %v7156_v17 }
 0xa19   :  { %6066 = vrcp.f32 %v1638_v14 }
 0xa1a   :  { %v1665_v46 = vpack.c.bf16 %v1657_v33, %v1657_v33 }
 0xa1c   :  { %v1721_v12 = vunpack.c.l.b16 %v1665_v46 }
 0xa1f   :  { %v6067_v11 = vpop.eup %6066 }
 0xa20   :  { %v1658_v26 = vmul.f32 %v6067_v11, %v6051_v42  ;;  %v1641_v38 = vpop.xlane.xlu0 %1640 }
 0xa21   :  { %6068 = vrcp.f32 %v1641_v38 }
 0xa22   :  { %v1666_v1 = vpack.c.bf16 %v1658_v26, %v1658_v26 }
 0xa24   :  { %v1722_v13 = vunpack.c.l.b16 %v1666_v1 }
 0xa26   :  { %v1723_v6 = vpack.c.b16 %v1722_v13, %v1721_v12  ;;  %v1644_v18 = vpop.xlane.xlu2 %1643 }
 0xa27   :  { %v6069_v60 = vpop.eup %6068  ;;  %6070 = vrcp.f32 %v1644_v18 }
 0xa28   :  { %5291 = vmatmul.msk.bf16.vlgmr.msrb.gmra.mxu0 %vm519_vm11, %v1723_v6  ;;  %v1659_v10 = vmul.f32 %v6069_v60, %v7161_v44  ;;  %v5821_v44 = vpack.i.bf16 %v7002_v48, %v6998_v43  ;;  %v5701_v43 = vld [vmem:[%s8537_s4 + $0x10] sm:$0xff] }
 0xa29   :  { %1944 = vmatpush.bf16.msra.mxu2 %v5701_v43 }
 0xa2a   :  { %v1667_v63 = vpack.c.bf16 %v1659_v10, %v1659_v10 }
 0xa2c   :  { %v1746_v28 = vunpack.c.l.b16 %v1667_v63 }
 0xa2d   :  { %v6071_v27 = vpop.eup %6070  ;;  %1945 = vmatpush.bf16.msra.mxu2 %v5700_v59 }
 0xa2e   :  { %v1660_v17 = vmul.f32 %v6071_v27, %v7165_v35 }
 0xa30   :  { %v1668_v49 = vpack.c.bf16 %v1660_v17, %v1660_v17 }
 0xa31   :  { %1946 = vmatpush.bf16.msra.mxu2 %v5699_v52 }
 0xa32   :  { %v1747_v42 = vunpack.c.l.b16 %v1668_v49 }
 0xa33   :  { %v5793_v45 = vpop.permute.xlu0 %5792 }
 0xa34   :  { %v1748_v41 = vpack.c.b16 %v1747_v42, %v1746_v28  ;;  %v5795_v32 = vunpack.i.h.bf16 %v5793_v45  ;;  %v5794_v31 = vunpack.i.l.bf16 %v5793_v45 }
 0xa36   :  { %5292 = vmatmul.msk.bf16.vlgmr.msra.gmra.mxu1 %vm519_vm11, %v1748_v41  ;;  %v1866_v40 = vsel %vm519_vm11, %v6901_v54, %v5795_v32  ;;  %v1865_v7 = vsel %vm519_vm11, %v6899_v53, %v5794_v31 }
 0xa37   :  { %v1874_v24 = vsel %vm1873_vm14, %v1865_v7, %v5799_v16  ;;  %v1875_v14 = vsel %vm1873_vm14, %v1866_v40, %v5800_v25  ;;  %v5913_v7 = vld [vmem:[#allocation7] ss:$0 sm:$0xff] }
 0xa3b   :  { %v5808_v54 = vpop.permute.xlu0 %5807 }
 0xa3c   :  { %v5810_v46 = vunpack.i.h.bf16 %v5808_v54  ;;  %v5809_v26 = vunpack.i.l.bf16 %v5808_v54 }
 0xa3e   :  { %v1868_v13 = vsel %vm519_vm11, %v6929_v21, %v5810_v46  ;;  %v1867_v6 = vsel %vm519_vm11, %v6921_v15, %v5809_v26  ;;  %v5828_v21 = vpop.permute.xlu2 %5827 }
 0xa64   :  { %v1689_v37 = vpop.f32.mrf.mxu2 }
 0xa6c   :  { %v1691_v51 = vpop.f32.mrf.mxu2 }
 0xa6d   :  { %v5801_v4 = vpack.i.bf16 %v1691_v51, %v1689_v37  ;;  %v5830_v51 = vunpack.i.h.bf16 %v5828_v21 }
 0xa6f   :  { %5802 = vrot.lane.b32.xlu1 %v5801_v4, %s6462_s0  ;;  %v5829_v4 = vunpack.i.l.bf16 %v5828_v21  ;;  %v6270_v21 = vld [vmem:[%s8552_s30 + $0x30] sm:$0xff] }
 0xa77   :  { %5812 = vrot.lane.b32.xlu1 %v5811_v58, %s6464_s18 }
 0xa7f   :  { %5822 = vrot.lane.b32.xlu1 %v5821_v44, %s6451_s29 }
 0xa83   :  { %v1714_v35 = vpop.f32.mrf.mxu3 }
 0xa87   :  { %5837 = vrot.lane.b32.xlu1 %v5836_v61, %s6451_s29 }
 0xa8b   :  { %v1716_v9 = vpop.f32.mrf.mxu3 }
 0xa8c   :  { %v5816_v8 = vpack.i.bf16 %v1716_v9, %v1714_v35 }
 0xa8e   :  { %5817 = vrot.lane.b32.xlu0 %v5816_v8, %s6462_s0 }
 0xaa5   :  { %v1739_v48 = vpop.f32.mrf.mxu0 }
 0xaad   :  { %v1741_v62 = vpop.f32.mrf.mxu0 }
 0xaae   :  { %v5831_v30 = vpack.i.bf16 %v1741_v62, %v1739_v48 }
 0xab0   :  { %5832 = vrot.lane.b32.xlu0 %v5831_v30, %s6462_s0 }
 0xab3   :  { %v1764_v0 = vpop.f32.mrf.mxu1 }
 0xab8   :  { %5842 = vrot.lane.b32.xlu0 %v5841_v2, %s6464_s18 }
 0xabb   :  { %v1766_v36 = vpop.f32.mrf.mxu1 }
 0xabc   :  { %v5846_v39 = vpack.i.bf16 %v1766_v36, %v1764_v0 }
 0xabe   :  { %5847 = vrot.lane.b32.xlu1 %v5846_v39, %s6462_s0 }
 0xae1   :  { %v5803_v3 = vpop.permute.xlu1 %5802 }
 0xae2   :  { %v5805_v57 = vunpack.i.h.bf16 %v5803_v3  ;;  %v5804_v19 = vunpack.i.l.bf16 %v5803_v3 }
 0xae4   :  { %v1883_v50 = vsel %vm1882_vm15, %v1874_v24, %v5804_v19  ;;  %v1884_v33 = vsel %vm1882_vm15, %v1875_v14, %v5805_v57  ;;  %v6265_v19 = vld [vmem:[%s8552_s30 + $0x8] sm:$0xff] }
 0xae5   :  { %v1891_v11 = vpack.c.bf16 %v1884_v33, %v1883_v50 }
 0xae7   :  { %5309 = vmatmul.msk.bf16.vlgmr.msra.gmra.mxu2 %vm168_vm0, %v1891_v11  ;;  %v6266_v11 = vld [vmem:[%s8552_s30 + $0x10] sm:$0xff] }
 0xae9   :  { %v5813_v53 = vpop.permute.xlu1 %5812 }
 0xaea   :  { %v5815_v38 = vunpack.i.h.bf16 %v5813_v53  ;;  %v5814_v1 = vunpack.i.l.bf16 %v5813_v53 }
 0xaec   :  { %v1876_v10 = vsel %vm1873_vm14, %v1867_v6, %v5814_v1  ;;  %v1877_v27 = vsel %vm1873_vm14, %v1868_v13, %v5815_v38  ;;  %v6267_v38 = vld [vmem:[%s8552_s30 + $0x18] sm:$0xff] }
 0xaf1   :  { %v5823_v28 = vpop.permute.xlu1 %5822 }
 0xaf2   :  { %v5825_v42 = vunpack.i.h.bf16 %v5823_v28  ;;  %v5824_v41 = vunpack.i.l.bf16 %v5823_v28 }
 0xaf4   :  { %v1870_v15 = vsel %vm519_vm11, %v6905_v56, %v5825_v42  ;;  %v1869_v37 = vsel %vm519_vm11, %v6903_v55, %v5824_v41 }
 0xaf5   :  { %v1878_v61 = vsel %vm1873_vm14, %v1869_v37, %v5829_v4  ;;  %v1879_v9 = vsel %vm1873_vm14, %v1870_v15, %v5830_v51 }
 0xaf9   :  { %v5838_v59 = vpop.permute.xlu1 %5837 }
 0xafa   :  { %v5840_v48 = vunpack.i.h.bf16 %v5838_v59  ;;  %v5839_v55 = vunpack.i.l.bf16 %v5838_v59 }
 0xafc   :  { %v1872_v2 = vsel %vm519_vm11, %v6933_v23, %v5840_v48  ;;  %v1871_v36 = vsel %vm519_vm11, %v6931_v22, %v5839_v55  ;;  %v6264_v23 = vld [vmem:[%s8552_s30] sm:$0xff] }
 0xb00   :  { %v5818_v12 = vpop.permute.xlu0 %5817 }
 0xb01   :  { %v5820_v18 = vunpack.i.h.bf16 %v5818_v12  ;;  %v5819_v60 = vunpack.i.l.bf16 %v5818_v12 }
 0xb03   :  { %v1885_v63 = vsel %vm1882_vm15, %v1876_v10, %v5819_v60  ;;  %v1886_v17 = vsel %vm1882_vm15, %v1877_v27, %v5820_v18  ;;  %v6268_v18 = vld [vmem:[%s8552_s30 + $0x20] sm:$0xff] }
 0xb04   :  { %v1892_v49 = vpack.c.bf16 %v1886_v17, %v1885_v63  ;;  %v6269_v17 = vld [vmem:[%s8552_s30 + $0x28] sm:$0xff] }
 0xb06   :  { %5310 = vmatmul.msk.bf16.gmra.mxu2 %vm168_vm0, %v1892_v49 }
 0xb22   :  { %v5833_v58 = vpop.permute.xlu0 %5832 }
 0xb23   :  { %v5835_v44 = vunpack.i.h.bf16 %v5833_v58  ;;  %v5834_v35 = vunpack.i.l.bf16 %v5833_v58 }
 0xb25   :  { %v1888_v8 = vsel %vm1882_vm15, %v1879_v9, %v5835_v44  ;;  %v1887_v47 = vsel %vm1882_vm15, %v1878_v61, %v5834_v35  ;;  %v6271_v9 = vld [vmem:[%s8552_s30 + $0x38] sm:$0xff] }
 0xb26   :  { %v1893_v43 = vpack.c.bf16 %v1888_v8, %v1887_v47 }
 0xb28   :  { %5311 = vmatmul.msk.bf16.gmra.mxu2 %vm168_vm0, %v1893_v43 }
 0xb2a   :  { %v5843_v56 = vpop.permute.xlu0 %5842 }
 0xb2b   :  { %v5845_v62 = vunpack.i.h.bf16 %v5843_v56  ;;  %v5844_v30 = vunpack.i.l.bf16 %v5843_v56 }
 0xb2d   :  { %v1881_v34 = vsel %vm1873_vm14, %v1872_v2, %v5845_v62  ;;  %v1880_v45 = vsel %vm1873_vm14, %v1871_v36, %v5844_v30 }
 0xb30   :  { %v5848_v0 = vpop.permute.xlu1 %5847 }
 0xb31   :  { %v5850_v39 = vunpack.i.h.bf16 %v5848_v0  ;;  %v5849_v52 = vunpack.i.l.bf16 %v5848_v0 }
 0xb33   :  { %v1889_v32 = vsel %vm1882_vm15, %v1880_v45, %v5849_v52  ;;  %v1890_v31 = vsel %vm1882_vm15, %v1881_v34, %v5850_v39 }
 0xb34   :  { %v1894_v40 = vpack.c.bf16 %v1890_v31, %v1889_v32 }
 0xb38   :  { %5312 = vmatmul.msk.bf16.gmra.mxu2 %vm168_vm0, %v1894_v40 }
 0xb6a   :  { %v1948_v25 = vpop.f32.mrf.mxu2 }
 0xb6b   :  { %v1968_v22 = vadd.f32 %v6264_v23, %v1948_v25 }
 0xb6d   :  { %v7256_v16 = vadd.f32 %v5913_v7, %v1968_v22 }
 0xb6f   :  { %v1990_v3 = vsel %vm168_vm0, %v7256_v16, 0.0 }
 0xb70   :  { %1991 = vadd.xlane.f32.xlu0 %v1990_v3 }
 0xb72   :  { %v1950_v57 = vpop.f32.mrf.mxu2 }
 0xb73   :  { %v1969_v24 = vadd.f32 %v6265_v19, %v1950_v57 }
 0xb75   :  { %v7263_v14 = vadd.f32 %v5913_v7, %v1969_v24 }
 0xb77   :  { %v1993_v50 = vsel %vm168_vm0, %v7263_v14, 0.0 }
 0xb78   :  { %1994 = vadd.xlane.f32.xlu1 %v1993_v50 }
 0xb89   :  { %v1953_v33 = vpop.f32.mrf.mxu2 }
 0xb8a   :  { %v1970_v54 = vadd.f32 %v6266_v11, %v1953_v33 }
 0xb8c   :  { %v7270_v53 = vadd.f32 %v5913_v7, %v1970_v54 }
 0xb8e   :  { %v1996_v46 = vsel %vm168_vm0, %v7270_v53, 0.0 }
 0xb8f   :  { %1997 = vadd.xlane.f32.xlu2 %v1996_v46 }
 0xb91   :  { %v1955_v26 = vpop.f32.mrf.mxu2 }
 0xb92   :  { %v1971_v1 = vadd.f32 %v6267_v38, %v1955_v26 }
 0xb94   :  { %v7277_v12 = vadd.f32 %v5913_v7, %v1971_v1  ;;  %v5339_v1 = vld [vmem:[%s8541_s8 + $0x30] sm:$0xf] }
 0xb96   :  { %v1999_v13 = vsel %vm168_vm0, %v7277_v12, 0.0 }
 0xb97   :  { %2000 = vadd.xlane.f32.xlu0 %v1999_v13  ;;  %v5710_v13 = vld [vmem:[%s8541_s8 + $0x34] sm:$0xf0] }
 0xbab   :  { %v1958_v6 = vpop.f32.mrf.mxu2 }
 0xbac   :  { %v1972_v60 = vadd.f32 %v6268_v18, %v1958_v6  ;;  %v5709_v6 = vld [vmem:[%s8541_s8 + $0x34] sm:$0xf]  ;;  %v5340_v18 = vor.u32 %v5710_v13, %v5339_v1  ;;  %v7415_v13 = vld [vmem:[#allocation8] ss:$0 sm:$0xff] }
 0xbae   :  { %v7284_v10 = vadd.f32 %v5913_v7, %v1972_v60  ;;  %v5341_v60 = vld [vmem:[%s8541_s8 + $0x38] sm:$0xf0]  ;;  %2262 = vmatpush.bf16.msrb.mxu3 %v5340_v18 }
 0xbb0   :  { %v2002_v27 = vsel %vm168_vm0, %v7284_v10, 0.0 }
 0xbb1   :  { %2003 = vadd.xlane.f32.xlu1 %v2002_v27  ;;  %v5344_v27 = vor.u32 %v5709_v6, %v5341_v60 }
 0xbb3   :  { %v1960_v63 = vpop.f32.mrf.mxu2  ;;  %2291 = vmatpush.bf16.msra.mxu0 %v5344_v27  ;;  %5767 = vmatpush.bf16.msrb.mxu1 %v5344_v27 }
 0xbb4   :  { %v1973_v49 = vadd.f32 %v6269_v17, %v1960_v63  ;;  %v5331_v63 = vld [vmem:[%s8541_s8 + $0x20] sm:$0xf]  ;;  %v5708_v17 = vld [vmem:[%s8541_s8 + $0x24] sm:$0xf0] }
 0xbb6   :  { %v7291_v28 = vadd.f32 %v5913_v7, %v1973_v49  ;;  %v5707_v49 = vld [vmem:[%s8541_s8 + $0x24] sm:$0xf] }
 0xbb8   :  { %v2005_v42 = vsel %vm168_vm0, %v7291_v28, 0.0 }
 0xbb9   :  { %2006 = vadd.xlane.f32.xlu2 %v2005_v42  ;;  %v5332_v42 = vor.u32 %v5708_v17, %v5331_v63 }
 0xbbb   :  { %v1963_v41 = vpop.f32.mrf.mxu2  ;;  %2263 = vmatpush.bf16.msrb.mxu3 %v5332_v42 }
 0xbbc   :  { %v1974_v15 = vadd.f32 %v6270_v21, %v1963_v41  ;;  %v5333_v41 = vld [vmem:[%s8541_s8 + $0x28] sm:$0xf0] }
 0xbbd   :  { %v5336_v21 = vor.u32 %v5707_v49, %v5333_v41  ;;  %v7420_v49 = vld [vmem:[#allocation10] ss:$0 sm:$0xff] }
 0xbbe   :  { %v7298_v37 = vadd.f32 %v5913_v7, %v1974_v15  ;;  %v5323_v15 = vld [vmem:[%s8541_s8 + $0x10] sm:$0xf] }
 0xbbf   :  { %2292 = vmatpush.bf16.msra.mxu0 %v5336_v21  ;;  %5768 = vmatpush.bf16.msrb.mxu1 %v5336_v21 }
 0xbc0   :  { %v2008_v51 = vsel %vm168_vm0, %v7298_v37, 0.0 }
 0xbc1   :  { %2009 = vadd.xlane.f32.xlu2 %v2008_v51  ;;  %v5706_v51 = vld [vmem:[%s8541_s8 + $0x14] sm:$0xf0] }
 0xbc3   :  { %v1965_v35 = vpop.f32.mrf.mxu2 }
 0xbc4   :  { %v1975_v8 = vadd.f32 %v6271_v9, %v1965_v35  ;;  %v5325_v35 = vld [vmem:[%s8541_s8 + $0x18] sm:$0xf0] }
 0xbc6   :  { %v7313_v56 = vadd.f32 %v5913_v7, %v1975_v8 }
 0xbc8   :  { %v2011_v30 = vsel %vm168_vm0, %v7313_v56, 0.0 }
 0xbe3   :  { %v1992_v4 = vpop.xlane.xlu0 %1991 }
 0xbe4   :  { %v2014_v58 = vmul.f32 %v1992_v4, %v6618_v20  ;;  %v5705_v4 = vld [vmem:[%s8541_s8 + $0x14] sm:$0xf] }
 0xbe5   :  { %v5328_v9 = vor.u32 %v5705_v4, %v5325_v35 }
 0xbe6   :  { %v7304_v44 = vsub.f32 %v7256_v16, %v2014_v58  ;;  %v5324_v58 = vor.u32 %v5706_v51, %v5323_v15 }
 0xbe7   :  { %2293 = vmatpush.bf16.msra.mxu0 %v5328_v9  ;;  %5769 = vmatpush.bf16.msrb.mxu1 %v5328_v9 }
 0xbe8   :  { %v2030_v61 = vmul.f32 %v7304_v44, %v7304_v44  ;;  %2264 = vmatpush.bf16.msrb.mxu3 %v5324_v58 }
 0xbea   :  { %v2038_v47 = vsel %vm168_vm0, %v2030_v61, 0.0 }
 0xbeb   :  { %v1995_v43 = vpop.xlane.xlu1 %1994  ;;  %2039 = vadd.xlane.f32.xlu0 %v2038_v47  ;;  %v5315_v47 = vld [vmem:[%s8541_s8] sm:$0xf] }
 0xbec   :  { %v2015_v59 = vmul.f32 %v1995_v43, %v6618_v20  ;;  %v5704_v43 = vld [vmem:[%s8541_s8 + $0x4] sm:$0xf0] }
 0xbee   :  { %v7316_v48 = vsub.f32 %v7263_v14, %v2015_v59  ;;  %v5703_v59 = vld [vmem:[%s8541_s8 + $0x4] sm:$0xf] }
 0xbf0   :  { %v2031_v55 = vmul.f32 %v7316_v48, %v7316_v48 }
 0xbf2   :  { %v2041_v62 = vsel %vm168_vm0, %v2031_v55, 0.0 }
 0xbf3   :  { %2042 = vadd.xlane.f32.xlu1 %v2041_v62  ;;  %2012 = vadd.xlane.f32.xlu0 %v2011_v30  ;;  %v5316_v62 = vor.u32 %v5704_v43, %v5315_v47  ;;  %v5317_v30 = vld [vmem:[%s8541_s8 + $0x8] sm:$0xf0] }
 0xbf5   :  { %2265 = vmatpush.bf16.msrb.mxu3 %v5316_v62 }
 0xc02   :  { %v1998_v0 = vpop.xlane.xlu2 %1997 }
 0xc03   :  { %v2016_v2 = vmul.f32 %v1998_v0, %v6618_v20  ;;  %v5320_v0 = vor.u32 %v5703_v59, %v5317_v30 }
 0xc05   :  { %v7325_v36 = vsub.f32 %v7270_v53, %v2016_v2  ;;  %2294 = vmatpush.bf16.msra.mxu0 %v5320_v0  ;;  %5770 = vmatpush.bf16.msrb.mxu1 %v5320_v0 }
 0xc07   :  { %v2032_v39 = vmul.f32 %v7325_v36, %v7325_v36 }
 0xc09   :  { %v2044_v52 = vsel %vm168_vm0, %v2032_v39, 0.0 }
 0xc0a   :  { %v2001_v34 = vpop.xlane.xlu0 %2000  ;;  %2045 = vadd.xlane.f32.xlu1 %v2044_v52 }
 0xc0b   :  { %v2017_v45 = vmul.f32 %v2001_v34, %v6618_v20 }
 0xc0d   :  { %v7332_v32 = vsub.f32 %v7277_v12, %v2017_v45 }
 0xc0f   :  { %v2033_v31 = vmul.f32 %v7332_v32, %v7332_v32 }
 0xc11   :  { %v2047_v40 = vsel %vm168_vm0, %v2033_v31, 0.0 }
 0xc12   :  { %2048 = vadd.xlane.f32.xlu2 %v2047_v40 }
 0xc24   :  { %v2004_v7 = vpop.xlane.xlu1 %2003 }
 0xc25   :  { %v2018_v25 = vmul.f32 %v2004_v7, %v6618_v20 }
 0xc27   :  { %v7339_v23 = vsub.f32 %v7284_v10, %v2018_v25 }
 0xc29   :  { %v2034_v22 = vmul.f32 %v7339_v23, %v7339_v23 }
 0xc2b   :  { %v2050_v3 = vsel %vm168_vm0, %v2034_v22, 0.0 }
 0xc2c   :  { %v2007_v57 = vpop.xlane.xlu2 %2006  ;;  %2051 = vadd.xlane.f32.xlu0 %v2050_v3 }
 0xc2d   :  { %v2019_v19 = vmul.f32 %v2007_v57, %v6618_v20 }
 0xc2f   :  { %v7346_v24 = vsub.f32 %v7291_v28, %v2019_v19 }
 0xc31   :  { %v2035_v50 = vmul.f32 %v7346_v24, %v7346_v24 }
 0xc33   :  { %v2053_v33 = vsel %vm168_vm0, %v2035_v50, 0.0 }
 0xc34   :  { %2054 = vadd.xlane.f32.xlu1 %v2053_v33  ;;  %v2010_v11 = vpop.xlane.xlu2 %2009 }
 0xc35   :  { %v2020_v54 = vmul.f32 %v2010_v11, %v6618_v20 }
 0xc37   :  { %v7353_v46 = vsub.f32 %v7298_v37, %v2020_v54 }
 0xc39   :  { %v2036_v26 = vmul.f32 %v7353_v46, %v7353_v46 }
 0xc3b   :  { %v2056_v38 = vsel %vm168_vm0, %v2036_v26, 0.0 }
 0xc3c   :  { %2057 = vadd.xlane.f32.xlu2 %v2056_v38 }
 0xc5e   :  { %v2040_v61 = vpop.xlane.xlu0 %2039 }
 0xc5f   :  { %v2062_v8 = vmul.f32 %v2040_v61, %v6618_v20 }
 0xc61   :  { %v2070_v55 = vadd.f32 1e-05, %v2062_v8 }
 0xc63   :  { %6072 = vrsqrt.f32 %v2070_v55  ;;  %vm2084_vm2 = vweird.f32 %v2070_v55 }
 0xc66   :  { %v2043_v2 = vpop.xlane.xlu1 %2042  ;;  %v2013_v39 = vpop.xlane.xlu0 %2012 }
 0xc67   :  { %v2063_v52 = vmul.f32 %v2043_v2, %v6618_v20  ;;  %v2021_v34 = vmul.f32 %v2013_v39, %v6618_v20 }
 0xc69   :  { %v6073_v45 = vpop.eup %6072  ;;  %v2071_v31 = vadd.f32 1e-05, %v2063_v52  ;;  %v7410_v40 = vsub.f32 %v7313_v56, %v2021_v34 }
 0xc6a   :  { %v2079_v7 = vmul.f32 %v6073_v45, %v2070_v55  ;;  %vm2085_vm1 = vweird.f32 %v6073_v45 }
 0xc6b   :  { %6074 = vrsqrt.f32 %v2071_v31  ;;  %v2037_v25 = vmul.f32 %v7410_v40, %v7410_v40  ;;  %vm2086_vm3 = vmor %vm2084_vm2, %vm2085_vm1  ;;  %vm2094_vm5 = vweird.f32 %v2071_v31 }
 0xc6c   :  { %v2080_v22 = vmul.f32 %v6073_v45, %v2079_v7 }
 0xc6d   :  { %v2059_v3 = vsel %vm168_vm0, %v2037_v25, 0.0 }
 0xc6e   :  { %v2081_v57 = vmul.f32 0.5, %v2080_v22  ;;  %2060 = vadd.xlane.f32.xlu0 %v2059_v3 }
 0xc70   :  { %v2082_v19 = vsub.f32 1.5, %v2081_v57 }
 0xc71   :  { %v6075_v50 = vpop.eup %6074 }
 0xc72   :  { %v2083_v33 = vmul.f32 %v6073_v45, %v2082_v19  ;;  %v2089_v11 = vmul.f32 %v6075_v50, %v2071_v31  ;;  %vm2095_vm4 = vweird.f32 %v6075_v50 }
 0xc73   :  { %vm2096_vm6 = vmor %vm2094_vm5, %vm2095_vm4 }
 0xc74   :  { %v2090_v54 = vmul.f32 %v6075_v50, %v2089_v11  ;;  %v2087_v26 = vsel %vm2086_vm3, %v6073_v45, %v2083_v33 }
 0xc75   :  { %v2158_v6 = vmul.f32 %v2087_v26, %v7304_v44 }
 0xc76   :  { %v2091_v38 = vmul.f32 0.5, %v2090_v54 }
 0xc77   :  { %v2169_v27 = vmul.f32 %v7415_v13, %v2158_v6 }
 0xc78   :  { %v2092_v1 = vsub.f32 1.5, %v2091_v38 }
 0xc79   :  { %v2180_v15 = vadd.f32 %v7420_v49, %v2169_v27 }
 0xc7a   :  { %v2093_v18 = vmul.f32 %v6075_v50, %v2092_v1 }
 0xc7c   :  { %v2097_v60 = vsel %vm2096_vm6, %v6075_v50, %v2093_v18 }
 0xc7d   :  { %v2159_v63 = vmul.f32 %v2097_v60, %v7316_v48  ;;  %v2046_v17 = vpop.xlane.xlu1 %2045 }
 0xc7e   :  { %v2064_v42 = vmul.f32 %v2046_v17, %v6618_v20 }
 0xc7f   :  { %v2170_v41 = vmul.f32 %v7415_v13, %v2159_v63 }
 0xc80   :  { %v2072_v21 = vadd.f32 1e-05, %v2064_v42 }
 0xc81   :  { %v2181_v44 = vadd.f32 %v7420_v49, %v2170_v41 }
 0xc82   :  { %6076 = vrsqrt.f32 %v2072_v21  ;;  %vm2104_vm8 = vweird.f32 %v2072_v21 }
 0xc83   :  { %v2188_v51 = vpack.c.bf16 %v2181_v44, %v2180_v15 }
 0xc85   :  { %5345 = vmatmul.msk.bf16.vlgmr.msrb.gmra.mxu3 %vm168_vm0, %v2188_v51  ;;  %5349 = vmatmul.msk.bf16.vlgmr.msra.gmra.mxu0 %vm168_vm0, %v2188_v51  ;;  %v2049_v4 = vpop.xlane.xlu2 %2048 }
 0xc86   :  { %v2065_v48 = vmul.f32 %v2049_v4, %v6618_v20 }
 0xc88   :  { %v6077_v58 = vpop.eup %6076  ;;  %v2073_v35 = vadd.f32 1e-05, %v2065_v48 }
 0xc89   :  { %v2099_v61 = vmul.f32 %v6077_v58, %v2072_v21  ;;  %vm2105_vm7 = vweird.f32 %v6077_v58 }
 0xc8a   :  { %6078 = vrsqrt.f32 %v2073_v35  ;;  %vm2106_vm9 = vmor %vm2104_vm8, %vm2105_vm7  ;;  %vm2114_vm12 = vweird.f32 %v2073_v35 }
 0xc8b   :  { %v2100_v9 = vmul.f32 %v6077_v58, %v2099_v61 }
 0xc8d   :  { %v2101_v8 = vmul.f32 0.5, %v2100_v9 }
 0xc8f   :  { %v2102_v47 = vsub.f32 1.5, %v2101_v8  ;;  %v5725_v8 = vld [vmem:[%s8543_s10 + $0x70] sm:$0xff] }
 0xc90   :  { %v6079_v43 = vpop.eup %6078 }
 0xc91   :  { %v2103_v59 = vmul.f32 %v6077_v58, %v2102_v47  ;;  %v2109_v55 = vmul.f32 %v6079_v43, %v2073_v35  ;;  %vm2115_vm10 = vweird.f32 %v6079_v43  ;;  %v5718_v47 = vld [vmem:[%s8543_s10 + $0x38] sm:$0xff] }
 0xc92   :  { %vm2116_vm13 = vmor %vm2114_vm12, %vm2115_vm10  ;;  %2472 = vmatpush.bf16.msra.mxu1 %v5718_v47 }
 0xc93   :  { %v2110_v62 = vmul.f32 %v6079_v43, %v2109_v55  ;;  %v2107_v30 = vsel %vm2106_vm9, %v6077_v58, %v2103_v59  ;;  %v5717_v59 = vld [vmem:[%s8543_s10 + $0x30] sm:$0xff] }
 0xc94   :  { %v2160_v39 = vmul.f32 %v2107_v30, %v7325_v36 }
 0xc95   :  { %v2111_v0 = vmul.f32 0.5, %v2110_v62  ;;  %v5723_v62 = vld [vmem:[%s8543_s10 + $0x60] sm:$0xff] }
 0xc96   :  { %v2171_v31 = vmul.f32 %v7415_v13, %v2160_v39  ;;  %2473 = vmatpush.bf16.msra.mxu1 %v5717_v59 }
 0xc97   :  { %v2112_v2 = vsub.f32 1.5, %v2111_v0  ;;  %v5716_v0 = vld [vmem:[%s8543_s10 + $0x28] sm:$0xff] }
 0xc98   :  { %v2182_v3 = vadd.f32 %v7420_v49, %v2171_v31 }
 0xc99   :  { %v2113_v52 = vmul.f32 %v6079_v43, %v2112_v2 }
 0xc9a   :  { %2474 = vmatpush.bf16.msra.mxu1 %v5716_v0 }
 0xc9b   :  { %v2117_v34 = vsel %vm2116_vm13, %v6079_v43, %v2113_v52  ;;  %v5724_v43 = vld [vmem:[%s8543_s10 + $0x68] sm:$0xff]  ;;  %v5722_v52 = vld [vmem:[%s8543_s10 + $0x58] sm:$0xff] }
 0xc9c   :  { %v2161_v45 = vmul.f32 %v2117_v34, %v7332_v32 }
 0xc9e   :  { %v2172_v7 = vmul.f32 %v7415_v13, %v2161_v45  ;;  %v5715_v45 = vld [vmem:[%s8543_s10 + $0x20] sm:$0xff] }
 0xc9f   :  { %v2052_v25 = vpop.xlane.xlu0 %2051  ;;  %2475 = vmatpush.bf16.msra.mxu1 %v5715_v45 }
 0xca0   :  { %v2066_v22 = vmul.f32 %v2052_v25, %v6618_v20  ;;  %v2183_v57 = vadd.f32 %v7420_v49, %v2172_v7  ;;  %v5721_v25 = vld [vmem:[%s8543_s10 + $0x50] sm:$0xff] }
 0xca2   :  { %v2074_v19 = vadd.f32 1e-05, %v2066_v22  ;;  %v2189_v50 = vpack.c.bf16 %v2183_v57, %v2182_v3  ;;  %v5714_v22 = vld [vmem:[%s8543_s10 + $0x18] sm:$0xff]  ;;  %v5720_v57 = vld [vmem:[%s8543_s10 + $0x48] sm:$0xff] }
 0xca3   :  { %2476 = vmatpush.bf16.msra.mxu1 %v5714_v22 }
 0xca4   :  { %6080 = vrsqrt.f32 %v2074_v19  ;;  %5346 = vmatmul.msk.bf16.gmra.mxu3 %vm168_vm0, %v2189_v50  ;;  %5350 = vmatmul.msk.bf16.vlgmr.msrb.gmra.mxu1 %vm168_vm0, %v2189_v50  ;;  %vm2124_vm2 = vweird.f32 %v2074_v19 }
 0xca7   :  { %v2055_v36 = vpop.xlane.xlu1 %2054 }
 0xca8   :  { %v2067_v32 = vmul.f32 %v2055_v36, %v6618_v20 }
 0xcaa   :  { %v6081_v33 = vpop.eup %6080  ;;  %v2075_v11 = vadd.f32 1e-05, %v2067_v32 }
 0xcab   :  { %v2119_v54 = vmul.f32 %v6081_v33, %v2074_v19  ;;  %vm2125_vm1 = vweird.f32 %v6081_v33  ;;  %v5713_v19 = vld [vmem:[%s8543_s10 + $0x10] sm:$0xff] }
 0xcac   :  { %6082 = vrsqrt.f32 %v2075_v11  ;;  %vm2126_vm3 = vmor %vm2124_vm2, %vm2125_vm1  ;;  %vm2134_vm5 = vweird.f32 %v2075_v11  ;;  %2477 = vmatpush.bf16.msra.mxu1 %v5713_v19 }
 0xcad   :  { %v2120_v26 = vmul.f32 %v6081_v33, %v2119_v54  ;;  %v5712_v54 = vld [vmem:[%s8543_s10 + $0x8] sm:$0xff] }
 0xcaf   :  { %v2121_v38 = vmul.f32 0.5, %v2120_v26 }
 0xcb0   :  { %2478 = vmatpush.bf16.msra.mxu1 %v5712_v54 }
 0xcb1   :  { %v2122_v1 = vsub.f32 1.5, %v2121_v38 }
 0xcb2   :  { %v6083_v6 = vpop.eup %6082 }
 0xcb3   :  { %v2123_v18 = vmul.f32 %v6081_v33, %v2122_v1  ;;  %v2129_v60 = vmul.f32 %v6083_v6, %v2075_v11  ;;  %vm2135_vm4 = vweird.f32 %v6083_v6 }
 0xcb4   :  { %vm2136_vm6 = vmor %vm2134_vm5, %vm2135_vm4 }
 0xcb5   :  { %v2130_v27 = vmul.f32 %v6083_v6, %v2129_v60  ;;  %v2127_v63 = vsel %vm2126_vm3, %v6081_v33, %v2123_v18  ;;  %v5719_v33 = vld [vmem:[%s8543_s10 + $0x40] sm:$0xff] }
 0xcb6   :  { %v2162_v41 = vmul.f32 %v2127_v63, %v7339_v23  ;;  %v2058_v23 = vpop.xlane.xlu2 %2057 }
 0xcb7   :  { %v2131_v17 = vmul.f32 0.5, %v2130_v27  ;;  %v2068_v61 = vmul.f32 %v2058_v23, %v6618_v20 }
 0xcb8   :  { %v2173_v51 = vmul.f32 %v7415_v13, %v2162_v41 }
 0xcb9   :  { %v2132_v42 = vsub.f32 1.5, %v2131_v17  ;;  %v2076_v9 = vadd.f32 1e-05, %v2068_v61 }
 0xcba   :  { %v2184_v48 = vadd.f32 %v7420_v49, %v2173_v51 }
 0xcbb   :  { %v2133_v21 = vmul.f32 %v6083_v6, %v2132_v42  ;;  %6084 = vrsqrt.f32 %v2076_v9  ;;  %vm2144_vm8 = vweird.f32 %v2076_v9 }
 0xcbd   :  { %v2137_v15 = vsel %vm2136_vm6, %v6083_v6, %v2133_v21  ;;  %v5711_v6 = vld [vmem:[%s8543_s10] sm:$0xff] }
 0xcbe   :  { %v2163_v44 = vmul.f32 %v2137_v15, %v7346_v24  ;;  %v5726_v24 = vld [vmem:[%s8543_s10 + $0x78] sm:$0xff]  ;;  %2479 = vmatpush.bf16.msra.mxu1 %v5711_v6 }
 0xcbf   :  { %2501 = vmatpush.bf16.msrb.mxu2 %v5726_v24 }
 0xcc0   :  { %v2174_v4 = vmul.f32 %v7415_v13, %v2163_v44 }
 0xcc1   :  { %v6085_v55 = vpop.eup %6084 }
 0xcc2   :  { %v2185_v58 = vadd.f32 %v7420_v49, %v2174_v4  ;;  %v2139_v30 = vmul.f32 %v6085_v55, %v2076_v9  ;;  %vm2145_vm7 = vweird.f32 %v6085_v55 }
 0xcc3   :  { %2502 = vmatpush.bf16.msrb.mxu2 %v5725_v8  ;;  %vm2146_vm9 = vmor %vm2144_vm8, %vm2145_vm7 }
 0xcc4   :  { %v2190_v35 = vpack.c.bf16 %v2185_v58, %v2184_v48  ;;  %v2140_v2 = vmul.f32 %v6085_v55, %v2139_v30 }
 0xcc6   :  { %5347 = vmatmul.msk.bf16.gmra.mxu3 %vm168_vm0, %v2190_v35  ;;  %5351 = vmatmul.msk.bf16.gmra.mxu1 %vm168_vm0, %v2190_v35  ;;  %v2141_v7 = vmul.f32 0.5, %v2140_v2 }
 0xcc7   :  { %2503 = vmatpush.bf16.msrb.mxu2 %v5724_v43 }
 0xcc8   :  { %v2142_v3 = vsub.f32 1.5, %v2141_v7 }
 0xcca   :  { %v2143_v36 = vmul.f32 %v6085_v55, %v2142_v3 }
 0xccb   :  { %2504 = vmatpush.bf16.msrb.mxu2 %v5723_v62 }
 0xccc   :  { %v2147_v26 = vsel %vm2146_vm9, %v6085_v55, %v2143_v36 }
 0xccd   :  { %v2164_v18 = vmul.f32 %v2147_v26, %v7353_v46  ;;  %v2200_v46 = vld [vmem:[%s8542_s9] sm:$0x3] }
 0xcce   :  { %v2203_v51 = vperm.slane %v2200_v46, 1  ;;  %v2202_v58 = vperm.slane %v2200_v46, 0 }
 0xccf   :  { %2505 = vmatpush.bf16.msrb.mxu2 %v5722_v52  ;;  %v2175_v17 = vmul.f32 %v7415_v13, %v2164_v18 }
 0xcd1   :  { %v2186_v41 = vadd.f32 %v7420_v49, %v2175_v17 }
 0xcd3   :  { %2506 = vmatpush.bf16.msrb.mxu2 %v5721_v25 }
 0xcd7   :  { %2507 = vmatpush.bf16.msrb.mxu2 %v5720_v57 }
 0xcdb   :  { %2508 = vmatpush.bf16.msrb.mxu2 %v5719_v33 }
 0xce1   :  { %v2061_v39 = vpop.xlane.xlu0 %2060 }
 0xce2   :  { %v2069_v34 = vmul.f32 %v2061_v39, %v6618_v20 }
 0xce4   :  { %v2077_v31 = vadd.f32 1e-05, %v2069_v34 }
 0xce6   :  { %6086 = vrsqrt.f32 %v2077_v31  ;;  %vm2154_vm12 = vweird.f32 %v2077_v31 }
 0xcec   :  { %v6087_v50 = vpop.eup %6086 }
 0xced   :  { %v2149_v32 = vmul.f32 %v6087_v50, %v2077_v31  ;;  %vm2155_vm10 = vweird.f32 %v6087_v50 }
 0xcee   :  { %vm2156_vm13 = vmor %vm2154_vm12, %vm2155_vm10 }
 0xcef   :  { %v2150_v11 = vmul.f32 %v6087_v50, %v2149_v32 }
 0xcf1   :  { %v2151_v38 = vmul.f32 0.5, %v2150_v11 }
 0xcf3   :  { %v2152_v1 = vsub.f32 1.5, %v2151_v38 }
 0xcf5   :  { %v2153_v60 = vmul.f32 %v6087_v50, %v2152_v1 }
 0xcf7   :  { %v2157_v27 = vsel %vm2156_vm13, %v6087_v50, %v2153_v60 }
 0xcf8   :  { %v2165_v63 = vmul.f32 %v2157_v27, %v7410_v40 }
 0xcfa   :  { %v2176_v42 = vmul.f32 %v7415_v13, %v2165_v63 }
 0xcfc   :  { %v2187_v21 = vadd.f32 %v7420_v49, %v2176_v42 }
 0xcfe   :  { %v2191_v15 = vpack.c.bf16 %v2187_v21, %v2186_v41 }
 0xd00   :  { %5348 = vmatmul.msk.bf16.gmra.mxu3 %vm168_vm0, %v2191_v15  ;;  %5352 = vmatmul.msk.bf16.gmra.mxu1 %vm168_vm0, %v2191_v15 }
 0xd02   :  { %v2296_v44 = vpop.f32.mrf.mxu0 }
 0xd03   :  { %v2297_v4 = vadd.f32 %v2296_v44, %v2203_v51 }
 0xd05   :  { %v2317_v35 = vmax.f32 %v2297_v4, 0.0 }
 0xd08   :  { %v2267_v40 = vpop.f32.mrf.mxu3 }
 0xd09   :  { %v2268_v61 = vadd.f32 %v2267_v40, %v2202_v58 }
 0xd0a   :  { %v2298_v48 = vpop.f32.mrf.mxu0 }
 0xd0b   :  { %v2299_v13 = vadd.f32 %v2298_v48, %v2203_v51  ;;  %v2316_v8 = vmax.f32 %v2268_v61, 0.0 }
 0xd0d   :  { %v2319_v23 = vmax.f32 %v2299_v13, 0.0 }
 0xd0f   :  { %v2333_v49 = vpack.c.bf16 %v2319_v23, %v2317_v35  ;;  %v5916_v35 = vld [vmem:[%s8544_s11] ss:$0 sm:$0xff] }
 0xd10   :  { %v2269_v9 = vpop.f32.mrf.mxu3 }
 0xd11   :  { %v2270_v24 = vadd.f32 %v2269_v9, %v2202_v58  ;;  %2509 = vmatmul.bf16.vlgmr.msrb.gmra.mxu2 %v2333_v49 }
 0xd13   :  { %v2318_v47 = vmax.f32 %v2270_v24, 0.0 }
 0xd15   :  { %v2332_v43 = vpack.c.bf16 %v2318_v47, %v2316_v8 }
 0xd17   :  { %2480 = vmatmul.bf16.vlgmr.msra.gmra.mxu1 %v2332_v43 }
 0xd21   :  { %v2301_v59 = vpop.f32.mrf.mxu1 }
 0xd22   :  { %v2302_v62 = vadd.f32 %v2301_v59, %v2203_v51 }
 0xd24   :  { %v2321_v2 = vmax.f32 %v2302_v62, 0.0 }
 0xd27   :  { %v2272_v55 = vpop.f32.mrf.mxu3 }
 0xd28   :  { %v2273_v52 = vadd.f32 %v2272_v55, %v2202_v58 }
 0xd29   :  { %v2303_v30 = vpop.f32.mrf.mxu1 }
 0xd2a   :  { %v2304_v0 = vadd.f32 %v2303_v30, %v2203_v51  ;;  %v2320_v7 = vmax.f32 %v2273_v52, 0.0 }
 0xd2c   :  { %v2323_v39 = vmax.f32 %v2304_v0, 0.0 }
 0xd2e   :  { %v2335_v34 = vpack.c.bf16 %v2323_v39, %v2321_v2 }
 0xd2f   :  { %v2274_v45 = vpop.f32.mrf.mxu3 }
 0xd30   :  { %v2275_v31 = vadd.f32 %v2274_v45, %v2202_v58  ;;  %2514 = vmatmul.bf16.gmra.mxu2 %v2335_v34 }
 0xd32   :  { %v2322_v25 = vmax.f32 %v2275_v31, 0.0 }
 0xd34   :  { %v2334_v22 = vpack.c.bf16 %v2322_v25, %v2320_v7 }
 0xd36   :  { %2485 = vmatmul.bf16.gmra.mxu1 %v2334_v22 }
 0xd43   :  { %v2306_v3 = vpop.f32.mrf.mxu1 }
 0xd44   :  { %v2307_v19 = vadd.f32 %v2306_v3, %v2203_v51 }
 0xd46   :  { %v2325_v32 = vmax.f32 %v2307_v19, 0.0 }
 0xd49   :  { %v2277_v57 = vpop.f32.mrf.mxu3 }
 0xd4a   :  { %v2278_v11 = vadd.f32 %v2277_v57, %v2202_v58 }
 0xd4b   :  { %v2308_v50 = vpop.f32.mrf.mxu1 }
 0xd4c   :  { %v2309_v36 = vadd.f32 %v2308_v50, %v2203_v51  ;;  %v2324_v1 = vmax.f32 %v2278_v11, 0.0 }
 0xd4e   :  { %v2327_v33 = vmax.f32 %v2309_v36, 0.0 }
 0xd50   :  { %v2337_v54 = vpack.c.bf16 %v2327_v33, %v2325_v32 }
 0xd51   :  { %v2279_v26 = vpop.f32.mrf.mxu3 }
 0xd52   :  { %v2280_v38 = vadd.f32 %v2279_v26, %v2202_v58  ;;  %2519 = vmatmul.bf16.gmra.mxu2 %v2337_v54 }
 0xd54   :  { %v2326_v6 = vmax.f32 %v2280_v38, 0.0 }
 0xd56   :  { %v2336_v18 = vpack.c.bf16 %v2326_v6, %v2324_v1 }
 0xd58   :  { %2490 = vmatmul.bf16.gmra.mxu1 %v2336_v18 }
 0xd7d   :  { %v2311_v60 = vpop.f32.mrf.mxu1 }
 0xd7e   :  { %v2312_v63 = vadd.f32 %v2311_v60, %v2203_v51 }
 0xd80   :  { %v2329_v41 = vmax.f32 %v2312_v63, 0.0 }
 0xd83   :  { %v2282_v27 = vpop.f32.mrf.mxu3 }
 0xd84   :  { %v2283_v15 = vadd.f32 %v2282_v27, %v2202_v58 }
 0xd85   :  { %v2313_v17 = vpop.f32.mrf.mxu1 }
 0xd86   :  { %v2314_v42 = vadd.f32 %v2313_v17, %v2203_v51  ;;  %v2328_v4 = vmax.f32 %v2283_v15, 0.0 }
 0xd88   :  { %v2331_v21 = vmax.f32 %v2314_v42, 0.0 }
 0xd8a   :  { %v2339_v46 = vpack.c.bf16 %v2331_v21, %v2329_v41 }
 0xd8b   :  { %v2284_v44 = vpop.f32.mrf.mxu3 }
 0xd8c   :  { %v2285_v40 = vadd.f32 %v2284_v44, %v2202_v58  ;;  %2524 = vmatmul.bf16.gmra.mxu2 %v2339_v46 }
 0xd8e   :  { %v2330_v48 = vmax.f32 %v2285_v40, 0.0 }
 0xd90   :  { %v2338_v13 = vpack.c.bf16 %v2330_v48, %v2328_v4 }
 0xd92   :  { %2495 = vmatmul.bf16.gmra.mxu1 %v2338_v13 }
 0xd94   :  { %v2481_v23 = vpop.f32.mrf.mxu1  ;;  %v2510_v61 = vpop.f32.mrf.mxu2 }
 0xd95   :  { %v2482_v49 = vadd.f32 %v5916_v35, %v2481_v23 }
 0xd97   :  { %v2511_v9 = vadd.f32 %v2510_v61, %v2482_v49 }
 0xd99   :  { %v7512_v51 = vadd.f32 %v2511_v9, %v7256_v16 }
 0xd9b   :  { %v2542_v24 = vsel %vm168_vm0, %v7512_v51, 0.0 }
 0xd9c   :  { %v2483_v58 = vpop.f32.mrf.mxu1  ;;  %2543 = vadd.xlane.f32.xlu1 %v2542_v24  ;;  %v2512_v47 = vpop.f32.mrf.mxu2 }
 0xd9d   :  { %v2484_v8 = vadd.f32 %v5916_v35, %v2483_v58 }
 0xd9f   :  { %v2513_v43 = vadd.f32 %v2512_v47, %v2484_v8 }
 0xda1   :  { %v7517_v59 = vadd.f32 %v2513_v43, %v7263_v14 }
 0xda3   :  { %v2545_v55 = vsel %vm168_vm0, %v7517_v59, 0.0 }
 0xda4   :  { %2546 = vadd.xlane.f32.xlu2 %v2545_v55 }
 0xdb3   :  { %v2486_v62 = vpop.f32.mrf.mxu1  ;;  %v2515_v30 = vpop.f32.mrf.mxu2 }
 0xdb4   :  { %v2487_v0 = vadd.f32 %v5916_v35, %v2486_v62 }
 0xdb6   :  { %v2516_v16 = vadd.f32 %v2515_v30, %v2487_v0 }
 0xdb8   :  { %v7522_v2 = vadd.f32 %v2516_v16, %v7270_v53 }
 0xdba   :  { %v2548_v39 = vsel %vm168_vm0, %v7522_v2, 0.0 }
 0xdbb   :  { %v2488_v52 = vpop.f32.mrf.mxu1  ;;  %2549 = vadd.xlane.f32.xlu0 %v2548_v39  ;;  %v2517_v45 = vpop.f32.mrf.mxu2 }
 0xdbc   :  { %v2489_v34 = vadd.f32 %v5916_v35, %v2488_v52 }
 0xdbe   :  { %v2518_v14 = vadd.f32 %v2517_v45, %v2489_v34  ;;  %v5451_v45 = vld [vmem:[%s8536_s3 + $0x70] sm:$0xf] }
 0xdc0   :  { %v7527_v31 = vadd.f32 %v2518_v14, %v7277_v12  ;;  %v5734_v14 = vld [vmem:[%s8536_s3 + $0x74] sm:$0xf0] }
 0xdc2   :  { %v2551_v7 = vsel %vm168_vm0, %v7527_v31, 0.0 }
 0xdc3   :  { %2552 = vadd.xlane.f32.xlu1 %v2551_v7  ;;  %v5733_v7 = vld [vmem:[%s8536_s3 + $0x74] sm:$0xf] }
 0xdd5   :  { %v2491_v25 = vpop.f32.mrf.mxu1  ;;  %v2520_v22 = vpop.f32.mrf.mxu2 }
 0xdd6   :  { %v2492_v3 = vadd.f32 %v5916_v35, %v2491_v25  ;;  %v5452_v25 = vor.u32 %v5734_v14, %v5451_v45 }
 0xdd8   :  { %v2521_v53 = vadd.f32 %v2520_v22, %v2492_v3  ;;  %v5453_v22 = vld [vmem:[%s8536_s3 + $0x78] sm:$0xf0]  ;;  %2809 = vmatpush.bf16.msra.mxu3 %v5452_v25 }
 0xdd9   :  { %v5456_v3 = vor.u32 %v5733_v7, %v5453_v22 }
 0xdda   :  { %v7532_v57 = vadd.f32 %v2521_v53, %v7284_v10  ;;  %v5443_v53 = vld [vmem:[%s8536_s3 + $0x60] sm:$0xf] }
 0xddb   :  { %2838 = vmatpush.bf16.msrb.mxu0 %v5456_v3  ;;  %v7657_v3 = vld [vmem:[#allocation2 + $0x1] ss:$0 sm:$0xff] }
 0xddc   :  { %v2554_v19 = vsel %vm168_vm0, %v7532_v57, 0.0 }
 0xddd   :  { %v2493_v50 = vpop.f32.mrf.mxu1  ;;  %2555 = vadd.xlane.f32.xlu2 %v2554_v19  ;;  %v2522_v32 = vpop.f32.mrf.mxu2  ;;  %v5732_v19 = vld [vmem:[%s8536_s3 + $0x64] sm:$0xf0] }
 0xdde   :  { %v2494_v36 = vadd.f32 %v5916_v35, %v2493_v50  ;;  %v5731_v50 = vld [vmem:[%s8536_s3 + $0x64] sm:$0xf] }
 0xde0   :  { %v2523_v12 = vadd.f32 %v2522_v32, %v2494_v36  ;;  %v5444_v36 = vor.u32 %v5732_v19, %v5443_v53  ;;  %v5445_v32 = vld [vmem:[%s8536_s3 + $0x68] sm:$0xf0] }
 0xde2   :  { %v7537_v33 = vadd.f32 %v2523_v12, %v7291_v28  ;;  %v5448_v12 = vor.u32 %v5731_v50, %v5445_v32  ;;  %2810 = vmatpush.bf16.msra.mxu3 %v5444_v36  ;;  %v7660_v36 = vld [vmem:[#allocation5 + $0x1] ss:$0 sm:$0xff] }
 0xde4   :  { %v2557_v11 = vsel %vm168_vm0, %v7537_v33, 0.0  ;;  %2839 = vmatpush.bf16.msrb.mxu0 %v5448_v12 }
 0xde5   :  { %2558 = vadd.xlane.f32.xlu0 %v2557_v11  ;;  %v5435_v11 = vld [vmem:[%s8536_s3 + $0x50] sm:$0xf] }
 0xe0f   :  { %v2544_v54 = vpop.xlane.xlu1 %2543  ;;  %v2496_v26 = vpop.f32.mrf.mxu1 }
 0xe10   :  { %v2566_v10 = vmul.f32 %v2544_v54, %v6618_v20  ;;  %v2497_v38 = vadd.f32 %v5916_v35, %v2496_v26  ;;  %v2525_v1 = vpop.f32.mrf.mxu2  ;;  %v5730_v54 = vld [vmem:[%s8536_s3 + $0x54] sm:$0xf0]  ;;  %v5729_v26 = vld [vmem:[%s8536_s3 + $0x54] sm:$0xf] }
 0xe12   :  { %v7543_v6 = vsub.f32 %v7512_v51, %v2566_v10  ;;  %v2526_v18 = vadd.f32 %v2525_v1, %v2497_v38  ;;  %v5436_v10 = vor.u32 %v5730_v54, %v5435_v11  ;;  %v5437_v38 = vld [vmem:[%s8536_s3 + $0x58] sm:$0xf0] }
 0xe14   :  { %v7546_v60 = vadd.f32 %v2526_v18, %v7298_v37  ;;  %v2582_v28 = vmul.f32 %v7543_v6, %v7543_v6  ;;  %2811 = vmatpush.bf16.msra.mxu3 %v5436_v10 }
 0xe16   :  { %v2590_v27 = vsel %vm168_vm0, %v2582_v28, 0.0  ;;  %v2560_v63 = vsel %vm168_vm0, %v7546_v60, 0.0  ;;  %v5440_v28 = vor.u32 %v5729_v26, %v5437_v38 }
 0xe17   :  { %v2547_v17 = vpop.xlane.xlu2 %2546  ;;  %2591 = vadd.xlane.f32.xlu1 %v2590_v27  ;;  %v2498_v42 = vpop.f32.mrf.mxu1  ;;  %2561 = vadd.xlane.f32.xlu0 %v2560_v63 }
 0xe18   :  { %v2567_v41 = vmul.f32 %v2547_v17, %v6618_v20  ;;  %v2499_v21 = vadd.f32 %v5916_v35, %v2498_v42  ;;  %v2527_v15 = vpop.f32.mrf.mxu2  ;;  %2840 = vmatpush.bf16.msrb.mxu0 %v5440_v28  ;;  %v5427_v17 = vld [vmem:[%s8536_s3 + $0x40] sm:$0xf]  ;;  %v5728_v42 = vld [vmem:[%s8536_s3 + $0x44] sm:$0xf0] }
 0xe1a   :  { %v7555_v46 = vsub.f32 %v7517_v59, %v2567_v41  ;;  %v2528_v37 = vadd.f32 %v2527_v15, %v2499_v21  ;;  %v5727_v41 = vld [vmem:[%s8536_s3 + $0x44] sm:$0xf] }
 0xe1c   :  { %v7558_v44 = vadd.f32 %v2528_v37, %v7313_v56  ;;  %v2583_v40 = vmul.f32 %v7555_v46, %v7555_v46  ;;  %v5428_v37 = vor.u32 %v5728_v42, %v5427_v17 }
 0xe1e   :  { %v2593_v4 = vsel %vm168_vm0, %v2583_v40, 0.0  ;;  %v2563_v48 = vsel %vm168_vm0, %v7558_v44, 0.0  ;;  %v5429_v40 = vld [vmem:[%s8536_s3 + $0x48] sm:$0xf0]  ;;  %2812 = vmatpush.bf16.msra.mxu3 %v5428_v37 }
 0xe1f   :  { %2594 = vadd.xlane.f32.xlu2 %v2593_v4  ;;  %2564 = vadd.xlane.f32.xlu1 %v2563_v48  ;;  %v5432_v4 = vor.u32 %v5727_v41, %v5429_v40 }
 0xe21   :  { %2841 = vmatpush.bf16.msrb.mxu0 %v5432_v4 }
 0xe2e   :  { %v2550_v13 = vpop.xlane.xlu0 %2549 }
 0xe2f   :  { %v2568_v35 = vmul.f32 %v2550_v13, %v6618_v20 }
 0xe31   :  { %v7567_v23 = vsub.f32 %v7522_v2, %v2568_v35 }
 0xe33   :  { %v2584_v56 = vmul.f32 %v7567_v23, %v7567_v23 }
 0xe35   :  { %v2596_v61 = vsel %vm168_vm0, %v2584_v56, 0.0 }
 0xe36   :  { %2597 = vadd.xlane.f32.xlu2 %v2596_v61  ;;  %v2553_v49 = vpop.xlane.xlu1 %2552 }
 0xe37   :  { %v2569_v9 = vmul.f32 %v2553_v49, %v6618_v20 }
 0xe39   :  { %v7574_v24 = vsub.f32 %v7527_v31, %v2569_v9 }
 0xe3b   :  { %v2585_v58 = vmul.f32 %v7574_v24, %v7574_v24 }
 0xe3d   :  { %v2599_v8 = vsel %vm168_vm0, %v2585_v58, 0.0 }
 0xe3e   :  { %2600 = vadd.xlane.f32.xlu0 %v2599_v8 }
 0xe50   :  { %v2556_v47 = vpop.xlane.xlu2 %2555 }
 0xe51   :  { %v2570_v43 = vmul.f32 %v2556_v47, %v6618_v20 }
 0xe53   :  { %v7581_v55 = vsub.f32 %v7532_v57, %v2570_v43 }
 0xe55   :  { %v2586_v62 = vmul.f32 %v7581_v55, %v7581_v55 }
 0xe57   :  { %v2602_v30 = vsel %vm168_vm0, %v2586_v62, 0.0 }
 0xe58   :  { %v2559_v0 = vpop.xlane.xlu0 %2558  ;;  %2603 = vadd.xlane.f32.xlu1 %v2602_v30 }
 0xe59   :  { %v2571_v16 = vmul.f32 %v2559_v0, %v6618_v20 }
 0xe5b   :  { %v7588_v39 = vsub.f32 %v7537_v33, %v2571_v16 }
 0xe5d   :  { %v2587_v52 = vmul.f32 %v7588_v39, %v7588_v39 }
 0xe5f   :  { %v2605_v34 = vsel %vm168_vm0, %v2587_v52, 0.0 }
 0xe60   :  { %2606 = vadd.xlane.f32.xlu2 %v2605_v34 }
 0xe8a   :  { %v2592_v1 = vpop.xlane.xlu1 %2591  ;;  %v2562_v18 = vpop.xlane.xlu0 %2561 }
 0xe8b   :  { %v2614_v27 = vmul.f32 %v2592_v1, %v6618_v20  ;;  %v2572_v63 = vmul.f32 %v2562_v18, %v6618_v20 }
 0xe8d   :  { %v2622_v21 = vadd.f32 1e-05, %v2614_v27  ;;  %v7641_v15 = vsub.f32 %v7546_v60, %v2572_v63 }
 0xe8f   :  { %6088 = vrsqrt.f32 %v2622_v21  ;;  %v2588_v48 = vmul.f32 %v7641_v15, %v7641_v15  ;;  %vm2636_vm2 = vweird.f32 %v2622_v21 }
 0xe91   :  { %v2608_v13 = vsel %vm168_vm0, %v2588_v48, 0.0 }
 0xe92   :  { %v2595_v35 = vpop.xlane.xlu2 %2594  ;;  %v2565_v56 = vpop.xlane.xlu1 %2564  ;;  %2609 = vadd.xlane.f32.xlu0 %v2608_v13 }
 0xe93   :  { %v2615_v61 = vmul.f32 %v2595_v35, %v6618_v20  ;;  %v2573_v49 = vmul.f32 %v2565_v56, %v6618_v20 }
 0xe95   :  { %v6089_v9 = vpop.eup %6088  ;;  %v2623_v58 = vadd.f32 1e-05, %v2615_v61  ;;  %v7652_v8 = vsub.f32 %v7558_v44, %v2573_v49 }
 0xe96   :  { %v2631_v47 = vmul.f32 %v6089_v9, %v2622_v21  ;;  %vm2637_vm1 = vweird.f32 %v6089_v9 }
 0xe97   :  { %6090 = vrsqrt.f32 %v2623_v58  ;;  %v2589_v43 = vmul.f32 %v7652_v8, %v7652_v8  ;;  %vm2638_vm3 = vmor %vm2636_vm2, %vm2637_vm1  ;;  %vm2646_vm5 = vweird.f32 %v2623_v58 }
 0xe98   :  { %v2632_v62 = vmul.f32 %v6089_v9, %v2631_v47 }
 0xe99   :  { %v2611_v30 = vsel %vm168_vm0, %v2589_v43, 0.0 }
 0xe9a   :  { %v2633_v0 = vmul.f32 0.5, %v2632_v62  ;;  %2612 = vadd.xlane.f32.xlu1 %v2611_v30 }
 0xe9c   :  { %v2634_v16 = vsub.f32 1.5, %v2633_v0 }
 0xe9d   :  { %v6091_v52 = vpop.eup %6090 }
 0xe9e   :  { %v2635_v34 = vmul.f32 %v6089_v9, %v2634_v16  ;;  %v2641_v45 = vmul.f32 %v6091_v52, %v2623_v58  ;;  %vm2647_vm4 = vweird.f32 %v6091_v52 }
 0xe9f   :  { %vm2648_vm6 = vmor %vm2646_vm5, %vm2647_vm4 }
 0xea0   :  { %v2642_v14 = vmul.f32 %v6091_v52, %v2641_v45  ;;  %v2639_v7 = vsel %vm2638_vm3, %v6089_v9, %v2635_v34 }
 0xea1   :  { %v2710_v53 = vmul.f32 %v2639_v7, %v7543_v6 }
 0xea2   :  { %v2643_v25 = vmul.f32 0.5, %v2642_v14 }
 0xea3   :  { %v2721_v32 = vmul.f32 %v7657_v3, %v2710_v53 }
 0xea4   :  { %v2644_v22 = vsub.f32 1.5, %v2643_v25 }
 0xea5   :  { %v2732_v38 = vadd.f32 %v7660_v36, %v2721_v32 }
 0xea6   :  { %v2645_v19 = vmul.f32 %v6091_v52, %v2644_v22 }
 0xea8   :  { %v2649_v50 = vsel %vm2648_vm6, %v6091_v52, %v2645_v19 }
 0xea9   :  { %v2711_v12 = vmul.f32 %v2649_v50, %v7555_v46  ;;  %v2598_v11 = vpop.xlane.xlu2 %2597 }
 0xeaa   :  { %v2616_v54 = vmul.f32 %v2598_v11, %v6618_v20 }
 0xeab   :  { %v2722_v26 = vmul.f32 %v7657_v3, %v2711_v12 }
 0xeac   :  { %v2624_v10 = vadd.f32 1e-05, %v2616_v54 }
 0xead   :  { %v2733_v6 = vadd.f32 %v7660_v36, %v2722_v26 }
 0xeae   :  { %6092 = vrsqrt.f32 %v2624_v10  ;;  %vm2656_vm8 = vweird.f32 %v2624_v10 }
 0xeaf   :  { %v2740_v1 = vpack.c.bf16 %v2733_v6, %v2732_v38 }
 0xeb1   :  { %5457 = vmatmul.msk.bf16.vlgmr.msra.gmra.mxu3 %vm168_vm0, %v2740_v1  ;;  %5461 = vmatmul.msk.bf16.vlgmr.msrb.gmra.mxu0 %vm168_vm0, %v2740_v1  ;;  %v2601_v18 = vpop.xlane.xlu0 %2600 }
 0xeb2   :  { %v2617_v28 = vmul.f32 %v2601_v18, %v6618_v20 }
 0xeb4   :  { %v6093_v46 = vpop.eup %6092  ;;  %v2625_v27 = vadd.f32 1e-05, %v2617_v28 }
 0xeb5   :  { %v2651_v63 = vmul.f32 %v6093_v46, %v2624_v10  ;;  %vm2657_vm7 = vweird.f32 %v6093_v46 }
 0xeb6   :  { %6094 = vrsqrt.f32 %v2625_v27  ;;  %vm2658_vm9 = vmor %vm2656_vm8, %vm2657_vm7  ;;  %vm2666_vm12 = vweird.f32 %v2625_v27 }
 0xeb7   :  { %v2652_v17 = vmul.f32 %v6093_v46, %v2651_v63 }
 0xeb9   :  { %v2653_v42 = vmul.f32 0.5, %v2652_v17 }
 0xebb   :  { %v2654_v41 = vsub.f32 1.5, %v2653_v42 }
 0xebc   :  { %v6095_v21 = vpop.eup %6094 }
 0xebd   :  { %v2655_v37 = vmul.f32 %v6093_v46, %v2654_v41  ;;  %v2661_v40 = vmul.f32 %v6095_v21, %v2625_v27  ;;  %vm2667_vm10 = vweird.f32 %v6095_v21 }
 0xebe   :  { %vm2668_vm13 = vmor %vm2666_vm12, %vm2667_vm10 }
 0xebf   :  { %v2662_v4 = vmul.f32 %v6095_v21, %v2661_v40  ;;  %v2659_v48 = vsel %vm2658_vm9, %v6093_v46, %v2655_v37 }
 0xec0   :  { %v2712_v56 = vmul.f32 %v2659_v48, %v7567_v23 }
 0xec1   :  { %v2663_v13 = vmul.f32 0.5, %v2662_v4 }
 0xec2   :  { %v2723_v58 = vmul.f32 %v7657_v3, %v2712_v56 }
 0xec3   :  { %v2664_v35 = vsub.f32 1.5, %v2663_v13 }
 0xec4   :  { %v2734_v30 = vadd.f32 %v7660_v36, %v2723_v58 }
 0xec5   :  { %v2665_v61 = vmul.f32 %v6095_v21, %v2664_v35 }
 0xec7   :  { %v2669_v49 = vsel %vm2668_vm13, %v6095_v21, %v2665_v61 }
 0xec8   :  { %v2713_v9 = vmul.f32 %v2669_v49, %v7574_v24 }
 0xeca   :  { %v2724_v47 = vmul.f32 %v7657_v3, %v2713_v9 }
 0xecb   :  { %v2604_v43 = vpop.xlane.xlu1 %2603 }
 0xecc   :  { %v2618_v62 = vmul.f32 %v2604_v43, %v6618_v20  ;;  %v2735_v0 = vadd.f32 %v7660_v36, %v2724_v47 }
 0xece   :  { %v2626_v16 = vadd.f32 1e-05, %v2618_v62  ;;  %v2741_v52 = vpack.c.bf16 %v2735_v0, %v2734_v30 }
 0xed0   :  { %6096 = vrsqrt.f32 %v2626_v16  ;;  %5458 = vmatmul.msk.bf16.gmra.mxu3 %vm168_vm0, %v2741_v52  ;;  %5462 = vmatmul.msk.bf16.gmra.mxu0 %vm168_vm0, %v2741_v52  ;;  %vm2676_vm2 = vweird.f32 %v2626_v16 }
 0xed3   :  { %v2607_v23 = vpop.xlane.xlu2 %2606 }
 0xed4   :  { %v2619_v24 = vmul.f32 %v2607_v23, %v6618_v20 }
 0xed6   :  { %v6097_v34 = vpop.eup %6096  ;;  %v2627_v45 = vadd.f32 1e-05, %v2619_v24 }
 0xed7   :  { %v2671_v14 = vmul.f32 %v6097_v34, %v2626_v16  ;;  %vm2677_vm1 = vweird.f32 %v6097_v34 }
 0xed8   :  { %6098 = vrsqrt.f32 %v2627_v45  ;;  %vm2678_vm3 = vmor %vm2676_vm2, %vm2677_vm1  ;;  %vm2686_vm5 = vweird.f32 %v2627_v45 }
 0xed9   :  { %v2672_v7 = vmul.f32 %v6097_v34, %v2671_v14 }
 0xedb   :  { %v2673_v25 = vmul.f32 0.5, %v2672_v7 }
 0xedd   :  { %v2674_v22 = vsub.f32 1.5, %v2673_v25 }
 0xede   :  { %v6099_v53 = vpop.eup %6098 }
 0xedf   :  { %v2675_v19 = vmul.f32 %v6097_v34, %v2674_v22  ;;  %v2681_v50 = vmul.f32 %v6099_v53, %v2627_v45  ;;  %vm2687_vm4 = vweird.f32 %v6099_v53 }
 0xee0   :  { %vm2688_vm6 = vmor %vm2686_vm5, %vm2687_vm4 }
 0xee1   :  { %v2682_v32 = vmul.f32 %v6099_v53, %v2681_v50  ;;  %v2679_v12 = vsel %vm2678_vm3, %v6097_v34, %v2675_v19 }
 0xee2   :  { %v2714_v26 = vmul.f32 %v2679_v12, %v7581_v55 }
 0xee3   :  { %v2683_v11 = vmul.f32 0.5, %v2682_v32 }
 0xee4   :  { %v2725_v1 = vmul.f32 %v7657_v3, %v2714_v26 }
 0xee5   :  { %v2684_v54 = vsub.f32 1.5, %v2683_v11 }
 0xee6   :  { %v2736_v28 = vadd.f32 %v7660_v36, %v2725_v1 }
 0xee7   :  { %v2685_v10 = vmul.f32 %v6099_v53, %v2684_v54 }
 0xee9   :  { %v2689_v38 = vsel %vm2688_vm6, %v6099_v53, %v2685_v10 }
 0xeea   :  { %v2715_v6 = vmul.f32 %v2689_v38, %v7588_v39 }
 0xeec   :  { %v2726_v18 = vmul.f32 %v7657_v3, %v2715_v6 }
 0xeee   :  { %v2737_v46 = vadd.f32 %v7660_v36, %v2726_v18 }
 0xef0   :  { %v2742_v27 = vpack.c.bf16 %v2737_v46, %v2736_v28 }
 0xef2   :  { %5459 = vmatmul.msk.bf16.gmra.mxu3 %vm168_vm0, %v2742_v27  ;;  %5463 = vmatmul.msk.bf16.gmra.mxu0 %vm168_vm0, %v2742_v27 }
 0xf05   :  { %v2610_v55 = vpop.xlane.xlu0 %2609 }
 0xf06   :  { %v2620_v63 = vmul.f32 %v2610_v55, %v6618_v20 }
 0xf08   :  { %v2628_v17 = vadd.f32 1e-05, %v2620_v63 }
 0xf0a   :  { %6100 = vrsqrt.f32 %v2628_v17  ;;  %vm2696_vm8 = vweird.f32 %v2628_v17 }
 0xf0d   :  { %v2613_v42 = vpop.xlane.xlu1 %2612 }
 0xf0e   :  { %v2621_v39 = vmul.f32 %v2613_v42, %v6618_v20 }
 0xf10   :  { %v6101_v41 = vpop.eup %6100  ;;  %v2629_v21 = vadd.f32 1e-05, %v2621_v39 }
 0xf11   :  { %v2691_v37 = vmul.f32 %v6101_v41, %v2628_v17  ;;  %vm2697_vm7 = vweird.f32 %v6101_v41 }
 0xf12   :  { %6102 = vrsqrt.f32 %v2629_v21  ;;  %vm2698_vm9 = vmor %vm2696_vm8, %vm2697_vm7  ;;  %vm2706_vm12 = vweird.f32 %v2629_v21 }
 0xf13   :  { %v2692_v40 = vmul.f32 %v6101_v41, %v2691_v37 }
 0xf15   :  { %v2693_v4 = vmul.f32 0.5, %v2692_v40 }
 0xf17   :  { %v2694_v48 = vsub.f32 1.5, %v2693_v4 }
 0xf18   :  { %v6103_v13 = vpop.eup %6102 }
 0xf19   :  { %v2695_v35 = vmul.f32 %v6101_v41, %v2694_v48  ;;  %v2701_v56 = vmul.f32 %v6103_v13, %v2629_v21  ;;  %vm2707_vm10 = vweird.f32 %v6103_v13 }
 0xf1a   :  { %vm2708_vm13 = vmor %vm2706_vm12, %vm2707_vm10 }
 0xf1b   :  { %v2702_v61 = vmul.f32 %v6103_v13, %v2701_v56  ;;  %v2699_v49 = vsel %vm2698_vm9, %v6101_v41, %v2695_v35 }
 0xf1c   :  { %v2716_v47 = vmul.f32 %v2699_v49, %v7641_v15 }
 0xf1d   :  { %v2703_v9 = vmul.f32 0.5, %v2702_v61 }
 0xf1e   :  { %v2727_v0 = vmul.f32 %v7657_v3, %v2716_v47 }
 0xf1f   :  { %v2704_v58 = vsub.f32 1.5, %v2703_v9 }
 0xf20   :  { %v2738_v52 = vadd.f32 %v7660_v36, %v2727_v0 }
 0xf21   :  { %v2705_v43 = vmul.f32 %v6103_v13, %v2704_v58 }
 0xf23   :  { %v2709_v62 = vsel %vm2708_vm13, %v6103_v13, %v2705_v43 }
 0xf24   :  { %v2717_v30 = vmul.f32 %v2709_v62, %v7652_v8 }
 0xf26   :  { %v2728_v16 = vmul.f32 %v7657_v3, %v2717_v30 }
 0xf28   :  { %v2739_v23 = vadd.f32 %v7660_v36, %v2728_v16 }
 0xf2a   :  { %v2743_v24 = vpack.c.bf16 %v2739_v23, %v2738_v52 }
 0xf2c   :  { %5460 = vmatmul.msk.bf16.gmra.mxu3 %vm168_vm0, %v2743_v24  ;;  %5464 = vmatmul.msk.bf16.gmra.mxu0 %vm168_vm0, %v2743_v24 }
 0xf2e   :  { %v2843_v15 = vpop.f32.mrf.mxu0 }
 0xf2f   :  { %v2871_v45 = vpack.c.bf16 %v2843_v15, %v2843_v15 }
 0xf31   :  { %v3106_v25 = vunpack.c.l.b16 %v2871_v45 }
 0xf34   :  { %v2814_v34 = vpop.f32.mrf.mxu3 }
 0xf35   :  { %v2863_v22 = vpack.c.bf16 %v2814_v34, %v2814_v34 }
 0xf36   :  { %v2845_v14 = vpop.f32.mrf.mxu0 }
 0xf37   :  { %v2872_v7 = vpack.c.bf16 %v2845_v14, %v2845_v14  ;;  %v2881_v36 = vunpack.c.l.b16 %v2863_v22 }
 0xf39   :  { %v3107_v8 = vunpack.c.l.b16 %v2872_v7 }
 0xf3b   :  { %v7699_v53 = vpack.c.b16 %v3107_v8, %v3106_v25 }
 0xf3c   :  { %v2816_v3 = vpop.f32.mrf.mxu3 }
 0xf3d   :  { %v2864_v19 = vpack.c.bf16 %v2816_v3, %v2816_v3  ;;  %3120 = vmatpush.bf16.msrb.mxu3 %v7699_v53 }
 0xf3f   :  { %v2882_v50 = vunpack.c.l.b16 %v2864_v19 }
 0xf41   :  { %v7702_v32 = vpack.c.b16 %v2882_v50, %v2881_v36 }
 0xf43   :  { %2884 = vrot.lane.b32.xlu2 %v7702_v32, %s6458_s2 }
 0xf4d   :  { %v2848_v12 = vpop.f32.mrf.mxu0 }
 0xf4e   :  { %v2873_v54 = vpack.c.bf16 %v2848_v12, %v2848_v12 }
 0xf50   :  { %v3134_v38 = vunpack.c.l.b16 %v2873_v54 }
 0xf53   :  { %v2819_v11 = vpop.f32.mrf.mxu3 }
 0xf54   :  { %v2865_v1 = vpack.c.bf16 %v2819_v11, %v2819_v11 }
 0xf55   :  { %v2850_v26 = vpop.f32.mrf.mxu0 }
 0xf56   :  { %v2874_v10 = vpack.c.bf16 %v2850_v26, %v2850_v26  ;;  %v2908_v27 = vunpack.c.l.b16 %v2865_v1 }
 0xf58   :  { %v3135_v6 = vunpack.c.l.b16 %v2874_v10 }
 0xf5a   :  { %v7706_v18 = vpack.c.b16 %v3135_v6, %v3134_v38 }
 0xf5b   :  { %v2821_v28 = vpop.f32.mrf.mxu3 }
 0xf5c   :  { %v2866_v46 = vpack.c.bf16 %v2821_v28, %v2821_v28  ;;  %3148 = vmatpush.bf16.msra.mxu0 %v7706_v18 }
 0xf5e   :  { %v2909_v55 = vunpack.c.l.b16 %v2866_v46 }
 0xf60   :  { %v7709_v63 = vpack.c.b16 %v2909_v55, %v2908_v27 }
 0xf62   :  { %2911 = vrot.lane.b32.xlu0 %v7709_v63, %s6458_s2 }
 0xf6f   :  { %v2853_v62 = vpop.f32.mrf.mxu0 }
 0xf70   :  { %v2875_v16 = vpack.c.bf16 %v2853_v62, %v2853_v62 }
 0xf72   :  { %v3162_v23 = vunpack.c.l.b16 %v2875_v16 }
 0xf75   :  { %v2824_v17 = vpop.f32.mrf.mxu3 }
 0xf76   :  { %v2867_v42 = vpack.c.bf16 %v2824_v17, %v2824_v17 }
 0xf77   :  { %v2855_v30 = vpop.f32.mrf.mxu0 }
 0xf78   :  { %v2935_v21 = vunpack.c.l.b16 %v2867_v42  ;;  %v2876_v0 = vpack.c.bf16 %v2855_v30, %v2855_v30 }
 0xf7a   :  { %v3163_v52 = vunpack.c.l.b16 %v2876_v0 }
 0xf7c   :  { %v7727_v15 = vpack.c.b16 %v3163_v52, %v3162_v23 }
 0xf7d   :  { %v2826_v39 = vpop.f32.mrf.mxu3 }
 0xf7e   :  { %v2868_v41 = vpack.c.bf16 %v2826_v39, %v2826_v39 }
 0xf80   :  { %v2936_v37 = vunpack.c.l.b16 %v2868_v41 }
 0xf82   :  { %v7713_v40 = vpack.c.b16 %v2936_v37, %v2935_v21 }
 0xf84   :  { %2938 = vrot.lane.b32.xlu0 %v7713_v40, %s6458_s2 }
 0xf9d   :  { %v2885_v4 = vpop.permute.xlu2 %2884 }
 0xf9e   :  { %v2890_v48 = vsel %vm519_vm11, %v2885_v4, 0 }
 0xf9f   :  { %2899 = vmatpush.bf16.xpose.msrb.mxu1 %v2890_v48 }
 0xfa6   :  { %5465 = vmatmul.msk.bf16.vlgmr.msrb.gmra.mxu1 %vm519_vm11, %v7702_v32 }
 0xfa9   :  { %v2858_v45 = vpop.f32.mrf.mxu0 }
 0xfaa   :  { %v2877_v19 = vpack.c.bf16 %v2858_v45, %v2858_v45 }
 0xfac   :  { %v3190_v54 = vunpack.c.l.b16 %v2877_v19 }
 0xfaf   :  { %v2829_v13 = vpop.f32.mrf.mxu3 }
 0xfb0   :  { %v2869_v35 = vpack.c.bf16 %v2829_v13, %v2829_v13 }
 0xfb1   :  { %v2860_v25 = vpop.f32.mrf.mxu0 }
 0xfb2   :  { %v2962_v49 = vunpack.c.l.b16 %v2869_v35  ;;  %v2878_v3 = vpack.c.bf16 %v2860_v25, %v2860_v25 }
 0xfb4   :  { %v3191_v12 = vunpack.c.l.b16 %v2878_v3 }
 0xfb6   :  { %v7737_v38 = vpack.c.b16 %v3191_v12, %v3190_v54 }
 0xfb7   :  { %v2831_v56 = vpop.f32.mrf.mxu3 }
 0xfb8   :  { %v2870_v61 = vpack.c.bf16 %v2831_v56, %v2831_v56 }
 0xfba   :  { %v2963_v9 = vunpack.c.l.b16 %v2870_v61 }
 0xfbc   :  { %v7720_v58 = vpack.c.b16 %v2963_v9, %v2962_v49 }
 0xfbe   :  { %2965 = vrot.lane.b32.xlu1 %v7720_v58, %s6458_s2 }
 0xfd4   :  { %v2912_v47 = vpop.permute.xlu0 %2911 }
 0xfd5   :  { %v2917_v43 = vsel %vm519_vm11, %v2912_v47, 0 }
 0xfd6   :  { %2926 = vmatpush.bf16.xpose.msra.mxu1 %v2917_v43 }
 0xfdd   :  { %5466 = vmatmul.msk.bf16.vlgmr.msra.gmra.mxu1 %vm519_vm11, %v7709_v63 }
 0xff6   :  { %v2939_v24 = vpop.permute.xlu0 %2938 }
 0xff7   :  { %v2944_v34 = vsel %vm519_vm11, %v2939_v24, 0 }
 0xff8   :  { %2953 = vmatpush.bf16.xpose.msrb.mxu1 %v2944_v34 }
 0xfff   :  { %5467 = vmatmul.msk.bf16.vlgmr.msrb.gmra.mxu1 %vm519_vm11, %v7713_v40 }
0x1000   :  { %3176 = vmatpush.bf16.msra.mxu1 %v7727_v15 }
0x1023   :  { %v2901_v14 = vpop.f32.mrf.mxu1 }
0x1024   :  { %v2987_v7 = vmul.f32 0.125, %v2901_v14 }
0x1026   :  { %v2995_v8 = vadd.f32 %v2987_v7, %v6831_v5 }
0x1028   :  { %v3003_v22 = vsel %vm519_vm11, %v2995_v8, -inf }
0x1029   :  { %3004 = vmax.xlane.f32.xlu2 %v3003_v22 }
0x102b   :  { %v2903_v36 = vpop.f32.mrf.mxu1 }
0x102c   :  { %v2988_v50 = vmul.f32 0.125, %v2903_v36 }
0x102e   :  { %v2996_v11 = vadd.f32 %v2988_v50, %v6835_v29 }
0x1030   :  { %v2966_v26 = vpop.permute.xlu1 %2965  ;;  %v3006_v10 = vsel %vm519_vm11, %v2996_v11, -inf }
0x1031   :  { %v2971_v6 = vsel %vm519_vm11, %v2966_v26, 0  ;;  %3007 = vmax.xlane.f32.xlu0 %v3006_v10 }
0x1032   :  { %2980 = vmatpush.bf16.xpose.msra.mxu2 %v2971_v6 }
0x1039   :  { %5468 = vmatmul.msk.bf16.vlgmr.msra.gmra.mxu2 %vm519_vm11, %v7720_v58 }
0x103a   :  { %3204 = vmatpush.bf16.msrb.mxu2 %v7737_v38 }
0x105a   :  { %v2928_v1 = vpop.f32.mrf.mxu1 }
0x105b   :  { %v2989_v28 = vmul.f32 0.125, %v2928_v1 }
0x105d   :  { %v2997_v46 = vadd.f32 %v2989_v28, %v6831_v5 }
0x105f   :  { %v3009_v27 = vsel %vm519_vm11, %v2997_v46, -inf }
0x1060   :  { %3010 = vmax.xlane.f32.xlu1 %v3009_v27 }
0x1062   :  { %v2930_v55 = vpop.f32.mrf.mxu1 }
0x1063   :  { %v2990_v17 = vmul.f32 0.125, %v2930_v55 }
0x1065   :  { %v2998_v42 = vadd.f32 %v2990_v17, %v6835_v29 }
0x1067   :  { %v3012_v39 = vsel %vm519_vm11, %v2998_v42, -inf }
0x1068   :  { %3013 = vmax.xlane.f32.xlu2 %v3012_v39 }
0x107c   :  { %v2955_v41 = vpop.f32.mrf.mxu1 }
0x107d   :  { %v2991_v21 = vmul.f32 0.125, %v2955_v41 }
0x107f   :  { %v2999_v37 = vadd.f32 %v2991_v21, %v6831_v5 }
0x1081   :  { %v3015_v4 = vsel %vm519_vm11, %v2999_v37, -inf }
0x1082   :  { %3016 = vmax.xlane.f32.xlu1 %v3015_v4 }
0x1084   :  { %v2957_v48 = vpop.f32.mrf.mxu1 }
0x1085   :  { %v2992_v13 = vmul.f32 0.125, %v2957_v48 }
0x1087   :  { %v3000_v35 = vadd.f32 %v2992_v13, %v6835_v29 }
0x1089   :  { %v3018_v56 = vsel %vm519_vm11, %v3000_v35, -inf }
0x108a   :  { %3019 = vmax.xlane.f32.xlu2 %v3018_v56 }
0x109c   :  { %v3005_v61 = vpop.xlane.xlu2 %3004 }
0x109d   :  { %v3027_v49 = vsub.f32 %v2995_v8, %v3005_v61 }
0x109f   :  { %v3035_v9 = vmul.f32 1.442695, %v3027_v49 }
0x10a1   :  { %6104 = vpow2.f32 %v3035_v9 }
0x10a4   :  { %v3008_v62 = vpop.xlane.xlu0 %3007 }
0x10a5   :  { %v3028_v30 = vsub.f32 %v2996_v11, %v3008_v62 }
0x10a7   :  { %v7751_v47 = vpop.eup %6104  ;;  %v3037_v0 = vmul.f32 1.442695, %v3028_v30 }
0x10a8   :  { %v3051_v43 = vsel %vm519_vm11, %v7751_v47, 0.0 }
0x10a9   :  { %3052 = vadd.xlane.f32.xlu2 %v3051_v43  ;;  %6106 = vpow2.f32 %v3037_v0 }
0x10af   :  { %v6107_v14 = vpop.eup %6106 }
0x10b0   :  { %v3054_v8 = vsel %vm519_vm11, %v6107_v14, 0.0 }
0x10bc   :  { %v2982_v16 = vpop.f32.mrf.mxu2 }
0x10bd   :  { %v2993_v52 = vmul.f32 0.125, %v2982_v16 }
0x10bf   :  { %v3001_v23 = vadd.f32 %v2993_v52, %v6831_v5 }
0x10c1   :  { %3237 = vrot.lane.b32.xlu2 %v7709_v63, %s6462_s0  ;;  %v3021_v24 = vsel %vm519_vm11, %v3001_v23, -inf }
0x10c2   :  { %3022 = vmax.xlane.f32.xlu0 %v3021_v24 }
0x10c4   :  { %v2984_v34 = vpop.f32.mrf.mxu2 }
0x10c5   :  { %v2994_v45 = vmul.f32 0.125, %v2984_v34 }
0x10c7   :  { %v3002_v7 = vadd.f32 %v2994_v45, %v6835_v29 }
0x10c9   :  { %3235 = vrot.lane.b32.xlu2 %v7709_v63, %s6463_s17  ;;  %v3024_v25 = vsel %vm519_vm11, %v3002_v7, -inf }
0x10ca   :  { %3025 = vmax.xlane.f32.xlu1 %v3024_v25  ;;  %3055 = vadd.xlane.f32.xlu0 %v3054_v8 }
0x10d3   :  { %v3011_v22 = vpop.xlane.xlu1 %3010 }
0x10d4   :  { %v3029_v3 = vsub.f32 %v2997_v46, %v3011_v22 }
0x10d6   :  { %v3039_v19 = vmul.f32 1.442695, %v3029_v3 }
0x10d8   :  { %6108 = vpow2.f32 %v3039_v19 }
0x10db   :  { %v3014_v36 = vpop.xlane.xlu2 %3013 }
0x10dc   :  { %v3030_v50 = vsub.f32 %v2998_v42, %v3014_v36 }
0x10de   :  { %3213 = vrot.lane.b32.xlu0 %v7702_v32, %s6462_s0  ;;  %v3041_v12 = vmul.f32 1.442695, %v3030_v50  ;;  %v7768_v11 = vpop.eup %6108 }
0x10df   :  { %v3057_v54 = vsel %vm519_vm11, %v7768_v11, 0.0 }
0x10e0   :  { %6110 = vpow2.f32 %v3041_v12 }
0x10e3   :  { %3211 = vrot.lane.b32.xlu1 %v7702_v32, %s6463_s17 }
0x10e6   :  { %v7772_v26 = vpop.eup %6110 }
0x10e7   :  { %v3060_v6 = vsel %vm519_vm11, %v7772_v26, 0.0 }
0x10f2   :  { %3058 = vadd.xlane.f32.xlu2 %v3057_v54 }
0x10f5   :  { %v3017_v10 = vpop.xlane.xlu1 %3016 }
0x10f6   :  { %v3031_v1 = vsub.f32 %v2999_v37, %v3017_v10 }
0x10f8   :  { %v3043_v27 = vmul.f32 1.442695, %v3031_v1 }
0x10fa   :  { %3061 = vadd.xlane.f32.xlu2 %v3060_v6 }
0x10fd   :  { %v3020_v28 = vpop.xlane.xlu2 %3019 }
0x10fe   :  { %v3032_v46 = vsub.f32 %v3000_v35, %v3020_v28 }
0x1100   :  { %v3045_v55 = vmul.f32 1.442695, %v3032_v46 }
0x1102   :  { %6112 = vpow2.f32 %v3045_v55 }
0x1103   :  { %6114 = vpow2.f32 %v3043_v27 }
0x1108   :  { %v7776_v17 = vpop.eup %6112 }
0x1109   :  { %v7778_v42 = vpop.eup %6114  ;;  %v3066_v39 = vsel %vm519_vm11, %v7776_v17, 0.0 }
0x110a   :  { %3067 = vadd.xlane.f32.xlu2 %v3066_v39  ;;  %v3063_v41 = vsel %vm519_vm11, %v7778_v42, 0.0 }
0x110d   :  { %3064 = vadd.xlane.f32.xlu1 %v3063_v41 }
0x111c   :  { %v3053_v21 = vpop.xlane.xlu2 %3052 }
0x111d   :  { %6116 = vrcp.f32 %v3053_v21 }
0x1123   :  { %v6117_v49 = vpop.eup %6116 }
0x1124   :  { %v3238_v37 = vpop.permute.xlu2 %3237  ;;  %v3083_v30 = vmul.f32 %v6117_v49, %v7751_v47 }
0x1125   :  { %v3243_v4 = vsel %vm519_vm11, %v3238_v37, 0 }
0x1126   :  { %3283 = vrot.lane.b32.xlu1 %v7720_v58, %s6463_s17  ;;  %3252 = vmatpush.bf16.xpose.msrb.mxu0 %v3243_v4  ;;  %v3091_v52 = vpack.c.bf16 %v3083_v30, %v3083_v30 }
0x1128   :  { %v3101_v45 = vunpack.c.l.b16 %v3091_v52 }
0x112c   :  { %v3236_v3 = vpop.permute.xlu2 %3235 }
0x112e   :  { %3424 = vrot.lane.b32.xlu1 %v7699_v53, %s6463_s17 }
0x1135   :  { %v3023_v48 = vpop.xlane.xlu0 %3022 }
0x1136   :  { %v3033_v13 = vsub.f32 %v3001_v23, %v3023_v48 }
0x1138   :  { %v3047_v35 = vmul.f32 1.442695, %v3033_v13 }
0x113a   :  { %6118 = vpow2.f32 %v3047_v35 }
0x113d   :  { %v3026_v56 = vpop.xlane.xlu1 %3025  ;;  %v3056_v61 = vpop.xlane.xlu0 %3055 }
0x113e   :  { %v3034_v9 = vsub.f32 %v3002_v7, %v3026_v56  ;;  %6120 = vrcp.f32 %v3056_v61 }
0x1140   :  { %v7789_v43 = vpop.eup %6118  ;;  %v3049_v62 = vmul.f32 1.442695, %v3034_v9 }
0x1141   :  { %v3069_v0 = vsel %vm519_vm11, %v7789_v43, 0.0 }
0x1142   :  { %6122 = vpow2.f32 %v3049_v62  ;;  %3070 = vadd.xlane.f32.xlu2 %v3069_v0 }
0x1144   :  { %v6121_v16 = vpop.eup %6120 }
0x1145   :  { %v3084_v23 = vmul.f32 %v6121_v16, %v6107_v14 }
0x1147   :  { %v3092_v24 = vpack.c.bf16 %v3084_v23, %v3084_v23 }
0x1148   :  { %v7794_v34 = vpop.eup %6122 }
0x1149   :  { %v3102_v25 = vunpack.c.l.b16 %v3092_v24  ;;  %v3072_v7 = vsel %vm519_vm11, %v7794_v34, 0.0 }
0x114a   :  { %3073 = vadd.xlane.f32.xlu0 %v3072_v7 }
0x114b   :  { %v3103_v8 = vpack.c.b16 %v3102_v25, %v3101_v45 }
0x114d   :  { %5469 = vmatmul.msk.bf16.vlgmr.msrb.gmra.mxu3 %vm519_vm11, %v3103_v8 }
0x1150   :  { %v3214_v47 = vpop.permute.xlu0 %3213 }
0x1151   :  { %v3219_v22 = vsel %vm519_vm11, %v3214_v47, 0 }
0x1152   :  { %3228 = vmatpush.bf16.xpose.msra.mxu3 %v3219_v22 }
0x1155   :  { %v3212_v14 = vpop.permute.xlu1 %3211 }
0x115a   :  { %3261 = vrot.lane.b32.xlu2 %v7713_v40, %s6462_s0 }
0x115d   :  { %5473 = vmatmul.msk.bf16.vlgmr.msra.gmra.mxu3 %vm519_vm11, %v3212_v14 }
0x115e   :  { %3285 = vrot.lane.b32.xlu0 %v7720_v58, %s6462_s0 }
0x1162   :  { %3259 = vrot.lane.b32.xlu2 %v7713_v40, %s6463_s17 }
0x1165   :  { %v3059_v19 = vpop.xlane.xlu2 %3058 }
0x1166   :  { %3519 = vrot.lane.b32.xlu0 %v7702_v32, %s6465_s19  ;;  %6124 = vrcp.f32 %v3059_v19 }
0x116a   :  { %3521 = vrot.lane.b32.xlu2 %v7702_v32, %s6464_s18 }
0x116c   :  { %v6125_v50 = vpop.eup %6124 }
0x116d   :  { %v3062_v36 = vpop.xlane.xlu2 %3061  ;;  %v3085_v12 = vmul.f32 %v6125_v50, %v7768_v11 }
0x116e   :  { %6126 = vrcp.f32 %v3062_v36  ;;  %3545 = vrot.lane.b32.xlu0 %v7709_v63, %s6464_s18 }
0x116f   :  { %v3093_v10 = vpack.c.bf16 %v3085_v12, %v3085_v12 }
0x1171   :  { %v3129_v28 = vunpack.c.l.b16 %v3093_v10 }
0x1172   :  { %3449 = vrot.lane.b32.xlu2 %v7706_v18, %s6463_s17 }
0x1174   :  { %v6127_v54 = vpop.eup %6126 }
0x1175   :  { %v3086_v6 = vmul.f32 %v6127_v54, %v7772_v26 }
0x1177   :  { %v3094_v1 = vpack.c.bf16 %v3086_v6, %v3086_v6 }
0x1179   :  { %v3130_v46 = vunpack.c.l.b16 %v3094_v1 }
0x117b   :  { %v3131_v27 = vpack.c.b16 %v3130_v46, %v3129_v28 }
0x117d   :  { %5470 = vmatmul.msk.bf16.vlgmr.msra.gmra.mxu0 %vm519_vm11, %v3131_v27  ;;  %v3068_v55 = vpop.xlane.xlu2 %3067 }
0x117e   :  { %6128 = vrcp.f32 %v3068_v55 }
0x1180   :  { %v3065_v39 = vpop.xlane.xlu1 %3064 }
0x1181   :  { %6130 = vrcp.f32 %v3065_v39 }
0x1184   :  { %v6129_v41 = vpop.eup %6128 }
0x1185   :  { %v3088_v11 = vmul.f32 %v6129_v41, %v7776_v17 }
0x1187   :  { %v6131_v21 = vpop.eup %6130  ;;  %v3096_v37 = vpack.c.bf16 %v3088_v11, %v3088_v11 }
0x1188   :  { %v3087_v4 = vmul.f32 %v6131_v21, %v7778_v42 }
0x1189   :  { %v3158_v13 = vunpack.c.l.b16 %v3096_v37 }
0x118a   :  { %v3095_v48 = vpack.c.bf16 %v3087_v4, %v3087_v4 }
0x118c   :  { %v3157_v26 = vunpack.c.l.b16 %v3095_v48 }
0x118d   :  { %5474 = vmatmul.msk.bf16.vlgmr.msrb.gmra.mxu0 %vm519_vm11, %v3236_v3 }
0x118e   :  { %v3159_v35 = vpack.c.b16 %v3158_v13, %v3157_v26 }
0x1190   :  { %5471 = vmatmul.msk.bf16.vlgmr.msra.gmra.mxu1 %vm519_vm11, %v3159_v35 }
0x1198   :  { %v3284_v56 = vpop.permute.xlu1 %3283 }
0x11a0   :  { %v3425_v61 = vpop.permute.xlu1 %3424 }
0x11a1   :  { %3437 = vmatpush.bf16.msrb.mxu3 %v3425_v61 }
0x11b5   :  { %v3071_v49 = vpop.xlane.xlu2 %3070 }
0x11b6   :  { %6132 = vrcp.f32 %v3071_v49 }
0x11bc   :  { %v6133_v17 = vpop.eup %6132 }
0x11bd   :  { %v3262_v9 = vpop.permute.xlu2 %3261  ;;  %v3074_v62 = vpop.xlane.xlu0 %3073  ;;  %v3089_v42 = vmul.f32 %v6133_v17, %v7789_v43 }
0x11be   :  { %v3267_v30 = vsel %vm519_vm11, %v3262_v9, 0  ;;  %6134 = vrcp.f32 %v3074_v62 }
0x11bf   :  { %3276 = vmatpush.bf16.xpose.msrb.mxu1 %v3267_v30  ;;  %v3097_v16 = vpack.c.bf16 %v3089_v42, %v3089_v42 }
0x11c1   :  { %v3185_v45 = vunpack.c.l.b16 %v3097_v16 }
0x11c4   :  { %v6135_v0 = vpop.eup %6134 }
0x11c5   :  { %v3090_v52 = vmul.f32 %v6135_v0, %v7794_v34  ;;  %v3260_v23 = vpop.permute.xlu2 %3259 }
0x11c6   :  { %5475 = vmatmul.msk.bf16.vlgmr.msrb.gmra.mxu1 %vm519_vm11, %v3260_v23 }
0x11c7   :  { %v3098_v24 = vpack.c.bf16 %v3090_v52, %v3090_v52 }
0x11c9   :  { %v3186_v25 = vunpack.c.l.b16 %v3098_v24 }
0x11cb   :  { %v3187_v7 = vpack.c.b16 %v3186_v25, %v3185_v45 }
0x11cd   :  { %v3522_v8 = vpop.permute.xlu2 %3521  ;;  %5472 = vmatmul.msk.bf16.vlgmr.msrb.gmra.mxu2 %vm519_vm11, %v3187_v7 }
0x11ce   :  { %v3527_v47 = vsel %vm519_vm11, %v3522_v8, 0 }
0x11cf   :  { %3536 = vmatpush.bf16.xpose.msra.mxu3 %v3527_v47 }
0x11d0   :  { %v7828_v22 = vpop.f32.mrf.mxu3  ;;  %v3286_v43 = vpop.permute.xlu0 %3285 }
0x11d1   :  { %v3291_v14 = vsel %vm519_vm11, %v3286_v43, 0 }
0x11d2   :  { %3300 = vmatpush.bf16.xpose.msra.mxu2 %v3291_v14 }
0x11d5   :  { %v3450_v34 = vpop.permute.xlu2 %3449 }
0x11d6   :  { %3462 = vmatpush.bf16.msra.mxu0 %v3450_v34 }
0x11d8   :  { %v7831_v3 = vpop.f32.mrf.mxu3  ;;  %v7833_v19 = vpop.permute.xlu0 %3519 }
0x11dd   :  { %5476 = vmatmul.msk.bf16.vlgmr.msra.gmra.mxu2 %vm519_vm11, %v3284_v56 }
0x11e0   :  { %v3230_v36 = vpop.f32.mrf.mxu3  ;;  %v3546_v50 = vpop.permute.xlu0 %3545 }
0x11e1   :  { %v3307_v12 = vmul.f32 0.125, %v3230_v36  ;;  %v3551_v54 = vsel %vm519_vm11, %v3546_v50, 0 }
0x11e2   :  { %3560 = vmatpush.bf16.xpose.msrb.mxu0 %v3551_v54 }
0x11e3   :  { %v3315_v10 = vadd.f32 %v3307_v12, %v6831_v5 }
0x11e5   :  { %v3323_v6 = vsel %vm519_vm11, %v3315_v10, -inf }
0x11e6   :  { %3324 = vmax.xlane.f32.xlu2 %v3323_v6 }
0x11e8   :  { %v3232_v1 = vpop.f32.mrf.mxu3 }
0x11e9   :  { %v3308_v28 = vmul.f32 0.125, %v3232_v1 }
0x11eb   :  { %v3316_v46 = vadd.f32 %v3308_v28, %v6835_v29 }
0x11ed   :  { %v3326_v27 = vsel %vm519_vm11, %v3316_v46, -inf }
0x11ee   :  { %3327 = vmax.xlane.f32.xlu0 %v3326_v27 }
0x11fa   :  { %v7841_v55 = vpop.f32.mrf.mxu0 }
0x11fe   :  { %3499 = vrot.lane.b32.xlu2 %v7737_v38, %s6463_s17 }
0x1202   :  { %v7845_v39 = vpop.f32.mrf.mxu0 }
0x120a   :  { %v3254_v41 = vpop.f32.mrf.mxu0 }
0x120b   :  { %v3309_v11 = vmul.f32 0.125, %v3254_v41 }
0x120d   :  { %v3317_v21 = vadd.f32 %v3309_v11, %v6831_v5  ;;  %v7851_v35 = vpop.f32.mrf.mxu1 }
0x120f   :  { %v3329_v37 = vsel %vm519_vm11, %v3317_v21, -inf }
0x1210   :  { %3330 = vmax.xlane.f32.xlu1 %v3329_v37 }
0x1212   :  { %v3256_v4 = vpop.f32.mrf.mxu0 }
0x1213   :  { %v3310_v48 = vmul.f32 0.125, %v3256_v4 }
0x1215   :  { %v3318_v13 = vadd.f32 %v3310_v48, %v6835_v29  ;;  %v7853_v56 = vpop.f32.mrf.mxu1 }
0x1217   :  { %v3332_v26 = vsel %vm519_vm11, %v3318_v13, -inf }
0x1227   :  { %3333 = vmax.xlane.f32.xlu2 %v3332_v26 }
0x1243   :  { %v3278_v61 = vpop.f32.mrf.mxu1 }
0x1244   :  { %v3311_v49 = vmul.f32 0.125, %v3278_v61 }
0x1246   :  { %v3319_v9 = vadd.f32 %v3311_v49, %v6831_v5 }
0x1248   :  { %v3335_v62 = vsel %vm519_vm11, %v3319_v9, -inf }
0x1249   :  { %3336 = vmax.xlane.f32.xlu0 %v3335_v62 }
0x124b   :  { %v3280_v17 = vpop.f32.mrf.mxu1 }
0x124c   :  { %v3312_v30 = vmul.f32 0.125, %v3280_v17 }
0x124e   :  { %v3320_v42 = vadd.f32 %v3312_v30, %v6835_v29 }
0x1250   :  { %v7858_v0 = vpop.f32.mrf.mxu2  ;;  %v3338_v16 = vsel %vm519_vm11, %v3320_v42, -inf }
0x1251   :  { %3339 = vmax.xlane.f32.xlu1 %v3338_v16 }
0x1258   :  { %v7861_v52 = vpop.f32.mrf.mxu2 }
0x1259   :  { %v3325_v23 = vpop.xlane.xlu2 %3324 }
0x125a   :  { %v3347_v43 = vsub.f32 %v3315_v10, %v3325_v23 }
0x125c   :  { %v3355_v36 = vmul.f32 1.442695, %v3347_v43 }
0x1260   :  { %v3302_v24 = vpop.f32.mrf.mxu2 }
0x1261   :  { %v3313_v45 = vmul.f32 0.125, %v3302_v24  ;;  %v3500_v25 = vpop.permute.xlu2 %3499  ;;  %v3328_v7 = vpop.xlane.xlu0 %3327 }
0x1262   :  { %v3348_v8 = vsub.f32 %v3316_v46, %v3328_v7  ;;  %3512 = vmatpush.bf16.msrb.mxu2 %v3500_v25 }
0x1263   :  { %v3321_v47 = vadd.f32 %v3313_v45, %v6831_v5 }
0x1264   :  { %v3357_v14 = vmul.f32 1.442695, %v3348_v8 }
0x1265   :  { %v3341_v34 = vsel %vm519_vm11, %v3321_v47, -inf }
0x1266   :  { %6136 = vpow2.f32 %v3357_v14  ;;  %3342 = vmax.xlane.f32.xlu0 %v3341_v34 }
0x1267   :  { %6138 = vpow2.f32 %v3355_v36 }
0x1268   :  { %v3304_v50 = vpop.f32.mrf.mxu2 }
0x1269   :  { %v3314_v12 = vmul.f32 0.125, %v3304_v50 }
0x126a   :  { %3474 = vrot.lane.b32.xlu1 %v7727_v15, %s6463_s17 }
0x126b   :  { %v3322_v54 = vadd.f32 %v3314_v12, %v6835_v29 }
0x126c   :  { %v6137_v6 = vpop.eup %6136 }
0x126d   :  { %v3344_v1 = vsel %vm519_vm11, %v3322_v54, -inf  ;;  %v3374_v28 = vsel %vm519_vm11, %v6137_v6, 0.0  ;;  %v6139_v10 = vpop.eup %6138 }
0x126e   :  { %3345 = vmax.xlane.f32.xlu2 %v3344_v1  ;;  %3375 = vadd.xlane.f32.xlu0 %v3374_v28  ;;  %v3371_v46 = vsel %vm519_vm11, %v6139_v10, 0.0 }
0x1276   :  { %3372 = vadd.xlane.f32.xlu2 %v3371_v46 }
0x1282   :  { %3543 = vrot.lane.b32.xlu0 %v7709_v63, %s6465_s19 }
0x1283   :  { %v3331_v27 = vpop.xlane.xlu1 %3330 }
0x1284   :  { %v3349_v41 = vsub.f32 %v3317_v21, %v3331_v27 }
0x1286   :  { %v3359_v11 = vmul.f32 1.442695, %v3349_v41 }
0x1288   :  { %6140 = vpow2.f32 %v3359_v11 }
0x128e   :  { %3593 = vrot.lane.b32.xlu2 %v7720_v58, %s6464_s18  ;;  %v7875_v37 = vpop.eup %6140 }
0x128f   :  { %v3377_v4 = vsel %vm519_vm11, %v7875_v37, 0.0 }
0x1294   :  { %3378 = vadd.xlane.f32.xlu1 %v3377_v4 }
0x129a   :  { %v3334_v48 = vpop.xlane.xlu2 %3333 }
0x129b   :  { %v3350_v26 = vsub.f32 %v3318_v13, %v3334_v48 }
0x129d   :  { %v3361_v61 = vmul.f32 1.442695, %v3350_v26 }
0x129f   :  { %6142 = vpow2.f32 %v3361_v61 }
0x12a5   :  { %v7879_v49 = vpop.eup %6142 }
0x12a6   :  { %v3380_v21 = vsel %vm519_vm11, %v7879_v49, 0.0 }
0x12ac   :  { %3381 = vadd.xlane.f32.xlu0 %v3380_v21 }
0x12bc   :  { %v3337_v62 = vpop.xlane.xlu0 %3336 }
0x12bd   :  { %v3351_v17 = vsub.f32 %v3319_v9, %v3337_v62 }
0x12bf   :  { %v3363_v30 = vmul.f32 1.442695, %v3351_v17 }
0x12c1   :  { %6144 = vpow2.f32 %v3363_v30 }
0x12c4   :  { %v3340_v16 = vpop.xlane.xlu1 %3339 }
0x12c5   :  { %v3352_v23 = vsub.f32 %v3320_v42, %v3340_v16 }
0x12c7   :  { %v7883_v24 = vpop.eup %6144  ;;  %v3365_v45 = vmul.f32 1.442695, %v3352_v23 }
0x12c8   :  { %v3383_v13 = vsel %vm519_vm11, %v7883_v24, 0.0 }
0x12c9   :  { %6146 = vpow2.f32 %v3365_v45  ;;  %3384 = vadd.xlane.f32.xlu0 %v3383_v13 }
0x12cf   :  { %v7887_v25 = vpop.eup %6146 }
0x12d0   :  { %v3386_v7 = vsel %vm519_vm11, %v7887_v25, 0.0 }
0x12d1   :  { %3387 = vadd.xlane.f32.xlu1 %v3386_v7 }
0x12d9   :  { %v3343_v8 = vpop.xlane.xlu0 %3342 }
0x12da   :  { %v3353_v9 = vsub.f32 %v3321_v47, %v3343_v8 }
0x12dc   :  { %v3367_v43 = vmul.f32 1.442695, %v3353_v9  ;;  %v3475_v14 = vpop.permute.xlu1 %3474 }
0x12dd   :  { %3487 = vmatpush.bf16.msra.mxu1 %v3475_v14  ;;  %3569 = vrot.lane.b32.xlu0 %v7713_v40, %s6464_s18 }
0x12de   :  { %6148 = vpow2.f32 %v3367_v43 }
0x12e1   :  { %v3346_v42 = vpop.xlane.xlu2 %3345  ;;  %v3376_v34 = vpop.xlane.xlu0 %3375 }
0x12e2   :  { %v3354_v36 = vsub.f32 %v3322_v54, %v3346_v42  ;;  %6150 = vrcp.f32 %v3376_v34 }
0x12e4   :  { %v7893_v50 = vpop.eup %6148  ;;  %v3369_v12 = vmul.f32 1.442695, %v3354_v36 }
0x12e5   :  { %3827 = vrot.lane.b32.xlu0 %v7702_v32, %s6466_s7  ;;  %v3389_v47 = vsel %vm519_vm11, %v7893_v50, 0.0 }
0x12e6   :  { %6152 = vpow2.f32 %v3369_v12  ;;  %3390 = vadd.xlane.f32.xlu2 %v3389_v47 }
0x12e8   :  { %v6151_v28 = vpop.eup %6150 }
0x12e9   :  { %v3373_v1 = vpop.xlane.xlu2 %3372  ;;  %v3404_v27 = vmul.f32 %v6151_v28, %v6137_v6 }
0x12ea   :  { %6154 = vrcp.f32 %v3373_v1 }
0x12eb   :  { %v3412_v11 = vpack.c.bf16 %v3404_v27, %v3404_v27 }
0x12ec   :  { %v7899_v46 = vpop.eup %6152 }
0x12ed   :  { %v3392_v54 = vsel %vm519_vm11, %v7899_v46, 0.0  ;;  %v3422_v21 = vunpack.c.l.b16 %v3412_v11 }
0x12ee   :  { %3393 = vadd.xlane.f32.xlu1 %v3392_v54 }
0x12f0   :  { %v6155_v41 = vpop.eup %6154 }
0x12f1   :  { %v3403_v4 = vmul.f32 %v6155_v41, %v6139_v10  ;;  %v3594_v48 = vpop.permute.xlu2 %3593 }
0x12f2   :  { %v3599_v26 = vsel %vm519_vm11, %v3594_v48, 0 }
0x12f3   :  { %v3411_v61 = vpack.c.bf16 %v3403_v4, %v3403_v4  ;;  %3608 = vmatpush.bf16.xpose.msra.mxu2 %v3599_v26 }
0x12f4   :  { %v3544_v6 = vpop.permute.xlu0 %3543 }
0x12f5   :  { %v3421_v62 = vunpack.c.l.b16 %v3411_v61 }
0x12f7   :  { %v3423_v17 = vpack.c.b16 %v3422_v21, %v3421_v62 }
0x12f9   :  { %5477 = vmatmul.msk.bf16.vlgmr.msrb.gmra.mxu3 %vm519_vm11, %v3423_v17 }
0x12fe   :  { %3567 = vrot.lane.b32.xlu2 %v7713_v40, %s6465_s19 }
0x1306   :  { %3829 = vrot.lane.b32.xlu2 %v7702_v32, %s6451_s29 }
0x1307   :  { %3591 = vrot.lane.b32.xlu1 %v7720_v58, %s6465_s19  ;;  %v3379_v10 = vpop.xlane.xlu1 %3378 }
0x1308   :  { %6156 = vrcp.f32 %v3379_v10 }
0x1309   :  { %5481 = vmatmul.msk.bf16.vlgmr.msra.gmra.mxu3 %vm519_vm11, %v7833_v19 }
0x130e   :  { %3757 = vrot.lane.b32.xlu2 %v7706_v18, %s6465_s19  ;;  %v6157_v30 = vpop.eup %6156 }
0x130f   :  { %3732 = vrot.lane.b32.xlu1 %v7699_v53, %s6465_s19  ;;  %v3405_v19 = vmul.f32 %v6157_v30, %v7875_v37 }
0x1311   :  { %v3413_v23 = vpack.c.bf16 %v3405_v19, %v3405_v19 }
0x1313   :  { %v3446_v7 = vunpack.c.l.b16 %v3413_v23 }
0x1316   :  { %3853 = vrot.lane.b32.xlu2 %v7709_v63, %s6451_s29 }
0x1317   :  { %3782 = vrot.lane.b32.xlu1 %v7727_v15, %s6465_s19 }
0x131f   :  { %v3382_v32 = vpop.xlane.xlu0 %3381 }
0x1320   :  { %6158 = vrcp.f32 %v3382_v32 }
0x1326   :  { %v6159_v16 = vpop.eup %6158 }
0x1327   :  { %v3406_v45 = vmul.f32 %v6159_v16, %v7879_v49 }
0x1329   :  { %v3414_v13 = vpack.c.bf16 %v3406_v45, %v3406_v45 }
0x132b   :  { %v3447_v8 = vunpack.c.l.b16 %v3414_v13 }
0x132d   :  { %v3448_v9 = vpack.c.b16 %v3447_v8, %v3446_v7 }
0x132f   :  { %5478 = vmatmul.msk.bf16.vlgmr.msra.gmra.mxu0 %vm519_vm11, %v3448_v9 }
0x133c   :  { %v3385_v43 = vpop.xlane.xlu0 %3384 }
0x133d   :  { %6160 = vrcp.f32 %v3385_v43 }
0x133f   :  { %5482 = vmatmul.msk.bf16.vlgmr.msrb.gmra.mxu0 %vm519_vm11, %v3544_v6 }
0x1343   :  { %v6161_v42 = vpop.eup %6160 }
0x1344   :  { %v3388_v14 = vpop.xlane.xlu1 %3387  ;;  %v3407_v34 = vmul.f32 %v6161_v42, %v7883_v24 }
0x1345   :  { %6162 = vrcp.f32 %v3388_v14 }
0x1346   :  { %v3415_v36 = vpack.c.bf16 %v3407_v34, %v3407_v34 }
0x1348   :  { %v3471_v1 = vunpack.c.l.b16 %v3415_v36 }
0x134b   :  { %v6163_v37 = vpop.eup %6162 }
0x134c   :  { %v3408_v12 = vmul.f32 %v6163_v37, %v7887_v25 }
0x134e   :  { %v3416_v49 = vpack.c.bf16 %v3408_v12, %v3408_v12 }
0x134f   :  { %v3570_v47 = vpop.permute.xlu0 %3569 }
0x1350   :  { %v3472_v28 = vunpack.c.l.b16 %v3416_v49  ;;  %v3575_v27 = vsel %vm519_vm11, %v3570_v47, 0 }
0x1351   :  { %3584 = vmatpush.bf16.xpose.msrb.mxu1 %v3575_v27 }
0x1352   :  { %v3473_v54 = vpack.c.b16 %v3472_v28, %v3471_v1 }
0x1354   :  { %5479 = vmatmul.msk.bf16.vlgmr.msra.gmra.mxu1 %vm519_vm11, %v3473_v54 }
0x1359   :  { %v3391_v41 = vpop.xlane.xlu2 %3390 }
0x135a   :  { %6164 = vrcp.f32 %v3391_v41 }
0x1360   :  { %v6165_v48 = vpop.eup %6164 }
0x1361   :  { %v3394_v11 = vpop.xlane.xlu1 %3393  ;;  %v3568_v4 = vpop.permute.xlu2 %3567  ;;  %v3409_v24 = vmul.f32 %v6165_v48, %v7893_v50 }
0x1362   :  { %6166 = vrcp.f32 %v3394_v11 }
0x1363   :  { %v3417_v26 = vpack.c.bf16 %v3409_v24, %v3409_v24 }
0x1364   :  { %5483 = vmatmul.msk.bf16.vlgmr.msrb.gmra.mxu1 %vm519_vm11, %v3568_v4 }
0x1365   :  { %v3496_v17 = vunpack.c.l.b16 %v3417_v26 }
0x1368   :  { %v6167_v25 = vpop.eup %6166 }
0x1369   :  { %v3410_v61 = vmul.f32 %v6167_v25, %v7899_v46  ;;  %v3830_v21 = vpop.permute.xlu2 %3829 }
0x136a   :  { %v3835_v46 = vsel %vm519_vm11, %v3830_v21, 0 }
0x136b   :  { %v3418_v62 = vpack.c.bf16 %v3410_v61, %v3410_v61 }
0x136d   :  { %v3497_v6 = vunpack.c.l.b16 %v3418_v62 }
0x136f   :  { %v3498_v10 = vpack.c.b16 %v3497_v6, %v3496_v17 }
0x1371   :  { %5480 = vmatmul.msk.bf16.vlgmr.msrb.gmra.mxu2 %vm519_vm11, %v3498_v10  ;;  %v3758_v32 = vpop.permute.xlu2 %3757 }
0x1372   :  { %3770 = vmatpush.bf16.msra.mxu0 %v3758_v32 }
0x1379   :  { %v3592_v30 = vpop.permute.xlu1 %3591  ;;  %v3854_v19 = vpop.permute.xlu2 %3853 }
0x137a   :  { %v3859_v16 = vsel %vm519_vm11, %v3854_v19, 0  ;;  %v7969_v19 = vpop.permute.xlu0 %3827 }
0x137b   :  { %3868 = vmatpush.bf16.xpose.msrb.mxu0 %v3859_v16 }
0x137c   :  { %v7934_v23 = vpop.f32.mrf.mxu3 }
0x1381   :  { %v3733_v50 = vpop.permute.xlu1 %3732  ;;  %5484 = vmatmul.msk.bf16.vlgmr.msra.gmra.mxu2 %vm519_vm11, %v3592_v30 }
0x1382   :  { %3745 = vmatpush.bf16.msrb.mxu3 %v3733_v50 }
0x1384   :  { %v7938_v45 = vpop.f32.mrf.mxu3 }
0x1386   :  { %3844 = vmatpush.bf16.xpose.msra.mxu3 %v3835_v46 }
0x1389   :  { %v3783_v13 = vpop.permute.xlu1 %3782 }
0x138a   :  { %3795 = vmatpush.bf16.msra.mxu1 %v3783_v13 }
0x138c   :  { %v3538_v7 = vpop.f32.mrf.mxu3 }
0x138d   :  { %v3615_v8 = vmul.f32 0.125, %v3538_v7 }
0x138f   :  { %v3623_v9 = vadd.f32 %v3615_v8, %v6831_v5 }
0x1391   :  { %v3631_v43 = vsel %vm519_vm11, %v3623_v9, -inf }
0x1392   :  { %3632 = vmax.xlane.f32.xlu0 %v3631_v43 }
0x1394   :  { %v3540_v14 = vpop.f32.mrf.mxu3 }
0x1395   :  { %v3616_v42 = vmul.f32 0.125, %v3540_v14 }
0x1397   :  { %v3624_v34 = vadd.f32 %v3616_v42, %v6835_v29 }
0x1399   :  { %v3634_v37 = vsel %vm519_vm11, %v3624_v34, -inf }
0x139a   :  { %3635 = vmax.xlane.f32.xlu1 %v3634_v37 }
0x13ac   :  { %v7944_v36 = vpop.f32.mrf.mxu0 }
0x13b4   :  { %v7946_v12 = vpop.f32.mrf.mxu0 }
0x13bc   :  { %v3562_v49 = vpop.f32.mrf.mxu0 }
0x13bd   :  { %v3617_v47 = vmul.f32 0.125, %v3562_v49 }
0x13bf   :  { %v3625_v1 = vadd.f32 %v3617_v47, %v6831_v5 }
0x13c1   :  { %v3637_v28 = vsel %vm519_vm11, %v3625_v1, -inf }
0x13c2   :  { %3638 = vmax.xlane.f32.xlu2 %v3637_v28 }
0x13c4   :  { %v3564_v27 = vpop.f32.mrf.mxu0 }
0x13c5   :  { %v3618_v54 = vmul.f32 0.125, %v3564_v27 }
0x13c7   :  { %v7951_v41 = vadd.f32 %v3618_v54, %v6835_v29 }
0x13c9   :  { %v3640_v11 = vsel %vm519_vm11, %v7951_v41, -inf }
0x13ca   :  { %3641 = vmax.xlane.f32.xlu0 %v3640_v11 }
0x13d1   :  { %v7955_v4 = vpop.f32.mrf.mxu1 }
0x13d9   :  { %v7957_v48 = vpop.f32.mrf.mxu1 }
0x13da   :  { %v5881_v24 = vpack.i.bf16 %v7957_v48, %v7955_v4 }
0x13e1   :  { %v3586_v25 = vpop.f32.mrf.mxu1 }
0x13e2   :  { %v3619_v26 = vmul.f32 0.125, %v3586_v25 }
0x13e4   :  { %v3627_v61 = vadd.f32 %v3619_v26, %v6831_v5 }
0x13e6   :  { %v3643_v21 = vsel %vm519_vm11, %v3627_v61, -inf }
0x13e7   :  { %3644 = vmax.xlane.f32.xlu1 %v3643_v21 }
0x13e9   :  { %v3588_v62 = vpop.f32.mrf.mxu1 }
0x13ea   :  { %v3620_v17 = vmul.f32 0.125, %v3588_v62 }
0x13ec   :  { %v3628_v6 = vadd.f32 %v3620_v17, %v6835_v29 }
0x13ee   :  { %v3646_v10 = vsel %vm519_vm11, %v3628_v6, -inf }
0x13ef   :  { %3647 = vmax.xlane.f32.xlu2 %v3646_v10 }
0x13f4   :  { %v7965_v32 = vpop.f32.mrf.mxu2 }
0x13fc   :  { %v7967_v30 = vpop.f32.mrf.mxu2 }
0x1404   :  { %v3610_v50 = vpop.f32.mrf.mxu2 }
0x1405   :  { %v3621_v46 = vmul.f32 0.125, %v3610_v50  ;;  %v3633_v13 = vpop.xlane.xlu0 %3632 }
0x1406   :  { %v3655_v7 = vsub.f32 %v3623_v9, %v3633_v13 }
0x1407   :  { %v3629_v8 = vadd.f32 %v3621_v46, %v6831_v5 }
0x1408   :  { %v3663_v43 = vmul.f32 1.442695, %v3655_v7 }
0x1409   :  { %v3649_v14 = vsel %vm519_vm11, %v3629_v8, -inf }
0x140a   :  { %6168 = vpow2.f32 %v3663_v43  ;;  %3650 = vmax.xlane.f32.xlu0 %v3649_v14 }
0x140c   :  { %v3612_v42 = vpop.f32.mrf.mxu2 }
0x140d   :  { %v3622_v37 = vmul.f32 0.125, %v3612_v42  ;;  %v3636_v9 = vpop.xlane.xlu1 %3635 }
0x140e   :  { %v3656_v25 = vsub.f32 %v3624_v34, %v3636_v9 }
0x140f   :  { %v3630_v49 = vadd.f32 %v3622_v37, %v6835_v29 }
0x1410   :  { %v7976_v47 = vpop.eup %6168  ;;  %v3665_v21 = vmul.f32 1.442695, %v3656_v25 }
0x1411   :  { %v3652_v28 = vsel %vm519_vm11, %v3630_v49, -inf  ;;  %v3679_v27 = vsel %vm519_vm11, %v7976_v47, 0.0 }
0x1412   :  { %3653 = vmax.xlane.f32.xlu1 %v3652_v28  ;;  %3680 = vadd.xlane.f32.xlu2 %v3679_v27 }
0x142a   :  { %3807 = vrot.lane.b32.xlu2 %v7737_v38, %s6465_s19 }
0x142b   :  { %3877 = vrot.lane.b32.xlu1 %v7713_v40, %s6451_s29 }
0x1435   :  { %v3639_v54 = vpop.xlane.xlu2 %3638 }
0x1436   :  { %v3657_v11 = vsub.f32 %v3625_v1, %v3639_v54 }
0x1438   :  { %v3667_v26 = vmul.f32 1.442695, %v3657_v11 }
0x143a   :  { %6170 = vpow2.f32 %v3667_v26 }
0x143b   :  { %6172 = vpow2.f32 %v3665_v21 }
0x143d   :  { %v3642_v27 = vpop.xlane.xlu0 %3641 }
0x1440   :  { %v7985_v62 = vpop.eup %6170 }
0x1441   :  { %v3685_v17 = vsel %vm519_vm11, %v7985_v62, 0.0  ;;  %v6173_v10 = vpop.eup %6172 }
0x1442   :  { %3686 = vadd.xlane.f32.xlu0 %v3685_v17  ;;  %v3682_v50 = vsel %vm519_vm11, %v6173_v10, 0.0 }
0x144a   :  { %3683 = vadd.xlane.f32.xlu0 %v3682_v50 }
0x145a   :  { %v3645_v46 = vpop.xlane.xlu1 %3644 }
0x145b   :  { %v3659_v13 = vsub.f32 %v3627_v61, %v3645_v46  ;;  %v3658_v61 = vsub.f32 %v7951_v41, %v3642_v27 }
0x145d   :  { %v3671_v7 = vmul.f32 1.442695, %v3659_v13  ;;  %v3669_v9 = vmul.f32 1.442695, %v3658_v61 }
0x145e   :  { %3851 = vrot.lane.b32.xlu0 %v7709_v63, %s6466_s7 }
0x145f   :  { %6174 = vpow2.f32 %v3671_v7 }
0x1462   :  { %v3648_v34 = vpop.xlane.xlu2 %3647 }
0x1463   :  { %v3660_v1 = vsub.f32 %v3628_v6, %v3648_v34 }
0x1465   :  { %v6175_v43 = vpop.eup %6174  ;;  %v3673_v14 = vmul.f32 1.442695, %v3660_v1 }
0x1466   :  { %v3691_v42 = vsel %vm519_vm11, %v6175_v43, 0.0 }
0x1467   :  { %6176 = vpow2.f32 %v3673_v14  ;;  %3692 = vadd.xlane.f32.xlu1 %v3691_v42 }
0x1468   :  { %6178 = vpow2.f32 %v3669_v9 }
0x146d   :  { %v6177_v37 = vpop.eup %6176 }
0x146e   :  { %v3694_v28 = vsel %vm519_vm11, %v6177_v37, 0.0  ;;  %v6179_v25 = vpop.eup %6178 }
0x146f   :  { %3695 = vadd.xlane.f32.xlu2 %v3694_v28  ;;  %v3688_v17 = vsel %vm519_vm11, %v6179_v25, 0.0 }
0x147d   :  { %v3651_v54 = vpop.xlane.xlu0 %3650 }
0x147e   :  { %v3661_v63 = vsub.f32 %v3629_v8, %v3651_v54 }
0x1480   :  { %v3675_v11 = vmul.f32 1.442695, %v3661_v63 }
0x1482   :  { %6180 = vpow2.f32 %v3675_v11 }
0x1485   :  { %v3654_v6 = vpop.xlane.xlu1 %3653  ;;  %v3681_v26 = vpop.xlane.xlu2 %3680 }
0x1486   :  { %v3662_v21 = vsub.f32 %v3630_v49, %v3654_v6 }
0x1487   :  { %3875 = vrot.lane.b32.xlu2 %v7713_v40, %s6466_s7 }
0x1488   :  { %v3677_v50 = vmul.f32 1.442695, %v3662_v21  ;;  %3689 = vadd.xlane.f32.xlu0 %v3688_v17  ;;  %v6181_v46 = vpop.eup %6180 }
0x1489   :  { %v3697_v13 = vsel %vm519_vm11, %v6181_v46, 0.0 }
0x148a   :  { %6182 = vpow2.f32 %v3677_v50 }
0x148b   :  { %6184 = vrcp.f32 %v3681_v26 }
0x148d   :  { %v3808_v41 = vpop.permute.xlu2 %3807 }
0x148e   :  { %3820 = vmatpush.bf16.msrb.mxu2 %v3808_v41 }
0x1490   :  { %v6183_v8 = vpop.eup %6182  ;;  %3698 = vadd.xlane.f32.xlu0 %v3697_v13 }
0x1491   :  { %v3700_v7 = vsel %vm519_vm11, %v6183_v8, 0.0  ;;  %v6185_v14 = vpop.eup %6184 }
0x1492   :  { %3701 = vadd.xlane.f32.xlu1 %v3700_v7  ;;  %v3711_v42 = vmul.f32 %v6185_v14, %v7976_v47 }
0x1494   :  { %v3719_v27 = vpack.c.bf16 %v3711_v42, %v3711_v42 }
0x1496   :  { %v3729_v54 = vunpack.c.l.b16 %v3719_v27 }
0x149d   :  { %v3878_v34 = vpop.permute.xlu1 %3877 }
0x149e   :  { %v3883_v49 = vsel %vm519_vm11, %v3878_v34, 0 }
0x149f   :  { %3892 = vmatpush.bf16.xpose.msrb.mxu1 %v3883_v49 }
0x14a4   :  { %3901 = vrot.lane.b32.xlu0 %v7720_v58, %s6451_s29 }
0x14ab   :  { %3899 = vrot.lane.b32.xlu1 %v7720_v58, %s6466_s7 }
0x14b5   :  { %v3687_v40 = vpop.xlane.xlu0 %3686 }
0x14bd   :  { %v3684_v1 = vpop.xlane.xlu0 %3683 }
0x14be   :  { %6186 = vrcp.f32 %v3684_v1 }
0x14c4   :  { %v6187_v28 = vpop.eup %6186 }
0x14c5   :  { %v3712_v61 = vmul.f32 %v6187_v28, %v6173_v10 }
0x14c7   :  { %v3720_v9 = vpack.c.bf16 %v3712_v61, %v3712_v61 }
0x14c9   :  { %v3730_v63 = vunpack.c.l.b16 %v3720_v9 }
0x14cb   :  { %v3731_v11 = vpack.c.b16 %v3730_v63, %v3729_v54 }
0x14cd   :  { %5485 = vmatmul.msk.bf16.vlgmr.msrb.gmra.mxu3 %vm519_vm11, %v3731_v11 }
0x14d0   :  { %v3852_v34 = vpop.permute.xlu0 %3851 }
0x14da   :  { %v3693_v6 = vpop.xlane.xlu1 %3692 }
0x14db   :  { %6188 = vrcp.f32 %v3693_v6 }
0x14dd   :  { %5489 = vmatmul.msk.bf16.vlgmr.msra.gmra.mxu3 %vm519_vm11, %v7969_v19 }
0x14e1   :  { %v6189_v26 = vpop.eup %6188 }
0x14e2   :  { %v3696_v58 = vpop.xlane.xlu2 %3695  ;;  %v3715_v21 = vmul.f32 %v6189_v26, %v6175_v43 }
0x14e3   :  { %6190 = vrcp.f32 %v3696_v58 }
0x14e4   :  { %v3723_v47 = vpack.c.bf16 %v3715_v21, %v3715_v21  ;;  %6192 = vrcp.f32 %v3687_v40 }
0x14e6   :  { %v3779_v10 = vunpack.c.l.b16 %v3723_v47 }
0x14e9   :  { %v6191_v17 = vpop.eup %6190 }
0x14ea   :  { %v3716_v50 = vmul.f32 %v6191_v17, %v6177_v37  ;;  %v6193_v1 = vpop.eup %6192  ;;  %v3876_v14 = vpop.permute.xlu2 %3875 }
0x14eb   :  { %v3713_v19 = vmul.f32 %v6193_v1, %v7985_v62 }
0x14ec   :  { %v3724_v41 = vpack.c.bf16 %v3716_v50, %v3716_v50 }
0x14ed   :  { %v3721_v43 = vpack.c.bf16 %v3713_v19, %v3713_v19 }
0x14ee   :  { %v3780_v13 = vunpack.c.l.b16 %v3724_v41 }
0x14ef   :  { %v3754_v9 = vunpack.c.l.b16 %v3721_v43 }
0x14f0   :  { %v3781_v7 = vpack.c.b16 %v3780_v13, %v3779_v10 }
0x14f2   :  { %5487 = vmatmul.msk.bf16.vlgmr.msra.gmra.mxu1 %vm519_vm11, %v3781_v7 }
0x14fb   :  { %v3690_v49 = vpop.xlane.xlu0 %3689 }
0x14fc   :  { %6194 = vrcp.f32 %v3690_v49 }
0x1502   :  { %v6195_v42 = vpop.eup %6194  ;;  %5491 = vmatmul.msk.bf16.vlgmr.msrb.gmra.mxu1 %vm519_vm11, %v3876_v14 }
0x1503   :  { %v3714_v28 = vmul.f32 %v6195_v42, %v6179_v25  ;;  %v3699_v37 = vpop.xlane.xlu0 %3698 }
0x1504   :  { %6196 = vrcp.f32 %v3699_v37 }
0x1505   :  { %v3722_v27 = vpack.c.bf16 %v3714_v28, %v3714_v28  ;;  %v3702_v61 = vpop.xlane.xlu1 %3701 }
0x1506   :  { %6198 = vrcp.f32 %v3702_v61 }
0x1507   :  { %v3755_v54 = vunpack.c.l.b16 %v3722_v27 }
0x1509   :  { %v3756_v63 = vpack.c.b16 %v3755_v54, %v3754_v9 }
0x150a   :  { %v6197_v40 = vpop.eup %6196 }
0x150b   :  { %v3717_v11 = vmul.f32 %v6197_v40, %v6181_v46  ;;  %5486 = vmatmul.msk.bf16.vlgmr.msra.gmra.mxu0 %vm519_vm11, %v3756_v63 }
0x150c   :  { %v6199_v6 = vpop.eup %6198 }
0x150d   :  { %v3725_v62 = vpack.c.bf16 %v3717_v11, %v3717_v11  ;;  %v3718_v58 = vmul.f32 %v6199_v6, %v6183_v8 }
0x150f   :  { %v3726_v26 = vpack.c.bf16 %v3718_v58, %v3718_v58  ;;  %v3804_v21 = vunpack.c.l.b16 %v3725_v62 }
0x1511   :  { %v3805_v17 = vunpack.c.l.b16 %v3726_v26 }
0x1513   :  { %v3806_v47 = vpack.c.b16 %v3805_v17, %v3804_v21 }
0x1515   :  { %5488 = vmatmul.msk.bf16.vlgmr.msrb.gmra.mxu2 %vm519_vm11, %v3806_v47 }
0x1516   :  { %v3902_v25 = vpop.permute.xlu0 %3901 }
0x1517   :  { %v3907_v50 = vsel %vm519_vm11, %v3902_v25, 0 }
0x1518   :  { %3916 = vmatpush.bf16.xpose.msra.mxu2 %v3907_v50 }
0x151b   :  { %5490 = vmatmul.msk.bf16.vlgmr.msrb.gmra.mxu0 %vm519_vm11, %v3852_v34 }
0x151d   :  { %v3900_v41 = vpop.permute.xlu1 %3899 }
0x1525   :  { %5492 = vmatmul.msk.bf16.vlgmr.msra.gmra.mxu2 %vm519_vm11, %v3900_v41 }
0x1550   :  { %v8017_v46 = vpop.f32.mrf.mxu3 }
0x1558   :  { %v8019_v10 = vpop.f32.mrf.mxu3 }
0x1559   :  { %v5856_v8 = vpack.i.bf16 %v8019_v10, %v8017_v46 }
0x1560   :  { %v3846_v13 = vpop.f32.mrf.mxu3 }
0x1561   :  { %v3923_v7 = vmul.f32 0.125, %v3846_v13 }
0x1563   :  { %v3931_v49 = vadd.f32 %v3923_v7, %v6831_v5 }
0x1565   :  { %v3939_v1 = vsel %vm519_vm11, %v3931_v49, -inf }
0x1566   :  { %3940 = vmax.xlane.f32.xlu0 %v3939_v1 }
0x1568   :  { %v3848_v19 = vpop.f32.mrf.mxu3 }
0x1569   :  { %v3924_v14 = vmul.f32 0.125, %v3848_v19 }
0x156b   :  { %v3932_v34 = vadd.f32 %v3924_v14, %v6835_v29 }
0x156d   :  { %v3942_v42 = vsel %vm519_vm11, %v3932_v34, -inf }
0x156e   :  { %3943 = vmax.xlane.f32.xlu2 %v3942_v42 }
0x156f   :  { %v8027_v43 = vpop.f32.mrf.mxu1 }
0x1577   :  { %v8029_v28 = vpop.f32.mrf.mxu1 }
0x1578   :  { %v5886_v37 = vpack.i.bf16 %v8029_v28, %v8027_v43  ;;  %v5735_v43 = vld [vmem:[%s8537_s4 + $0x20] sm:$0xff] }
0x157f   :  { %v3894_v27 = vpop.f32.mrf.mxu1 }
0x1580   :  { %v3927_v61 = vmul.f32 0.125, %v3894_v27 }
0x1582   :  { %v8034_v9 = vadd.f32 %v3927_v61, %v6831_v5 }
0x1584   :  { %v3951_v54 = vsel %vm519_vm11, %v8034_v9, -inf }
0x1585   :  { %3952 = vmax.xlane.f32.xlu2 %v3951_v54 }
0x1587   :  { %v3896_v26 = vpop.f32.mrf.mxu1 }
0x1588   :  { %v8038_v63 = vpop.f32.mrf.mxu0  ;;  %v3928_v17 = vmul.f32 0.125, %v3896_v26 }
0x158a   :  { %v3936_v41 = vadd.f32 %v3928_v17, %v6835_v29 }
0x158c   :  { %v3954_v19 = vsel %vm519_vm11, %v3936_v41, -inf }
0x1590   :  { %v8040_v40 = vpop.f32.mrf.mxu0 }
0x1591   :  { %v5871_v11 = vpack.i.bf16 %v8040_v40, %v8038_v63 }
0x1598   :  { %v8044_v6 = vpop.f32.mrf.mxu2  ;;  %v3870_v62 = vpop.f32.mrf.mxu0 }
0x1599   :  { %v3925_v58 = vmul.f32 0.125, %v3870_v62 }
0x159b   :  { %v3933_v21 = vadd.f32 %v3925_v58, %v6831_v5 }
0x159d   :  { %v3945_v47 = vsel %vm519_vm11, %v3933_v21, -inf }
0x159e   :  { %3946 = vmax.xlane.f32.xlu1 %v3945_v47 }
0x15a0   :  { %v8048_v25 = vpop.f32.mrf.mxu2  ;;  %v3872_v50 = vpop.f32.mrf.mxu0 }
0x15a1   :  { %v5901_v13 = vpack.i.bf16 %v8048_v25, %v8044_v6  ;;  %v3926_v7 = vmul.f32 0.125, %v3872_v50 }
0x15a3   :  { %v3934_v1 = vadd.f32 %v3926_v7, %v6835_v29 }
0x15a5   :  { %v3948_v14 = vsel %vm519_vm11, %v3934_v1, -inf }
0x15a6   :  { %3955 = vmax.xlane.f32.xlu1 %v3954_v19  ;;  %3949 = vmax.xlane.f32.xlu0 %v3948_v14 }
0x15a8   :  { %v3918_v42 = vpop.f32.mrf.mxu2 }
0x15a9   :  { %v3929_v27 = vmul.f32 0.125, %v3918_v42 }
0x15ab   :  { %v3937_v61 = vadd.f32 %v3929_v27, %v6831_v5 }
0x15ad   :  { %v3957_v54 = vsel %vm519_vm11, %v3937_v61, -inf }
0x15ae   :  { %3958 = vmax.xlane.f32.xlu0 %v3957_v54 }
0x15b0   :  { %v3920_v62 = vpop.f32.mrf.mxu2 }
0x15b1   :  { %v3930_v58 = vmul.f32 0.125, %v3920_v62 }
0x15b3   :  { %v3938_v26 = vadd.f32 %v3930_v58, %v6835_v29 }
0x15b5   :  { %v3960_v17 = vsel %vm519_vm11, %v3938_v26, -inf }
0x15b6   :  { %3961 = vmax.xlane.f32.xlu2 %v3960_v17 }
0x15ce   :  { %4040 = vrot.lane.b32.xlu2 %v7699_v53, %s6466_s7 }
0x15d9   :  { %v3941_v47 = vpop.xlane.xlu0 %3940 }
0x15da   :  { %v3963_v19 = vsub.f32 %v3931_v49, %v3941_v47 }
0x15dc   :  { %v3971_v5 = vmul.f32 1.442695, %v3963_v19 }
0x15e1   :  { %v3944_v42 = vpop.xlane.xlu2 %3943 }
0x15e2   :  { %v3964_v62 = vsub.f32 %v3932_v34, %v3944_v42 }
0x15e4   :  { %v3973_v53 = vmul.f32 1.442695, %v3964_v62 }
0x15f8   :  { %v3953_v17 = vpop.xlane.xlu2 %3952 }
0x1611   :  { %v3947_v50 = vpop.xlane.xlu1 %3946 }
0x1612   :  { %v3965_v7 = vsub.f32 %v3933_v21, %v3947_v50 }
0x1614   :  { %v3975_v14 = vmul.f32 1.442695, %v3965_v7 }
0x1616   :  { %6200 = vpow2.f32 %v3975_v14 }
0x1617   :  { %6202 = vpow2.f32 %v3971_v5 }
0x1619   :  { %v3950_v27 = vpop.xlane.xlu0 %3949  ;;  %v3956_v42 = vpop.xlane.xlu1 %3955 }
0x161a   :  { %v3966_v54 = vsub.f32 %v3934_v1, %v3950_v27  ;;  %v3967_v1 = vsub.f32 %v8034_v9, %v3953_v17 }
0x161c   :  { %v8062_v16 = vpop.eup %6200  ;;  %v3977_v29 = vmul.f32 1.442695, %v3966_v54  ;;  %v3979_v14 = vmul.f32 1.442695, %v3967_v1 }
0x161d   :  { %v3993_v58 = vsel %vm519_vm11, %v8062_v16, 0.0  ;;  %v6203_v49 = vpop.eup %6202 }
0x161e   :  { %3994 = vadd.xlane.f32.xlu1 %v3993_v58  ;;  %6204 = vpow2.f32 %v3977_v29  ;;  %v3987_v19 = vsel %vm519_vm11, %v6203_v49, 0.0 }
0x161f   :  { %6206 = vpow2.f32 %v3973_v53 }
0x1621   :  { %v3959_v21 = vpop.xlane.xlu0 %3958 }
0x1622   :  { %v3969_v47 = vsub.f32 %v3937_v61, %v3959_v21  ;;  %v3968_v61 = vsub.f32 %v3936_v41, %v3956_v42 }
0x1624   :  { %v3983_v50 = vmul.f32 1.442695, %v3969_v47  ;;  %v6205_v7 = vpop.eup %6204  ;;  %v3981_v62 = vmul.f32 1.442695, %v3968_v61 }
0x1625   :  { %v3996_v34 = vsel %vm519_vm11, %v6205_v7, 0.0  ;;  %v6207_v27 = vpop.eup %6206 }
0x1626   :  { %6208 = vpow2.f32 %v3983_v50  ;;  %3988 = vadd.xlane.f32.xlu1 %v3987_v19  ;;  %3997 = vadd.xlane.f32.xlu0 %v3996_v34  ;;  %v3990_v9 = vsel %vm519_vm11, %v6207_v27, 0.0 }
0x1627   :  { %6210 = vpow2.f32 %v3979_v14 }
0x1628   :  { %6212 = vpow2.f32 %v3981_v62 }
0x1629   :  { %v3962_v5 = vpop.xlane.xlu2 %3961 }
0x162a   :  { %v3970_v17 = vsub.f32 %v3938_v26, %v3962_v5  ;;  %v5851_v26 = vpack.i.bf16 %v7938_v45, %v7934_v23 }
0x162c   :  { %v8069_v54 = vpop.eup %6208  ;;  %v3985_v47 = vmul.f32 1.442695, %v3970_v17 }
0x162d   :  { %v4005_v29 = vsel %vm519_vm11, %v8069_v54, 0.0  ;;  %v6211_v53 = vpop.eup %6210 }
0x162e   :  { %4006 = vadd.xlane.f32.xlu2 %v4005_v29  ;;  %3991 = vadd.xlane.f32.xlu0 %v3990_v9  ;;  %v3999_v21 = vsel %vm519_vm11, %v6211_v53, 0.0  ;;  %v6213_v50 = vpop.eup %6212  ;;  %6214 = vpow2.f32 %v3985_v47 }
0x162f   :  { %v4002_v41 = vsel %vm519_vm11, %v6213_v50, 0.0 }
0x1631   :  { %v4041_v58 = vpop.permute.xlu2 %4040 }
0x1632   :  { %4053 = vmatpush.bf16.msrb.mxu3 %v4041_v58 }
0x1634   :  { %v8078_v1 = vpop.eup %6214 }
0x1635   :  { %v4008_v19 = vsel %vm519_vm11, %v8078_v1, 0.0 }
0x1636   :  { %4000 = vadd.xlane.f32.xlu0 %v3999_v21 }
0x163e   :  { %4003 = vadd.xlane.f32.xlu0 %v4002_v41 }
0x163f   :  { %4065 = vrot.lane.b32.xlu1 %v7706_v18, %s6466_s7  ;;  %v5866_v18 = vpack.i.bf16 %v7946_v12, %v7944_v36 }
0x1646   :  { %5872 = vrot.lane.b32.xlu2 %v5871_v11, %s6464_s18  ;;  %4009 = vadd.xlane.f32.xlu0 %v4008_v19 }
0x1647   :  { %4090 = vrot.lane.b32.xlu1 %v7727_v15, %s6466_s7 }
0x164f   :  { %5852 = vrot.lane.b32.xlu1 %v5851_v26, %s6451_s29 }
0x1657   :  { %5857 = vrot.lane.b32.xlu1 %v5856_v8, %s6464_s18 }
0x165a   :  { %4115 = vrot.lane.b32.xlu0 %v7737_v38, %s6466_s7 }
0x165f   :  { %5867 = vrot.lane.b32.xlu1 %v5866_v18, %s6451_s29 }
0x1667   :  { %5882 = vrot.lane.b32.xlu1 %v5881_v24, %s6451_s29 }
0x1691   :  { %v3995_v15 = vpop.xlane.xlu1 %3994 }
0x1699   :  { %v3989_v23 = vpop.xlane.xlu1 %3988  ;;  %v3998_v45 = vpop.xlane.xlu0 %3997 }
0x169a   :  { %6216 = vrcp.f32 %v3989_v23 }
0x169b   :  { %6218 = vrcp.f32 %v3998_v45 }
0x169c   :  { %6220 = vrcp.f32 %v3995_v15 }
0x16a0   :  { %v6217_v10 = vpop.eup %6216 }
0x16a1   :  { %v3992_v46 = vpop.xlane.xlu0 %3991  ;;  %v6219_v38 = vpop.eup %6218  ;;  %v4019_v63 = vmul.f32 %v6217_v10, %v6203_v49 }
0x16a2   :  { %6222 = vrcp.f32 %v3992_v46  ;;  %v6221_v8 = vpop.eup %6220  ;;  %v4022_v36 = vmul.f32 %v6219_v38, %v6205_v7  ;;  %v4007_v17 = vpop.xlane.xlu2 %4006 }
0x16a3   :  { %v4021_v40 = vmul.f32 %v6221_v8, %v8062_v16  ;;  %v4027_v11 = vpack.c.bf16 %v4019_v63, %v4019_v63 }
0x16a4   :  { %v4030_v48 = vpack.c.bf16 %v4022_v36, %v4022_v36 }
0x16a5   :  { %v4029_v14 = vpack.c.bf16 %v4021_v40, %v4021_v40  ;;  %v4037_v5 = vunpack.c.l.b16 %v4027_v11 }
0x16a6   :  { %v4063_v61 = vunpack.c.l.b16 %v4030_v48 }
0x16a7   :  { %v4062_v9 = vunpack.c.l.b16 %v4029_v14  ;;  %v5736_v14 = vld [vmem:[%s8537_s4 + $0x28] sm:$0xff] }
0x16a8   :  { %v6223_v12 = vpop.eup %6222 }
0x16a9   :  { %v4020_v34 = vmul.f32 %v6223_v12, %v6207_v27  ;;  %v4001_v4 = vpop.xlane.xlu0 %4000  ;;  %v4064_v58 = vpack.c.b16 %v4063_v61, %v4062_v9  ;;  %v8555_v9 = vpack.i.bf16 %v7967_v30, %v7965_v32 }
0x16aa   :  { %6224 = vrcp.f32 %v4001_v4 }
0x16ab   :  { %v4028_v24 = vpack.c.bf16 %v4020_v34, %v4020_v34 }
0x16ad   :  { %v4038_v42 = vunpack.c.l.b16 %v4028_v24 }
0x16af   :  { %v4039_v29 = vpack.c.b16 %v4038_v42, %v4037_v5 }
0x16b0   :  { %v6225_v7 = vpop.eup %6224 }
0x16b1   :  { %v4066_v62 = vpop.permute.xlu1 %4065  ;;  %5493 = vmatmul.msk.bf16.vlgmr.msrb.gmra.mxu3 %vm519_vm11, %v4039_v29  ;;  %v4004_v49 = vpop.xlane.xlu0 %4003  ;;  %v4023_v16 = vmul.f32 %v6225_v7, %v6211_v53 }
0x16b2   :  { %4078 = vmatpush.bf16.msra.mxu0 %v4066_v62  ;;  %6226 = vrcp.f32 %v4004_v49 }
0x16b3   :  { %v4031_v47 = vpack.c.bf16 %v4023_v16, %v4023_v16 }
0x16b5   :  { %5494 = vmatmul.msk.bf16.vlgmr.msra.gmra.mxu0 %vm519_vm11, %v4064_v58  ;;  %v4087_v18 = vunpack.c.l.b16 %v4031_v47 }
0x16b8   :  { %v6227_v27 = vpop.eup %6226 }
0x16b9   :  { %v4091_v21 = vpop.permute.xlu1 %4090  ;;  %v4024_v41 = vmul.f32 %v6227_v27, %v6213_v50  ;;  %v4010_v19 = vpop.xlane.xlu0 %4009 }
0x16ba   :  { %4103 = vmatpush.bf16.msra.mxu1 %v4091_v21  ;;  %6228 = vrcp.f32 %v4010_v19 }
0x16bb   :  { %6230 = vrcp.f32 %v4007_v17  ;;  %v4032_v26 = vpack.c.bf16 %v4024_v41, %v4024_v41 }
0x16bd   :  { %v4088_v15 = vunpack.c.l.b16 %v4032_v26 }
0x16bf   :  { %v4089_v23 = vpack.c.b16 %v4088_v15, %v4087_v18 }
0x16c0   :  { %v6229_v45 = vpop.eup %6228 }
0x16c1   :  { %v6231_v46 = vpop.eup %6230  ;;  %5495 = vmatmul.msk.bf16.vlgmr.msra.gmra.mxu1 %vm519_vm11, %v4089_v23  ;;  %v4026_v10 = vmul.f32 %v6229_v45, %v8078_v1  ;;  %v5738_v1 = vld [vmem:[%s8537_s4 + $0x38] sm:$0xff]  ;;  %v5853_v28 = vpop.permute.xlu1 %5852 }
0x16c2   :  { %v4025_v53 = vmul.f32 %v6231_v46, %v8069_v54  ;;  %4308 = vmatpush.bf16.msra.mxu3 %v5738_v1  ;;  %v5737_v54 = vld [vmem:[%s8537_s4 + $0x30] sm:$0xff]  ;;  %v5855_v7 = vunpack.i.h.bf16 %v5853_v28  ;;  %v5854_v6 = vunpack.i.l.bf16 %v5853_v28  ;;  %v5873_v23 = vpop.permute.xlu2 %5872 }
0x16c3   :  { %v4034_v38 = vpack.c.bf16 %v4026_v10, %v4026_v10 }
0x16c4   :  { %v4033_v8 = vpack.c.bf16 %v4025_v53, %v4025_v53  ;;  %v4232_v32 = vsel %vm519_vm11, %v7831_v3, %v5855_v7  ;;  %v4231_v30 = vsel %vm519_vm11, %v7828_v22, %v5854_v6  ;;  %v5875_v53 = vunpack.i.h.bf16 %v5873_v23 }
0x16c5   :  { %v4113_v63 = vunpack.c.l.b16 %v4034_v38  ;;  %v5874_v38 = vunpack.i.l.bf16 %v5873_v23 }
0x16c6   :  { %v4112_v50 = vunpack.c.l.b16 %v4033_v8  ;;  %4309 = vmatpush.bf16.msra.mxu3 %v5737_v54 }
0x16c8   :  { %v4114_v12 = vpack.c.b16 %v4113_v63, %v4112_v50 }
0x16ca   :  { %4310 = vmatpush.bf16.msra.mxu3 %v5736_v14 }
0x16cc   :  { %v4116_v36 = vpop.permute.xlu0 %4115 }
0x16cd   :  { %4128 = vmatpush.bf16.msrb.mxu2 %v4116_v36 }
0x16ce   :  { %4311 = vmatpush.bf16.msra.mxu3 %v5735_v43 }
0x16d0   :  { %5496 = vmatmul.msk.bf16.vlgmr.msrb.gmra.mxu2 %vm519_vm11, %v4114_v12 }
0x1732   :  { %v4080_v11 = vpop.f32.mrf.mxu0 }
0x1734   :  { %v4055_v40 = vpop.f32.mrf.mxu3 }
0x173a   :  { %v4082_v24 = vpop.f32.mrf.mxu0 }
0x173b   :  { %v5876_v5 = vpack.i.bf16 %v4082_v24, %v4080_v11 }
0x173c   :  { %v4057_v34 = vpop.f32.mrf.mxu3 }
0x173d   :  { %v5861_v4 = vpack.i.bf16 %v4057_v34, %v4055_v40 }
0x173e   :  { %v4105_v48 = vpop.f32.mrf.mxu1 }
0x173f   :  { %5862 = vrot.lane.b32.xlu0 %v5861_v4, %s6462_s0 }
0x1746   :  { %v4107_v42 = vpop.f32.mrf.mxu1 }
0x1747   :  { %v5891_v61 = vpack.i.bf16 %v4107_v42, %v4105_v48  ;;  %5877 = vrot.lane.b32.xlu0 %v5876_v5, %s6462_s0 }
0x1749   :  { %5892 = vrot.lane.b32.xlu1 %v5891_v61, %s6462_s0 }
0x174f   :  { %5887 = vrot.lane.b32.xlu0 %v5886_v37, %s6464_s18  ;;  %v5858_v37 = vpop.permute.xlu1 %5857 }
0x1750   :  { %v5860_v25 = vunpack.i.h.bf16 %v5858_v37 }
0x1751   :  { %5902 = vrot.lane.b32.xlu1 %v5901_v13, %s6464_s18  ;;  %v5859_v13 = vunpack.i.l.bf16 %v5858_v37  ;;  %s6469_s18 = smov 8  }
0x1752   :  { %v4240_v21 = vsel %vm1873_vm14, %v4232_v32, %v5860_v25 }
0x1753   :  { %v4130_v29 = vpop.f32.mrf.mxu2  ;;  %v4239_v17 = vsel %vm1873_vm14, %v4231_v30, %v5859_v13 }
0x1757   :  { %5897 = vrot.lane.b32.xlu0 %v8555_v9, %s6451_s29  ;;  %v5868_v26 = vpop.permute.xlu1 %5867  ;;  %s5205_s29 = sshll.u32 %s8549_s16, 4  ;;  %s5206_s29 = int_to_ptr.hbm [resolvable:$true] %s5205_s29 }
0x1758   :  { %v5870_v18 = vunpack.i.h.bf16 %v5868_v26  ;;  %v5869_v15 = vunpack.i.l.bf16 %v5868_v26 }
0x175a   :  { %v4234_v22 = vsel %vm519_vm11, %v7845_v39, %v5870_v18  ;;  %v4233_v45 = vsel %vm519_vm11, %v7841_v55, %v5869_v15 }
0x175b   :  { %v4132_v62 = vpop.f32.mrf.mxu2  ;;  %v4241_v8 = vsel %vm1873_vm14, %v4233_v45, %v5874_v38  ;;  %v4242_v63 = vsel %vm1873_vm14, %v4234_v22, %v5875_v53 }
0x175c   :  { %v5906_v49 = vpack.i.bf16 %v4132_v62, %v4130_v29 }
0x175e   :  { %5907 = vrot.lane.b32.xlu2 %v5906_v49, %s6462_s0  ;;  %s6468_s0 = smov 128  }
0x175f   :  { %v5883_v12 = vpop.permute.xlu1 %5882 }
0x1760   :  { %v5885_v11 = vunpack.i.h.bf16 %v5883_v12  ;;  %v5884_v34 = vunpack.i.l.bf16 %v5883_v12 }
0x1762   :  { %v4236_v1 = vsel %vm519_vm11, %v7853_v56, %v5885_v11  ;;  %v4235_v54 = vsel %vm519_vm11, %v7851_v35, %v5884_v34 }
0x17b1   :  { %v5863_v58 = vpop.permute.xlu0 %5862 }
0x17b2   :  { %v5865_v16 = vunpack.i.h.bf16 %v5863_v58  ;;  %v5864_v27 = vunpack.i.l.bf16 %v5863_v58 }
0x17b4   :  { %v4248_v47 = vsel %vm1882_vm15, %v4240_v21, %v5865_v16  ;;  %v4247_v41 = vsel %vm1882_vm15, %v4239_v17, %v5864_v27 }
0x17b5   :  { %v4255_v19 = vpack.c.bf16 %v4248_v47, %v4247_v41 }
0x17b7   :  { %5521 = vmatmul.msk.bf16.vlgmr.msra.gmra.mxu3 %vm168_vm0, %v4255_v19 }
0x17b8   :  { %v5908_v37 = vpop.permute.xlu2 %5907 }
0x17b9   :  { %v5878_v3 = vpop.permute.xlu0 %5877  ;;  %v5910_v58 = vunpack.i.h.bf16 %v5908_v37  ;;  %v5909_v32 = vunpack.i.l.bf16 %v5908_v37 }
0x17ba   :  { %v5880_v46 = vunpack.i.h.bf16 %v5878_v3  ;;  %v5879_v10 = vunpack.i.l.bf16 %v5878_v3 }
0x17bb   :  { %v5893_v48 = vpop.permute.xlu1 %5892 }
0x17bc   :  { %v4250_v50 = vsel %vm1882_vm15, %v4242_v63, %v5880_v46  ;;  %v4249_v36 = vsel %vm1882_vm15, %v4241_v8, %v5879_v10  ;;  %v5895_v5 = vunpack.i.h.bf16 %v5893_v48  ;;  %v5894_v42 = vunpack.i.l.bf16 %v5893_v48 }
0x17bd   :  { %v4256_v40 = vpack.c.bf16 %v4250_v50, %v4249_v36 }
0x17c1   :  { %v5888_v39 = vpop.permute.xlu0 %5887 }
0x17c2   :  { %v5890_v55 = vunpack.i.h.bf16 %v5888_v39  ;;  %v5889_v4 = vunpack.i.l.bf16 %v5888_v39 }
0x17c3   :  { %v5903_v56 = vpop.permute.xlu1 %5902 }
0x17c4   :  { %v4244_v24 = vsel %vm1873_vm14, %v4236_v1, %v5890_v55  ;;  %v4243_v14 = vsel %vm1873_vm14, %v4235_v54, %v5889_v4  ;;  %v5905_v7 = vunpack.i.h.bf16 %v5903_v56  ;;  %v5904_v6 = vunpack.i.l.bf16 %v5903_v56 }
0x17c5   :  { %v4251_v61 = vsel %vm1882_vm15, %v4243_v14, %v5894_v42  ;;  %v4252_v29 = vsel %vm1882_vm15, %v4244_v24, %v5895_v5 }
0x17c6   :  { %v4257_v62 = vpack.c.bf16 %v4252_v29, %v4251_v61 }
0x17c7   :  { %5522 = vmatmul.msk.bf16.gmra.mxu3 %vm168_vm0, %v4256_v40 }
0x17c9   :  { %v5898_v9 = vpop.permute.xlu0 %5897 }
0x17ca   :  { %v5900_v49 = vunpack.i.h.bf16 %v5898_v9  ;;  %v5899_v43 = vunpack.i.l.bf16 %v5898_v9 }
0x17cc   :  { %v4238_v35 = vsel %vm519_vm11, %v7861_v52, %v5900_v49  ;;  %v4237_v28 = vsel %vm519_vm11, %v7858_v0, %v5899_v43  ;;  %v5919_v52 = vld [vmem:[#allocation7 + $0x1] ss:$0 sm:$0xff] }
0x17cd   :  { %v4246_v25 = vsel %vm1873_vm14, %v4238_v35, %v5905_v7  ;;  %v4245_v13 = vsel %vm1873_vm14, %v4237_v28, %v5904_v6 }
0x17ce   :  { %v4253_v30 = vsel %vm1882_vm15, %v4245_v13, %v5909_v32  ;;  %v4254_v16 = vsel %vm1882_vm15, %v4246_v25, %v5910_v58 }
0x17cf   :  { %v4258_v27 = vpack.c.bf16 %v4254_v16, %v4253_v30 }
0x17d7   :  { %5523 = vmatmul.msk.bf16.gmra.mxu3 %vm168_vm0, %v4257_v62 }
0x17e7   :  { %5524 = vmatmul.msk.bf16.gmra.mxu3 %vm168_vm0, %v4258_v27 }
0x183a   :  { %v4313_v17 = vpop.f32.mrf.mxu3 }
0x183b   :  { %v4333_v0 = vadd.f32 %v4313_v17, %v7512_v51 }
0x183d   :  { %v8176_v21 = vadd.f32 %v5919_v52, %v4333_v0 }
0x183f   :  { %v4358_v47 = vsel %vm168_vm0, %v8176_v21, 0.0 }
0x1840   :  { %4359 = vadd.xlane.f32.xlu0 %v4358_v47 }
0x1842   :  { %v4315_v41 = vpop.f32.mrf.mxu3 }
0x1843   :  { %v4334_v19 = vadd.f32 %v4315_v41, %v7517_v59 }
0x1845   :  { %v8181_v26 = vadd.f32 %v5919_v52, %v4334_v19  ;;  %v5560_v19 = vld [vmem:[%s8541_s8 + $0x70] sm:$0xf] }
0x1847   :  { %v4361_v18 = vsel %vm168_vm0, %v8181_v26, 0.0 }
0x1848   :  { %4362 = vadd.xlane.f32.xlu1 %v4361_v18  ;;  %v5746_v18 = vld [vmem:[%s8541_s8 + $0x74] sm:$0xf0] }
0x184a   :  { %v4318_v15 = vpop.f32.mrf.mxu3 }
0x184b   :  { %v4335_v3 = vadd.f32 %v4318_v15, %v7522_v2  ;;  %v5745_v15 = vld [vmem:[%s8541_s8 + $0x74] sm:$0xf] }
0x184d   :  { %v8186_v23 = vadd.f32 %v5919_v52, %v4335_v3  ;;  %v5561_v3 = vor.u32 %v5746_v18, %v5560_v19 }
0x184f   :  { %v4364_v51 = vsel %vm168_vm0, %v8186_v23, 0.0  ;;  %4632 = vmatpush.bf16.msrb.mxu0 %v5561_v3 }
0x1850   :  { %4365 = vadd.xlane.f32.xlu2 %v4364_v51  ;;  %v5562_v51 = vld [vmem:[%s8541_s8 + $0x78] sm:$0xf0] }
0x1852   :  { %v4320_v22 = vpop.f32.mrf.mxu3 }
0x1853   :  { %v4336_v45 = vadd.f32 %v4320_v22, %v7527_v31  ;;  %v5565_v22 = vor.u32 %v5745_v15, %v5562_v51 }
0x1855   :  { %v8191_v46 = vadd.f32 %v5919_v52, %v4336_v45  ;;  %4661 = vmatpush.bf16.msrb.mxu1 %v5565_v22  ;;  %v5552_v45 = vld [vmem:[%s8541_s8 + $0x60] sm:$0xf]  ;;  %v8323_v22 = vld [vmem:[#allocation8 + $0x1] ss:$0 sm:$0xff] }
0x1857   :  { %v4367_v59 = vsel %vm168_vm0, %v8191_v46, 0.0 }
0x1858   :  { %4368 = vadd.xlane.f32.xlu0 %v4367_v59  ;;  %v5744_v59 = vld [vmem:[%s8541_s8 + $0x64] sm:$0xf0] }
0x185a   :  { %v4323_v10 = vpop.f32.mrf.mxu3 }
0x185b   :  { %v4337_v53 = vadd.f32 %v4323_v10, %v7532_v57  ;;  %v5743_v10 = vld [vmem:[%s8541_s8 + $0x64] sm:$0xf] }
0x185d   :  { %v8196_v38 = vadd.f32 %v5919_v52, %v4337_v53  ;;  %v5553_v53 = vor.u32 %v5744_v59, %v5552_v45 }
0x185f   :  { %v4370_v2 = vsel %vm168_vm0, %v8196_v38, 0.0  ;;  %4633 = vmatpush.bf16.msrb.mxu0 %v5553_v53 }
0x1860   :  { %4371 = vadd.xlane.f32.xlu1 %v4370_v2  ;;  %v5554_v2 = vld [vmem:[%s8541_s8 + $0x68] sm:$0xf0] }
0x1862   :  { %v4325_v8 = vpop.f32.mrf.mxu3 }
0x1863   :  { %v4338_v63 = vadd.f32 %v4325_v8, %v7537_v33  ;;  %v5557_v8 = vor.u32 %v5743_v10, %v5554_v2 }
0x1865   :  { %v8201_v50 = vadd.f32 %v5919_v52, %v4338_v63  ;;  %4662 = vmatpush.bf16.msrb.mxu1 %v5557_v8  ;;  %v5544_v63 = vld [vmem:[%s8541_s8 + $0x50] sm:$0xf] }
0x1867   :  { %v4373_v31 = vsel %vm168_vm0, %v8201_v50, 0.0 }
0x1868   :  { %4374 = vadd.xlane.f32.xlu2 %v4373_v31  ;;  %v5742_v31 = vld [vmem:[%s8541_s8 + $0x54] sm:$0xf0] }
0x186a   :  { %v4328_v36 = vpop.f32.mrf.mxu3 }
0x186b   :  { %v4339_v12 = vadd.f32 %v4328_v36, %v7546_v60  ;;  %v5741_v36 = vld [vmem:[%s8541_s8 + $0x54] sm:$0xf] }
0x186d   :  { %v8206_v40 = vadd.f32 %v5919_v52, %v4339_v12  ;;  %v5545_v12 = vor.u32 %v5742_v31, %v5544_v63  ;;  %v8326_v63 = vld [vmem:[#allocation10 + $0x1] ss:$0 sm:$0xff] }
0x186f   :  { %v4376_v57 = vsel %vm168_vm0, %v8206_v40, 0.0  ;;  %4634 = vmatpush.bf16.msrb.mxu0 %v5545_v12 }
0x1870   :  { %4377 = vadd.xlane.f32.xlu2 %v4376_v57  ;;  %v5546_v57 = vld [vmem:[%s8541_s8 + $0x58] sm:$0xf0] }
0x1872   :  { %v4330_v34 = vpop.f32.mrf.mxu3 }
0x1873   :  { %v4340_v4 = vadd.f32 %v4330_v34, %v7558_v44 }
0x1875   :  { %v8219_v54 = vadd.f32 %v5919_v52, %v4340_v4  ;;  %v5740_v4 = vld [vmem:[%s8541_s8 + $0x44] sm:$0xf0] }
0x1877   :  { %v4379_v42 = vsel %vm168_vm0, %v8219_v54, 0.0 }
0x18b3   :  { %v4360_v39 = vpop.xlane.xlu0 %4359 }
0x18b4   :  { %v4382_v11 = vmul.f32 %v4360_v39, %v6618_v20  ;;  %v5549_v39 = vor.u32 %v5741_v36, %v5546_v57 }
0x18b6   :  { %v8212_v33 = vsub.f32 %v8176_v21, %v4382_v11  ;;  %4663 = vmatpush.bf16.msrb.mxu1 %v5549_v39 }
0x18b8   :  { %v4398_v55 = vmul.f32 %v8212_v33, %v8212_v33 }
0x18ba   :  { %v4406_v60 = vsel %vm168_vm0, %v4398_v55, 0.0  ;;  %v5536_v55 = vld [vmem:[%s8541_s8 + $0x40] sm:$0xf] }
0x18bb   :  { %v4363_v48 = vpop.xlane.xlu1 %4362  ;;  %4407 = vadd.xlane.f32.xlu0 %v4406_v60  ;;  %v5739_v60 = vld [vmem:[%s8541_s8 + $0x44] sm:$0xf] }
0x18bc   :  { %v4383_v1 = vmul.f32 %v4363_v48, %v6618_v20  ;;  %v5537_v48 = vor.u32 %v5740_v4, %v5536_v55 }
0x18be   :  { %v8222_v24 = vsub.f32 %v8181_v26, %v4383_v1  ;;  %v5538_v1 = vld [vmem:[%s8541_s8 + $0x48] sm:$0xf0]  ;;  %4635 = vmatpush.bf16.msrb.mxu0 %v5537_v48 }
0x18c0   :  { %v4399_v14 = vmul.f32 %v8222_v24, %v8222_v24 }
0x18c2   :  { %v4409_v5 = vsel %vm168_vm0, %v4399_v14, 0.0 }
0x18c3   :  { %v4366_v44 = vpop.xlane.xlu2 %4365  ;;  %4410 = vadd.xlane.f32.xlu1 %v4409_v5  ;;  %4380 = vadd.xlane.f32.xlu0 %v4379_v42  ;;  %v5541_v5 = vor.u32 %v5739_v60, %v5538_v1 }
0x18c4   :  { %v4384_v61 = vmul.f32 %v4366_v44, %v6618_v20 }
0x18c5   :  { %4664 = vmatpush.bf16.msrb.mxu1 %v5541_v5 }
0x18c6   :  { %v8231_v29 = vsub.f32 %v8186_v23, %v4384_v61 }
0x18c8   :  { %v4400_v9 = vmul.f32 %v8231_v29, %v8231_v29 }
0x18ca   :  { %v4412_v62 = vsel %vm168_vm0, %v4400_v9, 0.0 }
0x18cb   :  { %v4369_v49 = vpop.xlane.xlu0 %4368  ;;  %4413 = vadd.xlane.f32.xlu1 %v4412_v62 }
0x18cc   :  { %v4385_v43 = vmul.f32 %v4369_v49, %v6618_v20 }
0x18ce   :  { %v8238_v56 = vsub.f32 %v8191_v46, %v4385_v43 }
0x18d0   :  { %v4401_v35 = vmul.f32 %v8238_v56, %v8238_v56 }
0x18d2   :  { %v4415_v28 = vsel %vm168_vm0, %v4401_v35, 0.0 }
0x18d3   :  { %v4372_v37 = vpop.xlane.xlu1 %4371  ;;  %4416 = vadd.xlane.f32.xlu2 %v4415_v28 }
0x18d4   :  { %v4386_v7 = vmul.f32 %v4372_v37, %v6618_v20 }
0x18d6   :  { %v8245_v6 = vsub.f32 %v8196_v38, %v4386_v7 }
0x18d8   :  { %v4402_v25 = vmul.f32 %v8245_v6, %v8245_v6 }
0x18da   :  { %v4418_v13 = vsel %vm168_vm0, %v4402_v25, 0.0 }
0x18db   :  { %v4375_v58 = vpop.xlane.xlu2 %4374  ;;  %4419 = vadd.xlane.f32.xlu0 %v4418_v13 }
0x18dc   :  { %v4387_v32 = vmul.f32 %v4375_v58, %v6618_v20 }
0x18de   :  { %v8252_v30 = vsub.f32 %v8201_v50, %v4387_v32 }
0x18e0   :  { %v4403_v16 = vmul.f32 %v8252_v30, %v8252_v30 }
0x18e2   :  { %v4421_v27 = vsel %vm168_vm0, %v4403_v16, 0.0 }
0x18e3   :  { %4422 = vadd.xlane.f32.xlu1 %v4421_v27  ;;  %v4378_v52 = vpop.xlane.xlu2 %4377 }
0x18e4   :  { %v4388_v17 = vmul.f32 %v4378_v52, %v6618_v20 }
0x18e6   :  { %v8259_v0 = vsub.f32 %v8206_v40, %v4388_v17 }
0x18e8   :  { %v4404_v47 = vmul.f32 %v8259_v0, %v8259_v0 }
0x18ea   :  { %v4424_v41 = vsel %vm168_vm0, %v4404_v47, 0.0 }
0x18eb   :  { %4425 = vadd.xlane.f32.xlu2 %v4424_v41 }
0x192e   :  { %v4408_v11 = vpop.xlane.xlu0 %4407 }
0x192f   :  { %v4430_v34 = vmul.f32 %v4408_v11, %v6618_v20 }
0x1931   :  { %v4438_v14 = vadd.f32 1e-05, %v4430_v34 }
0x1933   :  { %6232 = vrsqrt.f32 %v4438_v14  ;;  %vm4452_vm14 = vweird.f32 %v4438_v14 }
0x1936   :  { %v4411_v42 = vpop.xlane.xlu1 %4410  ;;  %v4381_v44 = vpop.xlane.xlu0 %4380 }
0x1937   :  { %v4431_v61 = vmul.f32 %v4411_v42, %v6618_v20  ;;  %v4389_v9 = vmul.f32 %v4381_v44, %v6618_v20 }
0x1939   :  { %v6233_v62 = vpop.eup %6232  ;;  %v4439_v49 = vadd.f32 1e-05, %v4431_v61  ;;  %v8316_v43 = vsub.f32 %v8219_v54, %v4389_v9 }
0x193a   :  { %v4447_v35 = vmul.f32 %v6233_v62, %v4438_v14  ;;  %vm4453_vm11 = vweird.f32 %v6233_v62 }
0x193b   :  { %6234 = vrsqrt.f32 %v4439_v49  ;;  %v4405_v28 = vmul.f32 %v8316_v43, %v8316_v43  ;;  %vm4454_vm15 = vmor %vm4452_vm14, %vm4453_vm11  ;;  %vm4462_vm2 = vweird.f32 %v4439_v49 }
0x193c   :  { %v4448_v37 = vmul.f32 %v6233_v62, %v4447_v35 }
0x193d   :  { %v4427_v7 = vsel %vm168_vm0, %v4405_v28, 0.0 }
0x193e   :  { %v4449_v25 = vmul.f32 0.5, %v4448_v37  ;;  %v4414_v13 = vpop.xlane.xlu1 %4413  ;;  %4428 = vadd.xlane.f32.xlu0 %v4427_v7 }
0x193f   :  { %v4432_v58 = vmul.f32 %v4414_v13, %v6618_v20 }
0x1940   :  { %v4450_v32 = vsub.f32 1.5, %v4449_v25 }
0x1941   :  { %v6235_v16 = vpop.eup %6234  ;;  %v4440_v27 = vadd.f32 1e-05, %v4432_v58 }
0x1942   :  { %v4451_v52 = vmul.f32 %v6233_v62, %v4450_v32  ;;  %v4457_v17 = vmul.f32 %v6235_v16, %v4439_v49  ;;  %vm4463_vm1 = vweird.f32 %v6235_v16 }
0x1943   :  { %6236 = vrsqrt.f32 %v4440_v27  ;;  %vm4464_vm3 = vmor %vm4462_vm2, %vm4463_vm1  ;;  %vm4472_vm5 = vweird.f32 %v4440_v27 }
0x1944   :  { %v4458_v47 = vmul.f32 %v6235_v16, %v4457_v17  ;;  %v4455_v41 = vsel %vm4454_vm15, %v6233_v62, %v4451_v52 }
0x1945   :  { %v4526_v45 = vmul.f32 %v4455_v41, %v8212_v33 }
0x1946   :  { %v4459_v19 = vmul.f32 0.5, %v4458_v47  ;;  %v4417_v18 = vpop.xlane.xlu2 %4416 }
0x1947   :  { %v4433_v15 = vmul.f32 %v4417_v18, %v6618_v20  ;;  %v4537_v31 = vmul.f32 %v8323_v22, %v4526_v45 }
0x1948   :  { %v4460_v3 = vsub.f32 1.5, %v4459_v19 }
0x1949   :  { %v6237_v51 = vpop.eup %6236  ;;  %v4441_v59 = vadd.f32 1e-05, %v4433_v15  ;;  %v4548_v55 = vadd.f32 %v8326_v63, %v4537_v31 }
0x194a   :  { %v4461_v10 = vmul.f32 %v6235_v16, %v4460_v3  ;;  %v4467_v53 = vmul.f32 %v6237_v51, %v4440_v27  ;;  %vm4473_vm4 = vweird.f32 %v6237_v51 }
0x194b   :  { %6238 = vrsqrt.f32 %v4441_v59  ;;  %vm4474_vm6 = vmor %vm4472_vm5, %vm4473_vm4  ;;  %vm4482_vm8 = vweird.f32 %v4441_v59 }
0x194c   :  { %v4465_v2 = vsel %vm4464_vm3, %v6235_v16, %v4461_v10  ;;  %v4468_v8 = vmul.f32 %v6237_v51, %v4467_v53 }
0x194d   :  { %v4527_v36 = vmul.f32 %v4465_v2, %v8222_v24 }
0x194e   :  { %v4469_v12 = vmul.f32 0.5, %v4468_v8  ;;  %v4420_v57 = vpop.xlane.xlu0 %4419 }
0x194f   :  { %v4538_v39 = vmul.f32 %v8323_v22, %v4527_v36  ;;  %v4434_v33 = vmul.f32 %v4420_v57, %v6618_v20 }
0x1950   :  { %v4470_v11 = vsub.f32 1.5, %v4469_v12 }
0x1951   :  { %v6239_v34 = vpop.eup %6238  ;;  %v4549_v4 = vadd.f32 %v8326_v63, %v4538_v39  ;;  %v4442_v60 = vadd.f32 1e-05, %v4434_v33  ;;  %v5762_v39 = vld [vmem:[%s8543_s10 + $0xf8] sm:$0xff]  ;;  %v5753_v33 = vld [vmem:[%s8543_s10 + $0xb0] sm:$0xff] }
0x1952   :  { %v4471_v48 = vmul.f32 %v6237_v51, %v4470_v11  ;;  %v4477_v1 = vmul.f32 %v6239_v34, %v4441_v59  ;;  %vm4483_vm7 = vweird.f32 %v6239_v34  ;;  %4873 = vmatpush.bf16.msrb.mxu3 %v5762_v39  ;;  %v5761_v11 = vld [vmem:[%s8543_s10 + $0xf0] sm:$0xff] }
0x1953   :  { %v4556_v14 = vpack.c.bf16 %v4549_v4, %v4548_v55  ;;  %6240 = vrsqrt.f32 %v4442_v60  ;;  %vm4484_vm9 = vmor %vm4482_vm8, %vm4483_vm7  ;;  %vm4492_vm12 = vweird.f32 %v4442_v60  ;;  %v5760_v55 = vld [vmem:[%s8543_s10 + $0xe8] sm:$0xff] }
0x1954   :  { %v4478_v24 = vmul.f32 %v6239_v34, %v4477_v1  ;;  %v4475_v5 = vsel %vm4474_vm6, %v6237_v51, %v4471_v48  ;;  %v5759_v48 = vld [vmem:[%s8543_s10 + $0xe0] sm:$0xff] }
0x1955   :  { %5566 = vmatmul.msk.bf16.vlgmr.msrb.gmra.mxu0 %vm168_vm0, %v4556_v14  ;;  %5570 = vmatmul.msk.bf16.vlgmr.msrb.gmra.mxu1 %vm168_vm0, %v4556_v14  ;;  %v4528_v49 = vmul.f32 %v4475_v5, %v8231_v29  ;;  %v5750_v14 = vld [vmem:[%s8543_s10 + $0x98] sm:$0xff] }
0x1956   :  { %v4479_v42 = vmul.f32 0.5, %v4478_v24  ;;  %v4423_v44 = vpop.xlane.xlu1 %4422  ;;  %4874 = vmatpush.bf16.msrb.mxu3 %v5761_v11  ;;  %v5758_v24 = vld [vmem:[%s8543_s10 + $0xd8] sm:$0xff] }
0x1957   :  { %v4435_v61 = vmul.f32 %v4423_v44, %v6618_v20  ;;  %v4539_v58 = vmul.f32 %v8323_v22, %v4528_v49 }
0x1958   :  { %v4480_v9 = vsub.f32 1.5, %v4479_v42 }
0x1959   :  { %v6241_v62 = vpop.eup %6240  ;;  %v4443_v35 = vadd.f32 1e-05, %v4435_v61  ;;  %v4550_v17 = vadd.f32 %v8326_v63, %v4539_v58 }
0x195a   :  { %v4481_v28 = vmul.f32 %v6239_v34, %v4480_v9  ;;  %v4487_v37 = vmul.f32 %v6241_v62, %v4442_v60  ;;  %vm4493_vm10 = vweird.f32 %v6241_v62  ;;  %4875 = vmatpush.bf16.msrb.mxu3 %v5760_v55  ;;  %v5751_v60 = vld [vmem:[%s8543_s10 + $0xa0] sm:$0xff]  ;;  %v5749_v9 = vld [vmem:[%s8543_s10 + $0x90] sm:$0xff] }
0x195b   :  { %6242 = vrsqrt.f32 %v4443_v35  ;;  %vm4494_vm13 = vmor %vm4492_vm12, %vm4493_vm10  ;;  %vm4502_vm14 = vweird.f32 %v4443_v35 }
0x195c   :  { %v4485_v7 = vsel %vm4484_vm9, %v6239_v34, %v4481_v28  ;;  %v4488_v25 = vmul.f32 %v6241_v62, %v4487_v37  ;;  %v5752_v34 = vld [vmem:[%s8543_s10 + $0xa8] sm:$0xff] }
0x195d   :  { %v4529_v13 = vmul.f32 %v4485_v7, %v8238_v56  ;;  %v5756_v28 = vld [vmem:[%s8543_s10 + $0xc8] sm:$0xff] }
0x195e   :  { %v4489_v32 = vmul.f32 0.5, %v4488_v25  ;;  %4876 = vmatpush.bf16.msrb.mxu3 %v5759_v48  ;;  %v5747_v25 = vld [vmem:[%s8543_s10 + $0x80] sm:$0xff] }
0x195f   :  { %v4540_v16 = vmul.f32 %v8323_v22, %v4529_v13  ;;  %v5755_v13 = vld [vmem:[%s8543_s10 + $0xc0] sm:$0xff] }
0x1960   :  { %v4490_v27 = vsub.f32 1.5, %v4489_v32 }
0x1961   :  { %v6243_v52 = vpop.eup %6242  ;;  %v4551_v29 = vadd.f32 %v8326_v63, %v4540_v16 }
0x1962   :  { %v4491_v47 = vmul.f32 %v6241_v62, %v4490_v27  ;;  %v4497_v41 = vmul.f32 %v6243_v52, %v4443_v35  ;;  %vm4503_vm11 = vweird.f32 %v6243_v52  ;;  %4877 = vmatpush.bf16.msrb.mxu3 %v5758_v24  ;;  %v5748_v35 = vld [vmem:[%s8543_s10 + $0x88] sm:$0xff] }
0x1963   :  { %v4557_v19 = vpack.c.bf16 %v4551_v29, %v4550_v17  ;;  %vm4504_vm15 = vmor %vm4502_vm14, %vm4503_vm11 }
0x1964   :  { %v4498_v18 = vmul.f32 %v6243_v52, %v4497_v41  ;;  %v4495_v56 = vsel %vm4494_vm13, %v6241_v62, %v4491_v47  ;;  %v5757_v62 = vld [vmem:[%s8543_s10 + $0xd0] sm:$0xff] }
0x1965   :  { %5567 = vmatmul.msk.bf16.gmra.mxu0 %vm168_vm0, %v4557_v19  ;;  %5571 = vmatmul.msk.bf16.gmra.mxu1 %vm168_vm0, %v4557_v19  ;;  %v4530_v51 = vmul.f32 %v4495_v56, %v8245_v6  ;;  %v4426_v6 = vpop.xlane.xlu2 %4425 }
0x1966   :  { %v4499_v15 = vmul.f32 0.5, %v4498_v18  ;;  %v4436_v12 = vmul.f32 %v4426_v6, %v6618_v20  ;;  %4878 = vmatpush.bf16.msrb.mxu3 %v5757_v62 }
0x1967   :  { %v4541_v53 = vmul.f32 %v8323_v22, %v4530_v51 }
0x1968   :  { %v4500_v3 = vsub.f32 1.5, %v4499_v15  ;;  %v4444_v57 = vadd.f32 1e-05, %v4436_v12 }
0x1969   :  { %v4552_v8 = vadd.f32 %v8326_v63, %v4541_v53 }
0x196a   :  { %v4501_v45 = vmul.f32 %v6243_v52, %v4500_v3  ;;  %6244 = vrsqrt.f32 %v4444_v57  ;;  %4879 = vmatpush.bf16.msrb.mxu3 %v5756_v28  ;;  %vm4512_vm2 = vweird.f32 %v4444_v57 }
0x196c   :  { %v4505_v59 = vsel %vm4504_vm15, %v6243_v52, %v4501_v45 }
0x196d   :  { %v4531_v10 = vmul.f32 %v4505_v59, %v8252_v30  ;;  %v5754_v30 = vld [vmem:[%s8543_s10 + $0xb8] sm:$0xff] }
0x196e   :  { %4844 = vmatpush.bf16.msra.mxu2 %v5754_v30  ;;  %4880 = vmatpush.bf16.msrb.mxu3 %v5755_v13 }
0x196f   :  { %v4542_v2 = vmul.f32 %v8323_v22, %v4531_v10 }
0x1970   :  { %v6245_v4 = vpop.eup %6244 }
0x1971   :  { %v4553_v31 = vadd.f32 %v8326_v63, %v4542_v2  ;;  %v4507_v1 = vmul.f32 %v6245_v4, %v4444_v57  ;;  %vm4513_vm1 = vweird.f32 %v6245_v4 }
0x1972   :  { %4845 = vmatpush.bf16.msra.mxu2 %v5753_v33  ;;  %vm4514_vm3 = vmor %vm4512_vm2, %vm4513_vm1 }
0x1973   :  { %v4558_v36 = vpack.c.bf16 %v4553_v31, %v4552_v8  ;;  %v4508_v5 = vmul.f32 %v6245_v4, %v4507_v1 }
0x1975   :  { %5568 = vmatmul.msk.bf16.gmra.mxu0 %vm168_vm0, %v4558_v36  ;;  %5572 = vmatmul.msk.bf16.gmra.mxu1 %vm168_vm0, %v4558_v36  ;;  %v4509_v49 = vmul.f32 0.5, %v4508_v5 }
0x1976   :  { %4846 = vmatpush.bf16.msra.mxu2 %v5752_v34 }
0x1977   :  { %v4510_v37 = vsub.f32 1.5, %v4509_v49 }
0x1979   :  { %v4511_v58 = vmul.f32 %v6245_v4, %v4510_v37 }
0x197a   :  { %4847 = vmatpush.bf16.msra.mxu2 %v5751_v60 }
0x197b   :  { %v4515_v27 = vsel %vm4514_vm3, %v6245_v4, %v4511_v58 }
0x197c   :  { %v4532_v29 = vmul.f32 %v4515_v27, %v8259_v0  ;;  %v5533_v0 = vld [vmem:[%s8542_s9 + $0x2] sm:$0x3] }
0x197d   :  { %v4573_v10 = vperm.slane %v5533_v0, 1 }
0x197e   :  { %4848 = vmatpush.bf16.msra.mxu2 %v5750_v14  ;;  %v4543_v18 = vmul.f32 %v8323_v22, %v4532_v29 }
0x1980   :  { %v4554_v15 = vadd.f32 %v8326_v63, %v4543_v18 }
0x1982   :  { %4849 = vmatpush.bf16.msra.mxu2 %v5749_v9 }
0x1986   :  { %4850 = vmatpush.bf16.msra.mxu2 %v5748_v35 }
0x198a   :  { %4851 = vmatpush.bf16.msra.mxu2 %v5747_v25 }
0x19b1   :  { %v4429_v42 = vpop.xlane.xlu0 %4428 }
0x19b2   :  { %v4437_v44 = vmul.f32 %v4429_v42, %v6618_v20 }
0x19b4   :  { %v4445_v61 = vadd.f32 1e-05, %v4437_v44 }
0x19b6   :  { %6246 = vrsqrt.f32 %v4445_v61  ;;  %vm4522_vm5 = vweird.f32 %v4445_v61 }
0x19bc   :  { %v6247_v7 = vpop.eup %6246 }
0x19bd   :  { %v4517_v32 = vmul.f32 %v6247_v7, %v4445_v61  ;;  %vm4523_vm4 = vweird.f32 %v6247_v7 }
0x19be   :  { %vm4524_vm6 = vmor %vm4522_vm5, %vm4523_vm4 }
0x19bf   :  { %v4518_v16 = vmul.f32 %v6247_v7, %v4517_v32 }
0x19c1   :  { %v4519_v52 = vmul.f32 0.5, %v4518_v16 }
0x19c3   :  { %v4520_v17 = vsub.f32 1.5, %v4519_v52 }
0x19c5   :  { %v4521_v47 = vmul.f32 %v6247_v7, %v4520_v17 }
0x19c7   :  { %v4525_v41 = vsel %vm4524_vm6, %v6247_v7, %v4521_v47 }
0x19c8   :  { %v4533_v19 = vmul.f32 %v4525_v41, %v8316_v43  ;;  %v4572_v43 = vperm.slane %v5533_v0, 0 }
0x19ca   :  { %v4544_v56 = vmul.f32 %v8323_v22, %v4533_v19 }
0x19cc   :  { %v4555_v3 = vadd.f32 %v8326_v63, %v4544_v56 }
0x19ce   :  { %v4559_v51 = vpack.c.bf16 %v4555_v3, %v4554_v15 }
0x19d0   :  { %5569 = vmatmul.msk.bf16.gmra.mxu0 %vm168_vm0, %v4559_v51  ;;  %5573 = vmatmul.msk.bf16.gmra.mxu1 %vm168_vm0, %v4559_v51 }
0x19d2   :  { %v4637_v45 = vpop.f32.mrf.mxu0  ;;  %v4666_v59 = vpop.f32.mrf.mxu1 }
0x19d3   :  { %v4638_v53 = vadd.f32 %v4637_v45, %v4572_v43  ;;  %v4667_v2 = vadd.f32 %v4666_v59, %v4573_v10 }
0x19d5   :  { %v4686_v63 = vmax.f32 %v4638_v53, 0.0  ;;  %v4687_v6 = vmax.f32 %v4667_v2, 0.0  ;;  %v5922_v2 = vld [vmem:[%s8544_s11 + $0x1] ss:$0 sm:$0xff] }
0x19da   :  { %v4639_v22 = vpop.f32.mrf.mxu0  ;;  %v4668_v8 = vpop.f32.mrf.mxu1 }
0x19db   :  { %v4640_v31 = vadd.f32 %v4639_v22, %v4572_v43  ;;  %v4669_v36 = vadd.f32 %v4668_v8, %v4573_v10 }
0x19dd   :  { %v4688_v12 = vmax.f32 %v4640_v31, 0.0  ;;  %v4689_v57 = vmax.f32 %v4669_v36, 0.0 }
0x19df   :  { %v4702_v30 = vpack.c.bf16 %v4688_v12, %v4686_v63  ;;  %v4703_v39 = vpack.c.bf16 %v4689_v57, %v4687_v6 }
0x19e1   :  { %4852 = vmatmul.bf16.vlgmr.msra.gmra.mxu2 %v4702_v30  ;;  %4881 = vmatmul.bf16.vlgmr.msrb.gmra.mxu3 %v4703_v39 }
0x19e2   :  { %v4642_v33 = vpop.f32.mrf.mxu0  ;;  %v4671_v11 = vpop.f32.mrf.mxu1 }
0x19e3   :  { %v4643_v34 = vadd.f32 %v4642_v33, %v4572_v43  ;;  %v4672_v55 = vadd.f32 %v4671_v11, %v4573_v10 }
0x19e5   :  { %v4690_v14 = vmax.f32 %v4643_v34, 0.0  ;;  %v4691_v24 = vmax.f32 %v4672_v55, 0.0 }
0x19ea   :  { %v4644_v4 = vpop.f32.mrf.mxu0  ;;  %v4673_v60 = vpop.f32.mrf.mxu1 }
0x19eb   :  { %v4645_v48 = vadd.f32 %v4644_v4, %v4572_v43  ;;  %v4674_v1 = vadd.f32 %v4673_v60, %v4573_v10 }
0x19ed   :  { %v4692_v5 = vmax.f32 %v4645_v48, 0.0  ;;  %v4693_v42 = vmax.f32 %v4674_v1, 0.0 }
0x19ef   :  { %v4704_v44 = vpack.c.bf16 %v4692_v5, %v4690_v14  ;;  %v4705_v61 = vpack.c.bf16 %v4693_v42, %v4691_v24 }
0x19f1   :  { %4857 = vmatmul.bf16.gmra.mxu2 %v4704_v44  ;;  %4886 = vmatmul.bf16.gmra.mxu3 %v4705_v61 }
0x19f2   :  { %v4647_v9 = vpop.f32.mrf.mxu0  ;;  %v4676_v62 = vpop.f32.mrf.mxu1 }
0x19f3   :  { %v4648_v49 = vadd.f32 %v4647_v9, %v4572_v43  ;;  %v4677_v35 = vadd.f32 %v4676_v62, %v4573_v10 }
0x19f5   :  { %v4694_v13 = vmax.f32 %v4648_v49, 0.0  ;;  %v4695_v58 = vmax.f32 %v4677_v35, 0.0 }
0x19fa   :  { %v4649_v28 = vpop.f32.mrf.mxu0  ;;  %v4678_v37 = vpop.f32.mrf.mxu1 }
0x19fb   :  { %v4650_v7 = vadd.f32 %v4649_v28, %v4572_v43  ;;  %v4679_v25 = vadd.f32 %v4678_v37, %v4573_v10 }
0x19fd   :  { %v4696_v32 = vmax.f32 %v4650_v7, 0.0  ;;  %v4697_v16 = vmax.f32 %v4679_v25, 0.0 }
0x19ff   :  { %v4706_v27 = vpack.c.bf16 %v4696_v32, %v4694_v13  ;;  %v4707_v52 = vpack.c.bf16 %v4697_v16, %v4695_v58 }
0x1a01   :  { %4862 = vmatmul.bf16.gmra.mxu2 %v4706_v27  ;;  %4891 = vmatmul.bf16.gmra.mxu3 %v4707_v52 }
0x1a4d   :  { %v4652_v17 = vpop.f32.mrf.mxu0  ;;  %v4681_v29 = vpop.f32.mrf.mxu1 }
0x1a4e   :  { %v4653_v47 = vadd.f32 %v4652_v17, %v4572_v43  ;;  %v4682_v41 = vadd.f32 %v4681_v29, %v4573_v10 }
0x1a50   :  { %v4698_v3 = vmax.f32 %v4653_v47, 0.0  ;;  %v4699_v51 = vmax.f32 %v4682_v41, 0.0 }
0x1a55   :  { %v4654_v19 = vpop.f32.mrf.mxu0  ;;  %v4683_v18 = vpop.f32.mrf.mxu1 }
0x1a56   :  { %v4655_v56 = vadd.f32 %v4654_v19, %v4572_v43  ;;  %v4684_v15 = vadd.f32 %v4683_v18, %v4573_v10 }
0x1a58   :  { %v4700_v0 = vmax.f32 %v4655_v56, 0.0  ;;  %v4701_v45 = vmax.f32 %v4684_v15, 0.0 }
0x1a5a   :  { %v4708_v59 = vpack.c.bf16 %v4700_v0, %v4698_v3  ;;  %v4709_v53 = vpack.c.bf16 %v4701_v45, %v4699_v51 }
0x1a5c   :  { %4867 = vmatmul.bf16.gmra.mxu2 %v4708_v59  ;;  %4896 = vmatmul.bf16.gmra.mxu3 %v4709_v53 }
0x1a64   :  { %v4853_v22 = vpop.f32.mrf.mxu2  ;;  %v4882_v8 = vpop.f32.mrf.mxu3 }
0x1a65   :  { %v4854_v31 = vadd.f32 %v5922_v2, %v4853_v22 }
0x1a67   :  { %v4883_v36 = vadd.f32 %v4882_v8, %v4854_v31 }
0x1a69   :  { %v4902_v63 = vadd.f32 %v4883_v36, %v8176_v21 }
0x1a6b   :  { %v4912_v43 = vsel %vm168_vm0, %v4902_v63, 0.0 }
0x1a6c   :  { %v4855_v10 = vpop.f32.mrf.mxu2  ;;  %v4884_v6 = vpop.f32.mrf.mxu3  ;;  %4913 = vadd.xlane.f32.xlu1 %v4912_v43 }
0x1a6d   :  { %v4856_v12 = vadd.f32 %v5922_v2, %v4855_v10 }
0x1a6f   :  { %v4885_v57 = vadd.f32 %v4884_v6, %v4856_v12 }
0x1a71   :  { %v4903_v30 = vadd.f32 %v4885_v57, %v8181_v26 }
0x1a73   :  { %v4915_v39 = vsel %vm168_vm0, %v4903_v30, 0.0 }
0x1a74   :  { %v4858_v33 = vpop.f32.mrf.mxu2  ;;  %v4887_v11 = vpop.f32.mrf.mxu3  ;;  %4916 = vadd.xlane.f32.xlu2 %v4915_v39 }
0x1a75   :  { %v4859_v34 = vadd.f32 %v5922_v2, %v4858_v33 }
0x1a77   :  { %v4888_v55 = vadd.f32 %v4887_v11, %v4859_v34 }
0x1a79   :  { %v4904_v4 = vadd.f32 %v4888_v55, %v8186_v23  ;;  %v5766_v55 = vld [vmem:[#allocation11 + $0x18] sm:$0xff] }
0x1a7a   :  { %5166 = vmatpush.bf16.msra.mxu0 %v5766_v55 }
0x1a7b   :  { %v4918_v21 = vsel %vm168_vm0, %v4904_v4, 0.0 }
0x1a7c   :  { %v4860_v60 = vpop.f32.mrf.mxu2  ;;  %v4889_v48 = vpop.f32.mrf.mxu3  ;;  %4919 = vadd.xlane.f32.xlu0 %v4918_v21  ;;  %v5764_v21 = vld [vmem:[#allocation11 + $0x8] sm:$0xff] }
0x1a7d   :  { %v4861_v1 = vadd.f32 %v5922_v2, %v4860_v60 }
0x1a7f   :  { %v4890_v14 = vadd.f32 %v4889_v48, %v4861_v1 }
0x1a81   :  { %v4905_v24 = vadd.f32 %v4890_v14, %v8191_v46 }
0x1a83   :  { %v4921_v26 = vsel %vm168_vm0, %v4905_v24, 0.0 }
0x1a84   :  { %4922 = vadd.xlane.f32.xlu1 %v4921_v26  ;;  %v4863_v5 = vpop.f32.mrf.mxu2  ;;  %v4892_v42 = vpop.f32.mrf.mxu3 }
0x1a85   :  { %v4864_v44 = vadd.f32 %v5922_v2, %v4863_v5  ;;  %v5763_v5 = vld [vmem:[#allocation11] sm:$0xff] }
0x1a87   :  { %v4893_v61 = vadd.f32 %v4892_v42, %v4864_v44 }
0x1a89   :  { %v4906_v9 = vadd.f32 %v4893_v61, %v8196_v38 }
0x1a8b   :  { %v4924_v23 = vsel %vm168_vm0, %v4906_v9, 0.0 }
0x1a8c   :  { %v4865_v62 = vpop.f32.mrf.mxu2  ;;  %4925 = vadd.xlane.f32.xlu2 %v4924_v23  ;;  %v4894_v35 = vpop.f32.mrf.mxu3 }
0x1a8d   :  { %v4866_v49 = vadd.f32 %v5922_v2, %v4865_v62 }
0x1a8f   :  { %v4895_v28 = vadd.f32 %v4894_v35, %v4866_v49 }
0x1a91   :  { %v4907_v37 = vadd.f32 %v4895_v28, %v8201_v50 }
0x1a93   :  { %v4927_v46 = vsel %vm168_vm0, %v4907_v37, 0.0 }
0x1a94   :  { %4928 = vadd.xlane.f32.xlu0 %v4927_v46 }
0x1adf   :  { %v4914_v7 = vpop.xlane.xlu1 %4913  ;;  %v4868_v25 = vpop.f32.mrf.mxu2 }
0x1ae0   :  { %v4936_v13 = vmul.f32 %v4914_v7, %v6618_v20  ;;  %v4869_v58 = vadd.f32 %v5922_v2, %v4868_v25  ;;  %v4897_v32 = vpop.f32.mrf.mxu3 }
0x1ae2   :  { %v8430_v16 = vsub.f32 %v4902_v63, %v4936_v13  ;;  %v4898_v38 = vadd.f32 %v4897_v32, %v4869_v58 }
0x1ae4   :  { %v4908_v27 = vadd.f32 %v4898_v38, %v8206_v40  ;;  %v4952_v52 = vmul.f32 %v8430_v16, %v8430_v16 }
0x1ae6   :  { %v4960_v17 = vsel %vm168_vm0, %v4952_v52, 0.0  ;;  %v4930_v50 = vsel %vm168_vm0, %v4908_v27, 0.0 }
0x1ae7   :  { %v4917_v29 = vpop.xlane.xlu2 %4916  ;;  %4961 = vadd.xlane.f32.xlu1 %v4960_v17  ;;  %v4870_v47 = vpop.f32.mrf.mxu2  ;;  %4931 = vadd.xlane.f32.xlu0 %v4930_v50 }
0x1ae8   :  { %v4937_v41 = vmul.f32 %v4917_v29, %v6618_v20  ;;  %v4871_v19 = vadd.f32 %v5922_v2, %v4870_v47  ;;  %v4899_v18 = vpop.f32.mrf.mxu3 }
0x1aea   :  { %v8438_v56 = vsub.f32 %v4903_v30, %v4937_v41  ;;  %v4900_v15 = vadd.f32 %v4899_v18, %v4871_v19 }
0x1aec   :  { %v4909_v40 = vadd.f32 %v4900_v15, %v8219_v54  ;;  %v4953_v3 = vmul.f32 %v8438_v56, %v8438_v56 }
0x1aee   :  { %v4963_v51 = vsel %vm168_vm0, %v4953_v3, 0.0  ;;  %v4933_v0 = vsel %vm168_vm0, %v4909_v40, 0.0  ;;  %v8488_v3 = vld [vmem:[%s8545_s12] ss:$0 sm:$0xff] }
0x1aef   :  { %4964 = vadd.xlane.f32.xlu2 %v4963_v51  ;;  %4934 = vadd.xlane.f32.xlu1 %v4933_v0  ;;  %v4920_v45 = vpop.xlane.xlu0 %4919 }
0x1af0   :  { %v4938_v59 = vmul.f32 %v4920_v45, %v6618_v20 }
0x1af2   :  { %v8446_v53 = vsub.f32 %v4904_v4, %v4938_v59  ;;  %v5765_v4 = vld [vmem:[#allocation11 + $0x10] sm:$0xff] }
0x1af3   :  { %5167 = vmatpush.bf16.msra.mxu0 %v5765_v4 }
0x1af4   :  { %v4954_v2 = vmul.f32 %v8446_v53, %v8446_v53 }
0x1af6   :  { %v4966_v22 = vsel %vm168_vm0, %v4954_v2, 0.0 }
0x1af7   :  { %v4923_v54 = vpop.xlane.xlu1 %4922  ;;  %4967 = vadd.xlane.f32.xlu2 %v4966_v22  ;;  %5168 = vmatpush.bf16.msra.mxu0 %v5764_v21 }
0x1af8   :  { %v4939_v8 = vmul.f32 %v4923_v54, %v6618_v20  ;;  %v8494_v54 = vld [vmem:[%s8546_s13] ss:$0 sm:$0xff] }
0x1afa   :  { %v8452_v31 = vsub.f32 %v4905_v24, %v4939_v8 }
0x1afb   :  { %5169 = vmatpush.bf16.msra.mxu0 %v5763_v5 }
0x1afc   :  { %v4955_v36 = vmul.f32 %v8452_v31, %v8452_v31 }
0x1afe   :  { %v4969_v63 = vsel %vm168_vm0, %v4955_v36, 0.0 }
0x1aff   :  { %v4926_v43 = vpop.xlane.xlu2 %4925  ;;  %4970 = vadd.xlane.f32.xlu0 %v4969_v63 }
0x1b00   :  { %v4940_v10 = vmul.f32 %v4926_v43, %v6618_v20 }
0x1b02   :  { %v8458_v6 = vsub.f32 %v4906_v9, %v4940_v10 }
0x1b04   :  { %v4956_v12 = vmul.f32 %v8458_v6, %v8458_v6 }
0x1b06   :  { %v4972_v57 = vsel %vm168_vm0, %v4956_v12, 0.0 }
0x1b07   :  { %4973 = vadd.xlane.f32.xlu1 %v4972_v57  ;;  %v4929_v30 = vpop.xlane.xlu0 %4928 }
0x1b08   :  { %v4941_v39 = vmul.f32 %v4929_v30, %v6618_v20 }
0x1b0a   :  { %v8464_v33 = vsub.f32 %v4907_v37, %v4941_v39 }
0x1b0c   :  { %v4957_v11 = vmul.f32 %v8464_v33, %v8464_v33 }
0x1b0e   :  { %v4975_v34 = vsel %vm168_vm0, %v4957_v11, 0.0 }
0x1b0f   :  { %4976 = vadd.xlane.f32.xlu2 %v4975_v34 }
0x1b5a   :  { %v4962_v60 = vpop.xlane.xlu1 %4961  ;;  %v4932_v48 = vpop.xlane.xlu0 %4931 }
0x1b5b   :  { %v4984_v1 = vmul.f32 %v4962_v60, %v6618_v20  ;;  %v4942_v14 = vmul.f32 %v4932_v48, %v6618_v20 }
0x1b5d   :  { %v4992_v24 = vadd.f32 1e-05, %v4984_v1  ;;  %v8471_v26 = vsub.f32 %v4908_v27, %v4942_v14 }
0x1b5f   :  { %6248 = vrsqrt.f32 %v4992_v24  ;;  %v4958_v42 = vmul.f32 %v8471_v26, %v8471_v26  ;;  %vm5006_vm8 = vweird.f32 %v4992_v24 }
0x1b61   :  { %v4978_v44 = vsel %vm168_vm0, %v4958_v42, 0.0 }
0x1b62   :  { %v4965_v61 = vpop.xlane.xlu2 %4964  ;;  %v4935_v9 = vpop.xlane.xlu1 %4934  ;;  %4979 = vadd.xlane.f32.xlu0 %v4978_v44 }
0x1b63   :  { %v4985_v23 = vmul.f32 %v4965_v61, %v6618_v20  ;;  %v4943_v62 = vmul.f32 %v4935_v9, %v6618_v20 }
0x1b65   :  { %v6249_v49 = vpop.eup %6248  ;;  %v4993_v35 = vadd.f32 1e-05, %v4985_v23  ;;  %v8478_v28 = vsub.f32 %v4909_v40, %v4943_v62 }
0x1b66   :  { %v5001_v37 = vmul.f32 %v6249_v49, %v4992_v24  ;;  %vm5007_vm7 = vweird.f32 %v6249_v49 }
0x1b67   :  { %6250 = vrsqrt.f32 %v4993_v35  ;;  %v4959_v46 = vmul.f32 %v8478_v28, %v8478_v28  ;;  %vm5008_vm9 = vmor %vm5006_vm8, %vm5007_vm7  ;;  %vm5016_vm12 = vweird.f32 %v4993_v35 }
0x1b68   :  { %v5002_v7 = vmul.f32 %v6249_v49, %v5001_v37 }
0x1b69   :  { %v4981_v25 = vsel %vm168_vm0, %v4959_v46, 0.0 }
0x1b6a   :  { %v5003_v13 = vmul.f32 0.5, %v5002_v7  ;;  %4982 = vadd.xlane.f32.xlu1 %v4981_v25  ;;  %v4968_v58 = vpop.xlane.xlu2 %4967 }
0x1b6b   :  { %v4986_v32 = vmul.f32 %v4968_v58, %v6618_v20 }
0x1b6c   :  { %v5004_v38 = vsub.f32 1.5, %v5003_v13 }
0x1b6d   :  { %v6251_v27 = vpop.eup %6250  ;;  %v4994_v52 = vadd.f32 1e-05, %v4986_v32 }
0x1b6e   :  { %v5005_v17 = vmul.f32 %v6249_v49, %v5004_v38  ;;  %v5011_v50 = vmul.f32 %v6251_v27, %v4993_v35  ;;  %vm5017_vm10 = vweird.f32 %v6251_v27 }
0x1b6f   :  { %6252 = vrsqrt.f32 %v4994_v52  ;;  %vm5018_vm13 = vmor %vm5016_vm12, %vm5017_vm10  ;;  %vm5026_vm14 = vweird.f32 %v4994_v52 }
0x1b70   :  { %v5012_v29 = vmul.f32 %v6251_v27, %v5011_v50  ;;  %v5009_v47 = vsel %vm5008_vm9, %v6249_v49, %v5005_v17 }
0x1b71   :  { %v5080_v51 = vmul.f32 %v5009_v47, %v8430_v16 }
0x1b72   :  { %v5013_v41 = vmul.f32 0.5, %v5012_v29  ;;  %v4971_v19 = vpop.xlane.xlu0 %4970 }
0x1b73   :  { %v4987_v18 = vmul.f32 %v4971_v19, %v6618_v20  ;;  %v5091_v8 = vmul.f32 %v8488_v3, %v5080_v51 }
0x1b74   :  { %v5014_v15 = vsub.f32 1.5, %v5013_v41 }
0x1b75   :  { %v6253_v40 = vpop.eup %6252  ;;  %v4995_v0 = vadd.f32 1e-05, %v4987_v18  ;;  %v5102_v30 = vadd.f32 %v8494_v54, %v5091_v8 }
0x1b76   :  { %v5015_v45 = vmul.f32 %v6251_v27, %v5014_v15  ;;  %v5021_v59 = vmul.f32 %v6253_v40, %v4994_v52  ;;  %vm5027_vm11 = vweird.f32 %v6253_v40 }
0x1b77   :  { %6254 = vrsqrt.f32 %v4995_v0  ;;  %vm5028_vm15 = vmor %vm5026_vm14, %vm5027_vm11  ;;  %vm5036_vm2 = vweird.f32 %v4995_v0 }
0x1b78   :  { %v5019_v2 = vsel %vm5018_vm13, %v6251_v27, %v5015_v45  ;;  %v5022_v22 = vmul.f32 %v6253_v40, %v5021_v59 }
0x1b79   :  { %v5081_v36 = vmul.f32 %v5019_v2, %v8438_v56 }
0x1b7a   :  { %v5023_v63 = vmul.f32 0.5, %v5022_v22  ;;  %v4974_v43 = vpop.xlane.xlu1 %4973 }
0x1b7b   :  { %v5092_v16 = vmul.f32 %v8488_v3, %v5081_v36  ;;  %v4988_v10 = vmul.f32 %v4974_v43, %v6618_v20 }
0x1b7c   :  { %v5024_v12 = vsub.f32 1.5, %v5023_v63 }
0x1b7d   :  { %v6255_v57 = vpop.eup %6254  ;;  %v5103_v39 = vadd.f32 %v8494_v54, %v5092_v16  ;;  %v4996_v11 = vadd.f32 1e-05, %v4988_v10 }
0x1b7e   :  { %v5025_v34 = vmul.f32 %v6253_v40, %v5024_v12  ;;  %v5031_v55 = vmul.f32 %v6255_v57, %v4995_v0  ;;  %vm5037_vm1 = vweird.f32 %v6255_v57 }
0x1b7f   :  { %v5110_v4 = vpack.c.bf16 %v5103_v39, %v5102_v30  ;;  %6256 = vrsqrt.f32 %v4996_v11  ;;  %vm5038_vm3 = vmor %vm5036_vm2, %vm5037_vm1  ;;  %vm5046_vm5 = vweird.f32 %v4996_v11 }
0x1b80   :  { %v5032_v56 = vmul.f32 %v6255_v57, %v5031_v55  ;;  %v5029_v21 = vsel %vm5028_vm15, %v6253_v40, %v5025_v34 }
0x1b81   :  { %5687 = vmatmul.msk.bf16.vlgmr.msra.gmra.mxu0 %vm168_vm0, %v5110_v4  ;;  %v5082_v5 = vmul.f32 %v5029_v21, %v8446_v53 }
0x1b82   :  { %v5033_v60 = vmul.f32 0.5, %v5032_v56  ;;  %v4977_v48 = vpop.xlane.xlu2 %4976 }
0x1b83   :  { %v4989_v1 = vmul.f32 %v4977_v48, %v6618_v20  ;;  %v5093_v49 = vmul.f32 %v8488_v3, %v5082_v5 }
0x1b84   :  { %v5034_v14 = vsub.f32 1.5, %v5033_v60 }
0x1b85   :  { %v6257_v24 = vpop.eup %6256  ;;  %v4997_v42 = vadd.f32 1e-05, %v4989_v1  ;;  %v5104_v25 = vadd.f32 %v8494_v54, %v5093_v49  ;;  %v5925_v1 = vld [vmem:[%s8548_s15] ss:$0 sm:$0xff]  ;;  %s6467_s15 = smov [#allocation13]  }
0x1b86   :  { %v5035_v44 = vmul.f32 %v6255_v57, %v5034_v14  ;;  %v5041_v61 = vmul.f32 %v6257_v24, %v4996_v11  ;;  %vm5047_vm4 = vweird.f32 %v6257_v24  ;;  %s5203_s6 = sshll.u32 %s6467_s15, 4  ;;  %s5204_s6 = int_to_ptr.vmem [resolvable:$true] %s5203_s6 }
0x1b87   :  { %6258 = vrsqrt.f32 %v4997_v42  ;;  %vm5048_vm6 = vmor %vm5046_vm5, %vm5047_vm4  ;;  %vm5056_vm8 = vweird.f32 %v4997_v42 }
0x1b88   :  { %v5039_v9 = vsel %vm5038_vm3, %v6255_v57, %v5035_v44  ;;  %v5042_v23 = vmul.f32 %v6257_v24, %v5041_v61 }
0x1b89   :  { %v5083_v62 = vmul.f32 %v5039_v9, %v8452_v31 }
0x1b8a   :  { %v5043_v35 = vmul.f32 0.5, %v5042_v23 }
0x1b8b   :  { %v5094_v37 = vmul.f32 %v8488_v3, %v5083_v62 }
0x1b8c   :  { %v5044_v46 = vsub.f32 1.5, %v5043_v35 }
0x1b8d   :  { %v6259_v7 = vpop.eup %6258  ;;  %v5105_v53 = vadd.f32 %v8494_v54, %v5094_v37 }
0x1b8e   :  { %v5045_v13 = vmul.f32 %v6257_v24, %v5044_v46  ;;  %v5051_v58 = vmul.f32 %v6259_v7, %v4997_v42  ;;  %vm5057_vm7 = vweird.f32 %v6259_v7 }
0x1b8f   :  { %v5111_v32 = vpack.c.bf16 %v5105_v53, %v5104_v25  ;;  %vm5058_vm9 = vmor %vm5056_vm8, %vm5057_vm7 }
0x1b90   :  { %v5052_v38 = vmul.f32 %v6259_v7, %v5051_v58  ;;  %v5049_v31 = vsel %vm5048_vm6, %v6257_v24, %v5045_v13 }
0x1b91   :  { %5688 = vmatmul.msk.bf16.gmra.mxu0 %vm168_vm0, %v5111_v32  ;;  %v5084_v17 = vmul.f32 %v5049_v31, %v8458_v6 }
0x1b92   :  { %v5053_v27 = vmul.f32 0.5, %v5052_v38 }
0x1b93   :  { %v5095_v41 = vmul.f32 %v8488_v3, %v5084_v17 }
0x1b94   :  { %v5054_v52 = vsub.f32 1.5, %v5053_v27 }
0x1b95   :  { %v5106_v18 = vadd.f32 %v8494_v54, %v5095_v41 }
0x1b96   :  { %v5055_v50 = vmul.f32 %v6259_v7, %v5054_v52 }
0x1b98   :  { %v5059_v29 = vsel %vm5058_vm9, %v6259_v7, %v5055_v50 }
0x1b99   :  { %v5085_v47 = vmul.f32 %v5059_v29, %v8464_v33 }
0x1b9b   :  { %v5096_v19 = vmul.f32 %v8488_v3, %v5085_v47 }
0x1b9d   :  { %v5107_v15 = vadd.f32 %v8494_v54, %v5096_v19 }
0x1b9f   :  { %v5112_v40 = vpack.c.bf16 %v5107_v15, %v5106_v18 }
0x1ba1   :  { %5689 = vmatmul.msk.bf16.gmra.mxu0 %vm168_vm0, %v5112_v40 }
0x1bd5   :  { %v4980_v51 = vpop.xlane.xlu0 %4979 }
0x1bd6   :  { %v4990_v6 = vmul.f32 %v4980_v51, %v6618_v20 }
0x1bd8   :  { %v4998_v0 = vadd.f32 1e-05, %v4990_v6 }
0x1bda   :  { %6260 = vrsqrt.f32 %v4998_v0  ;;  %vm5066_vm12 = vweird.f32 %v4998_v0 }
0x1bdd   :  { %v4983_v45 = vpop.xlane.xlu1 %4982 }
0x1bde   :  { %v4991_v59 = vmul.f32 %v4983_v45, %v6618_v20 }
0x1be0   :  { %v6261_v33 = vpop.eup %6260  ;;  %v4999_v2 = vadd.f32 1e-05, %v4991_v59 }
0x1be1   :  { %v5061_v22 = vmul.f32 %v6261_v33, %v4998_v0  ;;  %vm5067_vm10 = vweird.f32 %v6261_v33 }
0x1be2   :  { %6262 = vrsqrt.f32 %v4999_v2  ;;  %vm5068_vm13 = vmor %vm5066_vm12, %vm5067_vm10  ;;  %vm5076_vm14 = vweird.f32 %v4999_v2 }
0x1be3   :  { %v5062_v8 = vmul.f32 %v6261_v33, %v5061_v22 }
0x1be5   :  { %v5063_v36 = vmul.f32 0.5, %v5062_v8 }
0x1be7   :  { %v5064_v63 = vsub.f32 1.5, %v5063_v36 }
0x1be8   :  { %v6263_v43 = vpop.eup %6262 }
0x1be9   :  { %v5065_v16 = vmul.f32 %v6261_v33, %v5064_v63  ;;  %v5071_v10 = vmul.f32 %v6263_v43, %v4999_v2  ;;  %vm5077_vm11 = vweird.f32 %v6263_v43 }
0x1bea   :  { %vm5078_vm15 = vmor %vm5076_vm14, %vm5077_vm11 }
0x1beb   :  { %v5072_v12 = vmul.f32 %v6263_v43, %v5071_v10  ;;  %v5069_v57 = vsel %vm5068_vm13, %v6261_v33, %v5065_v16 }
0x1bec   :  { %v5086_v20 = vmul.f32 %v5069_v57, %v8471_v26 }
0x1bed   :  { %v5073_v30 = vmul.f32 0.5, %v5072_v12 }
0x1bee   :  { %v5097_v4 = vmul.f32 %v8488_v3, %v5086_v20 }
0x1bef   :  { %v5074_v39 = vsub.f32 1.5, %v5073_v30 }
0x1bf0   :  { %v5108_v21 = vadd.f32 %v8494_v54, %v5097_v4 }
0x1bf1   :  { %v5075_v11 = vmul.f32 %v6263_v43, %v5074_v39 }
0x1bf3   :  { %v5079_v34 = vsel %vm5078_vm15, %v6263_v43, %v5075_v11 }
0x1bf4   :  { %v5087_v55 = vmul.f32 %v5079_v34, %v8478_v28 }
0x1bf6   :  { %v5098_v56 = vmul.f32 %v8488_v3, %v5087_v55 }
0x1bf8   :  { %v5109_v60 = vadd.f32 %v8494_v54, %v5098_v56 }
0x1bfa   :  { %v5113_v48 = vpack.c.bf16 %v5109_v60, %v5108_v21 }
0x1bfc   :  { %5690 = vmatmul.msk.bf16.gmra.mxu0 %vm168_vm0, %v5113_v48 }
0x1bfe   :  { %v5171_v26 = vpop.f32.mrf.mxu0 }
0x1bff   :  { %v5172_v14 = vadd.f32 %v5925_v1, %v5171_v26 }
0x1c01   :  { %5191 = vst [vmem:[#allocation13] sm:$0xff] %v5172_v14 }
0x1c06   :  { %v5173_v24 = vpop.f32.mrf.mxu0 }
0x1c07   :  { %v5174_v28 = vadd.f32 %v5925_v1, %v5173_v24 }
0x1c09   :  { %5192 = vst [vmem:[#allocation13 + $0x8] sm:$0xff] %v5174_v28 }
0x1c0e   :  { %v5176_v5 = vpop.f32.mrf.mxu0 }
0x1c0f   :  { %v5177_v42 = vadd.f32 %v5925_v1, %v5176_v5 }
0x1c11   :  { %5193 = vst [vmem:[#allocation13 + $0x10] sm:$0xff] %v5177_v42 }
0x1c16   :  { %v5178_v3 = vpop.f32.mrf.mxu0 }
0x1c17   :  { %v5179_v44 = vadd.f32 %v5925_v1, %v5178_v3 }
0x1c19   :  { %5194 = vst [vmem:[#allocation13 + $0x18] sm:$0xff] %v5179_v44 }
0x1c1e   :  { %v5181_v54 = vpop.f32.mrf.mxu0 }
0x1c1f   :  { %v5182_v61 = vadd.f32 %v5925_v1, %v5181_v54 }
0x1c21   :  { %5195 = vst [vmem:[#allocation13 + $0x20] sm:$0xff] %v5182_v61 }
0x1c26   :  { %v5183_v9 = vpop.f32.mrf.mxu0 }
0x1c27   :  { %v5184_v23 = vadd.f32 %v5925_v1, %v5183_v9 }
0x1c29   :  { %5196 = vst [vmem:[#allocation13 + $0x28] sm:$0xff] %v5184_v23 }
0x1c79   :  { %v5186_v62 = vpop.f32.mrf.mxu0 }
0x1c7a   :  { %v5187_v49 = vadd.f32 %v5925_v1, %v5186_v62 }
0x1c7c   :  { %5197 = vst [vmem:[#allocation13 + $0x30] sm:$0xff] %v5187_v49 }
0x1c81   :  { %v5188_v35 = vpop.f32.mrf.mxu0 }
0x1c82   :  { %v5189_v37 = vadd.f32 %v5925_v1, %v5188_v35 }
0x1c84   :  { %5198 = vst [vmem:[#allocation13 + $0x38] sm:$0xff] %v5189_v37 }
0x1c85   :  { %5211 = dma.vmem_to_hbm [thread:$0]  %s5204_s6, 1024, %s5206_s29, [#allocation4], %s6468_s0, %s6468_s0, %s6469_s18  }
0x1c86   :  { %6448 = dma.done.wait [#allocation4], 1024  }
0x1c87   :  { %6449 = vsyncadd [#allocation4], 4294966272 }
0x1c88   :  { %5216 = vsyncpa [#allocation3], 1 }
0x1c89   :  { %5217 = vsyncpa [#allocation6], 1 }
0x1c8a   :  { %5218 = vsyncpa [#allocation9], 1 }
0x1c8b   :  { %5219 = vsyncpa [#allocation12], 1 }
0x1c8c   :  { %5220 = vsyncpa [#allocation4], 1 }

</bundles_post_ra>
